<compile_context>
chip_gen: v6e
topology: v6e:2x2x1
jax: 0.10.0
libtpu: 0.0.40
codegen_flags: <defaults>
</compile_context>

<pallas_src>
import functools

import jax
import jax.numpy as jnp
from jax.experimental import pallas as pl
from jax.experimental.pallas import tpu as pltpu


# ------------------------------- Pallas kernel -------------------------------

def _residual_block_kernel(xp_ref, w1_ref, b1_ref, w2_ref, b2_ref, ws_ref, bs_ref,
                           o_ref, acc_ref, hpad_ref, *, height, width):
    nb = xp_ref.shape[0]          # batch elements per grid step (1)
    c_in = xp_ref.shape[-1]
    m = nb * height * width       # rows of the full-resolution GEMMs

    # conv1 (3x3, stride 1, pad 1) and the skip conv read the same 9 input taps, so the
    # skip conv is computed at stride 1 in the same loop (subsampled in the wrapper).
    acc_ref[...] = jnp.zeros_like(acc_ref)
    o_ref[...] = jnp.broadcast_to(b2_ref[...] + bs_ref[...], o_ref.shape)
    for t in range(9):
        a, b = divmod(t, 3)
        x_tap = (xp_ref[:, a:a + height, b:b + width, :]
                 .reshape(m, c_in).astype(jnp.bfloat16))
        acc_ref[...] += jnp.dot(x_tap, w1_ref[t], preferred_element_type=jnp.float32)
        o_ref[...] += jnp.dot(x_tap, ws_ref[t], preferred_element_type=jnp.float32)

    # h = relu(bn1(conv1(x))): stays in VMEM, stored into a zero-padded spatial scratch
    # (data at rows [1:1+H], cols [8:8+W] -> sublane-aligned store) for conv2's taps.
    hpad_ref[...] = jnp.zeros_like(hpad_ref)
    hpad_ref[:, 1:1 + height, 8:8 + width, :] = jnp.maximum(
        acc_ref[...] + b1_ref[...], 0.0).reshape(nb, height, width, c_in)

    # conv2 (3x3 on h), computed at stride 1; wrapper subsamples to stride 2.
    for t in range(9):
        a, b = divmod(t, 3)
        h_tap = (hpad_ref[:, a:a + height, 7 + b:7 + b + width, :]
                 .reshape(m, c_in).astype(jnp.bfloat16))
        o_ref[...] += jnp.dot(h_tap, w2_ref[t], preferred_element_type=jnp.float32)

    o_ref[...] = jnp.maximum(o_ref[...], 0.0)     # final ReLU, f32


# --------------------------------- Wrapper -----------------------------------

def _fold_bn_into_weight(w_oihw, scale):
    """PyTorch conv weight (Cout, Cin, 3, 3) -> (9, Cin, Cout) bf16, BN scale folded in."""
    c_out, c_in = w_oihw.shape[0], w_oihw.shape[1]
    w = jnp.transpose(w_oihw, (2, 3, 1, 0)).reshape(9, c_in, c_out)
    return (w * scale[None, None, :]).astype(jnp.bfloat16)


def residual_block(x_nchw, params):
    n, c_in, height, width = x_nchw.shape
    c_out = params["conv2_w"].shape[0]

    x_nhwc = jnp.transpose(x_nchw, (0, 2, 3, 1))
    xp = jnp.pad(x_nhwc, ((0, 0), (1, 1), (1, 1), (0, 0)))       # f32 (N, H+2, W+2, Cin)

    w1 = _fold_bn_into_weight(params["conv1_w"], params["bn1"][0])
    w2 = _fold_bn_into_weight(params["conv2_w"], params["bn2"][0])
    ws = _fold_bn_into_weight(params["skip_w"], params["skip_bn"][0])
    b1 = params["bn1"][1][None, :].astype(jnp.float32)
    b2 = params["bn2"][1][None, :].astype(jnp.float32)
    bs = params["skip_bn"][1][None, :].astype(jnp.float32)

    kernel = functools.partial(_residual_block_kernel, height=height, width=width)
    out_full = pl.pallas_call(
        kernel,
        out_shape=jax.ShapeDtypeStruct((n * height * width, c_out), jnp.float32),
        grid_spec=pltpu.PrefetchScalarGridSpec(
            num_scalar_prefetch=0,
            grid=(n,),                                            # one image per grid step
            in_specs=[
                pl.BlockSpec((1, height + 2, width + 2, c_in), lambda i: (i, 0, 0, 0)),
                pl.BlockSpec((9, c_in, c_in), lambda i: (0, 0, 0)),     # w1 (BN1 folded)
                pl.BlockSpec((1, c_in), lambda i: (0, 0)),              # bn1 shift
                pl.BlockSpec((9, c_in, c_out), lambda i: (0, 0, 0)),    # w2 (BN2 folded)
                pl.BlockSpec((1, c_out), lambda i: (0, 0)),             # bn2 shift
                pl.BlockSpec((9, c_in, c_out), lambda i: (0, 0, 0)),    # skip w (BN folded)
                pl.BlockSpec((1, c_out), lambda i: (0, 0)),             # skip bn shift
            ],
            out_specs=pl.BlockSpec((height * width, c_out), lambda i: (i, 0)),
            scratch_shapes=[
                pltpu.VMEM((height * width, c_in), jnp.float32),             # conv1 acc
                pltpu.VMEM((1, height + 2, width + 16, c_in), jnp.float32),  # padded h
            ],
        ),
        compiler_params=pltpu.CompilerParams(
            dimension_semantics=("parallel",)),                   # megacore-shardable
    )(xp, w1, b1, w2, b2, ws, bs)

    out_full = out_full.reshape(n, height, width, c_out)
    out = out_full[:, ::2, ::2, :]                                # stride-2 subsample
    return jnp.transpose(out, (0, 3, 1, 2))                       # NHWC -> NCHW


# ---------------------------- Parameter creation ------------------------------

def _conv_w(key, c_in, c_out):
    return (jax.random.normal(key, (c_out, c_in, 3, 3), jnp.float32)
            * jnp.sqrt(2.0 / (c_in * 9)))


def _bn_params(key, c, eps=1e-5):
    k1, k2, k3, k4 = jax.random.split(key, 4)
    gamma = 1.0 + 0.1 * jax.random.normal(k1, (c,), jnp.float32)
    beta = 0.1 * jax.random.normal(k2, (c,), jnp.float32)
    mean = 0.1 * jax.random.normal(k3, (c,), jnp.float32)
    var = 1.0 + 0.1 * jax.random.uniform(k4, (c,), jnp.float32)
    scale = gamma / jnp.sqrt(var + eps)
    shift = beta - mean * scale
    return scale, shift


def make_params(key, c_in, c_out):
    ks = jax.random.split(key, 6)
    return dict(
        conv1_w=_conv_w(ks[0], c_in, c_in), bn1=_bn_params(ks[1], c_in),
        conv2_w=_conv_w(ks[2], c_in, c_out), bn2=_bn_params(ks[3], c_out),
        skip_w=_conv_w(ks[4], c_in, c_out), skip_bn=_bn_params(ks[5], c_out),
    )


# ------------------------------ Pure-JAX reference ----------------------------

def _reference(x_nchw, params):
    def conv(x, w, stride):
        return jax.lax.conv_general_dilated(
            x, jnp.transpose(w, (2, 3, 1, 0)), (stride, stride), ((1, 1), (1, 1)),
            dimension_numbers=("NHWC", "HWIO", "NHWC"),
            precision=jax.lax.Precision.HIGHEST)

    def bn(x, p):
        return x * p[0] + p[1]

    x = jnp.transpose(x_nchw, (0, 2, 3, 1))
    h = jax.nn.relu(bn(conv(x, params["conv1_w"], 1), params["bn1"]))
    y = bn(conv(h, params["conv2_w"], 2), params["bn2"])
    y = y + bn(conv(x, params["skip_w"], 2), params["skip_bn"])
    return jnp.transpose(jax.nn.relu(y), (0, 3, 1, 2))


# ----------------------------------- main -------------------------------------

if __name__ == "__main__":
    key = jax.random.PRNGKey(0)
    k_in, k_par = jax.random.split(key)

    batch, c_in, c_out, hw = 2, 64, 128, 16
    x = jax.random.normal(k_in, (batch, c_in, hw, hw), jnp.float32)
    params = make_params(k_par, c_in, c_out)

    out = jax.jit(residual_block)(x, params)
    jax.block_until_ready(out)
    assert out.shape == (batch, c_out, hw // 2, hw // 2)

    # Loose tolerance: the kernel feeds the MXU bf16 operands (f32 accumulation).
    ref = _reference(x, params)
    assert bool(jnp.allclose(out, ref, rtol=5e-2, atol=1.5e-1)), float(
        jnp.max(jnp.abs(out - ref)))

    print("KERNEL_OK")
</pallas_src>

<mosaic_0001>
module attributes {stable_mosaic.version = 11 : i64} {
  func.func @_residual_block_kernel(%arg0: i32, %arg1: memref<1x18x18x64xf32, #tpu.memory_space<vmem>>, %arg2: memref<9x64x64xbf16, #tpu.memory_space<vmem>>, %arg3: memref<1x64xf32, #tpu.memory_space<vmem>>, %arg4: memref<9x64x128xbf16, #tpu.memory_space<vmem>>, %arg5: memref<1x128xf32, #tpu.memory_space<vmem>>, %arg6: memref<9x64x128xbf16, #tpu.memory_space<vmem>>, %arg7: memref<1x128xf32, #tpu.memory_space<vmem>>, %arg8: memref<256x128xf32, #tpu.memory_space<vmem>>, %arg9: memref<256x64xf32, #tpu.memory_space<vmem>>, %arg10: memref<1x18x32x64xf32, #tpu.memory_space<vmem>>) attributes {dimension_semantics = [#tpu.dimension_semantics<parallel>], iteration_bounds = array<i64: 2>, scalar_prefetch = 0 : i64, scratch_operands = 2 : i64, tpu.core_type = #tpu.core_type<tc>, window_params = [{transform_indices = @transform_0, window_bounds = array<i64: 1, 18, 18, 64>}, {pipeline_mode = #tpu.pipeline_mode<synchronous>, transform_indices = @transform_1, window_bounds = array<i64: 9, 64, 64>}, {pipeline_mode = #tpu.pipeline_mode<synchronous>, transform_indices = @transform_2, window_bounds = array<i64: 1, 64>}, {pipeline_mode = #tpu.pipeline_mode<synchronous>, transform_indices = @transform_3, window_bounds = array<i64: 9, 64, 128>}, {pipeline_mode = #tpu.pipeline_mode<synchronous>, transform_indices = @transform_4, window_bounds = array<i64: 1, 128>}, {pipeline_mode = #tpu.pipeline_mode<synchronous>, transform_indices = @transform_5, window_bounds = array<i64: 9, 64, 128>}, {pipeline_mode = #tpu.pipeline_mode<synchronous>, transform_indices = @transform_6, window_bounds = array<i64: 1, 128>}, {transform_indices = @transform_7, window_bounds = array<i64: 256, 128>}]} {
    %cst = arith.constant 0.000000e+00 : f32
    %0 = vector.broadcast %cst : f32 to vector<256x64xf32>
    %c0 = arith.constant 0 : index
    %c0_0 = arith.constant 0 : index
    %1 = vector.load %arg9[%c0, %c0_0] : memref<256x64xf32, #tpu.memory_space<vmem>>, vector<256x64xf32>
    tpu.vector_store %arg9[%c0, %c0_0], %0 {strides = array<i32>} : memref<256x64xf32, #tpu.memory_space<vmem>>, vector<256x64xf32>,
    %c0_1 = arith.constant 0 : index
    %c0_2 = arith.constant 0 : index
    %2 = vector.load %arg5[%c0_1, %c0_2] : memref<1x128xf32, #tpu.memory_space<vmem>>, vector<1x128xf32>
    %c0_3 = arith.constant 0 : index
    %c0_4 = arith.constant 0 : index
    %3 = vector.load %arg7[%c0_3, %c0_4] : memref<1x128xf32, #tpu.memory_space<vmem>>, vector<1x128xf32>
    %4 = arith.addf %2, %3 : vector<1x128xf32>
    %5 = vector.shape_cast %4 : vector<1x128xf32> to vector<1x128xf32>
    %6 = vector.broadcast %5 : vector<1x128xf32> to vector<256x128xf32>
    %c0_5 = arith.constant 0 : index
    %c0_6 = arith.constant 0 : index
    %7 = vector.load %arg8[%c0_5, %c0_6] : memref<256x128xf32, #tpu.memory_space<vmem>>, vector<256x128xf32>
    tpu.vector_store %arg8[%c0_5, %c0_6], %6 {strides = array<i32>} : memref<256x128xf32, #tpu.memory_space<vmem>>, vector<256x128xf32>,
    %c0_7 = arith.constant 0 : index
    %c0_8 = arith.constant 0 : index
    %c0_9 = arith.constant 0 : index
    %c0_10 = arith.constant 0 : index
    %8 = vector.load %arg1[%c0_7, %c0_8, %c0_9, %c0_10] : memref<1x18x18x64xf32, #tpu.memory_space<vmem>>, vector<1x16x16x64xf32>
    %9 = vector.shape_cast %8 : vector<1x16x16x64xf32> to vector<256x64xf32>
    %10 = arith.truncf %9 : vector<256x64xf32> to vector<256x64xbf16>
    %c0_11 = arith.constant 0 : index
    %c0_12 = arith.constant 0 : index
    %11 = vector.load %arg9[%c0_11, %c0_12] : memref<256x64xf32, #tpu.memory_space<vmem>>, vector<256x64xf32>
    %c0_13 = arith.constant 0 : index
    %c0_14 = arith.constant 0 : index
    %c0_15 = arith.constant 0 : index
    %12 = vector.load %arg2[%c0_13, %c0_14, %c0_15] : memref<9x64x64xbf16, #tpu.memory_space<vmem>>, vector<1x64x64xbf16>
    %13 = vector.shape_cast %12 : vector<1x64x64xbf16> to vector<64x64xbf16>
    %cst_16 = arith.constant dense<0.000000e+00> : vector<256x64xf32>
    %14 = tpu.matmul %10, %13, %cst_16 {dimension_numbers = #tpu.dot_dimension_numbers<[1], [0], [0], [1], [0, 0, 1, 1], [], []>} : vector<256x64xbf16>, vector<64x64xbf16>, vector<256x64xf32> -> vector<256x64xf32>
    %15 = arith.addf %11, %14 : vector<256x64xf32>
    %c0_17 = arith.constant 0 : index
    %c0_18 = arith.constant 0 : index
    %16 = vector.load %arg9[%c0_17, %c0_18] : memref<256x64xf32, #tpu.memory_space<vmem>>, vector<256x64xf32>
    tpu.vector_store %arg9[%c0_17, %c0_18], %15 {strides = array<i32>} : memref<256x64xf32, #tpu.memory_space<vmem>>, vector<256x64xf32>,
    %c0_19 = arith.constant 0 : index
    %c0_20 = arith.constant 0 : index
    %17 = vector.load %arg8[%c0_19, %c0_20] : memref<256x128xf32, #tpu.memory_space<vmem>>, vector<256x128xf32>
    %c0_21 = arith.constant 0 : index
    %c0_22 = arith.constant 0 : index
    %c0_23 = arith.constant 0 : index
    %18 = vector.load %arg6[%c0_21, %c0_22, %c0_23] : memref<9x64x128xbf16, #tpu.memory_space<vmem>>, vector<1x64x128xbf16>
    %19 = vector.shape_cast %18 : vector<1x64x128xbf16> to vector<64x128xbf16>
    %cst_24 = arith.constant dense<0.000000e+00> : vector<256x128xf32>
    %20 = tpu.matmul %10, %19, %cst_24 {dimension_numbers = #tpu.dot_dimension_numbers<[1], [0], [0], [1], [0, 0, 1, 1], [], []>} : vector<256x64xbf16>, vector<64x128xbf16>, vector<256x128xf32> -> vector<256x128xf32>
    %21 = arith.addf %17, %20 : vector<256x128xf32>
    %c0_25 = arith.constant 0 : index
    %c0_26 = arith.constant 0 : index
    %22 = vector.load %arg8[%c0_25, %c0_26] : memref<256x128xf32, #tpu.memory_space<vmem>>, vector<256x128xf32>
    tpu.vector_store %arg8[%c0_25, %c0_26], %21 {strides = array<i32>} : memref<256x128xf32, #tpu.memory_space<vmem>>, vector<256x128xf32>,
    %c0_27 = arith.constant 0 : index
    %c0_28 = arith.constant 0 : index
    %c1 = arith.constant 1 : index
    %c0_29 = arith.constant 0 : index
    %23 = vector.load %arg1[%c0_27, %c0_28, %c1, %c0_29] : memref<1x18x18x64xf32, #tpu.memory_space<vmem>>, vector<1x16x16x64xf32>
    %24 = vector.shape_cast %23 : vector<1x16x16x64xf32> to vector<256x64xf32>
    %25 = arith.truncf %24 : vector<256x64xf32> to vector<256x64xbf16>
    %c0_30 = arith.constant 0 : index
    %c0_31 = arith.constant 0 : index
    %26 = vector.load %arg9[%c0_30, %c0_31] : memref<256x64xf32, #tpu.memory_space<vmem>>, vector<256x64xf32>
    %c1_32 = arith.constant 1 : index
    %c0_33 = arith.constant 0 : index
    %c0_34 = arith.constant 0 : index
    %27 = vector.load %arg2[%c1_32, %c0_33, %c0_34] : memref<9x64x64xbf16, #tpu.memory_space<vmem>>, vector<1x64x64xbf16>
    %28 = vector.shape_cast %27 : vector<1x64x64xbf16> to vector<64x64xbf16>
    %cst_35 = arith.constant dense<0.000000e+00> : vector<256x64xf32>
    %29 = tpu.matmul %25, %28, %cst_35 {dimension_numbers = #tpu.dot_dimension_numbers<[1], [0], [0], [1], [0, 0, 1, 1], [], []>} : vector<256x64xbf16>, vector<64x64xbf16>, vector<256x64xf32> -> vector<256x64xf32>
    %30 = arith.addf %26, %29 : vector<256x64xf32>
    %c0_36 = arith.constant 0 : index
    %c0_37 = arith.constant 0 : index
    %31 = vector.load %arg9[%c0_36, %c0_37] : memref<256x64xf32, #tpu.memory_space<vmem>>, vector<256x64xf32>
    tpu.vector_store %arg9[%c0_36, %c0_37], %30 {strides = array<i32>} : memref<256x64xf32, #tpu.memory_space<vmem>>, vector<256x64xf32>,
    %c0_38 = arith.constant 0 : index
    %c0_39 = arith.constant 0 : index
    %32 = vector.load %arg8[%c0_38, %c0_39] : memref<256x128xf32, #tpu.memory_space<vmem>>, vector<256x128xf32>
    %c1_40 = arith.constant 1 : index
    %c0_41 = arith.constant 0 : index
    %c0_42 = arith.constant 0 : index
    %33 = vector.load %arg6[%c1_40, %c0_41, %c0_42] : memref<9x64x128xbf16, #tpu.memory_space<vmem>>, vector<1x64x128xbf16>
    %34 = vector.shape_cast %33 : vector<1x64x128xbf16> to vector<64x128xbf16>
    %cst_43 = arith.constant dense<0.000000e+00> : vector<256x128xf32>
    %35 = tpu.matmul %25, %34, %cst_43 {dimension_numbers = #tpu.dot_dimension_numbers<[1], [0], [0], [1], [0, 0, 1, 1], [], []>} : vector<256x64xbf16>, vector<64x128xbf16>, vector<256x128xf32> -> vector<256x128xf32>
    %36 = arith.addf %32, %35 : vector<256x128xf32>
    %c0_44 = arith.constant 0 : index
    %c0_45 = arith.constant 0 : index
    %37 = vector.load %arg8[%c0_44, %c0_45] : memref<256x128xf32, #tpu.memory_space<vmem>>, vector<256x128xf32>
    tpu.vector_store %arg8[%c0_44, %c0_45], %36 {strides = array<i32>} : memref<256x128xf32, #tpu.memory_space<vmem>>, vector<256x128xf32>,
    %c0_46 = arith.constant 0 : index
    %c0_47 = arith.constant 0 : index
    %c2 = arith.constant 2 : index
    %c0_48 = arith.constant 0 : index
    %38 = vector.load %arg1[%c0_46, %c0_47, %c2, %c0_48] : memref<1x18x18x64xf32, #tpu.memory_space<vmem>>, vector<1x16x16x64xf32>
    %39 = vector.shape_cast %38 : vector<1x16x16x64xf32> to vector<256x64xf32>
    %40 = arith.truncf %39 : vector<256x64xf32> to vector<256x64xbf16>
    %c0_49 = arith.constant 0 : index
    %c0_50 = arith.constant 0 : index
    %41 = vector.load %arg9[%c0_49, %c0_50] : memref<256x64xf32, #tpu.memory_space<vmem>>, vector<256x64xf32>
    %c2_51 = arith.constant 2 : index
    %c0_52 = arith.constant 0 : index
    %c0_53 = arith.constant 0 : index
    %42 = vector.load %arg2[%c2_51, %c0_52, %c0_53] : memref<9x64x64xbf16, #tpu.memory_space<vmem>>, vector<1x64x64xbf16>
    %43 = vector.shape_cast %42 : vector<1x64x64xbf16> to vector<64x64xbf16>
    %cst_54 = arith.constant dense<0.000000e+00> : vector<256x64xf32>
    %44 = tpu.matmul %40, %43, %cst_54 {dimension_numbers = #tpu.dot_dimension_numbers<[1], [0], [0], [1], [0, 0, 1, 1], [], []>} : vector<256x64xbf16>, vector<64x64xbf16>, vector<256x64xf32> -> vector<256x64xf32>
    %45 = arith.addf %41, %44 : vector<256x64xf32>
    %c0_55 = arith.constant 0 : index
    %c0_56 = arith.constant 0 : index
    %46 = vector.load %arg9[%c0_55, %c0_56] : memref<256x64xf32, #tpu.memory_space<vmem>>, vector<256x64xf32>
    tpu.vector_store %arg9[%c0_55, %c0_56], %45 {strides = array<i32>} : memref<256x64xf32, #tpu.memory_space<vmem>>, vector<256x64xf32>,
    %c0_57 = arith.constant 0 : index
    %c0_58 = arith.constant 0 : index
    %47 = vector.load %arg8[%c0_57, %c0_58] : memref<256x128xf32, #tpu.memory_space<vmem>>, vector<256x128xf32>
    %c2_59 = arith.constant 2 : index
    %c0_60 = arith.constant 0 : index
    %c0_61 = arith.constant 0 : index
    %48 = vector.load %arg6[%c2_59, %c0_60, %c0_61] : memref<9x64x128xbf16, #tpu.memory_space<vmem>>, vector<1x64x128xbf16>
    %49 = vector.shape_cast %48 : vector<1x64x128xbf16> to vector<64x128xbf16>
    %cst_62 = arith.constant dense<0.000000e+00> : vector<256x128xf32>
    %50 = tpu.matmul %40, %49, %cst_62 {dimension_numbers = #tpu.dot_dimension_numbers<[1], [0], [0], [1], [0, 0, 1, 1], [], []>} : vector<256x64xbf16>, vector<64x128xbf16>, vector<256x128xf32> -> vector<256x128xf32>
    %51 = arith.addf %47, %50 : vector<256x128xf32>
    %c0_63 = arith.constant 0 : index
    %c0_64 = arith.constant 0 : index
    %52 = vector.load %arg8[%c0_63, %c0_64] : memref<256x128xf32, #tpu.memory_space<vmem>>, vector<256x128xf32>
    tpu.vector_store %arg8[%c0_63, %c0_64], %51 {strides = array<i32>} : memref<256x128xf32, #tpu.memory_space<vmem>>, vector<256x128xf32>,
    %c0_65 = arith.constant 0 : index
    %c1_66 = arith.constant 1 : index
    %c0_67 = arith.constant 0 : index
    %c0_68 = arith.constant 0 : index
    %53 = vector.load %arg1[%c0_65, %c1_66, %c0_67, %c0_68] : memref<1x18x18x64xf32, #tpu.memory_space<vmem>>, vector<1x16x16x64xf32>
    %54 = vector.shape_cast %53 : vector<1x16x16x64xf32> to vector<256x64xf32>
    %55 = arith.truncf %54 : vector<256x64xf32> to vector<256x64xbf16>
    %c0_69 = arith.constant 0 : index
    %c0_70 = arith.constant 0 : index
    %56 = vector.load %arg9[%c0_69, %c0_70] : memref<256x64xf32, #tpu.memory_space<vmem>>, vector<256x64xf32>
    %c3 = arith.constant 3 : index
    %c0_71 = arith.constant 0 : index
    %c0_72 = arith.constant 0 : index
    %57 = vector.load %arg2[%c3, %c0_71, %c0_72] : memref<9x64x64xbf16, #tpu.memory_space<vmem>>, vector<1x64x64xbf16>
    %58 = vector.shape_cast %57 : vector<1x64x64xbf16> to vector<64x64xbf16>
    %cst_73 = arith.constant dense<0.000000e+00> : vector<256x64xf32>
    %59 = tpu.matmul %55, %58, %cst_73 {dimension_numbers = #tpu.dot_dimension_numbers<[1], [0], [0], [1], [0, 0, 1, 1], [], []>} : vector<256x64xbf16>, vector<64x64xbf16>, vector<256x64xf32> -> vector<256x64xf32>
    %60 = arith.addf %56, %59 : vector<256x64xf32>
    %c0_74 = arith.constant 0 : index
    %c0_75 = arith.constant 0 : index
    %61 = vector.load %arg9[%c0_74, %c0_75] : memref<256x64xf32, #tpu.memory_space<vmem>>, vector<256x64xf32>
    tpu.vector_store %arg9[%c0_74, %c0_75], %60 {strides = array<i32>} : memref<256x64xf32, #tpu.memory_space<vmem>>, vector<256x64xf32>,
    %c0_76 = arith.constant 0 : index
    %c0_77 = arith.constant 0 : index
    %62 = vector.load %arg8[%c0_76, %c0_77] : memref<256x128xf32, #tpu.memory_space<vmem>>, vector<256x128xf32>
    %c3_78 = arith.constant 3 : index
    %c0_79 = arith.constant 0 : index
    %c0_80 = arith.constant 0 : index
    %63 = vector.load %arg6[%c3_78, %c0_79, %c0_80] : memref<9x64x128xbf16, #tpu.memory_space<vmem>>, vector<1x64x128xbf16>
    %64 = vector.shape_cast %63 : vector<1x64x128xbf16> to vector<64x128xbf16>
    %cst_81 = arith.constant dense<0.000000e+00> : vector<256x128xf32>
    %65 = tpu.matmul %55, %64, %cst_81 {dimension_numbers = #tpu.dot_dimension_numbers<[1], [0], [0], [1], [0, 0, 1, 1], [], []>} : vector<256x64xbf16>, vector<64x128xbf16>, vector<256x128xf32> -> vector<256x128xf32>
    %66 = arith.addf %62, %65 : vector<256x128xf32>
    %c0_82 = arith.constant 0 : index
    %c0_83 = arith.constant 0 : index
    %67 = vector.load %arg8[%c0_82, %c0_83] : memref<256x128xf32, #tpu.memory_space<vmem>>, vector<256x128xf32>
    tpu.vector_store %arg8[%c0_82, %c0_83], %66 {strides = array<i32>} : memref<256x128xf32, #tpu.memory_space<vmem>>, vector<256x128xf32>,
    %c0_84 = arith.constant 0 : index
    %c1_85 = arith.constant 1 : index
    %c1_86 = arith.constant 1 : index
    %c0_87 = arith.constant 0 : index
    %68 = vector.load %arg1[%c0_84, %c1_85, %c1_86, %c0_87] : memref<1x18x18x64xf32, #tpu.memory_space<vmem>>, vector<1x16x16x64xf32>
    %69 = vector.shape_cast %68 : vector<1x16x16x64xf32> to vector<256x64xf32>
    %70 = arith.truncf %69 : vector<256x64xf32> to vector<256x64xbf16>
    %c0_88 = arith.constant 0 : index
    %c0_89 = arith.constant 0 : index
    %71 = vector.load %arg9[%c0_88, %c0_89] : memref<256x64xf32, #tpu.memory_space<vmem>>, vector<256x64xf32>
    %c4 = arith.constant 4 : index
    %c0_90 = arith.constant 0 : index
    %c0_91 = arith.constant 0 : index
    %72 = vector.load %arg2[%c4, %c0_90, %c0_91] : memref<9x64x64xbf16, #tpu.memory_space<vmem>>, vector<1x64x64xbf16>
    %73 = vector.shape_cast %72 : vector<1x64x64xbf16> to vector<64x64xbf16>
    %cst_92 = arith.constant dense<0.000000e+00> : vector<256x64xf32>
    %74 = tpu.matmul %70, %73, %cst_92 {dimension_numbers = #tpu.dot_dimension_numbers<[1], [0], [0], [1], [0, 0, 1, 1], [], []>} : vector<256x64xbf16>, vector<64x64xbf16>, vector<256x64xf32> -> vector<256x64xf32>
    %75 = arith.addf %71, %74 : vector<256x64xf32>
    %c0_93 = arith.constant 0 : index
    %c0_94 = arith.constant 0 : index
    %76 = vector.load %arg9[%c0_93, %c0_94] : memref<256x64xf32, #tpu.memory_space<vmem>>, vector<256x64xf32>
    tpu.vector_store %arg9[%c0_93, %c0_94], %75 {strides = array<i32>} : memref<256x64xf32, #tpu.memory_space<vmem>>, vector<256x64xf32>,
    %c0_95 = arith.constant 0 : index
    %c0_96 = arith.constant 0 : index
    %77 = vector.load %arg8[%c0_95, %c0_96] : memref<256x128xf32, #tpu.memory_space<vmem>>, vector<256x128xf32>
    %c4_97 = arith.constant 4 : index
    %c0_98 = arith.constant 0 : index
    %c0_99 = arith.constant 0 : index
    %78 = vector.load %arg6[%c4_97, %c0_98, %c0_99] : memref<9x64x128xbf16, #tpu.memory_space<vmem>>, vector<1x64x128xbf16>
    %79 = vector.shape_cast %78 : vector<1x64x128xbf16> to vector<64x128xbf16>
    %cst_100 = arith.constant dense<0.000000e+00> : vector<256x128xf32>
    %80 = tpu.matmul %70, %79, %cst_100 {dimension_numbers = #tpu.dot_dimension_numbers<[1], [0], [0], [1], [0, 0, 1, 1], [], []>} : vector<256x64xbf16>, vector<64x128xbf16>, vector<256x128xf32> -> vector<256x128xf32>
    %81 = arith.addf %77, %80 : vector<256x128xf32>
    %c0_101 = arith.constant 0 : index
    %c0_102 = arith.constant 0 : index
    %82 = vector.load %arg8[%c0_101, %c0_102] : memref<256x128xf32, #tpu.memory_space<vmem>>, vector<256x128xf32>
    tpu.vector_store %arg8[%c0_101, %c0_102], %81 {strides = array<i32>} : memref<256x128xf32, #tpu.memory_space<vmem>>, vector<256x128xf32>,
    %c0_103 = arith.constant 0 : index
    %c1_104 = arith.constant 1 : index
    %c2_105 = arith.constant 2 : index
    %c0_106 = arith.constant 0 : index
    %83 = vector.load %arg1[%c0_103, %c1_104, %c2_105, %c0_106] : memref<1x18x18x64xf32, #tpu.memory_space<vmem>>, vector<1x16x16x64xf32>
    %84 = vector.shape_cast %83 : vector<1x16x16x64xf32> to vector<256x64xf32>
    %85 = arith.truncf %84 : vector<256x64xf32> to vector<256x64xbf16>
    %c0_107 = arith.constant 0 : index
    %c0_108 = arith.constant 0 : index
    %86 = vector.load %arg9[%c0_107, %c0_108] : memref<256x64xf32, #tpu.memory_space<vmem>>, vector<256x64xf32>
    %c5 = arith.constant 5 : index
    %c0_109 = arith.constant 0 : index
    %c0_110 = arith.constant 0 : index
    %87 = vector.load %arg2[%c5, %c0_109, %c0_110] : memref<9x64x64xbf16, #tpu.memory_space<vmem>>, vector<1x64x64xbf16>
    %88 = vector.shape_cast %87 : vector<1x64x64xbf16> to vector<64x64xbf16>
    %cst_111 = arith.constant dense<0.000000e+00> : vector<256x64xf32>
    %89 = tpu.matmul %85, %88, %cst_111 {dimension_numbers = #tpu.dot_dimension_numbers<[1], [0], [0], [1], [0, 0, 1, 1], [], []>} : vector<256x64xbf16>, vector<64x64xbf16>, vector<256x64xf32> -> vector<256x64xf32>
    %90 = arith.addf %86, %89 : vector<256x64xf32>
    %c0_112 = arith.constant 0 : index
    %c0_113 = arith.constant 0 : index
    %91 = vector.load %arg9[%c0_112, %c0_113] : memref<256x64xf32, #tpu.memory_space<vmem>>, vector<256x64xf32>
    tpu.vector_store %arg9[%c0_112, %c0_113], %90 {strides = array<i32>} : memref<256x64xf32, #tpu.memory_space<vmem>>, vector<256x64xf32>,
    %c0_114 = arith.constant 0 : index
    %c0_115 = arith.constant 0 : index
    %92 = vector.load %arg8[%c0_114, %c0_115] : memref<256x128xf32, #tpu.memory_space<vmem>>, vector<256x128xf32>
    %c5_116 = arith.constant 5 : index
    %c0_117 = arith.constant 0 : index
    %c0_118 = arith.constant 0 : index
    %93 = vector.load %arg6[%c5_116, %c0_117, %c0_118] : memref<9x64x128xbf16, #tpu.memory_space<vmem>>, vector<1x64x128xbf16>
    %94 = vector.shape_cast %93 : vector<1x64x128xbf16> to vector<64x128xbf16>
    %cst_119 = arith.constant dense<0.000000e+00> : vector<256x128xf32>
    %95 = tpu.matmul %85, %94, %cst_119 {dimension_numbers = #tpu.dot_dimension_numbers<[1], [0], [0], [1], [0, 0, 1, 1], [], []>} : vector<256x64xbf16>, vector<64x128xbf16>, vector<256x128xf32> -> vector<256x128xf32>
    %96 = arith.addf %92, %95 : vector<256x128xf32>
    %c0_120 = arith.constant 0 : index
    %c0_121 = arith.constant 0 : index
    %97 = vector.load %arg8[%c0_120, %c0_121] : memref<256x128xf32, #tpu.memory_space<vmem>>, vector<256x128xf32>
    tpu.vector_store %arg8[%c0_120, %c0_121], %96 {strides = array<i32>} : memref<256x128xf32, #tpu.memory_space<vmem>>, vector<256x128xf32>,
    %c0_122 = arith.constant 0 : index
    %c2_123 = arith.constant 2 : index
    %c0_124 = arith.constant 0 : index
    %c0_125 = arith.constant 0 : index
    %98 = vector.load %arg1[%c0_122, %c2_123, %c0_124, %c0_125] : memref<1x18x18x64xf32, #tpu.memory_space<vmem>>, vector<1x16x16x64xf32>
    %99 = vector.shape_cast %98 : vector<1x16x16x64xf32> to vector<256x64xf32>
    %100 = arith.truncf %99 : vector<256x64xf32> to vector<256x64xbf16>
    %c0_126 = arith.constant 0 : index
    %c0_127 = arith.constant 0 : index
    %101 = vector.load %arg9[%c0_126, %c0_127] : memref<256x64xf32, #tpu.memory_space<vmem>>, vector<256x64xf32>
    %c6 = arith.constant 6 : index
    %c0_128 = arith.constant 0 : index
    %c0_129 = arith.constant 0 : index
    %102 = vector.load %arg2[%c6, %c0_128, %c0_129] : memref<9x64x64xbf16, #tpu.memory_space<vmem>>, vector<1x64x64xbf16>
    %103 = vector.shape_cast %102 : vector<1x64x64xbf16> to vector<64x64xbf16>
    %cst_130 = arith.constant dense<0.000000e+00> : vector<256x64xf32>
    %104 = tpu.matmul %100, %103, %cst_130 {dimension_numbers = #tpu.dot_dimension_numbers<[1], [0], [0], [1], [0, 0, 1, 1], [], []>} : vector<256x64xbf16>, vector<64x64xbf16>, vector<256x64xf32> -> vector<256x64xf32>
    %105 = arith.addf %101, %104 : vector<256x64xf32>
    %c0_131 = arith.constant 0 : index
    %c0_132 = arith.constant 0 : index
    %106 = vector.load %arg9[%c0_131, %c0_132] : memref<256x64xf32, #tpu.memory_space<vmem>>, vector<256x64xf32>
    tpu.vector_store %arg9[%c0_131, %c0_132], %105 {strides = array<i32>} : memref<256x64xf32, #tpu.memory_space<vmem>>, vector<256x64xf32>,
    %c0_133 = arith.constant 0 : index
    %c0_134 = arith.constant 0 : index
    %107 = vector.load %arg8[%c0_133, %c0_134] : memref<256x128xf32, #tpu.memory_space<vmem>>, vector<256x128xf32>
    %c6_135 = arith.constant 6 : index
    %c0_136 = arith.constant 0 : index
    %c0_137 = arith.constant 0 : index
    %108 = vector.load %arg6[%c6_135, %c0_136, %c0_137] : memref<9x64x128xbf16, #tpu.memory_space<vmem>>, vector<1x64x128xbf16>
    %109 = vector.shape_cast %108 : vector<1x64x128xbf16> to vector<64x128xbf16>
    %cst_138 = arith.constant dense<0.000000e+00> : vector<256x128xf32>
    %110 = tpu.matmul %100, %109, %cst_138 {dimension_numbers = #tpu.dot_dimension_numbers<[1], [0], [0], [1], [0, 0, 1, 1], [], []>} : vector<256x64xbf16>, vector<64x128xbf16>, vector<256x128xf32> -> vector<256x128xf32>
    %111 = arith.addf %107, %110 : vector<256x128xf32>
    %c0_139 = arith.constant 0 : index
    %c0_140 = arith.constant 0 : index
    %112 = vector.load %arg8[%c0_139, %c0_140] : memref<256x128xf32, #tpu.memory_space<vmem>>, vector<256x128xf32>
    tpu.vector_store %arg8[%c0_139, %c0_140], %111 {strides = array<i32>} : memref<256x128xf32, #tpu.memory_space<vmem>>, vector<256x128xf32>,
    %c0_141 = arith.constant 0 : index
    %c2_142 = arith.constant 2 : index
    %c1_143 = arith.constant 1 : index
    %c0_144 = arith.constant 0 : index
    %113 = vector.load %arg1[%c0_141, %c2_142, %c1_143, %c0_144] : memref<1x18x18x64xf32, #tpu.memory_space<vmem>>, vector<1x16x16x64xf32>
    %114 = vector.shape_cast %113 : vector<1x16x16x64xf32> to vector<256x64xf32>
    %115 = arith.truncf %114 : vector<256x64xf32> to vector<256x64xbf16>
    %c0_145 = arith.constant 0 : index
    %c0_146 = arith.constant 0 : index
    %116 = vector.load %arg9[%c0_145, %c0_146] : memref<256x64xf32, #tpu.memory_space<vmem>>, vector<256x64xf32>
    %c7 = arith.constant 7 : index
    %c0_147 = arith.constant 0 : index
    %c0_148 = arith.constant 0 : index
    %117 = vector.load %arg2[%c7, %c0_147, %c0_148] : memref<9x64x64xbf16, #tpu.memory_space<vmem>>, vector<1x64x64xbf16>
    %118 = vector.shape_cast %117 : vector<1x64x64xbf16> to vector<64x64xbf16>
    %cst_149 = arith.constant dense<0.000000e+00> : vector<256x64xf32>
    %119 = tpu.matmul %115, %118, %cst_149 {dimension_numbers = #tpu.dot_dimension_numbers<[1], [0], [0], [1], [0, 0, 1, 1], [], []>} : vector<256x64xbf16>, vector<64x64xbf16>, vector<256x64xf32> -> vector<256x64xf32>
    %120 = arith.addf %116, %119 : vector<256x64xf32>
    %c0_150 = arith.constant 0 : index
    %c0_151 = arith.constant 0 : index
    %121 = vector.load %arg9[%c0_150, %c0_151] : memref<256x64xf32, #tpu.memory_space<vmem>>, vector<256x64xf32>
    tpu.vector_store %arg9[%c0_150, %c0_151], %120 {strides = array<i32>} : memref<256x64xf32, #tpu.memory_space<vmem>>, vector<256x64xf32>,
    %c0_152 = arith.constant 0 : index
    %c0_153 = arith.constant 0 : index
    %122 = vector.load %arg8[%c0_152, %c0_153] : memref<256x128xf32, #tpu.memory_space<vmem>>, vector<256x128xf32>
    %c7_154 = arith.constant 7 : index
    %c0_155 = arith.constant 0 : index
    %c0_156 = arith.constant 0 : index
    %123 = vector.load %arg6[%c7_154, %c0_155, %c0_156] : memref<9x64x128xbf16, #tpu.memory_space<vmem>>, vector<1x64x128xbf16>
    %124 = vector.shape_cast %123 : vector<1x64x128xbf16> to vector<64x128xbf16>
    %cst_157 = arith.constant dense<0.000000e+00> : vector<256x128xf32>
    %125 = tpu.matmul %115, %124, %cst_157 {dimension_numbers = #tpu.dot_dimension_numbers<[1], [0], [0], [1], [0, 0, 1, 1], [], []>} : vector<256x64xbf16>, vector<64x128xbf16>, vector<256x128xf32> -> vector<256x128xf32>
    %126 = arith.addf %122, %125 : vector<256x128xf32>
    %c0_158 = arith.constant 0 : index
    %c0_159 = arith.constant 0 : index
    %127 = vector.load %arg8[%c0_158, %c0_159] : memref<256x128xf32, #tpu.memory_space<vmem>>, vector<256x128xf32>
    tpu.vector_store %arg8[%c0_158, %c0_159], %126 {strides = array<i32>} : memref<256x128xf32, #tpu.memory_space<vmem>>, vector<256x128xf32>,
    %c0_160 = arith.constant 0 : index
    %c2_161 = arith.constant 2 : index
    %c2_162 = arith.constant 2 : index
    %c0_163 = arith.constant 0 : index
    %128 = vector.load %arg1[%c0_160, %c2_161, %c2_162, %c0_163] : memref<1x18x18x64xf32, #tpu.memory_space<vmem>>, vector<1x16x16x64xf32>
    %129 = vector.shape_cast %128 : vector<1x16x16x64xf32> to vector<256x64xf32>
    %130 = arith.truncf %129 : vector<256x64xf32> to vector<256x64xbf16>
    %c0_164 = arith.constant 0 : index
    %c0_165 = arith.constant 0 : index
    %131 = vector.load %arg9[%c0_164, %c0_165] : memref<256x64xf32, #tpu.memory_space<vmem>>, vector<256x64xf32>
    %c8 = arith.constant 8 : index
    %c0_166 = arith.constant 0 : index
    %c0_167 = arith.constant 0 : index
    %132 = vector.load %arg2[%c8, %c0_166, %c0_167] : memref<9x64x64xbf16, #tpu.memory_space<vmem>>, vector<1x64x64xbf16>
    %133 = vector.shape_cast %132 : vector<1x64x64xbf16> to vector<64x64xbf16>
    %cst_168 = arith.constant dense<0.000000e+00> : vector<256x64xf32>
    %134 = tpu.matmul %130, %133, %cst_168 {dimension_numbers = #tpu.dot_dimension_numbers<[1], [0], [0], [1], [0, 0, 1, 1], [], []>} : vector<256x64xbf16>, vector<64x64xbf16>, vector<256x64xf32> -> vector<256x64xf32>
    %135 = arith.addf %131, %134 : vector<256x64xf32>
    %c0_169 = arith.constant 0 : index
    %c0_170 = arith.constant 0 : index
    %136 = vector.load %arg9[%c0_169, %c0_170] : memref<256x64xf32, #tpu.memory_space<vmem>>, vector<256x64xf32>
    tpu.vector_store %arg9[%c0_169, %c0_170], %135 {strides = array<i32>} : memref<256x64xf32, #tpu.memory_space<vmem>>, vector<256x64xf32>,
    %c0_171 = arith.constant 0 : index
    %c0_172 = arith.constant 0 : index
    %137 = vector.load %arg8[%c0_171, %c0_172] : memref<256x128xf32, #tpu.memory_space<vmem>>, vector<256x128xf32>
    %c8_173 = arith.constant 8 : index
    %c0_174 = arith.constant 0 : index
    %c0_175 = arith.constant 0 : index
    %138 = vector.load %arg6[%c8_173, %c0_174, %c0_175] : memref<9x64x128xbf16, #tpu.memory_space<vmem>>, vector<1x64x128xbf16>
    %139 = vector.shape_cast %138 : vector<1x64x128xbf16> to vector<64x128xbf16>
    %cst_176 = arith.constant dense<0.000000e+00> : vector<256x128xf32>
    %140 = tpu.matmul %130, %139, %cst_176 {dimension_numbers = #tpu.dot_dimension_numbers<[1], [0], [0], [1], [0, 0, 1, 1], [], []>} : vector<256x64xbf16>, vector<64x128xbf16>, vector<256x128xf32> -> vector<256x128xf32>
    %141 = arith.addf %137, %140 : vector<256x128xf32>
    %c0_177 = arith.constant 0 : index
    %c0_178 = arith.constant 0 : index
    %142 = vector.load %arg8[%c0_177, %c0_178] : memref<256x128xf32, #tpu.memory_space<vmem>>, vector<256x128xf32>
    tpu.vector_store %arg8[%c0_177, %c0_178], %141 {strides = array<i32>} : memref<256x128xf32, #tpu.memory_space<vmem>>, vector<256x128xf32>,
    %cst_179 = arith.constant 0.000000e+00 : f32
    %143 = vector.broadcast %cst_179 : f32 to vector<1x18x32x64xf32>
    %c0_180 = arith.constant 0 : index
    %c0_181 = arith.constant 0 : index
    %c0_182 = arith.constant 0 : index
    %c0_183 = arith.constant 0 : index
    %144 = vector.load %arg10[%c0_180, %c0_181, %c0_182, %c0_183] : memref<1x18x32x64xf32, #tpu.memory_space<vmem>>, vector<1x18x32x64xf32>
    tpu.vector_store %arg10[%c0_180, %c0_181, %c0_182, %c0_183], %143 {strides = array<i32>} : memref<1x18x32x64xf32, #tpu.memory_space<vmem>>, vector<1x18x32x64xf32>,
    %c0_184 = arith.constant 0 : index
    %c0_185 = arith.constant 0 : index
    %145 = vector.load %arg9[%c0_184, %c0_185] : memref<256x64xf32, #tpu.memory_space<vmem>>, vector<256x64xf32>
    %c0_186 = arith.constant 0 : index
    %c0_187 = arith.constant 0 : index
    %146 = vector.load %arg3[%c0_186, %c0_187] : memref<1x64xf32, #tpu.memory_space<vmem>>, vector<1x64xf32>
    %147 = vector.broadcast %146 : vector<1x64xf32> to vector<256x64xf32>
    %148 = arith.addf %145, %147 : vector<256x64xf32>
    %cst_188 = arith.constant 0.000000e+00 : f32
    %149 = vector.broadcast %cst_188 : f32 to vector<256x64xf32>
    %150 = arith.maximumf %148, %149 : vector<256x64xf32>
    %151 = vector.shape_cast %150 : vector<256x64xf32> to vector<1x16x16x64xf32>
    %c0_189 = arith.constant 0 : index
    %c1_190 = arith.constant 1 : index
    %c8_191 = arith.constant 8 : index
    %c0_192 = arith.constant 0 : index
    %152 = vector.load %arg10[%c0_189, %c1_190, %c8_191, %c0_192] : memref<1x18x32x64xf32, #tpu.memory_space<vmem>>, vector<1x16x16x64xf32>
    tpu.vector_store %arg10[%c0_189, %c1_190, %c8_191, %c0_192], %151 {strides = array<i32>} : memref<1x18x32x64xf32, #tpu.memory_space<vmem>>, vector<1x16x16x64xf32>,
    %c0_193 = arith.constant 0 : index
    %c0_194 = arith.constant 0 : index
    %c7_195 = arith.constant 7 : index
    %c0_196 = arith.constant 0 : index
    %153 = vector.load %arg10[%c0_193, %c0_194, %c7_195, %c0_196] : memref<1x18x32x64xf32, #tpu.memory_space<vmem>>, vector<1x16x16x64xf32>
    %154 = vector.shape_cast %153 : vector<1x16x16x64xf32> to vector<256x64xf32>
    %155 = arith.truncf %154 : vector<256x64xf32> to vector<256x64xbf16>
    %c0_197 = arith.constant 0 : index
    %c0_198 = arith.constant 0 : index
    %156 = vector.load %arg8[%c0_197, %c0_198] : memref<256x128xf32, #tpu.memory_space<vmem>>, vector<256x128xf32>
    %c0_199 = arith.constant 0 : index
    %c0_200 = arith.constant 0 : index
    %c0_201 = arith.constant 0 : index
    %157 = vector.load %arg4[%c0_199, %c0_200, %c0_201] : memref<9x64x128xbf16, #tpu.memory_space<vmem>>, vector<1x64x128xbf16>
    %158 = vector.shape_cast %157 : vector<1x64x128xbf16> to vector<64x128xbf16>
    %cst_202 = arith.constant dense<0.000000e+00> : vector<256x128xf32>
    %159 = tpu.matmul %155, %158, %cst_202 {dimension_numbers = #tpu.dot_dimension_numbers<[1], [0], [0], [1], [0, 0, 1, 1], [], []>} : vector<256x64xbf16>, vector<64x128xbf16>, vector<256x128xf32> -> vector<256x128xf32>
    %160 = arith.addf %156, %159 : vector<256x128xf32>
    %c0_203 = arith.constant 0 : index
    %c0_204 = arith.constant 0 : index
    %161 = vector.load %arg8[%c0_203, %c0_204] : memref<256x128xf32, #tpu.memory_space<vmem>>, vector<256x128xf32>
    tpu.vector_store %arg8[%c0_203, %c0_204], %160 {strides = array<i32>} : memref<256x128xf32, #tpu.memory_space<vmem>>, vector<256x128xf32>,
    %c0_205 = arith.constant 0 : index
    %c0_206 = arith.constant 0 : index
    %c8_207 = arith.constant 8 : index
    %c0_208 = arith.constant 0 : index
    %162 = vector.load %arg10[%c0_205, %c0_206, %c8_207, %c0_208] : memref<1x18x32x64xf32, #tpu.memory_space<vmem>>, vector<1x16x16x64xf32>
    %163 = vector.shape_cast %162 : vector<1x16x16x64xf32> to vector<256x64xf32>
    %164 = arith.truncf %163 : vector<256x64xf32> to vector<256x64xbf16>
    %c0_209 = arith.constant 0 : index
    %c0_210 = arith.constant 0 : index
    %165 = vector.load %arg8[%c0_209, %c0_210] : memref<256x128xf32, #tpu.memory_space<vmem>>, vector<256x128xf32>
    %c1_211 = arith.constant 1 : index
    %c0_212 = arith.constant 0 : index
    %c0_213 = arith.constant 0 : index
    %166 = vector.load %arg4[%c1_211, %c0_212, %c0_213] : memref<9x64x128xbf16, #tpu.memory_space<vmem>>, vector<1x64x128xbf16>
    %167 = vector.shape_cast %166 : vector<1x64x128xbf16> to vector<64x128xbf16>
    %cst_214 = arith.constant dense<0.000000e+00> : vector<256x128xf32>
    %168 = tpu.matmul %164, %167, %cst_214 {dimension_numbers = #tpu.dot_dimension_numbers<[1], [0], [0], [1], [0, 0, 1, 1], [], []>} : vector<256x64xbf16>, vector<64x128xbf16>, vector<256x128xf32> -> vector<256x128xf32>
    %169 = arith.addf %165, %168 : vector<256x128xf32>
    %c0_215 = arith.constant 0 : index
    %c0_216 = arith.constant 0 : index
    %170 = vector.load %arg8[%c0_215, %c0_216] : memref<256x128xf32, #tpu.memory_space<vmem>>, vector<256x128xf32>
    tpu.vector_store %arg8[%c0_215, %c0_216], %169 {strides = array<i32>} : memref<256x128xf32, #tpu.memory_space<vmem>>, vector<256x128xf32>,
    %c0_217 = arith.constant 0 : index
    %c0_218 = arith.constant 0 : index
    %c9 = arith.constant 9 : index
    %c0_219 = arith.constant 0 : index
    %171 = vector.load %arg10[%c0_217, %c0_218, %c9, %c0_219] : memref<1x18x32x64xf32, #tpu.memory_space<vmem>>, vector<1x16x16x64xf32>
    %172 = vector.shape_cast %171 : vector<1x16x16x64xf32> to vector<256x64xf32>
    %173 = arith.truncf %172 : vector<256x64xf32> to vector<256x64xbf16>
    %c0_220 = arith.constant 0 : index
    %c0_221 = arith.constant 0 : index
    %174 = vector.load %arg8[%c0_220, %c0_221] : memref<256x128xf32, #tpu.memory_space<vmem>>, vector<256x128xf32>
    %c2_222 = arith.constant 2 : index
    %c0_223 = arith.constant 0 : index
    %c0_224 = arith.constant 0 : index
    %175 = vector.load %arg4[%c2_222, %c0_223, %c0_224] : memref<9x64x128xbf16, #tpu.memory_space<vmem>>, vector<1x64x128xbf16>
    %176 = vector.shape_cast %175 : vector<1x64x128xbf16> to vector<64x128xbf16>
    %cst_225 = arith.constant dense<0.000000e+00> : vector<256x128xf32>
    %177 = tpu.matmul %173, %176, %cst_225 {dimension_numbers = #tpu.dot_dimension_numbers<[1], [0], [0], [1], [0, 0, 1, 1], [], []>} : vector<256x64xbf16>, vector<64x128xbf16>, vector<256x128xf32> -> vector<256x128xf32>
    %178 = arith.addf %174, %177 : vector<256x128xf32>
    %c0_226 = arith.constant 0 : index
    %c0_227 = arith.constant 0 : index
    %179 = vector.load %arg8[%c0_226, %c0_227] : memref<256x128xf32, #tpu.memory_space<vmem>>, vector<256x128xf32>
    tpu.vector_store %arg8[%c0_226, %c0_227], %178 {strides = array<i32>} : memref<256x128xf32, #tpu.memory_space<vmem>>, vector<256x128xf32>,
    %c0_228 = arith.constant 0 : index
    %c1_229 = arith.constant 1 : index
    %c7_230 = arith.constant 7 : index
    %c0_231 = arith.constant 0 : index
    %180 = vector.load %arg10[%c0_228, %c1_229, %c7_230, %c0_231] : memref<1x18x32x64xf32, #tpu.memory_space<vmem>>, vector<1x16x16x64xf32>
    %181 = vector.shape_cast %180 : vector<1x16x16x64xf32> to vector<256x64xf32>
    %182 = arith.truncf %181 : vector<256x64xf32> to vector<256x64xbf16>
    %c0_232 = arith.constant 0 : index
    %c0_233 = arith.constant 0 : index
    %183 = vector.load %arg8[%c0_232, %c0_233] : memref<256x128xf32, #tpu.memory_space<vmem>>, vector<256x128xf32>
    %c3_234 = arith.constant 3 : index
    %c0_235 = arith.constant 0 : index
    %c0_236 = arith.constant 0 : index
    %184 = vector.load %arg4[%c3_234, %c0_235, %c0_236] : memref<9x64x128xbf16, #tpu.memory_space<vmem>>, vector<1x64x128xbf16>
    %185 = vector.shape_cast %184 : vector<1x64x128xbf16> to vector<64x128xbf16>
    %cst_237 = arith.constant dense<0.000000e+00> : vector<256x128xf32>
    %186 = tpu.matmul %182, %185, %cst_237 {dimension_numbers = #tpu.dot_dimension_numbers<[1], [0], [0], [1], [0, 0, 1, 1], [], []>} : vector<256x64xbf16>, vector<64x128xbf16>, vector<256x128xf32> -> vector<256x128xf32>
    %187 = arith.addf %183, %186 : vector<256x128xf32>
    %c0_238 = arith.constant 0 : index
    %c0_239 = arith.constant 0 : index
    %188 = vector.load %arg8[%c0_238, %c0_239] : memref<256x128xf32, #tpu.memory_space<vmem>>, vector<256x128xf32>
    tpu.vector_store %arg8[%c0_238, %c0_239], %187 {strides = array<i32>} : memref<256x128xf32, #tpu.memory_space<vmem>>, vector<256x128xf32>,
    %c0_240 = arith.constant 0 : index
    %c1_241 = arith.constant 1 : index
    %c8_242 = arith.constant 8 : index
    %c0_243 = arith.constant 0 : index
    %189 = vector.load %arg10[%c0_240, %c1_241, %c8_242, %c0_243] : memref<1x18x32x64xf32, #tpu.memory_space<vmem>>, vector<1x16x16x64xf32>
    %190 = vector.shape_cast %189 : vector<1x16x16x64xf32> to vector<256x64xf32>
    %191 = arith.truncf %190 : vector<256x64xf32> to vector<256x64xbf16>
    %c0_244 = arith.constant 0 : index
    %c0_245 = arith.constant 0 : index
    %192 = vector.load %arg8[%c0_244, %c0_245] : memref<256x128xf32, #tpu.memory_space<vmem>>, vector<256x128xf32>
    %c4_246 = arith.constant 4 : index
    %c0_247 = arith.constant 0 : index
    %c0_248 = arith.constant 0 : index
    %193 = vector.load %arg4[%c4_246, %c0_247, %c0_248] : memref<9x64x128xbf16, #tpu.memory_space<vmem>>, vector<1x64x128xbf16>
    %194 = vector.shape_cast %193 : vector<1x64x128xbf16> to vector<64x128xbf16>
    %cst_249 = arith.constant dense<0.000000e+00> : vector<256x128xf32>
    %195 = tpu.matmul %191, %194, %cst_249 {dimension_numbers = #tpu.dot_dimension_numbers<[1], [0], [0], [1], [0, 0, 1, 1], [], []>} : vector<256x64xbf16>, vector<64x128xbf16>, vector<256x128xf32> -> vector<256x128xf32>
    %196 = arith.addf %192, %195 : vector<256x128xf32>
    %c0_250 = arith.constant 0 : index
    %c0_251 = arith.constant 0 : index
    %197 = vector.load %arg8[%c0_250, %c0_251] : memref<256x128xf32, #tpu.memory_space<vmem>>, vector<256x128xf32>
    tpu.vector_store %arg8[%c0_250, %c0_251], %196 {strides = array<i32>} : memref<256x128xf32, #tpu.memory_space<vmem>>, vector<256x128xf32>,
    %c0_252 = arith.constant 0 : index
    %c1_253 = arith.constant 1 : index
    %c9_254 = arith.constant 9 : index
    %c0_255 = arith.constant 0 : index
    %198 = vector.load %arg10[%c0_252, %c1_253, %c9_254, %c0_255] : memref<1x18x32x64xf32, #tpu.memory_space<vmem>>, vector<1x16x16x64xf32>
    %199 = vector.shape_cast %198 : vector<1x16x16x64xf32> to vector<256x64xf32>
    %200 = arith.truncf %199 : vector<256x64xf32> to vector<256x64xbf16>
    %c0_256 = arith.constant 0 : index
    %c0_257 = arith.constant 0 : index
    %201 = vector.load %arg8[%c0_256, %c0_257] : memref<256x128xf32, #tpu.memory_space<vmem>>, vector<256x128xf32>
    %c5_258 = arith.constant 5 : index
    %c0_259 = arith.constant 0 : index
    %c0_260 = arith.constant 0 : index
    %202 = vector.load %arg4[%c5_258, %c0_259, %c0_260] : memref<9x64x128xbf16, #tpu.memory_space<vmem>>, vector<1x64x128xbf16>
    %203 = vector.shape_cast %202 : vector<1x64x128xbf16> to vector<64x128xbf16>
    %cst_261 = arith.constant dense<0.000000e+00> : vector<256x128xf32>
    %204 = tpu.matmul %200, %203, %cst_261 {dimension_numbers = #tpu.dot_dimension_numbers<[1], [0], [0], [1], [0, 0, 1, 1], [], []>} : vector<256x64xbf16>, vector<64x128xbf16>, vector<256x128xf32> -> vector<256x128xf32>
    %205 = arith.addf %201, %204 : vector<256x128xf32>
    %c0_262 = arith.constant 0 : index
    %c0_263 = arith.constant 0 : index
    %206 = vector.load %arg8[%c0_262, %c0_263] : memref<256x128xf32, #tpu.memory_space<vmem>>, vector<256x128xf32>
    tpu.vector_store %arg8[%c0_262, %c0_263], %205 {strides = array<i32>} : memref<256x128xf32, #tpu.memory_space<vmem>>, vector<256x128xf32>,
    %c0_264 = arith.constant 0 : index
    %c2_265 = arith.constant 2 : index
    %c7_266 = arith.constant 7 : index
    %c0_267 = arith.constant 0 : index
    %207 = vector.load %arg10[%c0_264, %c2_265, %c7_266, %c0_267] : memref<1x18x32x64xf32, #tpu.memory_space<vmem>>, vector<1x16x16x64xf32>
    %208 = vector.shape_cast %207 : vector<1x16x16x64xf32> to vector<256x64xf32>
    %209 = arith.truncf %208 : vector<256x64xf32> to vector<256x64xbf16>
    %c0_268 = arith.constant 0 : index
    %c0_269 = arith.constant 0 : index
    %210 = vector.load %arg8[%c0_268, %c0_269] : memref<256x128xf32, #tpu.memory_space<vmem>>, vector<256x128xf32>
    %c6_270 = arith.constant 6 : index
    %c0_271 = arith.constant 0 : index
    %c0_272 = arith.constant 0 : index
    %211 = vector.load %arg4[%c6_270, %c0_271, %c0_272] : memref<9x64x128xbf16, #tpu.memory_space<vmem>>, vector<1x64x128xbf16>
    %212 = vector.shape_cast %211 : vector<1x64x128xbf16> to vector<64x128xbf16>
    %cst_273 = arith.constant dense<0.000000e+00> : vector<256x128xf32>
    %213 = tpu.matmul %209, %212, %cst_273 {dimension_numbers = #tpu.dot_dimension_numbers<[1], [0], [0], [1], [0, 0, 1, 1], [], []>} : vector<256x64xbf16>, vector<64x128xbf16>, vector<256x128xf32> -> vector<256x128xf32>
    %214 = arith.addf %210, %213 : vector<256x128xf32>
    %c0_274 = arith.constant 0 : index
    %c0_275 = arith.constant 0 : index
    %215 = vector.load %arg8[%c0_274, %c0_275] : memref<256x128xf32, #tpu.memory_space<vmem>>, vector<256x128xf32>
    tpu.vector_store %arg8[%c0_274, %c0_275], %214 {strides = array<i32>} : memref<256x128xf32, #tpu.memory_space<vmem>>, vector<256x128xf32>,
    %c0_276 = arith.constant 0 : index
    %c2_277 = arith.constant 2 : index
    %c8_278 = arith.constant 8 : index
    %c0_279 = arith.constant 0 : index
    %216 = vector.load %arg10[%c0_276, %c2_277, %c8_278, %c0_279] : memref<1x18x32x64xf32, #tpu.memory_space<vmem>>, vector<1x16x16x64xf32>
    %217 = vector.shape_cast %216 : vector<1x16x16x64xf32> to vector<256x64xf32>
    %218 = arith.truncf %217 : vector<256x64xf32> to vector<256x64xbf16>
    %c0_280 = arith.constant 0 : index
    %c0_281 = arith.constant 0 : index
    %219 = vector.load %arg8[%c0_280, %c0_281] : memref<256x128xf32, #tpu.memory_space<vmem>>, vector<256x128xf32>
    %c7_282 = arith.constant 7 : index
    %c0_283 = arith.constant 0 : index
    %c0_284 = arith.constant 0 : index
    %220 = vector.load %arg4[%c7_282, %c0_283, %c0_284] : memref<9x64x128xbf16, #tpu.memory_space<vmem>>, vector<1x64x128xbf16>
    %221 = vector.shape_cast %220 : vector<1x64x128xbf16> to vector<64x128xbf16>
    %cst_285 = arith.constant dense<0.000000e+00> : vector<256x128xf32>
    %222 = tpu.matmul %218, %221, %cst_285 {dimension_numbers = #tpu.dot_dimension_numbers<[1], [0], [0], [1], [0, 0, 1, 1], [], []>} : vector<256x64xbf16>, vector<64x128xbf16>, vector<256x128xf32> -> vector<256x128xf32>
    %223 = arith.addf %219, %222 : vector<256x128xf32>
    %c0_286 = arith.constant 0 : index
    %c0_287 = arith.constant 0 : index
    %224 = vector.load %arg8[%c0_286, %c0_287] : memref<256x128xf32, #tpu.memory_space<vmem>>, vector<256x128xf32>
    tpu.vector_store %arg8[%c0_286, %c0_287], %223 {strides = array<i32>} : memref<256x128xf32, #tpu.memory_space<vmem>>, vector<256x128xf32>,
    %c0_288 = arith.constant 0 : index
    %c2_289 = arith.constant 2 : index
    %c9_290 = arith.constant 9 : index
    %c0_291 = arith.constant 0 : index
    %225 = vector.load %arg10[%c0_288, %c2_289, %c9_290, %c0_291] : memref<1x18x32x64xf32, #tpu.memory_space<vmem>>, vector<1x16x16x64xf32>
    %226 = vector.shape_cast %225 : vector<1x16x16x64xf32> to vector<256x64xf32>
    %227 = arith.truncf %226 : vector<256x64xf32> to vector<256x64xbf16>
    %c0_292 = arith.constant 0 : index
    %c0_293 = arith.constant 0 : index
    %228 = vector.load %arg8[%c0_292, %c0_293] : memref<256x128xf32, #tpu.memory_space<vmem>>, vector<256x128xf32>
    %c8_294 = arith.constant 8 : index
    %c0_295 = arith.constant 0 : index
    %c0_296 = arith.constant 0 : index
    %229 = vector.load %arg4[%c8_294, %c0_295, %c0_296] : memref<9x64x128xbf16, #tpu.memory_space<vmem>>, vector<1x64x128xbf16>
    %230 = vector.shape_cast %229 : vector<1x64x128xbf16> to vector<64x128xbf16>
    %cst_297 = arith.constant dense<0.000000e+00> : vector<256x128xf32>
    %231 = tpu.matmul %227, %230, %cst_297 {dimension_numbers = #tpu.dot_dimension_numbers<[1], [0], [0], [1], [0, 0, 1, 1], [], []>} : vector<256x64xbf16>, vector<64x128xbf16>, vector<256x128xf32> -> vector<256x128xf32>
    %232 = arith.addf %228, %231 : vector<256x128xf32>
    %c0_298 = arith.constant 0 : index
    %c0_299 = arith.constant 0 : index
    %233 = vector.load %arg8[%c0_298, %c0_299] : memref<256x128xf32, #tpu.memory_space<vmem>>, vector<256x128xf32>
    tpu.vector_store %arg8[%c0_298, %c0_299], %232 {strides = array<i32>} : memref<256x128xf32, #tpu.memory_space<vmem>>, vector<256x128xf32>,
    %c0_300 = arith.constant 0 : index
    %c0_301 = arith.constant 0 : index
    %234 = vector.load %arg8[%c0_300, %c0_301] : memref<256x128xf32, #tpu.memory_space<vmem>>, vector<256x128xf32>
    %cst_302 = arith.constant 0.000000e+00 : f32
    %235 = vector.broadcast %cst_302 : f32 to vector<256x128xf32>
    %236 = arith.maximumf %234, %235 : vector<256x128xf32>
    %c0_303 = arith.constant 0 : index
    %c0_304 = arith.constant 0 : index
    %237 = vector.load %arg8[%c0_303, %c0_304] : memref<256x128xf32, #tpu.memory_space<vmem>>, vector<256x128xf32>
    tpu.vector_store %arg8[%c0_303, %c0_304], %236 {strides = array<i32>} : memref<256x128xf32, #tpu.memory_space<vmem>>, vector<256x128xf32>,
    return
  }
  func.func @transform_0(%arg0: i32) -> (i32, i32, i32, i32) {
    %c0_i32 = arith.constant 0 : i32
    %c0_i32_0 = arith.constant 0 : i32
    %c0_i32_1 = arith.constant 0 : i32
    %c0_i32_2 = arith.constant 0 : i32
    return %arg0, %c0_i32, %c0_i32_0, %c0_i32_1 : i32, i32, i32, i32
  }
  func.func @transform_1(%arg0: i32) -> (i32, i32, i32) {
    %c0_i32 = arith.constant 0 : i32
    %c0_i32_0 = arith.constant 0 : i32
    %c0_i32_1 = arith.constant 0 : i32
    %c0_i32_2 = arith.constant 0 : i32
    return %c0_i32, %c0_i32_0, %c0_i32_1 : i32, i32, i32
  }
  func.func @transform_2(%arg0: i32) -> (i32, i32) {
    %c0_i32 = arith.constant 0 : i32
    %c0_i32_0 = arith.constant 0 : i32
    %c0_i32_1 = arith.constant 0 : i32
    return %c0_i32, %c0_i32_0 : i32, i32
  }
  func.func @transform_3(%arg0: i32) -> (i32, i32, i32) {
    %c0_i32 = arith.constant 0 : i32
    %c0_i32_0 = arith.constant 0 : i32
    %c0_i32_1 = arith.constant 0 : i32
    %c0_i32_2 = arith.constant 0 : i32
    return %c0_i32, %c0_i32_0, %c0_i32_1 : i32, i32, i32
  }
  func.func @transform_4(%arg0: i32) -> (i32, i32) {
    %c0_i32 = arith.constant 0 : i32
    %c0_i32_0 = arith.constant 0 : i32
    %c0_i32_1 = arith.constant 0 : i32
    return %c0_i32, %c0_i32_0 : i32, i32
  }
  func.func @transform_5(%arg0: i32) -> (i32, i32, i32) {
    %c0_i32 = arith.constant 0 : i32
    %c0_i32_0 = arith.constant 0 : i32
    %c0_i32_1 = arith.constant 0 : i32
    %c0_i32_2 = arith.constant 0 : i32
    return %c0_i32, %c0_i32_0, %c0_i32_1 : i32, i32, i32
  }
  func.func @transform_6(%arg0: i32) -> (i32, i32) {
    %c0_i32 = arith.constant 0 : i32
    %c0_i32_0 = arith.constant 0 : i32
    %c0_i32_1 = arith.constant 0 : i32
    return %c0_i32, %c0_i32_0 : i32, i32
  }
  func.func @transform_7(%arg0: i32) -> (i32, i32) {
    %c0_i32 = arith.constant 0 : i32
    %c0_i32_0 = arith.constant 0 : i32
    return %arg0, %c0_i32 : i32, i32
  }
}

</mosaic_0001>

<bundles_post_ra>
// kernel: residual_block.1
= control target key start
LH: loop header
LB: loop body
LE: loop exit
PB: predicated region body
PF: predicated region fallthrough
CT: control target
= control target key end

     0   :  { %s13003_s24 = smov 0   ;;  %s16889_s0 = inlined_call_operand.vmem [shape: f32[2,18,18,64], index: 0, kind: input, shape index: {}]   ;;  %s16890_s1 = inlined_call_operand.vmem [shape: bf16[9,64,64], index: 1, kind: input, shape index: {}]   ;;  %s16891_s2 = inlined_call_operand.vmem [shape: f32[1,64], index: 2, kind: input, shape index: {}]   ;;  %s16892_s3 = inlined_call_operand.vmem [shape: bf16[9,64,128], index: 3, kind: input, shape index: {}]   ;;  %s16893_s4 = inlined_call_operand.vmem [shape: f32[1,128], index: 4, kind: input, shape index: {}]   ;;  %s16894_s5 = inlined_call_operand.vmem [shape: bf16[9,64,128], index: 5, kind: input, shape index: {}]   ;;  %s16895_s6 = inlined_call_operand.vmem [shape: f32[1,128], index: 6, kind: input, shape index: {}]   ;;  %s16896_s7 = inlined_call_operand.vmem [shape: f32[512,128], index: 7, kind: output, shape index: {}]  }
   0x1 LB: > { %s13009_s25 = sadd.s32 4294967295, %s12960_s24   ;;  %p10277_p0 = scmp.ge.s32.totalorder %s12960_s24, 1  ;;  %s12960_s24 = sphi %s13003_s24, %s17_s24  }
   0x2   : > { %p237_p1 = scmp.lt.s32.totalorder %s12960_s24, 3 }
   0x4   : > { %p238_p2 = pnand %p10277_p0, %p237_p1 }
   0x6   : > { %241 = sbr.rel (%p238_p2) target bundleno = 1250 (0x4e2), region = 48 }
   0xb   : > { %v12846_v0 = vld [vmem:[%s16890_s1 + $0x18] sm:$0xff]   ;;  %p269_p3 = scmp.lt.s32.totalorder %s13009_s25, 1  ;;  %v12847_v1 = vld [vmem:[%s16890_s1 + $0x10] sm:$0xff]   ;;  %v12848_v2 = vld [vmem:[%s16890_s1 + $0x8] sm:$0xff]   ;;  %vm281_vm0 = vcmask 523264   ;;  %s10279_s11 = sshll.u32 %s13009_s25, 5 }
   0xc   : > { %11748 = vmatprep.subr.bf16.mxu0 %v12846_v0  ;;  %12828 = vmatprep.subr.bf16.mxu1 %v12846_v0  ;;  %v12849_v6 = vld [vmem:[%s16890_s1] sm:$0xff]   ;;  %v12850_v11 = vld [vmem:[%s16890_s1 + $0x38] sm:$0xff]   ;;  %v12851_v24 = vld [vmem:[%s16890_s1 + $0x30] sm:$0xff]   ;;  %p15779_p4 = scmp.lt.s32.totalorder %s10279_s11, 63 }
   0xd   : > { %s270_s30 = scalar_select %p269_p3, %s13009_s25, 1  ;;  %11749 = vmatpush3.bf16.msra.mxu0 %v12846_v0  ;;  %12832 = vmatpush3.bf16.msra.mxu1 %v12846_v0  ;;  %v12852_v17 = vld [vmem:[%s16894_s5 + $0x18] sm:$0xff]   ;;  %v12854_v31 = vld [vmem:[%s16894_s5 + $0x10] sm:$0xff]   ;;  %v12853_v34 = vld [vmem:[%s16890_s1 + $0x28] sm:$0xff]  }
   0xe   : > { %11750 = vmatprep.subr.bf16.mxu0 %v12847_v1  ;;  %12829 = vmatprep.subr.bf16.mxu1 %v12847_v1  ;;  %v12855_v39 = vld [vmem:[%s16894_s5 + $0x8] sm:$0xff]   ;;  %v12856_v42 = vld [vmem:[%s16890_s1 + $0x20] sm:$0xff]   ;;  %v12858_v50 = vld [vmem:[%s16890_s1 + $0x58] sm:$0xff]   ;;  %s17162_s11 = smov (!%p15779_p4, %s10279_s11), 63 }
   0xf   : > { %s12836_s10 = smul.u32 432, %s270_s30  ;;  %v12857_v45 = vld [vmem:[%s16894_s5] sm:$0xff]   ;;  %v12861_v60 = vld [vmem:[%s16894_s5 + $0x38] sm:$0xff]   ;;  %s10280_s25 = sshll.u32 %s17162_s11, 3 }
  0x10   : > { %s15847_s16 = scalar_lea.vmem %s16896_s7, %s10280_s25 }
  0x11   : > { %s13027_s13 = scalar_lea.vmem %s16889_s0, %s12836_s10  ;;  %11751 = vmatpush3.bf16.msra.mxu0 %v12847_v1  ;;  %12833 = vmatpush3.bf16.msra.mxu1 %v12847_v1 }
  0x12   : > { %v355_v3 = vld [vmem:[%s13027_s13] sm:$0xff]  ;;  %v356_v4 = vld [vmem:[%s13027_s13 + $0x8] sm:$0xff]  ;;  %11752 = vmatprep.subr.bf16.mxu0 %v12848_v2  ;;  %12830 = vmatprep.subr.bf16.mxu1 %v12848_v2  ;;  %v357_v10 = vld [vmem:[%s13027_s13 + $0x18] sm:$0xff] }
  0x13   : > { %v371_v5 = vld [vmem:[%s13027_s13 + $0xc0] sm:$0xff]  ;;  %v13035_v7 = vpack.c.bf16 %v356_v4, %v355_v3  ;;  %v372_v8 = vld [vmem:[%s13027_s13 + $0xc8] sm:$0xff]  ;;  %v373_v13 = vld [vmem:[%s13027_s13 + $0xd8] sm:$0xff] }
  0x14   : > { %v13038_v9 = vpack.c.bf16 %v372_v8, %v371_v5  ;;  %v358_v12 = vld [vmem:[%s13027_s13 + $0x20] sm:$0xff]  ;;  %v359_v15 = vld [vmem:[%s13027_s13 + $0x30] sm:$0xff]  ;;  %v360_v16 = vld [vmem:[%s13027_s13 + $0x38] sm:$0xff] }
  0x15   : > { %11756 = vmatprep.mubr.msk.bf16.mxu0 %vm281_vm0, %v13035_v7  ;;  %11753 = vmatpush3.bf16.msra.mxu0 %v12848_v2  ;;  %v374_v14 = vld [vmem:[%s13027_s13 + $0xe0] sm:$0xff]  ;;  %v375_v18 = vld [vmem:[%s13027_s13 + $0xf0] sm:$0xff]  ;;  %v376_v19 = vld [vmem:[%s13027_s13 + $0xf8] sm:$0xff]  ;;  %v13058_v20 = vpack.c.bf16 %v358_v12, %v357_v10  ;;  %v13062_v22 = vpack.c.bf16 %v360_v16, %v359_v15 }
  0x16   : > { %12834 = vmatpush3.bf16.msra.mxu1 %v12848_v2  ;;  %11754 = vmatprep.subr.bf16.mxu0 %v12849_v6  ;;  %v13060_v21 = vpack.c.bf16 %v374_v14, %v373_v13  ;;  %v13064_v23 = vpack.c.bf16 %v376_v19, %v375_v18  ;;  %v361_v25 = vld [vmem:[%s13027_s13 + $0x48] sm:$0xff]  ;;  %v362_v26 = vld [vmem:[%s13027_s13 + $0x50] sm:$0xff]  ;;  %v363_v29 = vld [vmem:[%s13027_s13 + $0x60] sm:$0xff] }
  0x17   : > { %12831 = vmatprep.subr.bf16.mxu1 %v12849_v6  ;;  %11772 = vmatprep.mubr.msk.bf16.mxu1 %vm281_vm0, %v13038_v9  ;;  %v377_v27 = vld [vmem:[%s13027_s13 + $0x108] sm:$0xff]  ;;  %v378_v28 = vld [vmem:[%s13027_s13 + $0x110] sm:$0xff]  ;;  %v379_v32 = vld [vmem:[%s13027_s13 + $0x120] sm:$0xff]  ;;  %v13091_v35 = vpack.c.bf16 %v362_v26, %v361_v25 }
  0x18   : > { %v364_v30 = vld [vmem:[%s13027_s13 + $0x68] sm:$0xff]  ;;  %v13093_v36 = vpack.c.bf16 %v378_v28, %v377_v27  ;;  %v365_v40 = vld [vmem:[%s13027_s13 + $0x78] sm:$0xff]  ;;  %v366_v41 = vld [vmem:[%s13027_s13 + $0x80] sm:$0xff] }
  0x19   : > { %11755 = vmatpush3.bf16.msra.mxu0 %v12849_v6  ;;  %v380_v33 = vld [vmem:[%s13027_s13 + $0x128] sm:$0xff]  ;;  %v13095_v37 = vpack.c.bf16 %v364_v30, %v363_v29  ;;  %v381_v43 = vld [vmem:[%s13027_s13 + $0x138] sm:$0xff]  ;;  %v382_v44 = vld [vmem:[%s13027_s13 + $0x140] sm:$0xff]  ;;  %v13127_v51 = vpack.c.bf16 %v366_v41, %v365_v40 }
  0x1a   : > { %12835 = vmatpush3.bf16.msra.mxu1 %v12849_v6  ;;  %11828 = vmatprep.subr.bf16.mxu0 %v12850_v11  ;;  %v13097_v38 = vpack.c.bf16 %v380_v33, %v379_v32  ;;  %v367_v46 = vld [vmem:[%s13027_s13 + $0x90] sm:$0xff]  ;;  %v368_v47 = vld [vmem:[%s13027_s13 + $0x98] sm:$0xff]  ;;  %v13129_v52 = vpack.c.bf16 %v382_v44, %v381_v43  ;;  %v369_v55 = vld [vmem:[%s13027_s13 + $0xa8] sm:$0xff] }
  0x1b   : > { %11788 = vmatprep.subr.bf16.mxu1 %v12852_v17  ;;  %v383_v48 = vld [vmem:[%s13027_s13 + $0x150] sm:$0xff]  ;;  %v384_v49 = vld [vmem:[%s13027_s13 + $0x158] sm:$0xff]  ;;  %v13131_v53 = vpack.c.bf16 %v368_v47, %v367_v46  ;;  %v385_v57 = vld [vmem:[%s13027_s13 + $0x168] sm:$0xff]  ;;  %v12962_v46 = vmov 0.0  }
  0x1c   : > { %11757 = vmatmul.mubr.msk.bf16.vlgmr.msra.gmra.mxu0 %vm281_vm0, %v13058_v20  ;;  %v13133_v54 = vpack.c.bf16 %v384_v49, %v383_v48  ;;  %v370_v56 = vld [vmem:[%s13027_s13 + $0xb0] sm:$0xff]  ;;  %v1029_v59 = vld [vmem:[%s13027_s13 + $0x1] sm:$0xff]  ;;  %v1031_v1 = vld [vmem:[%s13027_s13 + $0x19] sm:$0xff]  ;;  %284 = vst.msk [vmem:[#allocation2 + $0x10] sm:$0xff] %vm281_vm0, %v12962_v46 }
  0x1d   : > { %11773 = vmatmul.mubr.msk.bf16.vlgmr.msra.gmra.mxu1 %vm281_vm0, %v13060_v21  ;;  %11829 = vmatpush3.bf16.msra.mxu0 %v12850_v11  ;;  %v386_v58 = vld [vmem:[%s13027_s13 + $0x170] sm:$0xff]  ;;  %v13152_v62 = vpack.c.bf16 %v370_v56, %v369_v55  ;;  %v1032_v2 = vld [vmem:[%s13027_s13 + $0x21] sm:$0xff]  ;;  %v1034_v4 = vld [vmem:[%s13027_s13 + $0x39] sm:$0xff]  ;;  %282 = vst.msk [vmem:[#allocation2] sm:$0xff] %vm281_vm0, %v12962_v46 }
  0x1e   : > { %11760 = vmatprep.mubr.msk.bf16.mxu0 %vm281_vm0, %v13062_v22  ;;  %11776 = vmatprep.mubr.msk.bf16.mxu1 %vm281_vm0, %v13064_v23  ;;  %v1030_v61 = vld [vmem:[%s13027_s13 + $0x9] sm:$0xff]  ;;  %v13154_v63 = vpack.c.bf16 %v386_v58, %v385_v57  ;;  %v1033_v3 = vld [vmem:[%s13027_s13 + $0x31] sm:$0xff]  ;;  %v13170_v5 = vpack.c.bf16 %v1032_v2, %v1031_v1  ;;  %v1037_v12 = vld [vmem:[%s13027_s13 + $0x61] sm:$0xff]  ;;  %283 = vst.msk [vmem:[#allocation2 + $0x8] sm:$0xff] %vm281_vm0, %v12962_v46 }
  0x1f   : > { %11830 = vmatprep.subr.bf16.mxu0 %v12851_v24  ;;  %11789 = vmatpush3.bf16.msra.mxu1 %v12852_v17  ;;  %v13156_v0 = vpack.c.bf16 %v1030_v61, %v1029_v59  ;;  %v13172_v6 = vpack.c.bf16 %v1034_v4, %v1033_v3  ;;  %v12859_v8 = vld [vmem:[%s16890_s1 + $0x50] sm:$0xff]   ;;  %v12860_v14 = vld [vmem:[%s16890_s1 + $0x48] sm:$0xff]   ;;  %v1039_v18 = vld [vmem:[%s13027_s13 + $0x79] sm:$0xff]  ;;  %285 = vst.msk [vmem:[#allocation2 + $0x18] sm:$0xff] %vm281_vm0, %v12962_v46 }
  0x20   : > { %11790 = vmatprep.subr.bf16.mxu1 %v12854_v31  ;;  %v1035_v10 = vld [vmem:[%s13027_s13 + $0x49] sm:$0xff]  ;;  %v1036_v11 = vld [vmem:[%s13027_s13 + $0x51] sm:$0xff]  ;;  %v1040_v19 = vld [vmem:[%s13027_s13 + $0x81] sm:$0xff]  ;;  %286 = vst.msk [vmem:[#allocation2 + $0x20] sm:$0xff] %vm281_vm0, %v12962_v46 }
  0x21   : > { %11831 = vmatpush3.bf16.msra.mxu0 %v12851_v24  ;;  %v1038_v13 = vld [vmem:[%s13027_s13 + $0x69] sm:$0xff]  ;;  %v13195_v15 = vpack.c.bf16 %v1036_v11, %v1035_v10  ;;  %v12862_v24 = vld [vmem:[%s16890_s1 + $0x40] sm:$0xff]   ;;  %v1041_v25 = vld [vmem:[%s13027_s13 + $0x91] sm:$0xff]  ;;  %v13225_v29 = vpack.c.bf16 %v1040_v19, %v1039_v18  ;;  %287 = vst.msk [vmem:[#allocation2 + $0x28] sm:$0xff] %vm281_vm0, %v12962_v46 }
  0x22   : > { %11832 = vmatprep.subr.bf16.mxu0 %v12853_v34  ;;  %v13197_v16 = vpack.c.bf16 %v1038_v13, %v1037_v12  ;;  %v12864_v17 = vld [vmem:[%s16894_s5 + $0x28] sm:$0xff]   ;;  %v12865_v26 = vld [vmem:[%s16894_s5 + $0x20] sm:$0xff]   ;;  %v13223_v28 = vld [vmem:[%s16890_s1 + $0x78] sm:$0xff]   ;;  %288 = vst.msk [vmem:[#allocation2 + $0x30] sm:$0xff] %vm281_vm0, %v12962_v46 }
  0x23   : > { %11791 = vmatpush3.bf16.msra.mxu1 %v12854_v31  ;;  %v1042_v27 = vld [vmem:[%s13027_s13 + $0x99] sm:$0xff]  ;;  %v1043_v32 = vld [vmem:[%s13027_s13 + $0xa9] sm:$0xff]  ;;  %v1044_v33 = vld [vmem:[%s13027_s13 + $0xb1] sm:$0xff]  ;;  %289 = vst.msk [vmem:[#allocation2 + $0x38] sm:$0xff] %vm281_vm0, %v12962_v46 }
  0x24   : > { %11761 = vmatmul.mubr.msk.bf16.gmra.mxu0 %vm281_vm0, %v13091_v35  ;;  %11792 = vmatprep.subr.bf16.mxu1 %v12855_v39  ;;  %v13230_v30 = vld [vmem:[%s16894_s5 + $0x58] sm:$0xff]   ;;  %v13232_v31 = vpack.c.bf16 %v1042_v27, %v1041_v25  ;;  %v13248_v40 = vpack.c.bf16 %v1044_v33, %v1043_v32  ;;  %v13256_v43 = vld [vmem:[%s13027_s13 + $0xe1] sm:$0xff]  ;;  %290 = vst.msk [vmem:[#allocation2 + $0x40] sm:$0xff] %vm281_vm0, %v12962_v46  ;;  %291 = vst.msk [vmem:[#allocation2 + $0x48] sm:$0xff] %vm281_vm0, %v12962_v46 }
  0x25   : > { %11777 = vmatmul.mubr.msk.bf16.gmra.mxu1 %vm281_vm0, %v13093_v36  ;;  %11764 = vmatprep.mubr.msk.bf16.mxu0 %vm281_vm0, %v13095_v37  ;;  %v13263_v44 = vld [vmem:[%s13027_s13 + $0xf1] sm:$0xff]  ;;  %292 = vst.msk [vmem:[#allocation2 + $0x50] sm:$0xff] %vm281_vm0, %v12962_v46  ;;  %293 = vst.msk [vmem:[#allocation2 + $0x58] sm:$0xff] %vm281_vm0, %v12962_v46  ;;  %v1051_v49 = vld [vmem:[%s13027_s13 + $0x109] sm:$0xff] }
  0x26   : > { %11780 = vmatprep.mubr.msk.bf16.mxu1 %vm281_vm0, %v13097_v38  ;;  %11833 = vmatpush3.bf16.msra.mxu0 %v12853_v34  ;;  %v1045_v34 = vld [vmem:[%s13027_s13 + $0xc1] sm:$0xff]  ;;  %294 = vst.msk [vmem:[#allocation2 + $0x60] sm:$0xff] %vm281_vm0, %v12962_v46  ;;  %295 = vst.msk [vmem:[#allocation2 + $0x68] sm:$0xff] %vm281_vm0, %v12962_v46  ;;  %v1054_v56 = vld [vmem:[%s13027_s13 + $0x129] sm:$0xff] }
  0x27   : > { %11834 = vmatprep.subr.bf16.mxu0 %v12856_v42  ;;  %11793 = vmatpush3.bf16.msra.mxu1 %v12855_v39  ;;  %v1046_v39 = vld [vmem:[%s13027_s13 + $0xc9] sm:$0xff]  ;;  %296 = vst.msk [vmem:[#allocation2 + $0x70] sm:$0xff] %vm281_vm0, %v12962_v46  ;;  %297 = vst.msk [vmem:[#allocation2 + $0x78] sm:$0xff] %vm281_vm0, %v12962_v46  ;;  %v1053_v55 = vld [vmem:[%s13027_s13 + $0x121] sm:$0xff] }
  0x28   : > { %11794 = vmatprep.subr.bf16.mxu1 %v12857_v45  ;;  %v13250_v41 = vpack.c.bf16 %v1046_v39, %v1045_v34  ;;  %298 = vst.msk [vmem:[#allocation2 + $0x80] sm:$0xff] %vm281_vm0, %v12962_v46  ;;  %299 = vst.msk [vmem:[#allocation2 + $0x88] sm:$0xff] %vm281_vm0, %v12962_v46  ;;  %v13502_v58 = vpack.c.bf16 %v1054_v56, %v1053_v55  ;;  %v1055_v59 = vld [vmem:[%s13027_s13 + $0x139] sm:$0xff]  ;;  %v1057_v61 = vld [vmem:[%s13027_s13 + $0x151] sm:$0xff] }
  0x29   : > { %300 = vst.msk [vmem:[#allocation2 + $0x90] sm:$0xff] %vm281_vm0, %v12962_v46  ;;  %301 = vst.msk [vmem:[#allocation2 + $0x98] sm:$0xff] %vm281_vm0, %v12962_v46  ;;  %v1058_v1 = vld [vmem:[%s13027_s13 + $0x159] sm:$0xff]  ;;  %v1705_v4 = vld [vmem:[%s13027_s13 + $0x2] sm:$0xff] }
  0x2a   : > { %11835 = vmatpush3.bf16.msra.mxu0 %v12856_v42  ;;  %v13253_v42 = vld [vmem:[%s13027_s13 + $0xd9] sm:$0xff]  ;;  %302 = vst.msk [vmem:[#allocation2 + $0xa0] sm:$0xff] %vm281_vm0, %v12962_v46  ;;  %303 = vst.msk [vmem:[#allocation2 + $0xa8] sm:$0xff] %vm281_vm0, %v12962_v46  ;;  %v13518_v3 = vpack.c.bf16 %v1058_v1, %v1057_v61  ;;  %v1713_v19 = vld [vmem:[%s13027_s13 + $0x62] sm:$0xff] }
  0x2b   : > { %11795 = vmatpush3.bf16.msra.mxu1 %v12857_v45  ;;  %11908 = vmatprep.subr.bf16.mxu0 %v12858_v50  ;;  %v13266_v45 = vld [vmem:[%s13027_s13 + $0xf9] sm:$0xff]  ;;  %304 = vst.msk [vmem:[#allocation2 + $0xb0] sm:$0xff] %vm281_vm0, %v12962_v46  ;;  %305 = vst.msk [vmem:[#allocation2 + $0xb8] sm:$0xff] %vm281_vm0, %v12962_v46  ;;  %v13482_v47 = vpack.c.bf16 %v13256_v43, %v13253_v42  ;;  %v12872_v27 = vld [vmem:[%s16894_s5 + $0x48] sm:$0xff]  }
  0x2c   : > { %11765 = vmatmul.mubr.msk.bf16.gmra.mxu0 %vm281_vm0, %v13127_v51  ;;  %11868 = vmatprep.subr.bf16.mxu1 %v12861_v60  ;;  %306 = vst.msk [vmem:[#allocation2 + $0xc0] sm:$0xff] %vm281_vm0, %v12962_v46  ;;  %307 = vst.msk [vmem:[#allocation2 + $0xc8] sm:$0xff] %vm281_vm0, %v12962_v46  ;;  %v13486_v48 = vpack.c.bf16 %v13266_v45, %v13263_v44  ;;  %v1709_v11 = vld [vmem:[%s13027_s13 + $0x32] sm:$0xff]  ;;  %v1710_v12 = vld [vmem:[%s13027_s13 + $0x3a] sm:$0xff] }
  0x2d   : > { %11781 = vmatmul.mubr.msk.bf16.gmra.mxu1 %vm281_vm0, %v13129_v52  ;;  %11768 = vmatprep.mubr.msk.bf16.mxu0 %vm281_vm0, %v13131_v53  ;;  %308 = vst.msk [vmem:[#allocation2 + $0xd0] sm:$0xff] %vm281_vm0, %v12962_v46  ;;  %309 = vst.msk [vmem:[#allocation2 + $0xd8] sm:$0xff] %vm281_vm0, %v12962_v46  ;;  %v1712_v18 = vld [vmem:[%s13027_s13 + $0x52] sm:$0xff]  ;;  %v1716_v32 = vld [vmem:[%s13027_s13 + $0x82] sm:$0xff] }
  0x2e   : > { %11784 = vmatprep.mubr.msk.bf16.mxu1 %vm281_vm0, %v13133_v54  ;;  %310 = vst.msk [vmem:[#allocation2 + $0xe0] sm:$0xff] %vm281_vm0, %v12962_v46  ;;  %311 = vst.msk [vmem:[#allocation2 + $0xe8] sm:$0xff] %vm281_vm0, %v12962_v46  ;;  %v1717_v33 = vld [vmem:[%s13027_s13 + $0x92] sm:$0xff]  ;;  %v1718_v34 = vld [vmem:[%s13027_s13 + $0x9a] sm:$0xff] }
  0x2f   : > { %312 = vst.msk [vmem:[#allocation2 + $0xf0] sm:$0xff] %vm281_vm0, %v12962_v46  ;;  %313 = vst.msk [vmem:[#allocation2 + $0xf8] sm:$0xff] %vm281_vm0, %v12962_v46  ;;  %v13603_v39 = vld [vmem:[%s16890_s1 + $0x98] sm:$0xff]   ;;  %v13607_v42 = vpack.c.bf16 %v1718_v34, %v1717_v33  ;;  %v1719_v43 = vld [vmem:[%s13027_s13 + $0xaa] sm:$0xff] }
  0x30   : > { %6439 = vst.msk [vmem:[#allocation3] sm:$0xff] %vm281_vm0, %v12962_v46  ;;  %6440 = vst.msk [vmem:[#allocation3 + $0x8] sm:$0xff] %vm281_vm0, %v12962_v46  ;;  %v1720_v44 = vld [vmem:[%s13027_s13 + $0xb2] sm:$0xff]  ;;  %v1721_v45 = vld [vmem:[%s13027_s13 + $0xc2] sm:$0xff] }
  0x31   : > { %6441 = vst.msk [vmem:[#allocation3 + $0x10] sm:$0xff] %vm281_vm0, %v12962_v46  ;;  %6442 = vst.msk [vmem:[#allocation3 + $0x18] sm:$0xff] %vm281_vm0, %v12962_v46  ;;  %v1725_v55 = vld [vmem:[%s13027_s13 + $0xf2] sm:$0xff]  ;;  %v1726_v56 = vld [vmem:[%s13027_s13 + $0xfa] sm:$0xff] }
  0x32   : > { %6443 = vst.msk [vmem:[#allocation3 + $0x20] sm:$0xff] %vm281_vm0, %v12962_v46  ;;  %6444 = vst.msk [vmem:[#allocation3 + $0x28] sm:$0xff] %vm281_vm0, %v12962_v46  ;;  %v1729_v61 = vld [vmem:[%s13027_s13 + $0x122] sm:$0xff]  ;;  %v1730_v1 = vld [vmem:[%s13027_s13 + $0x12a] sm:$0xff] }
  0x33   : > { %6445 = vst.msk [vmem:[#allocation3 + $0x30] sm:$0xff] %vm281_vm0, %v12962_v46  ;;  %6446 = vst.msk [vmem:[#allocation3 + $0x38] sm:$0xff] %vm281_vm0, %v12962_v46  ;;  %v10456_v33 = vld [vmem:[%s13027_s13 + $0x128] sm:$0xff] }
  0x34   : > { %11769 = vmatmul.mubr.msk.bf16.gmra.mxu0 %vm281_vm0, %v13152_v62  ;;  %6447 = vst.msk [vmem:[#allocation3 + $0x40] sm:$0xff] %vm281_vm0, %v12962_v46  ;;  %6448 = vst.msk [vmem:[#allocation3 + $0x48] sm:$0xff] %vm281_vm0, %v12962_v46 }
  0x35   : > { %11785 = vmatmul.mubr.msk.bf16.gmra.mxu1 %vm281_vm0, %v13154_v63  ;;  %11836 = vmatprep.mubr.msk.bf16.mxu0 %vm281_vm0, %v13156_v0  ;;  %6449 = vst.msk [vmem:[#allocation3 + $0x50] sm:$0xff] %vm281_vm0, %v12962_v46  ;;  %6450 = vst.msk [vmem:[#allocation3 + $0x58] sm:$0xff] %vm281_vm0, %v12962_v46 }
  0x36   : > { %11796 = vmatprep.mubr.msk.bf16.mxu1 %vm281_vm0, %v13035_v7  ;;  %v12863_v7 = vld [vmem:[%s16894_s5 + $0x30] sm:$0xff]   ;;  %6451 = vst.msk [vmem:[#allocation3 + $0x60] sm:$0xff] %vm281_vm0, %v12962_v46  ;;  %6452 = vst.msk [vmem:[#allocation3 + $0x68] sm:$0xff] %vm281_vm0, %v12962_v46 }
  0x37   : > { %6453 = vst.msk [vmem:[#allocation3 + $0x70] sm:$0xff] %vm281_vm0, %v12962_v46  ;;  %6454 = vst.msk [vmem:[#allocation3 + $0x78] sm:$0xff] %vm281_vm0, %v12962_v46 }
  0x38   : > { %6455 = vst.msk [vmem:[#allocation3 + $0x80] sm:$0xff] %vm281_vm0, %v12962_v46  ;;  %6456 = vst.msk [vmem:[#allocation3 + $0x88] sm:$0xff] %vm281_vm0, %v12962_v46 }
  0x39   : > { %6457 = vst.msk [vmem:[#allocation3 + $0x90] sm:$0xff] %vm281_vm0, %v12962_v46  ;;  %6458 = vst.msk [vmem:[#allocation3 + $0x98] sm:$0xff] %vm281_vm0, %v12962_v46 }
  0x3a   : > { %6459 = vst.msk [vmem:[#allocation3 + $0xa0] sm:$0xff] %vm281_vm0, %v12962_v46  ;;  %6460 = vst.msk [vmem:[#allocation3 + $0xa8] sm:$0xff] %vm281_vm0, %v12962_v46 }
  0x3b   : > { %6461 = vst.msk [vmem:[#allocation3 + $0xb0] sm:$0xff] %vm281_vm0, %v12962_v46  ;;  %6462 = vst.msk [vmem:[#allocation3 + $0xb8] sm:$0xff] %vm281_vm0, %v12962_v46 }
  0x3c   : > { %11837 = vmatmul.mubr.msk.bf16.vlgmr.msra.gmra.mxu0 %vm281_vm0, %v13170_v5  ;;  %6463 = vst.msk [vmem:[#allocation3 + $0xc0] sm:$0xff] %vm281_vm0, %v12962_v46  ;;  %6464 = vst.msk [vmem:[#allocation3 + $0xc8] sm:$0xff] %vm281_vm0, %v12962_v46 }
  0x3d   : > { %11797 = vmatmul.mubr.msk.bf16.vlgmr.msra.gmra.mxu1 %vm281_vm0, %v13058_v20  ;;  %11909 = vmatpush3.bf16.msra.mxu0 %v12858_v50  ;;  %6465 = vst.msk [vmem:[#allocation3 + $0xd0] sm:$0xff] %vm281_vm0, %v12962_v46  ;;  %6466 = vst.msk [vmem:[#allocation3 + $0xd8] sm:$0xff] %vm281_vm0, %v12962_v46  ;;  %v1052_v50 = vld [vmem:[%s13027_s13 + $0x111] sm:$0xff] }
  0x3e   : > { %11800 = vmatprep.mubr.msk.bf16.mxu1 %vm281_vm0, %v13062_v22  ;;  %11840 = vmatprep.mubr.msk.bf16.mxu0 %vm281_vm0, %v13172_v6  ;;  %6467 = vst.msk [vmem:[#allocation3 + $0xe0] sm:$0xff] %vm281_vm0, %v12962_v46  ;;  %6468 = vst.msk [vmem:[#allocation3 + $0xe8] sm:$0xff] %vm281_vm0, %v12962_v46  ;;  %v13500_v57 = vpack.c.bf16 %v1052_v50, %v1051_v49  ;;  %v13628_v49 = vpack.c.bf16 %v1720_v44, %v1719_v43 }
  0x3f   : > { %11910 = vmatprep.subr.bf16.mxu0 %v12859_v8  ;;  %11869 = vmatpush3.bf16.msra.mxu1 %v12861_v60  ;;  %6469 = vst.msk [vmem:[#allocation3 + $0xf0] sm:$0xff] %vm281_vm0, %v12962_v46  ;;  %6470 = vst.msk [vmem:[#allocation3 + $0xf8] sm:$0xff] %vm281_vm0, %v12962_v46  ;;  %v1056_v60 = vld [vmem:[%s13027_s13 + $0x141] sm:$0xff] }
  0x40   : > { %11870 = vmatprep.subr.bf16.mxu1 %v12863_v7  ;;  %6471 = vst.msk [vmem:[#allocation3 + $0x100] sm:$0xff] %vm281_vm0, %v12962_v46  ;;  %6472 = vst.msk [vmem:[#allocation3 + $0x108] sm:$0xff] %vm281_vm0, %v12962_v46  ;;  %v13516_v2 = vpack.c.bf16 %v1056_v60, %v1055_v59  ;;  %v13646_v60 = vpack.c.bf16 %v1726_v56, %v1725_v55 }
  0x41   : > { %11911 = vmatpush3.bf16.msra.mxu0 %v12859_v8  ;;  %6473 = vst.msk [vmem:[#allocation3 + $0x110] sm:$0xff] %vm281_vm0, %v12962_v46  ;;  %6474 = vst.msk [vmem:[#allocation3 + $0x118] sm:$0xff] %vm281_vm0, %v12962_v46  ;;  %v1706_v8 = vld [vmem:[%s13027_s13 + $0xa] sm:$0xff] }
  0x42   : > { %11912 = vmatprep.subr.bf16.mxu0 %v12860_v14  ;;  %6475 = vst.msk [vmem:[#allocation3 + $0x120] sm:$0xff] %vm281_vm0, %v12962_v46  ;;  %6476 = vst.msk [vmem:[#allocation3 + $0x128] sm:$0xff] %vm281_vm0, %v12962_v46  ;;  %v13534_v10 = vpack.c.bf16 %v1706_v8, %v1705_v4  ;;  %v1733_v4 = vld [vmem:[%s13027_s13 + $0x152] sm:$0xff]  ;;  %v1734_v8 = vld [vmem:[%s13027_s13 + $0x15a] sm:$0xff] }
  0x43   : > { %11871 = vmatpush3.bf16.msra.mxu1 %v12863_v7  ;;  %6477 = vst.msk [vmem:[#allocation3 + $0x130] sm:$0xff] %vm281_vm0, %v12962_v46  ;;  %6478 = vst.msk [vmem:[#allocation3 + $0x138] sm:$0xff] %vm281_vm0, %v12962_v46 }
  0x44   : > { %11841 = vmatmul.mubr.msk.bf16.gmra.mxu0 %vm281_vm0, %v13195_v15  ;;  %11872 = vmatprep.subr.bf16.mxu1 %v12864_v17  ;;  %6479 = vst.msk [vmem:[#allocation3 + $0x140] sm:$0xff] %vm281_vm0, %v12962_v46  ;;  %6480 = vst.msk [vmem:[#allocation3 + $0x148] sm:$0xff] %vm281_vm0, %v12962_v46 }
  0x45   : > { %11801 = vmatmul.mubr.msk.bf16.gmra.mxu1 %vm281_vm0, %v13091_v35  ;;  %11844 = vmatprep.mubr.msk.bf16.mxu0 %vm281_vm0, %v13197_v16  ;;  %6481 = vst.msk [vmem:[#allocation3 + $0x150] sm:$0xff] %vm281_vm0, %v12962_v46  ;;  %6482 = vst.msk [vmem:[#allocation3 + $0x158] sm:$0xff] %vm281_vm0, %v12962_v46 }
  0x46   : > { %11804 = vmatprep.mubr.msk.bf16.mxu1 %vm281_vm0, %v13095_v37  ;;  %11913 = vmatpush3.bf16.msra.mxu0 %v12860_v14  ;;  %6483 = vst.msk [vmem:[#allocation3 + $0x160] sm:$0xff] %vm281_vm0, %v12962_v46  ;;  %6484 = vst.msk [vmem:[#allocation3 + $0x168] sm:$0xff] %vm281_vm0, %v12962_v46  ;;  %v13550_v14 = vpack.c.bf16 %v1710_v12, %v1709_v11  ;;  %v12878_v12 = vld [vmem:[%s16890_s1 + $0x80] sm:$0xff]  }
  0x47   : > { %11914 = vmatprep.subr.bf16.mxu0 %v12862_v24  ;;  %11873 = vmatpush3.bf16.msra.mxu1 %v12864_v17  ;;  %6485 = vst.msk [vmem:[#allocation3 + $0x170] sm:$0xff] %vm281_vm0, %v12962_v46  ;;  %6486 = vst.msk [vmem:[#allocation3 + $0x178] sm:$0xff] %vm281_vm0, %v12962_v46  ;;  %v1711_v17 = vld [vmem:[%s13027_s13 + $0x4a] sm:$0xff] }
  0x48   : > { %11874 = vmatprep.subr.bf16.mxu1 %v12865_v26  ;;  %6487 = vst.msk [vmem:[#allocation3 + $0x180] sm:$0xff] %vm281_vm0, %v12962_v46  ;;  %6488 = vst.msk [vmem:[#allocation3 + $0x188] sm:$0xff] %vm281_vm0, %v12962_v46  ;;  %v13575_v25 = vpack.c.bf16 %v1712_v18, %v1711_v17  ;;  %v10453_v17 = vld [vmem:[%s13027_s13 + $0x108] sm:$0xff] }
  0x49   : > { %6489 = vst.msk [vmem:[#allocation3 + $0x190] sm:$0xff] %vm281_vm0, %v12962_v46  ;;  %6490 = vst.msk [vmem:[#allocation3 + $0x198] sm:$0xff] %vm281_vm0, %v12962_v46 }
  0x4a   : > { %11915 = vmatpush3.bf16.msra.mxu0 %v12862_v24  ;;  %6491 = vst.msk [vmem:[#allocation3 + $0x1a0] sm:$0xff] %vm281_vm0, %v12962_v46  ;;  %6492 = vst.msk [vmem:[#allocation3 + $0x1a8] sm:$0xff] %vm281_vm0, %v12962_v46  ;;  %v1714_v24 = vld [vmem:[%s13027_s13 + $0x6a] sm:$0xff] }
  0x4b   : > { %11875 = vmatpush3.bf16.msra.mxu1 %v12865_v26  ;;  %11988 = vmatprep.subr.bf16.mxu0 %v13223_v28  ;;  %6493 = vst.msk [vmem:[#allocation3 + $0x1b0] sm:$0xff] %vm281_vm0, %v12962_v46  ;;  %6494 = vst.msk [vmem:[#allocation3 + $0x1b8] sm:$0xff] %vm281_vm0, %v12962_v46  ;;  %v12870_v26 = vld [vmem:[%s16890_s1 + $0x60] sm:$0xff]  }
  0x4c   : > { %11845 = vmatmul.mubr.msk.bf16.gmra.mxu0 %vm281_vm0, %v13225_v29  ;;  %11948 = vmatprep.subr.bf16.mxu1 %v13230_v30  ;;  %6495 = vst.msk [vmem:[#allocation3 + $0x1c0] sm:$0xff] %vm281_vm0, %v12962_v46  ;;  %6496 = vst.msk [vmem:[#allocation3 + $0x1c8] sm:$0xff] %vm281_vm0, %v12962_v46 }
  0x4d   : > { %11805 = vmatmul.mubr.msk.bf16.gmra.mxu1 %vm281_vm0, %v13127_v51  ;;  %11848 = vmatprep.mubr.msk.bf16.mxu0 %vm281_vm0, %v13232_v31  ;;  %6497 = vst.msk [vmem:[#allocation3 + $0x1d0] sm:$0xff] %vm281_vm0, %v12962_v46  ;;  %6498 = vst.msk [vmem:[#allocation3 + $0x1d8] sm:$0xff] %vm281_vm0, %v12962_v46 }
  0x4e   : > { %11808 = vmatprep.mubr.msk.bf16.mxu1 %vm281_vm0, %v13131_v53  ;;  %6499 = vst.msk [vmem:[#allocation3 + $0x1e0] sm:$0xff] %vm281_vm0, %v12962_v46  ;;  %6500 = vst.msk [vmem:[#allocation3 + $0x1e8] sm:$0xff] %vm281_vm0, %v12962_v46 }
  0x4f   : > { %6501 = vst.msk [vmem:[#allocation3 + $0x1f0] sm:$0xff] %vm281_vm0, %v12962_v46  ;;  %6502 = vst.msk [vmem:[#allocation3 + $0x1f8] sm:$0xff] %vm281_vm0, %v12962_v46 }
  0x50   : > { %6503 = vst.msk [vmem:[#allocation3 + $0x200] sm:$0xff] %vm281_vm0, %v12962_v46  ;;  %6504 = vst.msk [vmem:[#allocation3 + $0x208] sm:$0xff] %vm281_vm0, %v12962_v46 }
  0x51   : > { %6505 = vst.msk [vmem:[#allocation3 + $0x210] sm:$0xff] %vm281_vm0, %v12962_v46  ;;  %6506 = vst.msk [vmem:[#allocation3 + $0x218] sm:$0xff] %vm281_vm0, %v12962_v46 }
  0x52   : > { %6507 = vst.msk [vmem:[#allocation3 + $0x220] sm:$0xff] %vm281_vm0, %v12962_v46  ;;  %6508 = vst.msk [vmem:[#allocation3 + $0x228] sm:$0xff] %vm281_vm0, %v12962_v46 }
  0x53   : > { %6509 = vst.msk [vmem:[#allocation3 + $0x230] sm:$0xff] %vm281_vm0, %v12962_v46  ;;  %6510 = vst.msk [vmem:[#allocation3 + $0x238] sm:$0xff] %vm281_vm0, %v12962_v46  ;;  %v1722_v46 = vld [vmem:[%s13027_s13 + $0xca] sm:$0xff] }
  0x54   : > { %11849 = vmatmul.mubr.msk.bf16.gmra.mxu0 %vm281_vm0, %v13248_v40  ;;  %v13630_v50 = vpack.c.bf16 %v1722_v46, %v1721_v45 }
  0x55   : > { %11809 = vmatmul.mubr.msk.bf16.gmra.mxu1 %vm281_vm0, %v13152_v62  ;;  %11852 = vmatprep.mubr.msk.bf16.mxu0 %vm281_vm0, %v13250_v41 }
  0x56   : > { %11812 = vmatprep.mubr.msk.bf16.mxu1 %vm281_vm0, %v13038_v9 }
  0x5c   : > { %11853 = vmatmul.mubr.msk.bf16.gmra.mxu0 %vm281_vm0, %v13482_v47 }
  0x5d   : > { %11813 = vmatmul.mubr.msk.bf16.gmra.mxu1 %vm281_vm0, %v13060_v21  ;;  %11856 = vmatprep.mubr.msk.bf16.mxu0 %vm281_vm0, %v13486_v48 }
  0x5e   : > { %11816 = vmatprep.mubr.msk.bf16.mxu1 %vm281_vm0, %v13064_v23 }
  0x64   : > { %11857 = vmatmul.mubr.msk.bf16.gmra.mxu0 %vm281_vm0, %v13500_v57 }
  0x65   : > { %11817 = vmatmul.mubr.msk.bf16.gmra.mxu1 %vm281_vm0, %v13093_v36  ;;  %11860 = vmatprep.mubr.msk.bf16.mxu0 %vm281_vm0, %v13502_v58  ;;  %v1059_v36 = vld [vmem:[%s13027_s13 + $0x169] sm:$0xff] }
  0x66   : > { %11820 = vmatprep.mubr.msk.bf16.mxu1 %vm281_vm0, %v13097_v38  ;;  %v1060_v38 = vld [vmem:[%s13027_s13 + $0x171] sm:$0xff] }
  0x67   : > { %v13532_v7 = vpack.c.bf16 %v1060_v38, %v1059_v36  ;;  %v13662_v38 = vpack.c.bf16 %v1730_v1, %v1729_v61 }
  0x6c   : > { %11861 = vmatmul.mubr.msk.bf16.gmra.mxu0 %vm281_vm0, %v13516_v2 }
  0x6d   : > { %11821 = vmatmul.mubr.msk.bf16.gmra.mxu1 %vm281_vm0, %v13129_v52  ;;  %11864 = vmatprep.mubr.msk.bf16.mxu0 %vm281_vm0, %v13518_v3  ;;  %v1707_v52 = vld [vmem:[%s13027_s13 + $0x1a] sm:$0xff] }
  0x6e   : > { %11824 = vmatprep.mubr.msk.bf16.mxu1 %vm281_vm0, %v13133_v54  ;;  %v1708_v54 = vld [vmem:[%s13027_s13 + $0x22] sm:$0xff] }
  0x6f   : > { %v13548_v13 = vpack.c.bf16 %v1708_v54, %v1707_v52  ;;  %v13678_v54 = vpack.c.bf16 %v1734_v8, %v1733_v4  ;;  %v407_v4 = vld [vmem:[#allocation2 + $0x20] sm:$0xff] }
  0x70   : > { %v423_v8 = vld [vmem:[#allocation2 + $0xa0] sm:$0xff] }
  0x74   : > { %11865 = vmatmul.mubr.msk.bf16.gmra.mxu0 %vm281_vm0, %v13532_v7 }
  0x75   : > { %11825 = vmatmul.mubr.msk.bf16.gmra.mxu1 %vm281_vm0, %v13154_v63  ;;  %11916 = vmatprep.mubr.msk.bf16.mxu0 %vm281_vm0, %v13534_v10  ;;  %v12867_v63 = vld [vmem:[%s16890_s1 + $0x70] sm:$0xff]  }
  0x76   : > { %11876 = vmatprep.mubr.msk.bf16.mxu1 %vm281_vm0, %v13156_v0  ;;  %v12871_v0 = vld [vmem:[%s16894_s5 + $0x50] sm:$0xff]  }
  0x7c   : > { %11917 = vmatmul.mubr.msk.bf16.vlgmr.msra.gmra.mxu0 %vm281_vm0, %v13548_v13 }
  0x7d   : > { %11877 = vmatmul.mubr.msk.bf16.vlgmr.msra.gmra.mxu1 %vm281_vm0, %v13170_v5  ;;  %11989 = vmatpush3.bf16.msra.mxu0 %v13223_v28  ;;  %v12868_v5 = vld [vmem:[%s16890_s1 + $0x68] sm:$0xff]   ;;  %v12873_v28 = vld [vmem:[%s16894_s5 + $0x40] sm:$0xff]  }
  0x7e   : > { %11880 = vmatprep.mubr.msk.bf16.mxu1 %vm281_vm0, %v13172_v6  ;;  %11920 = vmatprep.mubr.msk.bf16.mxu0 %vm281_vm0, %v13550_v14  ;;  %v13577_v6 = vpack.c.bf16 %v1714_v24, %v1713_v19  ;;  %v405_v19 = vld [vmem:[#allocation2 + $0x10] sm:$0xff] }
  0x7f   : > { %11990 = vmatprep.subr.bf16.mxu0 %v12867_v63  ;;  %11949 = vmatpush3.bf16.msra.mxu1 %v13230_v30  ;;  %v1715_v30 = vld [vmem:[%s13027_s13 + $0x7a] sm:$0xff]  ;;  %v421_v24 = vld [vmem:[#allocation2 + $0x90] sm:$0xff] }
  0x80   : > { %11950 = vmatprep.subr.bf16.mxu1 %v12871_v0 }
  0x81   : > { %11991 = vmatpush3.bf16.msra.mxu0 %v12867_v63  ;;  %v13744_v63 = vld [vmem:[%s16894_s5 + $0x98] sm:$0xff]  }
  0x82   : > { %11992 = vmatprep.subr.bf16.mxu0 %v12868_v5 }
  0x83   : > { %11951 = vmatpush3.bf16.msra.mxu1 %v12871_v0  ;;  %v10454_v0 = vld [vmem:[%s13027_s13 + $0x110] sm:$0xff] }
  0x84   : > { %11921 = vmatmul.mubr.msk.bf16.gmra.mxu0 %vm281_vm0, %v13575_v25  ;;  %11952 = vmatprep.subr.bf16.mxu1 %v12872_v27  ;;  %v13766_v18 = vpack.c.bf16 %v10454_v0, %v10453_v17  ;;  %v10462_v17 = vld [vmem:[%s13027_s13 + $0x170] sm:$0xff] }
  0x85   : > { %11881 = vmatmul.mubr.msk.bf16.gmra.mxu1 %vm281_vm0, %v13195_v15  ;;  %11924 = vmatprep.mubr.msk.bf16.mxu0 %vm281_vm0, %v13577_v6  ;;  %v13605_v15 = vpack.c.bf16 %v1716_v32, %v1715_v30  ;;  %v406_v30 = vld [vmem:[#allocation2 + $0x18] sm:$0xff]  ;;  %v10455_v32 = vld [vmem:[%s13027_s13 + $0x120] sm:$0xff] }
  0x86   : > { %11884 = vmatprep.mubr.msk.bf16.mxu1 %vm281_vm0, %v13197_v16  ;;  %11993 = vmatpush3.bf16.msra.mxu0 %v12868_v5  ;;  %v13612_v16 = vld [vmem:[%s16894_s5 + $0x78] sm:$0xff]  }
  0x87   : > { %11994 = vmatprep.subr.bf16.mxu0 %v12870_v26  ;;  %11953 = vmatpush3.bf16.msra.mxu1 %v12872_v27 }
  0x88   : > { %11954 = vmatprep.subr.bf16.mxu1 %v12873_v28 }
  0x8a   : > { %11995 = vmatpush3.bf16.msra.mxu0 %v12870_v26  ;;  %v419_v26 = vld [vmem:[#allocation2 + $0x80] sm:$0xff] }
  0x8b   : > { %11955 = vmatpush3.bf16.msra.mxu1 %v12873_v28  ;;  %12068 = vmatprep.subr.bf16.mxu0 %v13603_v39 }
  0x8c   : > { %11925 = vmatmul.mubr.msk.bf16.gmra.mxu0 %vm281_vm0, %v13605_v15  ;;  %12028 = vmatprep.subr.bf16.mxu1 %v13612_v16 }
  0x8d   : > { %11885 = vmatmul.mubr.msk.bf16.gmra.mxu1 %vm281_vm0, %v13225_v29  ;;  %11928 = vmatprep.mubr.msk.bf16.mxu0 %vm281_vm0, %v13607_v42  ;;  %v1723_v29 = vld [vmem:[%s13027_s13 + $0xda] sm:$0xff] }
  0x8e   : > { %11888 = vmatprep.mubr.msk.bf16.mxu1 %vm281_vm0, %v13232_v31  ;;  %v1724_v31 = vld [vmem:[%s13027_s13 + $0xe2] sm:$0xff] }
  0x8f   : > { %v13644_v59 = vpack.c.bf16 %v1724_v31, %v1723_v29  ;;  %v13782_v29 = vpack.c.bf16 %v10456_v33, %v10455_v32  ;;  %v413_v33 = vld [vmem:[#allocation2 + $0x50] sm:$0xff] }
  0x94   : > { %11929 = vmatmul.mubr.msk.bf16.gmra.mxu0 %vm281_vm0, %v13628_v49 }
  0x95   : > { %11889 = vmatmul.mubr.msk.bf16.gmra.mxu1 %vm281_vm0, %v13248_v40  ;;  %11932 = vmatprep.mubr.msk.bf16.mxu0 %vm281_vm0, %v13630_v50  ;;  %v1727_v40 = vld [vmem:[%s13027_s13 + $0x10a] sm:$0xff] }
  0x96   : > { %11892 = vmatprep.mubr.msk.bf16.mxu1 %vm281_vm0, %v13250_v41  ;;  %v1728_v41 = vld [vmem:[%s13027_s13 + $0x112] sm:$0xff] }
  0x97   : > { %v13660_v36 = vpack.c.bf16 %v1728_v41, %v1727_v40  ;;  %v409_v40 = vld [vmem:[#allocation2 + $0x30] sm:$0xff] }
  0x98   : > { %v425_v41 = vld [vmem:[#allocation2 + $0xb0] sm:$0xff] }
  0x9c   : > { %11933 = vmatmul.mubr.msk.bf16.gmra.mxu0 %vm281_vm0, %v13644_v59 }
  0x9d   : > { %11893 = vmatmul.mubr.msk.bf16.gmra.mxu1 %vm281_vm0, %v13482_v47  ;;  %11936 = vmatprep.mubr.msk.bf16.mxu0 %vm281_vm0, %v13646_v60  ;;  %v1731_v47 = vld [vmem:[%s13027_s13 + $0x13a] sm:$0xff] }
  0x9e   : > { %11896 = vmatprep.mubr.msk.bf16.mxu1 %vm281_vm0, %v13486_v48  ;;  %v1732_v48 = vld [vmem:[%s13027_s13 + $0x142] sm:$0xff] }
  0x9f   : > { %v13676_v52 = vpack.c.bf16 %v1732_v48, %v1731_v47 }
  0xa4   : > { %11937 = vmatmul.mubr.msk.bf16.gmra.mxu0 %vm281_vm0, %v13660_v36 }
  0xa5   : > { %11897 = vmatmul.mubr.msk.bf16.gmra.mxu1 %vm281_vm0, %v13500_v57  ;;  %11940 = vmatprep.mubr.msk.bf16.mxu0 %vm281_vm0, %v13662_v38  ;;  %v1735_v57 = vld [vmem:[%s13027_s13 + $0x16a] sm:$0xff] }
  0xa6   : > { %11900 = vmatprep.mubr.msk.bf16.mxu1 %vm281_vm0, %v13502_v58  ;;  %v1736_v58 = vld [vmem:[%s13027_s13 + $0x172] sm:$0xff] }
  0xa7   : > { %v13690_v11 = vpack.c.bf16 %v1736_v58, %v1735_v57 }
  0xac   : > { %11941 = vmatmul.mubr.msk.bf16.gmra.mxu0 %vm281_vm0, %v13676_v52 }
  0xad   : > { %11901 = vmatmul.mubr.msk.bf16.gmra.mxu1 %vm281_vm0, %v13516_v2  ;;  %11944 = vmatprep.mubr.msk.bf16.mxu0 %vm281_vm0, %v13678_v54  ;;  %v12875_v2 = vld [vmem:[%s16890_s1 + $0x90] sm:$0xff]  }
  0xae   : > { %11904 = vmatprep.mubr.msk.bf16.mxu1 %vm281_vm0, %v13518_v3  ;;  %v12879_v3 = vld [vmem:[%s16894_s5 + $0x70] sm:$0xff]  }
  0xb4   : > { %11945 = vmatmul.mubr.msk.bf16.gmra.mxu0 %vm281_vm0, %v13690_v11 }
  0xb5   : > { %11905 = vmatmul.mubr.msk.bf16.gmra.mxu1 %vm281_vm0, %v13532_v7  ;;  %11996 = vmatprep.mubr.msk.bf16.mxu0 %vm281_vm0, %v13058_v20  ;;  %v12876_v7 = vld [vmem:[%s16890_s1 + $0x88] sm:$0xff]  }
  0xb6   : > { %11956 = vmatprep.mubr.msk.bf16.mxu1 %vm281_vm0, %v13534_v10  ;;  %v12880_v10 = vld [vmem:[%s16894_s5 + $0x68] sm:$0xff]  }
  0xbc   : > { %11997 = vmatmul.mubr.msk.bf16.vlgmr.msra.gmra.mxu0 %vm281_vm0, %v13062_v22 }
  0xbd   : > { %11957 = vmatmul.mubr.msk.bf16.vlgmr.msra.gmra.mxu1 %vm281_vm0, %v13548_v13  ;;  %12069 = vmatpush3.bf16.msra.mxu0 %v13603_v39  ;;  %v12881_v13 = vld [vmem:[%s16894_s5 + $0x60] sm:$0xff]  }
  0xbe   : > { %11960 = vmatprep.mubr.msk.bf16.mxu1 %vm281_vm0, %v13550_v14  ;;  %12000 = vmatprep.mubr.msk.bf16.mxu0 %vm281_vm0, %v13091_v35  ;;  %v13739_v14 = vld [vmem:[%s16890_s1 + $0xb8] sm:$0xff]  }
  0xbf   : > { %12070 = vmatprep.subr.bf16.mxu0 %v12875_v2  ;;  %12029 = vmatpush3.bf16.msra.mxu1 %v13612_v16  ;;  %v10458_v16 = vld [vmem:[%s13027_s13 + $0x140] sm:$0xff] }
  0xc0   : > { %12030 = vmatprep.subr.bf16.mxu1 %v12879_v3 }
  0xc1   : > { %12071 = vmatpush3.bf16.msra.mxu0 %v12875_v2  ;;  %v410_v2 = vld [vmem:[#allocation2 + $0x38] sm:$0xff] }
  0xc2   : > { %12072 = vmatprep.subr.bf16.mxu0 %v12876_v7 }
  0xc3   : > { %12031 = vmatpush3.bf16.msra.mxu1 %v12879_v3  ;;  %v10460_v3 = vld [vmem:[%s13027_s13 + $0x158] sm:$0xff] }
  0xc4   : > { %12001 = vmatmul.mubr.msk.bf16.gmra.mxu0 %vm281_vm0, %v13095_v37  ;;  %12032 = vmatprep.subr.bf16.mxu1 %v12880_v10 }
  0xc5   : > { %11961 = vmatmul.mubr.msk.bf16.gmra.mxu1 %vm281_vm0, %v13575_v25  ;;  %12004 = vmatprep.mubr.msk.bf16.mxu0 %vm281_vm0, %v13127_v51 }
  0xc6   : > { %11964 = vmatprep.mubr.msk.bf16.mxu1 %vm281_vm0, %v13577_v6  ;;  %12073 = vmatpush3.bf16.msra.mxu0 %v12876_v7  ;;  %v403_v6 = vld [vmem:[#allocation2] sm:$0xff] }
  0xc7   : > { %12074 = vmatprep.subr.bf16.mxu0 %v12878_v12  ;;  %12033 = vmatpush3.bf16.msra.mxu1 %v12880_v10 }
  0xc8   : > { %12034 = vmatprep.subr.bf16.mxu1 %v12881_v13 }
  0xca   : > { %12075 = vmatpush3.bf16.msra.mxu0 %v12878_v12  ;;  %v426_v12 = vld [vmem:[#allocation2 + $0xb8] sm:$0xff] }
  0xcb   : > { %12035 = vmatpush3.bf16.msra.mxu1 %v12881_v13  ;;  %12148 = vmatprep.subr.bf16.mxu0 %v13739_v14  ;;  %v10461_v13 = vld [vmem:[%s13027_s13 + $0x168] sm:$0xff] }
  0xcc   : > { %12005 = vmatmul.mubr.msk.bf16.gmra.mxu0 %vm281_vm0, %v13131_v53  ;;  %12108 = vmatprep.subr.bf16.mxu1 %v13744_v63 }
  0xcd   : > { %11965 = vmatmul.mubr.msk.bf16.gmra.mxu1 %vm281_vm0, %v13605_v15  ;;  %12008 = vmatprep.mubr.msk.bf16.mxu0 %vm281_vm0, %v13152_v62  ;;  %v422_v15 = vld [vmem:[#allocation2 + $0x98] sm:$0xff] }
  0xce   : > { %11968 = vmatprep.mubr.msk.bf16.mxu1 %vm281_vm0, %v13607_v42  ;;  %v10457_v42 = vld [vmem:[%s13027_s13 + $0x138] sm:$0xff] }
  0xcf   : > { %v13786_v56 = vpack.c.bf16 %v10458_v16, %v10457_v42 }
  0xd4   : > { %12009 = vmatmul.mubr.msk.bf16.gmra.mxu0 %vm281_vm0, %v13038_v9 }
  0xd5   : > { %11969 = vmatmul.mubr.msk.bf16.gmra.mxu1 %vm281_vm0, %v13628_v49  ;;  %12012 = vmatprep.mubr.msk.bf16.mxu0 %vm281_vm0, %v13060_v21  ;;  %v404_v49 = vld [vmem:[#allocation2 + $0x8] sm:$0xff] }
  0xd6   : > { %11972 = vmatprep.mubr.msk.bf16.mxu1 %vm281_vm0, %v13630_v50  ;;  %v420_v50 = vld [vmem:[#allocation2 + $0x88] sm:$0xff] }
  0xdc   : > { %v11758_v5 = vpop.f32.mrf.mxu0  ;;  %12013 = vmatmul.mubr.msk.bf16.gmra.mxu0 %vm281_vm0, %v13064_v23 }
  0xdd   : > { %v11774_v25 = vpop.f32.mrf.mxu1  ;;  %11973 = vmatmul.mubr.msk.bf16.gmra.mxu1 %vm281_vm0, %v13644_v59  ;;  %v678_v27 = vadd.f32 %v11758_v5, %v405_v19  ;;  %12016 = vmatprep.mubr.msk.bf16.mxu0 %vm281_vm0, %v13766_v18 }
  0xde   : > { %v694_v28 = vadd.f32 %v11774_v25, %v421_v24  ;;  %11976 = vmatprep.mubr.msk.bf16.mxu1 %vm281_vm0, %v13646_v60  ;;  %v549_v34 = vpop.f32.mrf.mxu0  ;;  %v408_v25 = vld [vmem:[#allocation2 + $0x28] sm:$0xff] }
  0xdf   : > { %v613_v39 = vpop.f32.mrf.mxu1  ;;  %710 = vst.msk [vmem:[#allocation2 + $0x10] sm:$0xff] %vm281_vm0, %v678_v27  ;;  %v676_v43 = vadd.f32 %v549_v34, %v403_v6  ;;  %v429_v34 = vld [vmem:[#allocation2 + $0xd0] sm:$0xff] }
  0xe0   : > { %726 = vst.msk [vmem:[#allocation2 + $0x90] sm:$0xff] %vm281_vm0, %v694_v28  ;;  %v692_v44 = vadd.f32 %v613_v39, %v419_v26  ;;  %v11759_v45 = vpop.f32.mrf.mxu0  ;;  %v13810_v28 = vpack.c.bf16 %v10462_v17, %v10461_v13 }
  0xe1   : > { %v11775_v46 = vpop.f32.mrf.mxu1  ;;  %708 = vst.msk [vmem:[#allocation2] sm:$0xff] %vm281_vm0, %v676_v43  ;;  %v679_v31 = vadd.f32 %v11759_v45, %v406_v30  ;;  %v411_v43 = vld [vmem:[#allocation2 + $0x40] sm:$0xff] }
  0xe2   : > { %724 = vst.msk [vmem:[#allocation2 + $0x80] sm:$0xff] %vm281_vm0, %v692_v44  ;;  %v695_v55 = vadd.f32 %v11775_v46, %v422_v15  ;;  %v552_v59 = vpop.f32.mrf.mxu0  ;;  %v427_v44 = vld [vmem:[#allocation2 + $0xc0] sm:$0xff] }
  0xe3   : > { %v616_v60 = vpop.f32.mrf.mxu1  ;;  %711 = vst.msk [vmem:[#allocation2 + $0x18] sm:$0xff] %vm281_vm0, %v679_v31  ;;  %v677_v61 = vadd.f32 %v552_v59, %v404_v49  ;;  %v414_v49 = vld [vmem:[#allocation2 + $0x58] sm:$0xff] }
  0xe4   : > { %727 = vst.msk [vmem:[#allocation2 + $0x98] sm:$0xff] %vm281_vm0, %v695_v55  ;;  %v693_v1 = vadd.f32 %v616_v60, %v420_v50  ;;  %v11762_v47 = vpop.f32.mrf.mxu0  ;;  %12017 = vmatmul.mubr.msk.bf16.gmra.mxu0 %vm281_vm0, %v13782_v29  ;;  %v10464_v50 = vld [vmem:[%s13027_s13 + $0x188] sm:$0xff]  ;;  %v430_v59 = vld [vmem:[#allocation2 + $0xd8] sm:$0xff] }
  0xe5   : > { %v11778_v48 = vpop.f32.mrf.mxu1  ;;  %11977 = vmatmul.mubr.msk.bf16.gmra.mxu1 %vm281_vm0, %v13660_v36  ;;  %709 = vst.msk [vmem:[#allocation2 + $0x8] sm:$0xff] %vm281_vm0, %v677_v61  ;;  %v682_v57 = vadd.f32 %v11762_v47, %v409_v40  ;;  %12020 = vmatprep.mubr.msk.bf16.mxu0 %vm281_vm0, %v13786_v56  ;;  %v10459_v36 = vld [vmem:[%s13027_s13 + $0x150] sm:$0xff]  ;;  %v10521_v60 = vld [vmem:[%s13027_s13 + $0x19] sm:$0xff]  ;;  %v10522_v40 = vld [vmem:[%s13027_s13 + $0x21] sm:$0xff] }
  0xe6   : > { %725 = vst.msk [vmem:[#allocation2 + $0x88] sm:$0xff] %vm281_vm0, %v693_v1  ;;  %v698_v58 = vadd.f32 %v11778_v48, %v425_v41  ;;  %11980 = vmatprep.mubr.msk.bf16.mxu1 %vm281_vm0, %v13662_v38  ;;  %v565_v7 = vpop.f32.mrf.mxu0  ;;  %v424_v38 = vld [vmem:[#allocation2 + $0xa8] sm:$0xff]  ;;  %v13806_v6 = vpack.c.bf16 %v10460_v3, %v10459_v36  ;;  %v417_v3 = vld [vmem:[#allocation2 + $0x70] sm:$0xff] }
  0xe7   : > { %v629_v10 = vpop.f32.mrf.mxu1  ;;  %714 = vst.msk [vmem:[#allocation2 + $0x30] sm:$0xff] %vm281_vm0, %v682_v57  ;;  %v680_v0 = vadd.f32 %v565_v7, %v407_v4  ;;  %v412_v48 = vld [vmem:[#allocation2 + $0x48] sm:$0xff]  ;;  %v433_v7 = vld [vmem:[#allocation2 + $0xf0] sm:$0xff] }
  0xe8   : > { %730 = vst.msk [vmem:[#allocation2 + $0xb0] sm:$0xff] %vm281_vm0, %v698_v58  ;;  %v696_v19 = vadd.f32 %v629_v10, %v423_v8  ;;  %v11763_v24 = vpop.f32.mrf.mxu0  ;;  %v13834_v58 = vpack.c.bf16 %v10522_v40, %v10521_v60  ;;  %v1079_v60 = vld [vmem:[#allocation2 + $0x10] sm:$0xff] }
  0xe9   : > { %v11779_v5 = vpop.f32.mrf.mxu1  ;;  %712 = vst.msk [vmem:[#allocation2 + $0x20] sm:$0xff] %vm281_vm0, %v680_v0  ;;  %v683_v26 = vadd.f32 %v11763_v24, %v410_v2  ;;  %v415_v0 = vld [vmem:[#allocation2 + $0x60] sm:$0xff] }
  0xea   : > { %728 = vst.msk [vmem:[#allocation2 + $0xa0] sm:$0xff] %vm281_vm0, %v696_v19  ;;  %v699_v27 = vadd.f32 %v11779_v5, %v426_v12  ;;  %v568_v30 = vpop.f32.mrf.mxu0  ;;  %v431_v19 = vld [vmem:[#allocation2 + $0xe0] sm:$0xff] }
  0xeb   : > { %v632_v32 = vpop.f32.mrf.mxu1  ;;  %715 = vst.msk [vmem:[#allocation2 + $0x38] sm:$0xff] %vm281_vm0, %v683_v26  ;;  %v681_v39 = vadd.f32 %v568_v30, %v408_v25  ;;  %v10524_v25 = vld [vmem:[%s13027_s13 + $0x39] sm:$0xff] }
  0xec   : > { %731 = vst.msk [vmem:[#allocation2 + $0xb8] sm:$0xff] %vm281_vm0, %v699_v27  ;;  %v697_v15 = vadd.f32 %v632_v32, %v424_v38  ;;  %v11766_v42 = vpop.f32.mrf.mxu0  ;;  %12021 = vmatmul.mubr.msk.bf16.gmra.mxu0 %vm281_vm0, %v13806_v6  ;;  %v418_v27 = vld [vmem:[#allocation2 + $0x78] sm:$0xff] }
  0xed   : > { %v11782_v16 = vpop.f32.mrf.mxu1  ;;  %11981 = vmatmul.mubr.msk.bf16.gmra.mxu1 %vm281_vm0, %v13676_v52  ;;  %713 = vst.msk [vmem:[#allocation2 + $0x28] sm:$0xff] %vm281_vm0, %v681_v39  ;;  %v686_v45 = vadd.f32 %v11766_v42, %v413_v33  ;;  %12024 = vmatprep.mubr.msk.bf16.mxu0 %vm281_vm0, %v13810_v28  ;;  %v10463_v52 = vld [vmem:[%s13027_s13 + $0x180] sm:$0xff]  ;;  %v434_v30 = vld [vmem:[#allocation2 + $0xf8] sm:$0xff] }
  0xee   : > { %729 = vst.msk [vmem:[#allocation2 + $0xa8] sm:$0xff] %vm281_vm0, %v697_v15  ;;  %v702_v46 = vadd.f32 %v11782_v16, %v429_v34  ;;  %11984 = vmatprep.mubr.msk.bf16.mxu1 %vm281_vm0, %v13678_v54  ;;  %v581_v31 = vpop.f32.mrf.mxu0  ;;  %v428_v54 = vld [vmem:[#allocation2 + $0xc8] sm:$0xff]  ;;  %v13830_v4 = vpack.c.bf16 %v10464_v50, %v10463_v52  ;;  %v10526_v39 = vld [vmem:[%s13027_s13 + $0x51] sm:$0xff] }
  0xef   : > { %v645_v55 = vpop.f32.mrf.mxu1  ;;  %718 = vst.msk [vmem:[#allocation2 + $0x50] sm:$0xff] %vm281_vm0, %v686_v45  ;;  %v684_v41 = vadd.f32 %v581_v31, %v411_v43  ;;  %v10525_v34 = vld [vmem:[%s13027_s13 + $0x49] sm:$0xff] }
  0xf0   : > { %734 = vst.msk [vmem:[#allocation2 + $0xd0] sm:$0xff] %vm281_vm0, %v702_v46  ;;  %v700_v61 = vadd.f32 %v645_v55, %v427_v44  ;;  %v11767_v1 = vpop.f32.mrf.mxu0  ;;  %v432_v16 = vld [vmem:[#allocation2 + $0xe8] sm:$0xff]  ;;  %v13858_v52 = vpack.c.bf16 %v10526_v39, %v10525_v34  ;;  %v12883_v50 = vld [vmem:[%s16890_s1 + $0xb0] sm:$0xff]  }
  0xf1   : > { %v11783_v47 = vpop.f32.mrf.mxu1  ;;  %716 = vst.msk [vmem:[#allocation2 + $0x40] sm:$0xff] %vm281_vm0, %v684_v41  ;;  %v687_v8 = vadd.f32 %v11767_v1, %v414_v49  ;;  %v12887_v41 = vld [vmem:[%s16894_s5 + $0x90] sm:$0xff]   ;;  %v10527_v1 = vld [vmem:[%s13027_s13 + $0x61] sm:$0xff] }
  0xf2   : > { %732 = vst.msk [vmem:[#allocation2 + $0xc0] sm:$0xff] %vm281_vm0, %v700_v61  ;;  %v703_v57 = vadd.f32 %v11783_v47, %v430_v59  ;;  %v584_v2 = vpop.f32.mrf.mxu0  ;;  %v10528_v47 = vld [vmem:[%s13027_s13 + $0x69] sm:$0xff]  ;;  %v10534_v39 = vld [vmem:[%s13027_s13 + $0xb1] sm:$0xff] }
  0xf3   : > { %v648_v36 = vpop.f32.mrf.mxu1  ;;  %719 = vst.msk [vmem:[#allocation2 + $0x58] sm:$0xff] %vm281_vm0, %v687_v8  ;;  %v685_v10 = vadd.f32 %v584_v2, %v412_v48  ;;  %v12884_v2 = vld [vmem:[%s16890_s1 + $0xa8] sm:$0xff]  }
  0xf4   : > { %735 = vst.msk [vmem:[#allocation2 + $0xd8] sm:$0xff] %vm281_vm0, %v703_v57  ;;  %v701_v12 = vadd.f32 %v648_v36, %v428_v54  ;;  %v11770_v13 = vpop.f32.mrf.mxu0  ;;  %12025 = vmatmul.mubr.msk.bf16.gmra.mxu0 %vm281_vm0, %v13830_v4  ;;  %v1077_v54 = vld [vmem:[#allocation2] sm:$0xff]  ;;  %v1080_v36 = vld [vmem:[#allocation2 + $0x18] sm:$0xff]  ;;  %v10533_v34 = vld [vmem:[%s13027_s13 + $0xa9] sm:$0xff] }
  0xf5   : > { %v11786_v17 = vpop.f32.mrf.mxu1  ;;  %11985 = vmatmul.mubr.msk.bf16.gmra.mxu1 %vm281_vm0, %v13690_v11  ;;  %717 = vst.msk [vmem:[#allocation2 + $0x48] sm:$0xff] %vm281_vm0, %v685_v10  ;;  %v690_v24 = vadd.f32 %v11770_v13, %v417_v3  ;;  %12076 = vmatprep.mubr.msk.bf16.mxu0 %vm281_vm0, %v13834_v58  ;;  %v10523_v11 = vld [vmem:[%s13027_s13 + $0x31] sm:$0xff]  ;;  %v10530_v57 = vld [vmem:[%s13027_s13 + $0x81] sm:$0xff] }
  0xf6   : > { %733 = vst.msk [vmem:[#allocation2 + $0xc8] sm:$0xff] %vm281_vm0, %v701_v12  ;;  %v706_v5 = vadd.f32 %v11786_v17, %v433_v7  ;;  %12036 = vmatprep.mubr.msk.bf16.mxu1 %vm281_vm0, %v13058_v20  ;;  %v597_v38 = vpop.f32.mrf.mxu0  ;;  %v416_v20 = vld [vmem:[#allocation2 + $0x68] sm:$0xff]  ;;  %v13854_v43 = vpack.c.bf16 %v10524_v25, %v10523_v11  ;;  %v13894_v7 = vpack.c.bf16 %v10528_v47, %v10527_v1  ;;  %v1083_v11 = vld [vmem:[#allocation2 + $0x30] sm:$0xff] }
  0xf7   : > { %v661_v26 = vpop.f32.mrf.mxu1  ;;  %722 = vst.msk [vmem:[#allocation2 + $0x70] sm:$0xff] %vm281_vm0, %v690_v24  ;;  %v688_v32 = vadd.f32 %v597_v38, %v415_v0  ;;  %v1078_v17 = vld [vmem:[#allocation2 + $0x8] sm:$0xff]  ;;  %v12886_v24 = vld [vmem:[%s16890_s1 + $0xa0] sm:$0xff]  }
  0xf8   : > { %738 = vst.msk [vmem:[#allocation2 + $0xf0] sm:$0xff] %vm281_vm0, %v706_v5  ;;  %v704_v33 = vadd.f32 %v661_v26, %v431_v19  ;;  %v11771_v15 = vpop.f32.mrf.mxu0  ;;  %v12889_v38 = vld [vmem:[%s16894_s5 + $0x80] sm:$0xff]  }
  0xf9   : > { %v11787_v42 = vpop.f32.mrf.mxu1  ;;  %720 = vst.msk [vmem:[#allocation2 + $0x60] sm:$0xff] %vm281_vm0, %v688_v32  ;;  %v691_v44 = vadd.f32 %v11771_v15, %v418_v27  ;;  %v10531_v27 = vld [vmem:[%s13027_s13 + $0x91] sm:$0xff]  ;;  %v10535_v47 = vld [vmem:[%s13027_s13 + $0xc1] sm:$0xff] }
  0xfa   : > { %736 = vst.msk [vmem:[#allocation2 + $0xe0] sm:$0xff] %vm281_vm0, %v704_v33  ;;  %v707_v45 = vadd.f32 %v11787_v42, %v434_v30  ;;  %v600_v46 = vpop.f32.mrf.mxu0  ;;  %v10532_v30 = vld [vmem:[%s13027_s13 + $0x99] sm:$0xff] }
  0xfb   : > { %v664_v49 = vpop.f32.mrf.mxu1  ;;  %723 = vst.msk [vmem:[#allocation2 + $0x78] sm:$0xff] %vm281_vm0, %v691_v44  ;;  %v689_v31 = vadd.f32 %v600_v46, %v416_v20  ;;  %v1084_v20 = vld [vmem:[#allocation2 + $0x38] sm:$0xff]  ;;  %v13936_v44 = vpack.c.bf16 %v10532_v30, %v10531_v27  ;;  %v13939_v46 = vpack.c.bf16 %v10534_v39, %v10533_v34 }
  0xfc   : > { %739 = vst.msk [vmem:[#allocation2 + $0xf8] sm:$0xff] %vm281_vm0, %v707_v45  ;;  %v705_v55 = vadd.f32 %v664_v49, %v432_v16  ;;  %v11838_v40 = vpop.f32.mrf.mxu0  ;;  %12077 = vmatmul.mubr.msk.bf16.vlgmr.msra.gmra.mxu0 %vm281_vm0, %v13854_v43  ;;  %v10539_v30 = vld [vmem:[%s13027_s13 + $0xf1] sm:$0xff] }
  0xfd   : > { %v13865_v59 = vpop.f32.mrf.mxu1  ;;  %12037 = vmatmul.mubr.msk.bf16.vlgmr.msra.gmra.mxu1 %vm281_vm0, %v13062_v22  ;;  %721 = vst.msk [vmem:[#allocation2 + $0x68] sm:$0xff] %vm281_vm0, %v689_v31  ;;  %v1353_v61 = vadd.f32 %v11838_v40, %v1079_v60  ;;  %12149 = vmatpush3.bf16.msra.mxu0 %v13739_v14  ;;  %v10529_v22 = vld [vmem:[%s13027_s13 + $0x79] sm:$0xff] }
  0xfe   : > { %737 = vst.msk [vmem:[#allocation2 + $0xe8] sm:$0xff] %vm281_vm0, %v705_v55  ;;  %12040 = vmatprep.mubr.msk.bf16.mxu1 %vm281_vm0, %v13091_v35  ;;  %v1224_v8 = vpop.f32.mrf.mxu0  ;;  %12080 = vmatprep.mubr.msk.bf16.mxu0 %vm281_vm0, %v13858_v52  ;;  %v13897_v12 = vpack.c.bf16 %v10530_v57, %v10529_v22  ;;  %v13946_v55 = vld [vmem:[%s16894_s5 + $0xb8] sm:$0xff]   ;;  %v10536_v22 = vld [vmem:[%s13027_s13 + $0xc9] sm:$0xff] }
  0xff   : > { %v13882_v48 = vpop.f32.mrf.mxu1  ;;  %12150 = vmatprep.subr.bf16.mxu0 %v12883_v50  ;;  %1385 = vst.msk [vmem:[#allocation2 + $0x10] sm:$0xff] %vm281_vm0, %v1353_v61  ;;  %v1351_v14 = vadd.f32 %v1224_v8, %v1077_v54  ;;  %12109 = vmatpush3.bf16.msra.mxu1 %v13744_v63  ;;  %v12888_v63 = vld [vmem:[%s16894_s5 + $0x88] sm:$0xff]   ;;  %v1085_v8 = vld [vmem:[#allocation2 + $0x40] sm:$0xff] }
 0x100   : > { %v11839_v3 = vpop.f32.mrf.mxu0  ;;  %12110 = vmatprep.subr.bf16.mxu1 %v12887_v41  ;;  %v1089_v34 = vld [vmem:[#allocation2 + $0x60] sm:$0xff] }
 0x101   : > { %v13892_v35 = vpop.f32.mrf.mxu1  ;;  %1383 = vst.msk [vmem:[#allocation2] sm:$0xff] %vm281_vm0, %v1351_v14  ;;  %v1354_v10 = vadd.f32 %v11839_v3, %v1080_v36  ;;  %12151 = vmatpush3.bf16.msra.mxu0 %v12883_v50  ;;  %v1082_v50 = vld [vmem:[#allocation2 + $0x28] sm:$0xff]  ;;  %v1088_v3 = vld [vmem:[#allocation2 + $0x58] sm:$0xff] }
 0x102   : > { %v1227_v0 = vpop.f32.mrf.mxu0  ;;  %12152 = vmatprep.subr.bf16.mxu0 %v12884_v2 }
 0x103   : > { %v13899_v13 = vpop.f32.mrf.mxu1  ;;  %1386 = vst.msk [vmem:[#allocation2 + $0x18] sm:$0xff] %vm281_vm0, %v1354_v10  ;;  %v1352_v19 = vadd.f32 %v1227_v0, %v1078_v17  ;;  %12111 = vmatpush3.bf16.msra.mxu1 %v12887_v41  ;;  %v1087_v41 = vld [vmem:[#allocation2 + $0x50] sm:$0xff]  ;;  %v13971_v10 = vpack.c.bf16 %v10536_v22, %v10535_v47 }
 0x104   : > { %v11842_v25 = vpop.f32.mrf.mxu0  ;;  %12081 = vmatmul.mubr.msk.bf16.gmra.mxu0 %vm281_vm0, %v13894_v7  ;;  %12112 = vmatprep.subr.bf16.mxu1 %v12888_v63  ;;  %v1095_v47 = vld [vmem:[#allocation2 + $0x90] sm:$0xff] }
 0x105   : > { %v13908_v5 = vpop.f32.mrf.mxu1  ;;  %12041 = vmatmul.mubr.msk.bf16.gmra.mxu1 %vm281_vm0, %v13095_v37  ;;  %1384 = vst.msk [vmem:[#allocation2 + $0x8] sm:$0xff] %vm281_vm0, %v1352_v19  ;;  %v1357_v26 = vadd.f32 %v11842_v25, %v1083_v11  ;;  %12084 = vmatprep.mubr.msk.bf16.mxu0 %vm281_vm0, %v13897_v12  ;;  %v1081_v37 = vld [vmem:[#allocation2 + $0x20] sm:$0xff]  ;;  %v1086_v19 = vld [vmem:[#allocation2 + $0x48] sm:$0xff] }
 0x106   : > { %12044 = vmatprep.mubr.msk.bf16.mxu1 %vm281_vm0, %v13127_v51  ;;  %v1240_v33 = vpop.f32.mrf.mxu0  ;;  %12153 = vmatpush3.bf16.msra.mxu0 %v12884_v2  ;;  %v13932_v51 = vld [vmem:[%s16890_s1 + $0xd8] sm:$0xff]  }
 0x107   : > { %v13924_v32 = vpop.f32.mrf.mxu1  ;;  %1389 = vst.msk [vmem:[#allocation2 + $0x30] sm:$0xff] %vm281_vm0, %v1357_v26  ;;  %v1355_v15 = vadd.f32 %v1240_v33, %v1081_v37  ;;  %12154 = vmatprep.subr.bf16.mxu0 %v12886_v24  ;;  %12113 = vmatpush3.bf16.msra.mxu1 %v12888_v63  ;;  %v10537_v2 = vld [vmem:[%s13027_s13 + $0xd9] sm:$0xff] }
 0x108   : > { %v11843_v16 = vpop.f32.mrf.mxu0  ;;  %12114 = vmatprep.subr.bf16.mxu1 %v12889_v38  ;;  %v10540_v37 = vld [vmem:[%s13027_s13 + $0xf9] sm:$0xff] }
 0x109   : > { %v13934_v42 = vpop.f32.mrf.mxu1  ;;  %1387 = vst.msk [vmem:[#allocation2 + $0x20] sm:$0xff] %vm281_vm0, %v1355_v15  ;;  %v1358_v45 = vadd.f32 %v11843_v16, %v1084_v20  ;;  %v10541_v15 = vld [vmem:[%s13027_s13 + $0x109] sm:$0xff] }
 0x10a   : > { %v1243_v31 = vpop.f32.mrf.mxu0  ;;  %12155 = vmatpush3.bf16.msra.mxu0 %v12886_v24 }
 0x10b   : > { %v13941_v49 = vpop.f32.mrf.mxu1  ;;  %1390 = vst.msk [vmem:[#allocation2 + $0x38] sm:$0xff] %vm281_vm0, %v1358_v45  ;;  %v1356_v60 = vadd.f32 %v1243_v31, %v1082_v50  ;;  %12115 = vmatpush3.bf16.msra.mxu1 %v12889_v38  ;;  %12228 = vmatprep.subr.bf16.mxu0 %v13932_v51  ;;  %v1091_v38 = vld [vmem:[#allocation2 + $0x70] sm:$0xff]  ;;  %v1092_v45 = vld [vmem:[#allocation2 + $0x78] sm:$0xff]  ;;  %v13999_v31 = vpack.c.bf16 %v10540_v37, %v10539_v30 }
 0x10c   : > { %v11846_v61 = vpop.f32.mrf.mxu0  ;;  %12085 = vmatmul.mubr.msk.bf16.gmra.mxu0 %vm281_vm0, %v13936_v44  ;;  %12188 = vmatprep.subr.bf16.mxu1 %v13946_v55 }
 0x10d   : > { %v13950_v40 = vpop.f32.mrf.mxu1  ;;  %12045 = vmatmul.mubr.msk.bf16.gmra.mxu1 %vm281_vm0, %v13131_v53  ;;  %1388 = vst.msk [vmem:[#allocation2 + $0x28] sm:$0xff] %vm281_vm0, %v1356_v60  ;;  %v1361_v1 = vadd.f32 %v11846_v61, %v1087_v41  ;;  %12088 = vmatprep.mubr.msk.bf16.mxu0 %vm281_vm0, %v13939_v46  ;;  %v10538_v53 = vld [vmem:[%s13027_s13 + $0xe1] sm:$0xff] }
 0x10e   : > { %12048 = vmatprep.mubr.msk.bf16.mxu1 %vm281_vm0, %v13152_v62  ;;  %v1256_v57 = vpop.f32.mrf.mxu0  ;;  %v13974_v0 = vpack.c.bf16 %v10538_v53, %v10537_v2  ;;  %v1090_v61 = vld [vmem:[#allocation2 + $0x68] sm:$0xff]  ;;  %v1093_v2 = vld [vmem:[#allocation2 + $0x80] sm:$0xff] }
 0x10f   : > { %v13963_v54 = vpop.f32.mrf.mxu1  ;;  %1393 = vst.msk [vmem:[#allocation2 + $0x50] sm:$0xff] %vm281_vm0, %v1361_v1  ;;  %v1359_v14 = vadd.f32 %v1256_v57, %v1085_v8 }
 0x110   : > { %v11847_v62 = vpop.f32.mrf.mxu0 }
 0x111   : > { %v13969_v36 = vpop.f32.mrf.mxu1  ;;  %1391 = vst.msk [vmem:[#allocation2 + $0x40] sm:$0xff] %vm281_vm0, %v1359_v14  ;;  %v1362_v17 = vadd.f32 %v11847_v62, %v1088_v3  ;;  %v10543_v14 = vld [vmem:[%s13027_s13 + $0x121] sm:$0xff]  ;;  %v10544_v3 = vld [vmem:[%s13027_s13 + $0x129] sm:$0xff] }
 0x112   : > { %v1259_v24 = vpop.f32.mrf.mxu0  ;;  %v14027_v30 = vpack.c.bf16 %v10544_v3, %v10543_v14 }
 0x113   : > { %v13976_v63 = vpop.f32.mrf.mxu1  ;;  %1394 = vst.msk [vmem:[#allocation2 + $0x58] sm:$0xff] %vm281_vm0, %v1362_v17  ;;  %v1360_v11 = vadd.f32 %v1259_v24, %v1086_v19  ;;  %v1096_v19 = vld [vmem:[#allocation2 + $0x98] sm:$0xff]  ;;  %v10546_v24 = vld [vmem:[%s13027_s13 + $0x141] sm:$0xff] }
 0x114   : > { %v11850_v26 = vpop.f32.mrf.mxu0  ;;  %12089 = vmatmul.mubr.msk.bf16.gmra.mxu0 %vm281_vm0, %v13971_v10 }
 0x115   : > { %v13979_v25 = vpop.f32.mrf.mxu1  ;;  %12049 = vmatmul.mubr.msk.bf16.gmra.mxu1 %vm281_vm0, %v13038_v9  ;;  %1392 = vst.msk [vmem:[#allocation2 + $0x48] sm:$0xff] %vm281_vm0, %v1360_v11  ;;  %v1365_v27 = vadd.f32 %v11850_v26, %v1091_v38  ;;  %12092 = vmatprep.mubr.msk.bf16.mxu0 %vm281_vm0, %v13974_v0  ;;  %v10542_v9 = vld [vmem:[%s13027_s13 + $0x111] sm:$0xff] }
 0x116   : > { %12052 = vmatprep.mubr.msk.bf16.mxu1 %vm281_vm0, %v13060_v21  ;;  %v1272_v39 = vpop.f32.mrf.mxu0  ;;  %v14002_v60 = vpack.c.bf16 %v10542_v9, %v10541_v15  ;;  %v1099_v15 = vld [vmem:[#allocation2 + $0xb0] sm:$0xff] }
 0x117   : > { %v13992_v33 = vpop.f32.mrf.mxu1  ;;  %1397 = vst.msk [vmem:[#allocation2 + $0x70] sm:$0xff] %vm281_vm0, %v1365_v27  ;;  %v1363_v20 = vadd.f32 %v1272_v39, %v1089_v34  ;;  %v1094_v27 = vld [vmem:[#allocation2 + $0x88] sm:$0xff] }
 0x118   : > { %v11851_v50 = vpop.f32.mrf.mxu0 }
 0x119   : > { %v13997_v16 = vpop.f32.mrf.mxu1  ;;  %1395 = vst.msk [vmem:[#allocation2 + $0x60] sm:$0xff] %vm281_vm0, %v1363_v20  ;;  %v1366_v21 = vadd.f32 %v11851_v50, %v1092_v45  ;;  %v1097_v50 = vld [vmem:[#allocation2 + $0xa0] sm:$0xff] }
 0x11a   : > { %v1275_v1 = vpop.f32.mrf.mxu0 }
 0x11b   : > { %v14004_v41 = vpop.f32.mrf.mxu1  ;;  %1398 = vst.msk [vmem:[#allocation2 + $0x78] sm:$0xff] %vm281_vm0, %v1366_v21  ;;  %v1364_v22 = vadd.f32 %v1275_v1, %v1090_v61  ;;  %v10547_v61 = vld [vmem:[%s13027_s13 + $0x151] sm:$0xff]  ;;  %v10548_v1 = vld [vmem:[%s13027_s13 + $0x159] sm:$0xff] }
 0x11c   : > { %v11854_v57 = vpop.f32.mrf.mxu0  ;;  %12093 = vmatmul.mubr.msk.bf16.gmra.mxu0 %vm281_vm0, %v13999_v31 }
 0x11d   : > { %v14007_v8 = vpop.f32.mrf.mxu1  ;;  %12053 = vmatmul.mubr.msk.bf16.gmra.mxu1 %vm281_vm0, %v13064_v23  ;;  %1396 = vst.msk [vmem:[#allocation2 + $0x68] sm:$0xff] %vm281_vm0, %v1364_v22  ;;  %v1369_v53 = vadd.f32 %v11854_v57, %v1095_v47  ;;  %12096 = vmatprep.mubr.msk.bf16.mxu0 %vm281_vm0, %v14002_v60  ;;  %v10545_v23 = vld [vmem:[%s13027_s13 + $0x139] sm:$0xff] }
 0x11e   : > { %12056 = vmatprep.mubr.msk.bf16.mxu1 %vm281_vm0, %v13766_v18  ;;  %v1288_v17 = vpop.f32.mrf.mxu0  ;;  %v14030_v37 = vpack.c.bf16 %v10546_v24, %v10545_v23  ;;  %v1100_v57 = vld [vmem:[#allocation2 + $0xb8] sm:$0xff] }
 0x11f   : > { %v14020_v62 = vpop.f32.mrf.mxu1  ;;  %1401 = vst.msk [vmem:[#allocation2 + $0x90] sm:$0xff] %vm281_vm0, %v1369_v53  ;;  %v1367_v11 = vadd.f32 %v1288_v17, %v1093_v2  ;;  %v10550_v2 = vld [vmem:[%s13027_s13 + $0x171] sm:$0xff]  ;;  %v1098_v17 = vld [vmem:[#allocation2 + $0xa8] sm:$0xff] }
 0x120   : > { %v11855_v26 = vpop.f32.mrf.mxu0 }
 0x121   : > { %v14025_v38 = vpop.f32.mrf.mxu1  ;;  %1399 = vst.msk [vmem:[#allocation2 + $0x80] sm:$0xff] %vm281_vm0, %v1367_v11  ;;  %v1370_v18 = vadd.f32 %v11855_v26, %v1096_v19  ;;  %v14055_v19 = vpack.c.bf16 %v10548_v1, %v10547_v61  ;;  %v10551_v1 = vld [vmem:[%s13027_s13 + $0x181] sm:$0xff] }
 0x122   : > { %v1291_v39 = vpop.f32.mrf.mxu0 }
 0x123   : > { %v14032_v34 = vpop.f32.mrf.mxu1  ;;  %1402 = vst.msk [vmem:[#allocation2 + $0x98] sm:$0xff] %vm281_vm0, %v1370_v18  ;;  %v1368_v9 = vadd.f32 %v1291_v39, %v1094_v27  ;;  %16918 = vst [vmem:[#allocation4_spill] sm:$0xff] %v14055_v19  ;;  %v1103_v27 = vld [vmem:[#allocation2 + $0xd0] sm:$0xff]  ;;  %v314_v39 = vld [vmem:[%s16893_s4] sm:$0x1] }
 0x124   : > { %v11858_v45 = vpop.f32.mrf.mxu0  ;;  %12097 = vmatmul.mubr.msk.bf16.gmra.mxu0 %vm281_vm0, %v14027_v30 }
 0x125   : > { %v14035_v20 = vpop.f32.mrf.mxu1  ;;  %12057 = vmatmul.mubr.msk.bf16.gmra.mxu1 %vm281_vm0, %v13782_v29  ;;  %1400 = vst.msk [vmem:[#allocation2 + $0x88] sm:$0xff] %vm281_vm0, %v1368_v9  ;;  %v1373_v21 = vadd.f32 %v11858_v45, %v1099_v15  ;;  %12100 = vmatprep.mubr.msk.bf16.mxu0 %vm281_vm0, %v14030_v37  ;;  %v10549_v29 = vld [vmem:[%s13027_s13 + $0x169] sm:$0xff]  ;;  %v1101_v45 = vld [vmem:[#allocation2 + $0xc0] sm:$0xff] }
 0x126   : > { %12060 = vmatprep.mubr.msk.bf16.mxu1 %vm281_vm0, %v13786_v56  ;;  %v1304_v22 = vpop.f32.mrf.mxu0  ;;  %v318_v56 = vlaneseq  ;;  %v14058_v24 = vpack.c.bf16 %v10550_v2, %v10549_v29  ;;  %v1104_v29 = vld [vmem:[#allocation2 + $0xd8] sm:$0xff] }
 0x127   : > { %v14048_v47 = vpop.f32.mrf.mxu1  ;;  %1405 = vst.msk [vmem:[#allocation2 + $0xb0] sm:$0xff] %vm281_vm0, %v1373_v21  ;;  %v1371_v53 = vadd.f32 %v1304_v22, %v1097_v50  ;;  %v315_v50 = vld [vmem:[%s16895_s6] sm:$0x1] }
 0x128   : > { %v11859_v3 = vpop.f32.mrf.mxu0  ;;  %16919 = vst [vmem:[#allocation5_spill] sm:$0xff] %v14058_v24  ;;  %v319_v21 = vshrl.u32 %v318_v56, 7  ;;  %v10609_v2 = vld [vmem:[%s13027_s13 + $0x1a] sm:$0xff] }
 0x129   : > { %v14053_v14 = vpop.f32.mrf.mxu1  ;;  %1403 = vst.msk [vmem:[#allocation2 + $0xa0] sm:$0xff] %vm281_vm0, %v1371_v53  ;;  %v1374_v23 = vadd.f32 %v11859_v3, %v1100_v57  ;;  %v10610_v53 = vld [vmem:[%s13027_s13 + $0x22] sm:$0xff] }
 0x12a   : > { %v1307_v26 = vpop.f32.mrf.mxu0 }
 0x12b   : > { %v14060_v11 = vpop.f32.mrf.mxu1  ;;  %1406 = vst.msk [vmem:[#allocation2 + $0xb8] sm:$0xff] %vm281_vm0, %v1374_v23  ;;  %v1372_v18 = vadd.f32 %v1307_v26, %v1098_v17  ;;  %v1102_v23 = vld [vmem:[#allocation2 + $0xc8] sm:$0xff] }
 0x12c   : > { %v11862_v9 = vpop.f32.mrf.mxu0  ;;  %12101 = vmatmul.mubr.msk.bf16.gmra.mxu0 %vm281_vm0, %v14055_v19 }
 0x12d   : > { %v14066_v15 = vpop.f32.mrf.mxu1  ;;  %12061 = vmatmul.mubr.msk.bf16.gmra.mxu1 %vm281_vm0, %v13806_v6  ;;  %1404 = vst.msk [vmem:[#allocation2 + $0xa8] sm:$0xff] %vm281_vm0, %v1372_v18  ;;  %v1377_v61 = vadd.f32 %v11862_v9, %v1103_v27  ;;  %12104 = vmatprep.mubr.msk.bf16.mxu0 %vm281_vm0, %v14058_v24  ;;  %v10552_v6 = vld [vmem:[%s13027_s13 + $0x189] sm:$0xff]  ;;  %v320_v27 = vsub.s32 0, %v319_v21  ;;  %v14092_v9 = vpack.c.bf16 %v10610_v53, %v10609_v2  ;;  %v1108_v2 = vld [vmem:[#allocation2 + $0xf8] sm:$0xff] }
 0x12e   : > { %12064 = vmatprep.mubr.msk.bf16.mxu1 %vm281_vm0, %v13810_v28  ;;  %v1320_v57 = vpop.f32.mrf.mxu0  ;;  %v14089_v26 = vpack.c.bf16 %v10552_v6, %v10551_v1  ;;  %v316_v28 = vadd.f32 %v315_v50, %v314_v39  ;;  %v1105_v39 = vld [vmem:[#allocation2 + $0xe0] sm:$0xff] }
 0x12f   : > { %v14082_v22 = vpop.f32.mrf.mxu1  ;;  %1409 = vst.msk [vmem:[#allocation2 + $0xd0] sm:$0xff] %vm281_vm0, %v1377_v61  ;;  %v1375_v3 = vadd.f32 %v1320_v57, %v1101_v45  ;;  %16920 = vst [vmem:[#allocation6_spill] sm:$0xff] %v14092_v9  ;;  %v1107_v61 = vld [vmem:[#allocation2 + $0xf0] sm:$0xff]  ;;  %v10612_v6 = vld [vmem:[%s13027_s13 + $0x3a] sm:$0xff] }
 0x130   : > { %v11863_v56 = vpop.f32.mrf.mxu0  ;;  %v14103_v50 = vrot.slane %v316_v28, %v320_v27  ;;  %v1106_v27 = vld [vmem:[#allocation2 + $0xe8] sm:$0xff] }
 0x131   : > { %v14087_v17 = vpop.f32.mrf.mxu1  ;;  %1407 = vst.msk [vmem:[#allocation2 + $0xc0] sm:$0xff] %vm281_vm0, %v1375_v3  ;;  %v1378_v18 = vadd.f32 %v11863_v56, %v1104_v29  ;;  %v10613_v3 = vld [vmem:[%s13027_s13 + $0x4a] sm:$0xff]  ;;  %v10614_v56 = vld [vmem:[%s13027_s13 + $0x52] sm:$0xff] }
 0x132   : > { %v1323_v19 = vpop.f32.mrf.mxu0 }
 0x133   : > { %v14094_v24 = vpop.f32.mrf.mxu1  ;;  %1410 = vst.msk [vmem:[#allocation2 + $0xd8] sm:$0xff] %vm281_vm0, %v1378_v18  ;;  %v1376_v45 = vadd.f32 %v1323_v19, %v1102_v23  ;;  %v10611_v19 = vld [vmem:[%s13027_s13 + $0x32] sm:$0xff] }
 0x134   : > { %v11866_v1 = vpop.f32.mrf.mxu0  ;;  %12105 = vmatmul.mubr.msk.bf16.gmra.mxu0 %vm281_vm0, %v14089_v26  ;;  %v14119_v18 = vpack.c.bf16 %v10612_v6, %v10611_v19  ;;  %v1755_v6 = vld [vmem:[#allocation2 + $0x10] sm:$0xff] }
 0x135   : > { %v14097_v57 = vpop.f32.mrf.mxu1  ;;  %12065 = vmatmul.mubr.msk.bf16.gmra.mxu1 %vm281_vm0, %v13830_v4  ;;  %1408 = vst.msk [vmem:[#allocation2 + $0xc8] sm:$0xff] %vm281_vm0, %v1376_v45  ;;  %v1381_v21 = vadd.f32 %v11866_v1, %v1107_v61  ;;  %12156 = vmatprep.mubr.msk.bf16.mxu0 %vm281_vm0, %v14092_v9  ;;  %v14126_v9 = vpack.c.bf16 %v10614_v56, %v10613_v3  ;;  %v10616_v56 = vld [vmem:[%s13027_s13 + $0x6a] sm:$0xff] }
 0x136   : > { %12116 = vmatprep.mubr.msk.bf16.mxu1 %vm281_vm0, %v13834_v58  ;;  %v1336_v4 = vpop.f32.mrf.mxu0  ;;  %16921 = vst [vmem:[#allocation7_spill] sm:$0xff] %v14119_v18  ;;  %v967_v58 = vadd.f32 %v13865_v59, %v14103_v50 }
 0x137   : > { %v14112_v29 = vpop.f32.mrf.mxu1  ;;  %1413 = vst.msk [vmem:[#allocation2 + $0xf0] sm:$0xff] %vm281_vm0, %v1381_v21  ;;  %v1379_v53 = vadd.f32 %v1336_v4, %v1105_v39  ;;  %16922 = vst [vmem:[#allocation8_spill] sm:$0xff] %v14126_v9  ;;  %v12891_v39 = vld [vmem:[%s16890_s1 + $0xd0] sm:$0xff]   ;;  %v965_v21 = vadd.f32 %v13882_v48, %v14103_v50  ;;  %v968_v48 = vadd.f32 %v13892_v35, %v14103_v50  ;;  %v10618_v35 = vld [vmem:[%s13027_s13 + $0x82] sm:$0xff] }
 0x138   : > { %v11867_v28 = vpop.f32.mrf.mxu0 }
 0x139   : > { %v14117_v23 = vpop.f32.mrf.mxu1  ;;  %1411 = vst.msk [vmem:[#allocation2 + $0xe0] sm:$0xff] %vm281_vm0, %v1379_v53  ;;  %v1382_v61 = vadd.f32 %v11867_v28, %v1108_v2  ;;  %v12895_v2 = vld [vmem:[%s16894_s5 + $0xb0] sm:$0xff]   ;;  %v10617_v28 = vld [vmem:[%s13027_s13 + $0x7a] sm:$0xff] }
 0x13a   : > { %v1339_v1 = vpop.f32.mrf.mxu0 }
 0x13b   : > { %v14124_v45 = vpop.f32.mrf.mxu1  ;;  %1414 = vst.msk [vmem:[#allocation2 + $0xf8] sm:$0xff] %vm281_vm0, %v1382_v61  ;;  %v1380_v59 = vadd.f32 %v1339_v1, %v1106_v27  ;;  %v1753_v61 = vld [vmem:[#allocation2] sm:$0xff] }
 0x13c   : > { %v11918_v4 = vpop.f32.mrf.mxu0  ;;  %12157 = vmatmul.mubr.msk.bf16.vlgmr.msra.gmra.mxu0 %vm281_vm0, %v14119_v18 }
 0x13d   : > { %v11878_v19 = vpop.f32.mrf.mxu1  ;;  %12117 = vmatmul.mubr.msk.bf16.vlgmr.msra.gmra.mxu1 %vm281_vm0, %v13854_v43  ;;  %1412 = vst.msk [vmem:[#allocation2 + $0xe8] sm:$0xff] %vm281_vm0, %v1380_v59  ;;  %v2029_v3 = vadd.f32 %v11918_v4, %v1755_v6  ;;  %12229 = vmatpush3.bf16.msra.mxu0 %v13932_v51  ;;  %v10615_v43 = vld [vmem:[%s13027_s13 + $0x62] sm:$0xff]  ;;  %v966_v51 = vadd.f32 %v13899_v13, %v14103_v50  ;;  %v1756_v6 = vld [vmem:[#allocation2 + $0x18] sm:$0xff] }
 0x13e   : > { %v14144_v53 = vadd.f32 %v11878_v19, %v967_v58  ;;  %12120 = vmatprep.mubr.msk.bf16.mxu1 %vm281_vm0, %v13858_v52  ;;  %v1900_v1 = vpop.f32.mrf.mxu0  ;;  %12160 = vmatprep.mubr.msk.bf16.mxu0 %vm281_vm0, %v14126_v9  ;;  %v12892_v58 = vld [vmem:[%s16890_s1 + $0xc8] sm:$0xff]   ;;  %v14164_v9 = vpack.c.bf16 %v10616_v56, %v10615_v43  ;;  %v969_v56 = vadd.f32 %v13924_v32, %v14103_v50  ;;  %v12897_v32 = vld [vmem:[%s16894_s5 + $0xa0] sm:$0xff]  }
 0x13f   : > { %v1514_v27 = vpop.f32.mrf.mxu1  ;;  %12230 = vmatprep.subr.bf16.mxu0 %v12891_v39  ;;  %2061 = vst.msk [vmem:[#allocation2 + $0x10] sm:$0xff] %vm281_vm0, %v2029_v3  ;;  %v2027_v59 = vadd.f32 %v1900_v1, %v1753_v61  ;;  %12189 = vmatpush3.bf16.msra.mxu1 %v13946_v55  ;;  %v14171_v3 = vpack.c.bf16 %v10618_v35, %v10617_v28  ;;  %v12896_v43 = vld [vmem:[%s16894_s5 + $0xa8] sm:$0xff]   ;;  %v1759_v61 = vld [vmem:[#allocation2 + $0x30] sm:$0xff] }
 0x140   : > { %16923 = vst [vmem:[#allocation9_spill] sm:$0xff] %v14144_v53  ;;  %v14161_v52 = vadd.f32 %v1514_v27, %v965_v21  ;;  %v11919_v4 = vpop.f32.mrf.mxu0  ;;  %12190 = vmatprep.subr.bf16.mxu1 %v12895_v2  ;;  %v971_v53 = vadd.f32 %v13908_v5, %v14103_v50  ;;  %v1754_v27 = vld [vmem:[#allocation2 + $0x8] sm:$0xff]  ;;  %v972_v35 = vadd.f32 %v13934_v42, %v14103_v50 }
 0x141   : > { %v11879_v19 = vpop.f32.mrf.mxu1  ;;  %2059 = vst.msk [vmem:[#allocation2] sm:$0xff] %vm281_vm0, %v2027_v59  ;;  %v2030_v13 = vadd.f32 %v11919_v4, %v1756_v6  ;;  %12231 = vmatpush3.bf16.msra.mxu0 %v12891_v39  ;;  %v12894_v39 = vld [vmem:[%s16890_s1 + $0xc0] sm:$0xff]   ;;  %v970_v42 = vadd.f32 %v13941_v49, %v14103_v50  ;;  %v975_v49 = vadd.f32 %v13950_v40, %v14103_v50 }
 0x142   : > { %v14169_v18 = vadd.f32 %v11879_v19, %v968_v48  ;;  %v1903_v55 = vpop.f32.mrf.mxu0  ;;  %12232 = vmatprep.subr.bf16.mxu0 %v12892_v58  ;;  %v10620_v59 = vld [vmem:[%s13027_s13 + $0x9a] sm:$0xff] }
 0x143   : > { %v1517_v21 = vpop.f32.mrf.mxu1  ;;  %2062 = vst.msk [vmem:[#allocation2 + $0x18] sm:$0xff] %vm281_vm0, %v2030_v13  ;;  %v2028_v48 = vadd.f32 %v1903_v55, %v1754_v27  ;;  %12191 = vmatpush3.bf16.msra.mxu1 %v12895_v2  ;;  %v1757_v6 = vld [vmem:[#allocation2 + $0x20] sm:$0xff]  ;;  %v10621_v13 = vld [vmem:[%s13027_s13 + $0xaa] sm:$0xff]  ;;  %v14212_v27 = vld [vmem:[%s16890_s1 + $0xf8] sm:$0xff]  }
 0x144   : > { %v14179_v5 = vadd.f32 %v1517_v21, %v966_v51  ;;  %v11922_v1 = vpop.f32.mrf.mxu0  ;;  %12161 = vmatmul.mubr.msk.bf16.gmra.mxu0 %vm281_vm0, %v14164_v9  ;;  %v10622_v21 = vld [vmem:[%s13027_s13 + $0xb2] sm:$0xff]  ;;  %12192 = vmatprep.subr.bf16.mxu1 %v12896_v43 }
 0x145   : > { %v11882_v28 = vpop.f32.mrf.mxu1  ;;  %12121 = vmatmul.mubr.msk.bf16.gmra.mxu1 %vm281_vm0, %v13894_v7  ;;  %2060 = vst.msk [vmem:[#allocation2 + $0x8] sm:$0xff] %vm281_vm0, %v2028_v48  ;;  %v2033_v51 = vadd.f32 %v11922_v1, %v1759_v61  ;;  %12164 = vmatprep.mubr.msk.bf16.mxu0 %vm281_vm0, %v14171_v3  ;;  %v10619_v7 = vld [vmem:[%s13027_s13 + $0x92] sm:$0xff] }
 0x146   : > { %v14194_v2 = vadd.f32 %v11882_v28, %v971_v53  ;;  %12124 = vmatprep.mubr.msk.bf16.mxu1 %vm281_vm0, %v13897_v12  ;;  %v1916_v4 = vpop.f32.mrf.mxu0  ;;  %12233 = vmatpush3.bf16.msra.mxu0 %v12892_v58  ;;  %v1760_v48 = vld [vmem:[#allocation2 + $0x38] sm:$0xff]  ;;  %v14214_v58 = vpack.c.bf16 %v10620_v59, %v10619_v7  ;;  %v973_v59 = vadd.f32 %v13963_v54, %v14103_v50 }
 0x147   : > { %v1530_v19 = vpop.f32.mrf.mxu1  ;;  %2065 = vst.msk [vmem:[#allocation2 + $0x30] sm:$0xff] %vm281_vm0, %v2033_v51  ;;  %v2031_v12 = vadd.f32 %v1916_v4, %v1757_v6  ;;  %12234 = vmatprep.subr.bf16.mxu0 %v12894_v39  ;;  %12193 = vmatpush3.bf16.msra.mxu1 %v12896_v43  ;;  %v14221_v43 = vpack.c.bf16 %v10622_v21, %v10621_v13  ;;  %v1758_v51 = vld [vmem:[#allocation2 + $0x28] sm:$0xff]  ;;  %v14226_v7 = vld [vmem:[%s16894_s5 + $0xd8] sm:$0xff]  }
 0x148   : > { %v14207_v53 = vadd.f32 %v1530_v19, %v969_v56  ;;  %v11923_v28 = vpop.f32.mrf.mxu0  ;;  %12194 = vmatprep.subr.bf16.mxu1 %v12897_v32  ;;  %v976_v54 = vadd.f32 %v13969_v36, %v14103_v50  ;;  %v10623_v21 = vld [vmem:[%s13027_s13 + $0xc2] sm:$0xff]  ;;  %v974_v36 = vadd.f32 %v13976_v63, %v14103_v50 }
 0x149   : > { %v11883_v55 = vpop.f32.mrf.mxu1  ;;  %2063 = vst.msk [vmem:[#allocation2 + $0x20] sm:$0xff] %vm281_vm0, %v2031_v12  ;;  %v2034_v61 = vadd.f32 %v11923_v28, %v1760_v48  ;;  %v1761_v12 = vld [vmem:[#allocation2 + $0x40] sm:$0xff] }
 0x14a   : > { %v14219_v56 = vadd.f32 %v11883_v55, %v972_v35  ;;  %v1919_v19 = vpop.f32.mrf.mxu0  ;;  %12235 = vmatpush3.bf16.msra.mxu0 %v12894_v39  ;;  %v1763_v39 = vld [vmem:[#allocation2 + $0x50] sm:$0xff]  ;;  %v10625_v48 = vld [vmem:[%s13027_s13 + $0xda] sm:$0xff]  ;;  %v10626_v28 = vld [vmem:[%s13027_s13 + $0xe2] sm:$0xff] }
 0x14b   : > { %v1533_v1 = vpop.f32.mrf.mxu1  ;;  %2066 = vst.msk [vmem:[#allocation2 + $0x38] sm:$0xff] %vm281_vm0, %v2034_v61  ;;  %v2032_v35 = vadd.f32 %v1919_v19, %v1758_v51  ;;  %12195 = vmatpush3.bf16.msra.mxu1 %v12897_v32  ;;  %12308 = vmatprep.subr.bf16.mxu0 %v14212_v27 }
 0x14c   : > { %v14231_v40 = vadd.f32 %v1533_v1, %v970_v42  ;;  %v11926_v4 = vpop.f32.mrf.mxu0  ;;  %12165 = vmatmul.mubr.msk.bf16.gmra.mxu0 %vm281_vm0, %v14214_v58  ;;  %v10624_v42 = vld [vmem:[%s13027_s13 + $0xca] sm:$0xff]  ;;  %12268 = vmatprep.subr.bf16.mxu1 %v14226_v7  ;;  %v1764_v1 = vld [vmem:[#allocation2 + $0x58] sm:$0xff] }
 0x14d   : > { %v11886_v6 = vpop.f32.mrf.mxu1  ;;  %12125 = vmatmul.mubr.msk.bf16.gmra.mxu1 %vm281_vm0, %v13936_v44  ;;  %2064 = vst.msk [vmem:[#allocation2 + $0x28] sm:$0xff] %vm281_vm0, %v2032_v35  ;;  %v2037_v32 = vadd.f32 %v11926_v4, %v1763_v39  ;;  %12168 = vmatprep.mubr.msk.bf16.mxu0 %vm281_vm0, %v14221_v43  ;;  %v14257_v19 = vpack.c.bf16 %v10624_v42, %v10623_v21 }
 0x14e   : > { %v14241_v13 = vadd.f32 %v11886_v6, %v975_v49  ;;  %12128 = vmatprep.mubr.msk.bf16.mxu1 %vm281_vm0, %v13939_v46  ;;  %v1932_v55 = vpop.f32.mrf.mxu0  ;;  %v979_v35 = vadd.f32 %v13979_v25, %v14103_v50  ;;  %v14264_v4 = vpack.c.bf16 %v10626_v28, %v10625_v48  ;;  %v10627_v28 = vld [vmem:[%s13027_s13 + $0xf2] sm:$0xff] }
 0x14f   : > { %v1546_v44 = vpop.f32.mrf.mxu1  ;;  %2069 = vst.msk [vmem:[#allocation2 + $0x50] sm:$0xff] %vm281_vm0, %v2037_v32  ;;  %v2035_v46 = vadd.f32 %v1932_v55, %v1761_v12  ;;  %v1762_v32 = vld [vmem:[#allocation2 + $0x48] sm:$0xff] }
 0x150   : > { %v14255_v49 = vadd.f32 %v1546_v44, %v973_v59  ;;  %v11927_v51 = vpop.f32.mrf.mxu0  ;;  %v977_v44 = vadd.f32 %v13992_v33, %v14103_v50  ;;  %v980_v33 = vadd.f32 %v13997_v16, %v14103_v50  ;;  %v978_v16 = vadd.f32 %v14004_v41, %v14103_v50 }
 0x151   : > { %v11887_v61 = vpop.f32.mrf.mxu1  ;;  %2067 = vst.msk [vmem:[#allocation2 + $0x40] sm:$0xff] %vm281_vm0, %v2035_v46  ;;  %v2038_v39 = vadd.f32 %v11927_v51, %v1764_v1  ;;  %v1765_v46 = vld [vmem:[#allocation2 + $0x60] sm:$0xff]  ;;  %v10629_v1 = vld [vmem:[%s13027_s13 + $0x10a] sm:$0xff]  ;;  %v10630_v51 = vld [vmem:[%s13027_s13 + $0x112] sm:$0xff] }
 0x152   : > { %v14262_v6 = vadd.f32 %v11887_v61, %v976_v54  ;;  %v1935_v59 = vpop.f32.mrf.mxu0  ;;  %v1767_v54 = vld [vmem:[#allocation2 + $0x70] sm:$0xff] }
 0x153   : > { %v1549_v63 = vpop.f32.mrf.mxu1  ;;  %2070 = vst.msk [vmem:[#allocation2 + $0x58] sm:$0xff] %vm281_vm0, %v2038_v39  ;;  %v2036_v25 = vadd.f32 %v1935_v59, %v1762_v32 }
 0x154   : > { %v14269_v21 = vadd.f32 %v1549_v63, %v974_v36  ;;  %v11930_v12 = vpop.f32.mrf.mxu0  ;;  %12169 = vmatmul.mubr.msk.bf16.gmra.mxu0 %vm281_vm0, %v14257_v19  ;;  %v10628_v36 = vld [vmem:[%s13027_s13 + $0xfa] sm:$0xff] }
 0x155   : > { %v11890_v42 = vpop.f32.mrf.mxu1  ;;  %12129 = vmatmul.mubr.msk.bf16.gmra.mxu1 %vm281_vm0, %v13971_v10  ;;  %2068 = vst.msk [vmem:[#allocation2 + $0x48] sm:$0xff] %vm281_vm0, %v2036_v25  ;;  %v2041_v48 = vadd.f32 %v11930_v12, %v1767_v54  ;;  %12172 = vmatprep.mubr.msk.bf16.mxu0 %vm281_vm0, %v14264_v4  ;;  %v14293_v59 = vpack.c.bf16 %v10628_v36, %v10627_v28 }
 0x156   : > { %v14278_v55 = vadd.f32 %v11890_v42, %v979_v35  ;;  %12132 = vmatprep.mubr.msk.bf16.mxu1 %vm281_vm0, %v13974_v0  ;;  %v1948_v61 = vpop.f32.mrf.mxu0  ;;  %v1768_v0 = vld [vmem:[#allocation2 + $0x78] sm:$0xff]  ;;  %v983_v25 = vadd.f32 %v14007_v8, %v14103_v50  ;;  %v14300_v12 = vpack.c.bf16 %v10630_v51, %v10629_v1  ;;  %v10631_v51 = vld [vmem:[%s13027_s13 + $0x122] sm:$0xff] }
 0x157   : > { %v1562_v10 = vpop.f32.mrf.mxu1  ;;  %2073 = vst.msk [vmem:[#allocation2 + $0x70] sm:$0xff] %vm281_vm0, %v2041_v48  ;;  %v2039_v39 = vadd.f32 %v1948_v61, %v1765_v46  ;;  %v1766_v48 = vld [vmem:[#allocation2 + $0x68] sm:$0xff] }
 0x158   : > { %v14291_v35 = vadd.f32 %v1562_v10, %v977_v44  ;;  %v11931_v32 = vpop.f32.mrf.mxu0  ;;  %v981_v10 = vadd.f32 %v14020_v62, %v14103_v50  ;;  %v984_v62 = vadd.f32 %v14025_v38, %v14103_v50  ;;  %v982_v38 = vadd.f32 %v14032_v34, %v14103_v50 }
 0x159   : > { %v11891_v63 = vpop.f32.mrf.mxu1  ;;  %2071 = vst.msk [vmem:[#allocation2 + $0x60] sm:$0xff] %vm281_vm0, %v2039_v39  ;;  %v2042_v54 = vadd.f32 %v11931_v32, %v1768_v0  ;;  %v1769_v39 = vld [vmem:[#allocation2 + $0x80] sm:$0xff] }
 0x15a   : > { %v14298_v42 = vadd.f32 %v11891_v63, %v980_v33  ;;  %v1951_v44 = vpop.f32.mrf.mxu0  ;;  %v1771_v33 = vld [vmem:[#allocation2 + $0x90] sm:$0xff]  ;;  %v10633_v0 = vld [vmem:[%s13027_s13 + $0x13a] sm:$0xff]  ;;  %v10634_v32 = vld [vmem:[%s13027_s13 + $0x142] sm:$0xff] }
 0x15b   : > { %v1565_v41 = vpop.f32.mrf.mxu1  ;;  %2074 = vst.msk [vmem:[#allocation2 + $0x78] sm:$0xff] %vm281_vm0, %v2042_v54  ;;  %v2040_v8 = vadd.f32 %v1951_v44, %v1766_v48 }
 0x15c   : > { %v14305_v28 = vadd.f32 %v1565_v41, %v978_v16  ;;  %v11934_v46 = vpop.f32.mrf.mxu0  ;;  %12173 = vmatmul.mubr.msk.bf16.gmra.mxu0 %vm281_vm0, %v14293_v59  ;;  %v10632_v16 = vld [vmem:[%s13027_s13 + $0x12a] sm:$0xff] }
 0x15d   : > { %v11894_v36 = vpop.f32.mrf.mxu1  ;;  %12133 = vmatmul.mubr.msk.bf16.gmra.mxu1 %vm281_vm0, %v13999_v31  ;;  %2072 = vst.msk [vmem:[#allocation2 + $0x68] sm:$0xff] %vm281_vm0, %v2040_v8  ;;  %v2045_v1 = vadd.f32 %v11934_v46, %v1771_v33  ;;  %12176 = vmatprep.mubr.msk.bf16.mxu0 %vm281_vm0, %v14300_v12  ;;  %v14329_v44 = vpack.c.bf16 %v10632_v16, %v10631_v51 }
 0x15e   : > { %v14314_v61 = vadd.f32 %v11894_v36, %v983_v25  ;;  %12136 = vmatprep.mubr.msk.bf16.mxu1 %vm281_vm0, %v14002_v60  ;;  %v1964_v63 = vpop.f32.mrf.mxu0  ;;  %v1772_v60 = vld [vmem:[#allocation2 + $0x98] sm:$0xff]  ;;  %v987_v8 = vadd.f32 %v14035_v20, %v14103_v50  ;;  %v14336_v46 = vpack.c.bf16 %v10634_v32, %v10633_v0 }
 0x15f   : > { %v1578_v31 = vpop.f32.mrf.mxu1  ;;  %2077 = vst.msk [vmem:[#allocation2 + $0x90] sm:$0xff] %vm281_vm0, %v2045_v1  ;;  %v2043_v54 = vadd.f32 %v1964_v63, %v1769_v39  ;;  %v1770_v1 = vld [vmem:[#allocation2 + $0x88] sm:$0xff]  ;;  %v10635_v32 = vld [vmem:[%s13027_s13 + $0x152] sm:$0xff] }
 0x160   : > { %v14327_v25 = vadd.f32 %v1578_v31, %v981_v10  ;;  %v11935_v48 = vpop.f32.mrf.mxu0  ;;  %v985_v31 = vadd.f32 %v14048_v47, %v14103_v50  ;;  %v988_v47 = vadd.f32 %v14053_v14, %v14103_v50  ;;  %v986_v14 = vadd.f32 %v14060_v11, %v14103_v50 }
 0x161   : > { %v11895_v41 = vpop.f32.mrf.mxu1  ;;  %2075 = vst.msk [vmem:[#allocation2 + $0x80] sm:$0xff] %vm281_vm0, %v2043_v54  ;;  %v2046_v33 = vadd.f32 %v11935_v48, %v1772_v60  ;;  %v1773_v54 = vld [vmem:[#allocation2 + $0xa0] sm:$0xff]  ;;  %v10637_v60 = vld [vmem:[%s13027_s13 + $0x16a] sm:$0xff]  ;;  %v10638_v48 = vld [vmem:[%s13027_s13 + $0x172] sm:$0xff] }
 0x162   : > { %v14334_v36 = vadd.f32 %v11895_v41, %v984_v62  ;;  %v1967_v10 = vpop.f32.mrf.mxu0  ;;  %v1775_v62 = vld [vmem:[#allocation2 + $0xb0] sm:$0xff] }
 0x163   : > { %v1581_v34 = vpop.f32.mrf.mxu1  ;;  %2078 = vst.msk [vmem:[#allocation2 + $0x98] sm:$0xff] %vm281_vm0, %v2046_v33  ;;  %v2044_v20 = vadd.f32 %v1967_v10, %v1770_v1 }
 0x164   : > { %v14341_v51 = vadd.f32 %v1581_v34, %v982_v38  ;;  %v11938_v39 = vpop.f32.mrf.mxu0  ;;  %12177 = vmatmul.mubr.msk.bf16.gmra.mxu0 %vm281_vm0, %v14329_v44  ;;  %v10636_v38 = vld [vmem:[%s13027_s13 + $0x15a] sm:$0xff] }
 0x165   : > { %v11898_v16 = vpop.f32.mrf.mxu1  ;;  %12137 = vmatmul.mubr.msk.bf16.gmra.mxu1 %vm281_vm0, %v14027_v30  ;;  %2076 = vst.msk [vmem:[#allocation2 + $0x88] sm:$0xff] %vm281_vm0, %v2044_v20  ;;  %v2049_v0 = vadd.f32 %v11938_v39, %v1775_v62  ;;  %12180 = vmatprep.mubr.msk.bf16.mxu0 %vm281_vm0, %v14336_v46  ;;  %v14365_v10 = vpack.c.bf16 %v10636_v38, %v10635_v32 }
 0x166   : > { %v14350_v63 = vadd.f32 %v11898_v16, %v987_v8  ;;  %12140 = vmatprep.mubr.msk.bf16.mxu1 %vm281_vm0, %v14030_v37  ;;  %v1980_v41 = vpop.f32.mrf.mxu0  ;;  %v1776_v37 = vld [vmem:[#allocation2 + $0xb8] sm:$0xff]  ;;  %v991_v20 = vadd.f32 %v14066_v15, %v14103_v50  ;;  %v14372_v39 = vpack.c.bf16 %v10638_v48, %v10637_v60 }
 0x167   : > { %v1594_v30 = vpop.f32.mrf.mxu1  ;;  %2081 = vst.msk [vmem:[#allocation2 + $0xb0] sm:$0xff] %vm281_vm0, %v2049_v0  ;;  %v2047_v33 = vadd.f32 %v1980_v41, %v1773_v54  ;;  %v1774_v0 = vld [vmem:[#allocation2 + $0xa8] sm:$0xff]  ;;  %v16925_v41 = vld [vmem:[#allocation4_spill] sm:$0xff] }
 0x168   : > { %v14363_v8 = vadd.f32 %v1594_v30, %v985_v31  ;;  %v11939_v1 = vpop.f32.mrf.mxu0  ;;  %16924 = vst [vmem:[#allocation10_spill] sm:$0xff] %v14372_v39  ;;  %v989_v30 = vadd.f32 %v14082_v22, %v14103_v50  ;;  %v992_v22 = vadd.f32 %v14087_v17, %v14103_v50  ;;  %v990_v17 = vadd.f32 %v14094_v24, %v14103_v50 }
 0x169   : > { %v11899_v34 = vpop.f32.mrf.mxu1  ;;  %2079 = vst.msk [vmem:[#allocation2 + $0xa0] sm:$0xff] %vm281_vm0, %v2047_v33  ;;  %v2050_v62 = vadd.f32 %v11939_v1, %v1776_v37  ;;  %v10639_v33 = vld [vmem:[%s13027_s13 + $0x182] sm:$0xff] }
 0x16a   : > { %v14370_v16 = vadd.f32 %v11899_v34, %v988_v47  ;;  %v1983_v31 = vpop.f32.mrf.mxu0  ;;  %v1779_v47 = vld [vmem:[#allocation2 + $0xd0] sm:$0xff]  ;;  %v1777_v1 = vld [vmem:[#allocation2 + $0xc0] sm:$0xff] }
 0x16b   : > { %v1597_v11 = vpop.f32.mrf.mxu1  ;;  %2082 = vst.msk [vmem:[#allocation2 + $0xb8] sm:$0xff] %vm281_vm0, %v2050_v62  ;;  %v2048_v15 = vadd.f32 %v1983_v31, %v1774_v0  ;;  %v10640_v34 = vld [vmem:[%s13027_s13 + $0x18a] sm:$0xff]  ;;  %v10698_v0 = vld [vmem:[%s13027_s13 + $0x38] sm:$0xff] }
 0x16c   : > { %v14377_v32 = vadd.f32 %v1597_v11, %v986_v14  ;;  %v11942_v54 = vpop.f32.mrf.mxu0  ;;  %12181 = vmatmul.mubr.msk.bf16.gmra.mxu0 %vm281_vm0, %v14365_v10  ;;  %v16927_v14 = vld [vmem:[#allocation5_spill] sm:$0xff]  ;;  %v10697_v11 = vld [vmem:[%s13027_s13 + $0x30] sm:$0xff] }
 0x16d   : > { %v11902_v38 = vpop.f32.mrf.mxu1  ;;  %12141 = vmatmul.mubr.msk.bf16.gmra.mxu1 %vm281_vm0, %v16925_v41  ;;  %2080 = vst.msk [vmem:[#allocation2 + $0xa8] sm:$0xff] %vm281_vm0, %v2048_v15  ;;  %v2053_v48 = vadd.f32 %v11942_v54, %v1779_v47  ;;  %12184 = vmatprep.mubr.msk.bf16.mxu0 %vm281_vm0, %v14372_v39  ;;  %v14401_v54 = vpack.c.bf16 %v10640_v34, %v10639_v33 }
 0x16e   : > { %v14386_v60 = vadd.f32 %v11902_v38, %v991_v20  ;;  %12144 = vmatprep.mubr.msk.bf16.mxu1 %vm281_vm0, %v16927_v14  ;;  %v1996_v62 = vpop.f32.mrf.mxu0  ;;  %v1780_v38 = vld [vmem:[#allocation2 + $0xd8] sm:$0xff]  ;;  %v995_v41 = vadd.f32 %v14097_v57, %v14103_v50 }
 0x16f   : > { %v1610_v37 = vpop.f32.mrf.mxu1  ;;  %2085 = vst.msk [vmem:[#allocation2 + $0xd0] sm:$0xff] %vm281_vm0, %v2053_v48  ;;  %v2051_v31 = vadd.f32 %v1996_v62, %v1777_v1  ;;  %v1778_v48 = vld [vmem:[#allocation2 + $0xc8] sm:$0xff]  ;;  %v1783_v1 = vld [vmem:[#allocation2 + $0xf0] sm:$0xff]  ;;  %v996_v62 = vadd.f32 %v14117_v23, %v14103_v50  ;;  %v994_v23 = vadd.f32 %v14124_v45, %v14103_v50 }
 0x170   : > { %16926 = vst [vmem:[#allocation4_spill] sm:$0xff] %v14386_v60  ;;  %v14399_v20 = vadd.f32 %v1610_v37, %v989_v30  ;;  %v11943_v47 = vpop.f32.mrf.mxu0  ;;  %v14408_v60 = vpack.c.bf16 %v10698_v0, %v10697_v11  ;;  %v993_v37 = vadd.f32 %v14112_v29, %v14103_v50  ;;  %v16929_v11 = vld [vmem:[#allocation6_spill] sm:$0xff] }
 0x171   : > { %v11903_v15 = vpop.f32.mrf.mxu1  ;;  %2083 = vst.msk [vmem:[#allocation2 + $0xc0] sm:$0xff] %vm281_vm0, %v2051_v31  ;;  %v2054_v39 = vadd.f32 %v11943_v47, %v1780_v38  ;;  %v10700_v0 = vld [vmem:[%s13027_s13 + $0x50] sm:$0xff]  ;;  %v1781_v31 = vld [vmem:[#allocation2 + $0xe0] sm:$0xff] }
 0x172   : > { %v14406_v14 = vadd.f32 %v11903_v15, %v992_v22  ;;  %16928 = vst [vmem:[#allocation5_spill] sm:$0xff] %v14408_v60  ;;  %v1999_v30 = vpop.f32.mrf.mxu0 }
 0x173   : > { %v1613_v24 = vpop.f32.mrf.mxu1  ;;  %2086 = vst.msk [vmem:[#allocation2 + $0xd8] sm:$0xff] %vm281_vm0, %v2054_v39  ;;  %v2052_v57 = vadd.f32 %v1999_v30, %v1778_v48  ;;  %v1784_v30 = vld [vmem:[#allocation2 + $0xf8] sm:$0xff] }
 0x174   : > { %v14413_v33 = vadd.f32 %v1613_v24, %v990_v17  ;;  %v11946_v22 = vpop.f32.mrf.mxu0  ;;  %12185 = vmatmul.mubr.msk.bf16.gmra.mxu0 %vm281_vm0, %v14401_v54  ;;  %v10702_v24 = vld [vmem:[%s13027_s13 + $0x68] sm:$0xff] }
 0x175   : > { %v11906_v34 = vpop.f32.mrf.mxu1  ;;  %12145 = vmatmul.mubr.msk.bf16.gmra.mxu1 %vm281_vm0, %v14089_v26  ;;  %2084 = vst.msk [vmem:[#allocation2 + $0xc8] sm:$0xff] %vm281_vm0, %v2052_v57  ;;  %v2057_v39 = vadd.f32 %v11946_v22, %v1783_v1  ;;  %12236 = vmatprep.mubr.msk.bf16.mxu0 %vm281_vm0, %v14408_v60  ;;  %v10699_v26 = vld [vmem:[%s13027_s13 + $0x48] sm:$0xff] }
 0x176   : > { %v14422_v29 = vadd.f32 %v11906_v34, %v995_v41  ;;  %12196 = vmatprep.mubr.msk.bf16.mxu1 %vm281_vm0, %v16929_v11  ;;  %v2012_v15 = vpop.f32.mrf.mxu0  ;;  %v10701_v41 = vld [vmem:[%s13027_s13 + $0x60] sm:$0xff]  ;;  %v14437_v34 = vpack.c.bf16 %v10700_v0, %v10699_v26  ;;  %v1782_v60 = vld [vmem:[#allocation2 + $0xe8] sm:$0xff]  ;;  %v2432_v0 = vld [vmem:[#allocation2 + $0x10] sm:$0xff] }
 0x177   : > { %v1626_v17 = vpop.f32.mrf.mxu1  ;;  %2089 = vst.msk [vmem:[#allocation2 + $0xf0] sm:$0xff] %vm281_vm0, %v2057_v39  ;;  %v2055_v47 = vadd.f32 %v2012_v15, %v1781_v31  ;;  %v14442_v45 = vpack.c.bf16 %v10702_v24, %v10701_v41  ;;  %v16931_v31 = vld [vmem:[#allocation7_spill] sm:$0xff]  ;;  %v12903_v15 = vld [vmem:[%s16894_s5 + $0xd0] sm:$0xff]   ;;  %v16934_v41 = vld [vmem:[#allocation8_spill] sm:$0xff] }
 0x178   : > { %v14433_v38 = vadd.f32 %v1626_v17, %v993_v37  ;;  %v11947_v57 = vpop.f32.mrf.mxu0  ;;  %v12899_v37 = vld [vmem:[%s16890_s1 + $0xf0] sm:$0xff]   ;;  %v10703_v24 = vld [vmem:[%s13027_s13 + $0x78] sm:$0xff] }
 0x179   : > { %v11907_v48 = vpop.f32.mrf.mxu1  ;;  %2087 = vst.msk [vmem:[#allocation2 + $0xe0] sm:$0xff] %vm281_vm0, %v2055_v47  ;;  %v2058_v22 = vadd.f32 %v11947_v57, %v1784_v30  ;;  %16930 = vst [vmem:[#allocation6_spill] sm:$0xff] %v14442_v45  ;;  %v16932_v47 = vld [vmem:[#allocation9_spill] sm:$0xff]  ;;  %v10705_v30 = vld [vmem:[%s13027_s13 + $0x90] sm:$0xff] }
 0x17a   : > { %v14440_v1 = vadd.f32 %v11907_v48, %v996_v62  ;;  %v2015_v50 = vpop.f32.mrf.mxu0  ;;  %v10704_v48 = vld [vmem:[%s13027_s13 + $0x80] sm:$0xff] }
 0x17b   : > { %v1629_v11 = vpop.f32.mrf.mxu1  ;;  %2090 = vst.msk [vmem:[#allocation2 + $0xf8] sm:$0xff] %vm281_vm0, %v2058_v22  ;;  %v2056_v26 = vadd.f32 %v2015_v50, %v1782_v60  ;;  %v2430_v22 = vld [vmem:[#allocation2] sm:$0xff]  ;;  %v10706_v50 = vld [vmem:[%s13027_s13 + $0x98] sm:$0xff] }
 0x17c   : > { %v14448_v39 = vadd.f32 %v1629_v11, %v994_v23  ;;  %v11998_v17 = vpop.f32.mrf.mxu0  ;;  %12237 = vmatmul.mubr.msk.bf16.vlgmr.msra.gmra.mxu0 %vm281_vm0, %v14437_v34 }
 0x17d   : > { %v11958_v62 = vpop.f32.mrf.mxu1  ;;  %12197 = vmatmul.mubr.msk.bf16.vlgmr.msra.gmra.mxu1 %vm281_vm0, %v16931_v31  ;;  %2088 = vst.msk [vmem:[#allocation2 + $0xe8] sm:$0xff] %vm281_vm0, %v2056_v26  ;;  %v2706_v60 = vadd.f32 %v11998_v17, %v2432_v0  ;;  %12309 = vmatpush3.bf16.msra.mxu0 %v14212_v27  ;;  %v12900_v26 = vld [vmem:[%s16890_s1 + $0xe8] sm:$0xff]   ;;  %v2433_v17 = vld [vmem:[#allocation2 + $0x18] sm:$0xff] }
 0x17e   : > { %v14459_v23 = vadd.f32 %v11958_v62, %v16932_v47  ;;  %12200 = vmatprep.mubr.msk.bf16.mxu1 %vm281_vm0, %v16934_v41  ;;  %v2577_v11 = vpop.f32.mrf.mxu0  ;;  %12240 = vmatprep.mubr.msk.bf16.mxu0 %vm281_vm0, %v14442_v45  ;;  %v14478_v47 = vpack.c.bf16 %v10704_v48, %v10703_v24 }
 0x17f   : > { %v2190_v57 = vpop.f32.mrf.mxu1  ;;  %12310 = vmatprep.subr.bf16.mxu0 %v12899_v37  ;;  %2738 = vst.msk [vmem:[#allocation2 + $0x10] sm:$0xff] %vm281_vm0, %v2706_v60  ;;  %v2704_v62 = vadd.f32 %v2577_v11, %v2430_v22  ;;  %12269 = vmatpush3.bf16.msra.mxu1 %v14226_v7  ;;  %v2431_v60 = vld [vmem:[#allocation2 + $0x8] sm:$0xff]  ;;  %v10708_v11 = vld [vmem:[%s13027_s13 + $0xb0] sm:$0xff] }
 0x180   : > { %16933 = vst [vmem:[#allocation7_spill] sm:$0xff] %v14459_v23  ;;  %v14475_v27 = vadd.f32 %v2190_v57, %v14161_v52  ;;  %v11999_v31 = vpop.f32.mrf.mxu0  ;;  %12270 = vmatprep.subr.bf16.mxu1 %v12903_v15  ;;  %v14484_v23 = vpack.c.bf16 %v10706_v50, %v10705_v30  ;;  %v12904_v7 = vld [vmem:[%s16894_s5 + $0xc8] sm:$0xff]   ;;  %v2436_v30 = vld [vmem:[#allocation2 + $0x30] sm:$0xff] }
 0x181   : > { %v11959_v0 = vpop.f32.mrf.mxu1  ;;  %2736 = vst.msk [vmem:[#allocation2] sm:$0xff] %vm281_vm0, %v2704_v62  ;;  %v2707_v45 = vadd.f32 %v11999_v31, %v2433_v17  ;;  %12311 = vmatpush3.bf16.msra.mxu0 %v12899_v37  ;;  %v12902_v37 = vld [vmem:[%s16890_s1 + $0xe0] sm:$0xff]   ;;  %v10710_v31 = vld [vmem:[%s13027_s13 + $0xc8] sm:$0xff] }
 0x182   : > { %v14482_v41 = vadd.f32 %v11959_v0, %v14169_v18  ;;  %v2580_v57 = vpop.f32.mrf.mxu0  ;;  %12312 = vmatprep.subr.bf16.mxu0 %v12900_v26  ;;  %v2434_v62 = vld [vmem:[#allocation2 + $0x20] sm:$0xff] }
 0x183   : > { %v2193_v52 = vpop.f32.mrf.mxu1  ;;  %2739 = vst.msk [vmem:[#allocation2 + $0x18] sm:$0xff] %vm281_vm0, %v2707_v45  ;;  %v2705_v18 = vadd.f32 %v2580_v57, %v2431_v60  ;;  %12271 = vmatpush3.bf16.msra.mxu1 %v12903_v15  ;;  %v10709_v17 = vld [vmem:[%s13027_s13 + $0xc0] sm:$0xff]  ;;  %v2437_v57 = vld [vmem:[#allocation2 + $0x38] sm:$0xff] }
 0x184   : > { %v14491_v24 = vadd.f32 %v2193_v52, %v14179_v5  ;;  %v12002_v22 = vpop.f32.mrf.mxu0  ;;  %12241 = vmatmul.mubr.msk.bf16.gmra.mxu0 %vm281_vm0, %v14478_v47  ;;  %v12905_v5 = vld [vmem:[%s16894_s5 + $0xc0] sm:$0xff]   ;;  %12272 = vmatprep.subr.bf16.mxu1 %v12904_v7 }
 0x185   : > { %v11962_v48 = vpop.f32.mrf.mxu1  ;;  %12201 = vmatmul.mubr.msk.bf16.gmra.mxu1 %vm281_vm0, %v14164_v9  ;;  %2737 = vst.msk [vmem:[#allocation2 + $0x8] sm:$0xff] %vm281_vm0, %v2705_v18  ;;  %v2710_v15 = vadd.f32 %v12002_v22, %v2436_v30  ;;  %12244 = vmatprep.mubr.msk.bf16.mxu0 %vm281_vm0, %v14484_v23  ;;  %v10707_v9 = vld [vmem:[%s13027_s13 + $0xa8] sm:$0xff]  ;;  %v14530_v30 = vpack.c.bf16 %v10710_v31, %v10709_v17  ;;  %v10712_v17 = vld [vmem:[%s13027_s13 + $0xe0] sm:$0xff] }
 0x186   : > { %v14505_v45 = vadd.f32 %v11962_v48, %v14194_v2  ;;  %12204 = vmatprep.mubr.msk.bf16.mxu1 %vm281_vm0, %v14171_v3  ;;  %v2593_v0 = vpop.f32.mrf.mxu0  ;;  %12313 = vmatpush3.bf16.msra.mxu0 %v12900_v26  ;;  %v14522_v3 = vld [vmem:[%s16890_s1 + $0x118] sm:$0xff]   ;;  %v14524_v48 = vpack.c.bf16 %v10708_v11, %v10707_v9  ;;  %v2435_v22 = vld [vmem:[#allocation2 + $0x28] sm:$0xff] }
 0x187   : > { %v2206_v50 = vpop.f32.mrf.mxu1  ;;  %2742 = vst.msk [vmem:[#allocation2 + $0x30] sm:$0xff] %vm281_vm0, %v2710_v15  ;;  %v2708_v52 = vadd.f32 %v2593_v0, %v2434_v62  ;;  %12314 = vmatprep.subr.bf16.mxu0 %v12902_v37  ;;  %12273 = vmatpush3.bf16.msra.mxu1 %v12904_v7 }
 0x188   : > { %v14517_v2 = vadd.f32 %v2206_v50, %v14207_v53  ;;  %v12003_v18 = vpop.f32.mrf.mxu0  ;;  %12274 = vmatprep.subr.bf16.mxu1 %v12905_v5  ;;  %v14535_v50 = vld [vmem:[%s16894_s5 + $0xf8] sm:$0xff]  }
 0x189   : > { %v11963_v60 = vpop.f32.mrf.mxu1  ;;  %2740 = vst.msk [vmem:[#allocation2 + $0x20] sm:$0xff] %vm281_vm0, %v2708_v52  ;;  %v2711_v53 = vadd.f32 %v12003_v18, %v2437_v57  ;;  %v2438_v52 = vld [vmem:[#allocation2 + $0x40] sm:$0xff]  ;;  %v10714_v57 = vld [vmem:[%s13027_s13 + $0xf8] sm:$0xff] }
 0x18a   : > { %v14528_v26 = vadd.f32 %v11963_v60, %v14219_v56  ;;  %v2596_v15 = vpop.f32.mrf.mxu0  ;;  %12315 = vmatpush3.bf16.msra.mxu0 %v12902_v37  ;;  %v2440_v37 = vld [vmem:[#allocation2 + $0x50] sm:$0xff] }
 0x18b   : > { %v2209_v7 = vpop.f32.mrf.mxu1  ;;  %2743 = vst.msk [vmem:[#allocation2 + $0x38] sm:$0xff] %vm281_vm0, %v2711_v53  ;;  %v2709_v56 = vadd.f32 %v2596_v15, %v2435_v22  ;;  %12275 = vmatpush3.bf16.msra.mxu1 %v12905_v5  ;;  %12388 = vmatprep.subr.bf16.mxu0 %v14522_v3  ;;  %v10711_v5 = vld [vmem:[%s13027_s13 + $0xd8] sm:$0xff]  ;;  %v10713_v60 = vld [vmem:[%s13027_s13 + $0xf0] sm:$0xff] }
 0x18c   : > { %v14539_v9 = vadd.f32 %v2209_v7, %v14231_v40  ;;  %v12006_v62 = vpop.f32.mrf.mxu0  ;;  %12245 = vmatmul.mubr.msk.bf16.gmra.mxu0 %vm281_vm0, %v14524_v48  ;;  %12348 = vmatprep.subr.bf16.mxu1 %v14535_v50  ;;  %v14563_v22 = vpack.c.bf16 %v10712_v17, %v10711_v5 }
 0x18d   : > { %v11966_v11 = vpop.f32.mrf.mxu1  ;;  %12205 = vmatmul.mubr.msk.bf16.gmra.mxu1 %vm281_vm0, %v14214_v58  ;;  %2741 = vst.msk [vmem:[#allocation2 + $0x28] sm:$0xff] %vm281_vm0, %v2709_v56  ;;  %v2714_v0 = vadd.f32 %v12006_v62, %v2440_v37  ;;  %12248 = vmatprep.mubr.msk.bf16.mxu0 %vm281_vm0, %v14530_v30  ;;  %v2439_v62 = vld [vmem:[#allocation2 + $0x48] sm:$0xff] }
 0x18e   : > { %v14548_v40 = vadd.f32 %v11966_v11, %v14241_v13  ;;  %12208 = vmatprep.mubr.msk.bf16.mxu1 %vm281_vm0, %v14221_v43  ;;  %v2609_v58 = vpop.f32.mrf.mxu0  ;;  %v2441_v43 = vld [vmem:[#allocation2 + $0x58] sm:$0xff]  ;;  %v14569_v11 = vpack.c.bf16 %v10714_v57, %v10713_v60  ;;  %v10716_v60 = vld [vmem:[%s13027_s13 + $0x110] sm:$0xff] }
 0x18f   : > { %v2222_v31 = vpop.f32.mrf.mxu1  ;;  %2746 = vst.msk [vmem:[#allocation2 + $0x50] sm:$0xff] %vm281_vm0, %v2714_v0  ;;  %v2712_v18 = vadd.f32 %v2609_v58, %v2438_v52 }
 0x190   : > { %v14561_v13 = vadd.f32 %v2222_v31, %v14255_v49  ;;  %v12007_v7 = vpop.f32.mrf.mxu0  ;;  %v2444_v31 = vld [vmem:[#allocation2 + $0x70] sm:$0xff] }
 0x191   : > { %v11967_v53 = vpop.f32.mrf.mxu1  ;;  %2744 = vst.msk [vmem:[#allocation2 + $0x40] sm:$0xff] %vm281_vm0, %v2712_v18  ;;  %v2715_v56 = vadd.f32 %v12007_v7, %v2441_v43  ;;  %v2442_v18 = vld [vmem:[#allocation2 + $0x60] sm:$0xff]  ;;  %v10718_v43 = vld [vmem:[%s13027_s13 + $0x128] sm:$0xff] }
 0x192   : > { %v14567_v15 = vadd.f32 %v11967_v53, %v14262_v6  ;;  %v2612_v49 = vpop.f32.mrf.mxu0  ;;  %v10717_v53 = vld [vmem:[%s13027_s13 + $0x120] sm:$0xff] }
 0x193   : > { %v2225_v37 = vpop.f32.mrf.mxu1  ;;  %2747 = vst.msk [vmem:[#allocation2 + $0x58] sm:$0xff] %vm281_vm0, %v2715_v56  ;;  %v2713_v5 = vadd.f32 %v2612_v49, %v2439_v62 }
 0x194   : > { %v14573_v0 = vadd.f32 %v2225_v37, %v14269_v21  ;;  %v12010_v6 = vpop.f32.mrf.mxu0  ;;  %12249 = vmatmul.mubr.msk.bf16.gmra.mxu0 %vm281_vm0, %v14563_v22  ;;  %v10715_v21 = vld [vmem:[%s13027_s13 + $0x108] sm:$0xff]  ;;  %v2445_v37 = vld [vmem:[#allocation2 + $0x78] sm:$0xff] }
 0x195   : > { %v11970_v17 = vpop.f32.mrf.mxu1  ;;  %12209 = vmatmul.mubr.msk.bf16.gmra.mxu1 %vm281_vm0, %v14257_v19  ;;  %2745 = vst.msk [vmem:[#allocation2 + $0x48] sm:$0xff] %vm281_vm0, %v2713_v5  ;;  %v2718_v58 = vadd.f32 %v12010_v6, %v2444_v31  ;;  %12252 = vmatprep.mubr.msk.bf16.mxu0 %vm281_vm0, %v14569_v11  ;;  %v2443_v6 = vld [vmem:[#allocation2 + $0x68] sm:$0xff] }
 0x196   : > { %v14581_v52 = vadd.f32 %v11970_v17, %v14278_v55  ;;  %12212 = vmatprep.mubr.msk.bf16.mxu1 %vm281_vm0, %v14264_v4  ;;  %v2625_v19 = vpop.f32.mrf.mxu0  ;;  %v14595_v4 = vpack.c.bf16 %v10716_v60, %v10715_v21  ;;  %v14601_v17 = vpack.c.bf16 %v10718_v43, %v10717_v53  ;;  %v10720_v53 = vld [vmem:[%s13027_s13 + $0x140] sm:$0xff] }
 0x197   : > { %v2238_v57 = vpop.f32.mrf.mxu1  ;;  %2750 = vst.msk [vmem:[#allocation2 + $0x70] sm:$0xff] %vm281_vm0, %v2718_v58  ;;  %v2716_v55 = vadd.f32 %v2625_v19, %v2442_v18 }
 0x198   : > { %v14593_v7 = vadd.f32 %v2238_v57, %v14291_v35  ;;  %v12011_v62 = vpop.f32.mrf.mxu0  ;;  %v2448_v57 = vld [vmem:[#allocation2 + $0x90] sm:$0xff] }
 0x199   : > { %v11971_v56 = vpop.f32.mrf.mxu1  ;;  %2748 = vst.msk [vmem:[#allocation2 + $0x60] sm:$0xff] %vm281_vm0, %v2716_v55  ;;  %v2719_v5 = vadd.f32 %v12011_v62, %v2445_v37  ;;  %v2446_v55 = vld [vmem:[#allocation2 + $0x80] sm:$0xff]  ;;  %v10722_v37 = vld [vmem:[%s13027_s13 + $0x158] sm:$0xff] }
 0x19a   : > { %v14599_v49 = vadd.f32 %v11971_v56, %v14298_v42  ;;  %v2628_v35 = vpop.f32.mrf.mxu0  ;;  %v10721_v56 = vld [vmem:[%s13027_s13 + $0x150] sm:$0xff] }
 0x19b   : > { %v2241_v31 = vpop.f32.mrf.mxu1  ;;  %2751 = vst.msk [vmem:[#allocation2 + $0x78] sm:$0xff] %vm281_vm0, %v2719_v5  ;;  %v2717_v21 = vadd.f32 %v2628_v35, %v2443_v6 }
 0x19c   : > { %v14605_v58 = vadd.f32 %v2241_v31, %v14305_v28  ;;  %v12014_v42 = vpop.f32.mrf.mxu0  ;;  %12253 = vmatmul.mubr.msk.bf16.gmra.mxu0 %vm281_vm0, %v14595_v4  ;;  %v10719_v28 = vld [vmem:[%s13027_s13 + $0x138] sm:$0xff] }
 0x19d   : > { %v11974_v60 = vpop.f32.mrf.mxu1  ;;  %12213 = vmatmul.mubr.msk.bf16.gmra.mxu1 %vm281_vm0, %v14293_v59  ;;  %2749 = vst.msk [vmem:[#allocation2 + $0x68] sm:$0xff] %vm281_vm0, %v2717_v21  ;;  %v2722_v19 = vadd.f32 %v12014_v42, %v2448_v57  ;;  %12256 = vmatprep.mubr.msk.bf16.mxu0 %vm281_vm0, %v14601_v17  ;;  %v2449_v31 = vld [vmem:[#allocation2 + $0x98] sm:$0xff]  ;;  %v2447_v42 = vld [vmem:[#allocation2 + $0x88] sm:$0xff] }
 0x19e   : > { %v14613_v18 = vadd.f32 %v11974_v60, %v14314_v61  ;;  %12216 = vmatprep.mubr.msk.bf16.mxu1 %vm281_vm0, %v14300_v12  ;;  %v2641_v59 = vpop.f32.mrf.mxu0  ;;  %v14627_v12 = vpack.c.bf16 %v10720_v53, %v10719_v28  ;;  %v14633_v60 = vpack.c.bf16 %v10722_v37, %v10721_v56  ;;  %v10724_v56 = vld [vmem:[%s13027_s13 + $0x170] sm:$0xff] }
 0x19f   : > { %v2254_v43 = vpop.f32.mrf.mxu1  ;;  %2754 = vst.msk [vmem:[#allocation2 + $0x90] sm:$0xff] %vm281_vm0, %v2722_v19  ;;  %v2720_v61 = vadd.f32 %v2641_v59, %v2446_v55 }
 0x1a0   : > { %v14625_v62 = vadd.f32 %v2254_v43, %v14327_v25  ;;  %v12015_v6 = vpop.f32.mrf.mxu0  ;;  %v2452_v43 = vld [vmem:[#allocation2 + $0xb0] sm:$0xff] }
 0x1a1   : > { %v11975_v5 = vpop.f32.mrf.mxu1  ;;  %2752 = vst.msk [vmem:[#allocation2 + $0x80] sm:$0xff] %vm281_vm0, %v2720_v61  ;;  %v2723_v21 = vadd.f32 %v12015_v6, %v2449_v31  ;;  %v2450_v61 = vld [vmem:[#allocation2 + $0xa0] sm:$0xff]  ;;  %v10726_v31 = vld [vmem:[%s13027_s13 + $0x188] sm:$0xff] }
 0x1a2   : > { %v14631_v35 = vadd.f32 %v11975_v5, %v14334_v36  ;;  %v2644_v25 = vpop.f32.mrf.mxu0  ;;  %v10725_v5 = vld [vmem:[%s13027_s13 + $0x180] sm:$0xff] }
 0x1a3   : > { %v2257_v57 = vpop.f32.mrf.mxu1  ;;  %2755 = vst.msk [vmem:[#allocation2 + $0x98] sm:$0xff] %vm281_vm0, %v2723_v21  ;;  %v2721_v28 = vadd.f32 %v2644_v25, %v2447_v42 }
 0x1a4   : > { %v14637_v19 = vadd.f32 %v2257_v57, %v14341_v51  ;;  %v12018_v36 = vpop.f32.mrf.mxu0  ;;  %12257 = vmatmul.mubr.msk.bf16.gmra.mxu0 %vm281_vm0, %v14627_v12  ;;  %v10723_v51 = vld [vmem:[%s13027_s13 + $0x168] sm:$0xff]  ;;  %v2453_v57 = vld [vmem:[#allocation2 + $0xb8] sm:$0xff] }
 0x1a5   : > { %v11978_v53 = vpop.f32.mrf.mxu1  ;;  %12217 = vmatmul.mubr.msk.bf16.gmra.mxu1 %vm281_vm0, %v14329_v44  ;;  %2753 = vst.msk [vmem:[#allocation2 + $0x88] sm:$0xff] %vm281_vm0, %v2721_v28  ;;  %v2726_v59 = vadd.f32 %v12018_v36, %v2452_v43  ;;  %12260 = vmatprep.mubr.msk.bf16.mxu0 %vm281_vm0, %v14633_v60  ;;  %v2451_v36 = vld [vmem:[#allocation2 + $0xa8] sm:$0xff] }
 0x1a6   : > { %v14645_v55 = vadd.f32 %v11978_v53, %v14350_v63  ;;  %12220 = vmatprep.mubr.msk.bf16.mxu1 %vm281_vm0, %v14336_v46  ;;  %v2657_v44 = vpop.f32.mrf.mxu0  ;;  %v14659_v46 = vpack.c.bf16 %v10724_v56, %v10723_v51  ;;  %v14665_v53 = vpack.c.bf16 %v10726_v31, %v10725_v5  ;;  %v10727_v31 = vld [vmem:[%s13027_s13 + $0x198] sm:$0xff] }
 0x1a7   : > { %v2270_v37 = vpop.f32.mrf.mxu1  ;;  %2758 = vst.msk [vmem:[#allocation2 + $0xb0] sm:$0xff] %vm281_vm0, %v2726_v59  ;;  %v2724_v63 = vadd.f32 %v2657_v44, %v2450_v61  ;;  %v16936_v61 = vld [vmem:[#allocation4_spill] sm:$0xff] }
 0x1a8   : > { %v14657_v6 = vadd.f32 %v2270_v37, %v14363_v8  ;;  %v12019_v42 = vpop.f32.mrf.mxu0  ;;  %16935 = vst [vmem:[#allocation9_spill] sm:$0xff] %v14665_v53  ;;  %v2456_v37 = vld [vmem:[#allocation2 + $0xd0] sm:$0xff] }
 0x1a9   : > { %v11979_v21 = vpop.f32.mrf.mxu1  ;;  %2756 = vst.msk [vmem:[#allocation2 + $0xa0] sm:$0xff] %vm281_vm0, %v2724_v63  ;;  %v2727_v28 = vadd.f32 %v12019_v42, %v2453_v57  ;;  %v10728_v63 = vld [vmem:[%s13027_s13 + $0x1a0] sm:$0xff]  ;;  %v10785_v42 = vld [vmem:[%s13027_s13 + $0x31] sm:$0xff] }
 0x1aa   : > { %v14663_v25 = vadd.f32 %v11979_v21, %v14370_v16  ;;  %v2660_v8 = vpop.f32.mrf.mxu0  ;;  %v2454_v57 = vld [vmem:[#allocation2 + $0xc0] sm:$0xff] }
 0x1ab   : > { %v2273_v43 = vpop.f32.mrf.mxu1  ;;  %2759 = vst.msk [vmem:[#allocation2 + $0xb8] sm:$0xff] %vm281_vm0, %v2727_v28  ;;  %v2725_v51 = vadd.f32 %v2660_v8, %v2451_v36  ;;  %v10786_v28 = vld [vmem:[%s13027_s13 + $0x39] sm:$0xff] }
 0x1ac   : > { %v14669_v59 = vadd.f32 %v2273_v43, %v14377_v32  ;;  %v12022_v16 = vpop.f32.mrf.mxu0  ;;  %12261 = vmatmul.mubr.msk.bf16.gmra.mxu0 %vm281_vm0, %v14659_v46  ;;  %v16937_v32 = vld [vmem:[#allocation10_spill] sm:$0xff] }
 0x1ad   : > { %v11982_v56 = vpop.f32.mrf.mxu1  ;;  %12221 = vmatmul.mubr.msk.bf16.gmra.mxu1 %vm281_vm0, %v14365_v10  ;;  %2757 = vst.msk [vmem:[#allocation2 + $0xa8] sm:$0xff] %vm281_vm0, %v2725_v51  ;;  %v2730_v5 = vadd.f32 %v12022_v16, %v2456_v37  ;;  %12264 = vmatprep.mubr.msk.bf16.mxu0 %vm281_vm0, %v14665_v53  ;;  %v2457_v51 = vld [vmem:[#allocation2 + $0xd8] sm:$0xff]  ;;  %v14691_v37 = vpack.c.bf16 %v10728_v63, %v10727_v31 }
 0x1ae   : > { %v14677_v44 = vadd.f32 %v11982_v56, %v16936_v61  ;;  %12224 = vmatprep.mubr.msk.bf16.mxu1 %vm281_vm0, %v16937_v32  ;;  %v2673_v10 = vpop.f32.mrf.mxu0  ;;  %v14697_v32 = vpack.c.bf16 %v10786_v28, %v10785_v42  ;;  %v10788_v28 = vld [vmem:[%s13027_s13 + $0x51] sm:$0xff] }
 0x1af   : > { %v2286_v21 = vpop.f32.mrf.mxu1  ;;  %2762 = vst.msk [vmem:[#allocation2 + $0xd0] sm:$0xff] %vm281_vm0, %v2730_v5  ;;  %v2728_v36 = vadd.f32 %v2673_v10, %v2454_v57  ;;  %v2455_v5 = vld [vmem:[#allocation2 + $0xc8] sm:$0xff]  ;;  %v2460_v57 = vld [vmem:[#allocation2 + $0xf0] sm:$0xff] }
 0x1b0   : > { %v14689_v43 = vadd.f32 %v2286_v21, %v14399_v20  ;;  %v12023_v56 = vpop.f32.mrf.mxu0  ;;  %16938 = vst [vmem:[#allocation8_spill] sm:$0xff] %v14697_v32 }
 0x1b1   : > { %v11983_v8 = vpop.f32.mrf.mxu1  ;;  %2760 = vst.msk [vmem:[#allocation2 + $0xc0] sm:$0xff] %vm281_vm0, %v2728_v36  ;;  %v2731_v61 = vadd.f32 %v12023_v56, %v2457_v51 }
 0x1b2   : > { %v14695_v16 = vadd.f32 %v11983_v8, %v14406_v14  ;;  %v2676_v20 = vpop.f32.mrf.mxu0 }
 0x1b3   : > { %v2289_v53 = vpop.f32.mrf.mxu1  ;;  %2763 = vst.msk [vmem:[#allocation2 + $0xd8] sm:$0xff] %vm281_vm0, %v2731_v61  ;;  %v2729_v31 = vadd.f32 %v2676_v20, %v2455_v5  ;;  %v10790_v61 = vld [vmem:[%s13027_s13 + $0x69] sm:$0xff]  ;;  %v2461_v20 = vld [vmem:[#allocation2 + $0xf8] sm:$0xff] }
 0x1b4   : > { %v14701_v21 = vadd.f32 %v2289_v53, %v14413_v33  ;;  %v12026_v10 = vpop.f32.mrf.mxu0  ;;  %12265 = vmatmul.mubr.msk.bf16.gmra.mxu0 %vm281_vm0, %v14691_v37  ;;  %v16940_v33 = vld [vmem:[#allocation5_spill] sm:$0xff] }
 0x1b5   : > { %v11986_v63 = vpop.f32.mrf.mxu1  ;;  %12225 = vmatmul.mubr.msk.bf16.gmra.mxu1 %vm281_vm0, %v14401_v54  ;;  %2761 = vst.msk [vmem:[#allocation2 + $0xc8] sm:$0xff] %vm281_vm0, %v2729_v31  ;;  %v2734_v42 = vadd.f32 %v12026_v10, %v2460_v57  ;;  %12316 = vmatprep.mubr.msk.bf16.mxu0 %vm281_vm0, %v14697_v32  ;;  %v10787_v53 = vld [vmem:[%s13027_s13 + $0x49] sm:$0xff]  ;;  %v2458_v54 = vld [vmem:[#allocation2 + $0xe0] sm:$0xff] }
 0x1b6   : > { %v14709_v14 = vadd.f32 %v11986_v63, %v14422_v29  ;;  %12276 = vmatprep.mubr.msk.bf16.mxu1 %vm281_vm0, %v16940_v33  ;;  %v2689_v8 = vpop.f32.mrf.mxu0  ;;  %v10789_v29 = vld [vmem:[%s13027_s13 + $0x61] sm:$0xff]  ;;  %v14723_v63 = vpack.c.bf16 %v10788_v28, %v10787_v53 }
 0x1b7   : > { %v2302_v36 = vpop.f32.mrf.mxu1  ;;  %2766 = vst.msk [vmem:[#allocation2 + $0xf0] sm:$0xff] %vm281_vm0, %v2734_v42  ;;  %v2732_v56 = vadd.f32 %v2689_v8, %v2458_v54  ;;  %v2459_v32 = vld [vmem:[#allocation2 + $0xe8] sm:$0xff]  ;;  %v12911_v8 = vld [vmem:[%s16894_s5 + $0xf0] sm:$0xff]  }
 0x1b8   : > { %16939 = vst [vmem:[#allocation4_spill] sm:$0xff] %v14709_v14  ;;  %v14719_v51 = vadd.f32 %v2302_v36, %v14433_v38  ;;  %v12027_v31 = vpop.f32.mrf.mxu0  ;;  %v14729_v14 = vpack.c.bf16 %v10790_v61, %v10789_v29  ;;  %v12907_v38 = vld [vmem:[%s16890_s1 + $0x110] sm:$0xff]   ;;  %v10791_v61 = vld [vmem:[%s13027_s13 + $0x79] sm:$0xff] }
 0x1b9   : > { %v11987_v5 = vpop.f32.mrf.mxu1  ;;  %2764 = vst.msk [vmem:[#allocation2 + $0xe0] sm:$0xff] %vm281_vm0, %v2732_v56  ;;  %v2735_v10 = vadd.f32 %v12027_v31, %v2461_v20  ;;  %v3108_v36 = vld [vmem:[#allocation2 + $0x10] sm:$0xff]  ;;  %v16942_v56 = vld [vmem:[#allocation7_spill] sm:$0xff]  ;;  %v3106_v31 = vld [vmem:[#allocation2] sm:$0xff] }
 0x1ba   : > { %v14727_v57 = vadd.f32 %v11987_v5, %v14440_v1  ;;  %v2692_v42 = vpop.f32.mrf.mxu0  ;;  %16941 = vst [vmem:[#allocation10_spill] sm:$0xff] %v14729_v14  ;;  %v16944_v29 = vld [vmem:[#allocation6_spill] sm:$0xff] }
 0x1bb   : > { %v2305_v33 = vpop.f32.mrf.mxu1  ;;  %2767 = vst.msk [vmem:[#allocation2 + $0xf8] sm:$0xff] %vm281_vm0, %v2735_v10  ;;  %v2733_v1 = vadd.f32 %v2692_v42, %v2459_v32  ;;  %v10793_v5 = vld [vmem:[%s13027_s13 + $0x91] sm:$0xff]  ;;  %v12908_v42 = vld [vmem:[%s16890_s1 + $0x108] sm:$0xff]  }
 0x1bc   : > { %v14736_v53 = vadd.f32 %v2305_v33, %v14448_v39  ;;  %v12078_v54 = vpop.f32.mrf.mxu0  ;;  %12317 = vmatmul.mubr.msk.bf16.vlgmr.msra.gmra.mxu0 %vm281_vm0, %v14723_v63  ;;  %v10794_v33 = vld [vmem:[%s13027_s13 + $0x99] sm:$0xff] }
 0x1bd   : > { %v12038_v28 = vpop.f32.mrf.mxu1  ;;  %12277 = vmatmul.mubr.msk.bf16.vlgmr.msra.gmra.mxu1 %vm281_vm0, %v14437_v34  ;;  %2765 = vst.msk [vmem:[#allocation2 + $0xe8] sm:$0xff] %vm281_vm0, %v2733_v1  ;;  %v3382_v32 = vadd.f32 %v12078_v54, %v3108_v36  ;;  %12389 = vmatpush3.bf16.msra.mxu0 %v14522_v3  ;;  %v10792_v34 = vld [vmem:[%s13027_s13 + $0x81] sm:$0xff]  ;;  %v3109_v36 = vld [vmem:[#allocation2 + $0x18] sm:$0xff] }
 0x1be   : > { %v14747_v39 = vadd.f32 %v12038_v28, %v16942_v56  ;;  %12280 = vmatprep.mubr.msk.bf16.mxu1 %vm281_vm0, %v16944_v29  ;;  %v3253_v10 = vpop.f32.mrf.mxu0  ;;  %12320 = vmatprep.mubr.msk.bf16.mxu0 %vm281_vm0, %v14729_v14  ;;  %v14766_v56 = vpack.c.bf16 %v10792_v34, %v10791_v61 }
 0x1bf   : > { %v2867_v20 = vpop.f32.mrf.mxu1  ;;  %12390 = vmatprep.subr.bf16.mxu0 %v12907_v38  ;;  %3414 = vst.msk [vmem:[#allocation2 + $0x10] sm:$0xff] %vm281_vm0, %v3382_v32  ;;  %v3380_v1 = vadd.f32 %v3253_v10, %v3106_v31  ;;  %12349 = vmatpush3.bf16.msra.mxu1 %v14535_v50  ;;  %v3107_v32 = vld [vmem:[#allocation2 + $0x8] sm:$0xff]  ;;  %v10796_v10 = vld [vmem:[%s13027_s13 + $0xb1] sm:$0xff] }
 0x1c0   : > { %16943 = vst [vmem:[#allocation5_spill] sm:$0xff] %v14747_v39  ;;  %v14763_v3 = vadd.f32 %v2867_v20, %v14475_v27  ;;  %v12079_v54 = vpop.f32.mrf.mxu0  ;;  %12350 = vmatprep.subr.bf16.mxu1 %v12911_v8  ;;  %v14772_v39 = vpack.c.bf16 %v10794_v33, %v10793_v5  ;;  %v12912_v50 = vld [vmem:[%s16894_s5 + $0xe8] sm:$0xff]   ;;  %v3112_v5 = vld [vmem:[#allocation2 + $0x30] sm:$0xff] }
 0x1c1   : > { %v12039_v28 = vpop.f32.mrf.mxu1  ;;  %3412 = vst.msk [vmem:[#allocation2] sm:$0xff] %vm281_vm0, %v3380_v1  ;;  %v3383_v14 = vadd.f32 %v12079_v54, %v3109_v36  ;;  %12391 = vmatpush3.bf16.msra.mxu0 %v12907_v38  ;;  %v12910_v38 = vld [vmem:[%s16890_s1 + $0x100] sm:$0xff]   ;;  %v10798_v54 = vld [vmem:[%s13027_s13 + $0xc9] sm:$0xff] }
 0x1c2   : > { %v14770_v29 = vadd.f32 %v12039_v28, %v14482_v41  ;;  %v3256_v20 = vpop.f32.mrf.mxu0  ;;  %12392 = vmatprep.subr.bf16.mxu0 %v12908_v42  ;;  %v3110_v1 = vld [vmem:[#allocation2 + $0x20] sm:$0xff] }
 0x1c3   : > { %v2870_v27 = vpop.f32.mrf.mxu1  ;;  %3415 = vst.msk [vmem:[#allocation2 + $0x18] sm:$0xff] %vm281_vm0, %v3383_v14  ;;  %v3381_v41 = vadd.f32 %v3256_v20, %v3107_v32  ;;  %12351 = vmatpush3.bf16.msra.mxu1 %v12911_v8  ;;  %v10797_v36 = vld [vmem:[%s13027_s13 + $0xc1] sm:$0xff]  ;;  %v3113_v32 = vld [vmem:[#allocation2 + $0x38] sm:$0xff] }
 0x1c4   : > { %v14779_v61 = vadd.f32 %v2870_v27, %v14491_v24  ;;  %v12082_v31 = vpop.f32.mrf.mxu0  ;;  %12321 = vmatmul.mubr.msk.bf16.gmra.mxu0 %vm281_vm0, %v14766_v56  ;;  %v12913_v24 = vld [vmem:[%s16894_s5 + $0xe0] sm:$0xff]   ;;  %12352 = vmatprep.subr.bf16.mxu1 %v12912_v50 }
 0x1c5   : > { %v12042_v34 = vpop.f32.mrf.mxu1  ;;  %12281 = vmatmul.mubr.msk.bf16.gmra.mxu1 %vm281_vm0, %v14478_v47  ;;  %3413 = vst.msk [vmem:[#allocation2 + $0x8] sm:$0xff] %vm281_vm0, %v3381_v41  ;;  %v3386_v8 = vadd.f32 %v12082_v31, %v3112_v5  ;;  %12324 = vmatprep.mubr.msk.bf16.mxu0 %vm281_vm0, %v14772_v39  ;;  %v10795_v47 = vld [vmem:[%s13027_s13 + $0xa9] sm:$0xff]  ;;  %v14813_v5 = vpack.c.bf16 %v10798_v54, %v10797_v36  ;;  %v3114_v54 = vld [vmem:[#allocation2 + $0x40] sm:$0xff] }
 0x1c6   : > { %v14793_v14 = vadd.f32 %v12042_v34, %v14505_v45  ;;  %12284 = vmatprep.mubr.msk.bf16.mxu1 %vm281_vm0, %v14484_v23  ;;  %v3269_v28 = vpop.f32.mrf.mxu0  ;;  %12393 = vmatpush3.bf16.msra.mxu0 %v12908_v42  ;;  %v14807_v41 = vpack.c.bf16 %v10796_v10, %v10795_v47 }
 0x1c7   : > { %v2883_v33 = vpop.f32.mrf.mxu1  ;;  %3418 = vst.msk [vmem:[#allocation2 + $0x30] sm:$0xff] %vm281_vm0, %v3386_v8  ;;  %v3384_v27 = vadd.f32 %v3269_v28, %v3110_v1  ;;  %12394 = vmatprep.subr.bf16.mxu0 %v12910_v38  ;;  %12353 = vmatpush3.bf16.msra.mxu1 %v12912_v50  ;;  %v14818_v50 = vld [vmem:[%s16894_s5 + $0x118] sm:$0xff]   ;;  %v10800_v28 = vld [vmem:[%s13027_s13 + $0xe1] sm:$0xff] }
 0x1c8   : > { %v14805_v45 = vadd.f32 %v2883_v33, %v14517_v2  ;;  %v12083_v20 = vpop.f32.mrf.mxu0  ;;  %12354 = vmatprep.subr.bf16.mxu1 %v12913_v24  ;;  %v3111_v2 = vld [vmem:[#allocation2 + $0x28] sm:$0xff]  ;;  %v3116_v33 = vld [vmem:[#allocation2 + $0x50] sm:$0xff] }
 0x1c9   : > { %v12043_v23 = vpop.f32.mrf.mxu1  ;;  %3416 = vst.msk [vmem:[#allocation2 + $0x20] sm:$0xff] %vm281_vm0, %v3384_v27  ;;  %v3387_v42 = vadd.f32 %v12083_v20, %v3113_v32  ;;  %v10801_v27 = vld [vmem:[%s13027_s13 + $0xf1] sm:$0xff] }
 0x1ca   : > { %v14811_v34 = vadd.f32 %v12043_v23, %v14528_v26  ;;  %v3272_v8 = vpop.f32.mrf.mxu0  ;;  %12395 = vmatpush3.bf16.msra.mxu0 %v12910_v38  ;;  %v10802_v23 = vld [vmem:[%s13027_s13 + $0xf9] sm:$0xff] }
 0x1cb   : > { %v2886_v31 = vpop.f32.mrf.mxu1  ;;  %3419 = vst.msk [vmem:[#allocation2 + $0x38] sm:$0xff] %vm281_vm0, %v3387_v42  ;;  %v3385_v26 = vadd.f32 %v3272_v8, %v3111_v2  ;;  %12355 = vmatpush3.bf16.msra.mxu1 %v12913_v24  ;;  %v10799_v24 = vld [vmem:[%s13027_s13 + $0xd9] sm:$0xff] }
 0x1cc   : > { %v14822_v47 = vadd.f32 %v2886_v31, %v14539_v9  ;;  %v12086_v1 = vpop.f32.mrf.mxu0  ;;  %12325 = vmatmul.mubr.msk.bf16.gmra.mxu0 %vm281_vm0, %v14807_v41  ;;  %12428 = vmatprep.subr.bf16.mxu1 %v14818_v50  ;;  %v14845_v31 = vpack.c.bf16 %v10800_v28, %v10799_v24  ;;  %v3120_v28 = vld [vmem:[#allocation2 + $0x70] sm:$0xff] }
 0x1cd   : > { %v12046_v10 = vpop.f32.mrf.mxu1  ;;  %12285 = vmatmul.mubr.msk.bf16.gmra.mxu1 %vm281_vm0, %v14524_v48  ;;  %3417 = vst.msk [vmem:[#allocation2 + $0x28] sm:$0xff] %vm281_vm0, %v3385_v26  ;;  %v3390_v9 = vadd.f32 %v12086_v1, %v3116_v33  ;;  %12328 = vmatprep.mubr.msk.bf16.mxu0 %vm281_vm0, %v14813_v5  ;;  %v14851_v26 = vpack.c.bf16 %v10802_v23, %v10801_v27  ;;  %v3115_v33 = vld [vmem:[#allocation2 + $0x48] sm:$0xff]  ;;  %v3118_v23 = vld [vmem:[#allocation2 + $0x60] sm:$0xff] }
 0x1ce   : > { %v14830_v38 = vadd.f32 %v12046_v10, %v14548_v40  ;;  %12288 = vmatprep.mubr.msk.bf16.mxu1 %vm281_vm0, %v14530_v30  ;;  %v3285_v48 = vpop.f32.mrf.mxu0  ;;  %v3117_v30 = vld [vmem:[#allocation2 + $0x58] sm:$0xff] }
 0x1cf   : > { %v2899_v36 = vpop.f32.mrf.mxu1  ;;  %3422 = vst.msk [vmem:[#allocation2 + $0x50] sm:$0xff] %vm281_vm0, %v3390_v9  ;;  %v3388_v32 = vadd.f32 %v3285_v48, %v3114_v54  ;;  %v10804_v48 = vld [vmem:[%s13027_s13 + $0x111] sm:$0xff] }
 0x1d0   : > { %v14843_v40 = vadd.f32 %v2899_v36, %v14561_v13  ;;  %v12087_v42 = vpop.f32.mrf.mxu0 }
 0x1d1   : > { %v12047_v20 = vpop.f32.mrf.mxu1  ;;  %3420 = vst.msk [vmem:[#allocation2 + $0x40] sm:$0xff] %vm281_vm0, %v3388_v32  ;;  %v3391_v8 = vadd.f32 %v12087_v42, %v3117_v30  ;;  %v10805_v32 = vld [vmem:[%s13027_s13 + $0x121] sm:$0xff] }
 0x1d2   : > { %v14849_v2 = vadd.f32 %v12047_v20, %v14567_v15  ;;  %v3288_v13 = vpop.f32.mrf.mxu0  ;;  %v10806_v20 = vld [vmem:[%s13027_s13 + $0x129] sm:$0xff] }
 0x1d3   : > { %v2902_v10 = vpop.f32.mrf.mxu1  ;;  %3423 = vst.msk [vmem:[#allocation2 + $0x58] sm:$0xff] %vm281_vm0, %v3391_v8  ;;  %v3389_v9 = vadd.f32 %v3288_v13, %v3115_v33  ;;  %v3121_v8 = vld [vmem:[#allocation2 + $0x78] sm:$0xff] }
 0x1d4   : > { %v14855_v1 = vadd.f32 %v2902_v10, %v14573_v0  ;;  %v12090_v15 = vpop.f32.mrf.mxu0  ;;  %12329 = vmatmul.mubr.msk.bf16.gmra.mxu0 %vm281_vm0, %v14845_v31  ;;  %v10803_v0 = vld [vmem:[%s13027_s13 + $0x109] sm:$0xff] }
 0x1d5   : > { %v12050_v24 = vpop.f32.mrf.mxu1  ;;  %12289 = vmatmul.mubr.msk.bf16.gmra.mxu1 %vm281_vm0, %v14563_v22  ;;  %3421 = vst.msk [vmem:[#allocation2 + $0x48] sm:$0xff] %vm281_vm0, %v3389_v9  ;;  %v3394_v54 = vadd.f32 %v12090_v15, %v3120_v28  ;;  %12332 = vmatprep.mubr.msk.bf16.mxu0 %vm281_vm0, %v14851_v26  ;;  %v14883_v9 = vpack.c.bf16 %v10806_v20, %v10805_v32  ;;  %v3119_v28 = vld [vmem:[#allocation2 + $0x68] sm:$0xff]  ;;  %v3122_v20 = vld [vmem:[#allocation2 + $0x80] sm:$0xff] }
 0x1d6   : > { %v14863_v36 = vadd.f32 %v12050_v24, %v14581_v52  ;;  %12292 = vmatprep.mubr.msk.bf16.mxu1 %vm281_vm0, %v14569_v11  ;;  %v3301_v22 = vpop.f32.mrf.mxu0  ;;  %v14877_v11 = vpack.c.bf16 %v10804_v48, %v10803_v0  ;;  %v3124_v48 = vld [vmem:[#allocation2 + $0x90] sm:$0xff] }
 0x1d7   : > { %v2915_v27 = vpop.f32.mrf.mxu1  ;;  %3426 = vst.msk [vmem:[#allocation2 + $0x70] sm:$0xff] %vm281_vm0, %v3394_v54  ;;  %v3392_v52 = vadd.f32 %v3301_v22, %v3118_v23  ;;  %v10808_v22 = vld [vmem:[%s13027_s13 + $0x141] sm:$0xff] }
 0x1d8   : > { %v14875_v30 = vadd.f32 %v2915_v27, %v14593_v7  ;;  %v12091_v10 = vpop.f32.mrf.mxu0 }
 0x1d9   : > { %v12051_v42 = vpop.f32.mrf.mxu1  ;;  %3424 = vst.msk [vmem:[#allocation2 + $0x60] sm:$0xff] %vm281_vm0, %v3392_v52  ;;  %v3395_v13 = vadd.f32 %v12091_v10, %v3121_v8  ;;  %v10809_v52 = vld [vmem:[%s13027_s13 + $0x151] sm:$0xff] }
 0x1da   : > { %v14881_v33 = vadd.f32 %v12051_v42, %v14599_v49  ;;  %v3304_v7 = vpop.f32.mrf.mxu0  ;;  %v10810_v42 = vld [vmem:[%s13027_s13 + $0x159] sm:$0xff] }
 0x1db   : > { %v2918_v24 = vpop.f32.mrf.mxu1  ;;  %3427 = vst.msk [vmem:[#allocation2 + $0x78] sm:$0xff] %vm281_vm0, %v3395_v13  ;;  %v3393_v54 = vadd.f32 %v3304_v7, %v3119_v28  ;;  %v3125_v13 = vld [vmem:[#allocation2 + $0x98] sm:$0xff] }
 0x1dc   : > { %v14887_v15 = vadd.f32 %v2918_v24, %v14605_v58  ;;  %v12094_v49 = vpop.f32.mrf.mxu0  ;;  %12333 = vmatmul.mubr.msk.bf16.gmra.mxu0 %vm281_vm0, %v14877_v11  ;;  %v10807_v58 = vld [vmem:[%s13027_s13 + $0x139] sm:$0xff] }
 0x1dd   : > { %v12054_v0 = vpop.f32.mrf.mxu1  ;;  %12293 = vmatmul.mubr.msk.bf16.gmra.mxu1 %vm281_vm0, %v14595_v4  ;;  %3425 = vst.msk [vmem:[#allocation2 + $0x68] sm:$0xff] %vm281_vm0, %v3393_v54  ;;  %v3398_v23 = vadd.f32 %v12094_v49, %v3124_v48  ;;  %12336 = vmatprep.mubr.msk.bf16.mxu0 %vm281_vm0, %v14883_v9  ;;  %v14915_v54 = vpack.c.bf16 %v10810_v42, %v10809_v52  ;;  %v3123_v48 = vld [vmem:[#allocation2 + $0x88] sm:$0xff]  ;;  %v3126_v42 = vld [vmem:[#allocation2 + $0xa0] sm:$0xff] }
 0x1de   : > { %v14895_v27 = vadd.f32 %v12054_v0, %v14613_v18  ;;  %12296 = vmatprep.mubr.msk.bf16.mxu1 %vm281_vm0, %v14601_v17  ;;  %v3317_v4 = vpop.f32.mrf.mxu0  ;;  %v14909_v17 = vpack.c.bf16 %v10808_v22, %v10807_v58  ;;  %v3128_v22 = vld [vmem:[#allocation2 + $0xb0] sm:$0xff] }
 0x1df   : > { %v2931_v32 = vpop.f32.mrf.mxu1  ;;  %3430 = vst.msk [vmem:[#allocation2 + $0x90] sm:$0xff] %vm281_vm0, %v3398_v23  ;;  %v3396_v18 = vadd.f32 %v3317_v4, %v3122_v20  ;;  %v10812_v4 = vld [vmem:[%s13027_s13 + $0x171] sm:$0xff] }
 0x1e0   : > { %v14907_v8 = vadd.f32 %v2931_v32, %v14625_v62  ;;  %v12095_v24 = vpop.f32.mrf.mxu0 }
 0x1e1   : > { %v12055_v10 = vpop.f32.mrf.mxu1  ;;  %3428 = vst.msk [vmem:[#allocation2 + $0x80] sm:$0xff] %vm281_vm0, %v3396_v18  ;;  %v3399_v7 = vadd.f32 %v12095_v24, %v3125_v13  ;;  %v10813_v18 = vld [vmem:[%s13027_s13 + $0x181] sm:$0xff] }
 0x1e2   : > { %v14913_v28 = vadd.f32 %v12055_v10, %v14631_v35  ;;  %v3320_v62 = vpop.f32.mrf.mxu0  ;;  %v10814_v10 = vld [vmem:[%s13027_s13 + $0x189] sm:$0xff] }
 0x1e3   : > { %v2934_v0 = vpop.f32.mrf.mxu1  ;;  %3431 = vst.msk [vmem:[#allocation2 + $0x98] sm:$0xff] %vm281_vm0, %v3399_v7  ;;  %v3397_v23 = vadd.f32 %v3320_v62, %v3123_v48  ;;  %v3129_v7 = vld [vmem:[#allocation2 + $0xb8] sm:$0xff] }
 0x1e4   : > { %v14919_v49 = vadd.f32 %v2934_v0, %v14637_v19  ;;  %v12098_v35 = vpop.f32.mrf.mxu0  ;;  %12337 = vmatmul.mubr.msk.bf16.gmra.mxu0 %vm281_vm0, %v14909_v17  ;;  %v10811_v19 = vld [vmem:[%s13027_s13 + $0x169] sm:$0xff] }
 0x1e5   : > { %v12058_v58 = vpop.f32.mrf.mxu1  ;;  %12297 = vmatmul.mubr.msk.bf16.gmra.mxu1 %vm281_vm0, %v14627_v12  ;;  %3429 = vst.msk [vmem:[#allocation2 + $0x88] sm:$0xff] %vm281_vm0, %v3397_v23  ;;  %v3402_v20 = vadd.f32 %v12098_v35, %v3128_v22  ;;  %12340 = vmatprep.mubr.msk.bf16.mxu0 %vm281_vm0, %v14915_v54  ;;  %v14947_v23 = vpack.c.bf16 %v10814_v10, %v10813_v18  ;;  %v3127_v22 = vld [vmem:[#allocation2 + $0xa8] sm:$0xff] }
 0x1e6   : > { %v14927_v32 = vadd.f32 %v12058_v58, %v14645_v55  ;;  %12300 = vmatprep.mubr.msk.bf16.mxu1 %vm281_vm0, %v14633_v60  ;;  %v3333_v12 = vpop.f32.mrf.mxu0  ;;  %v14941_v60 = vpack.c.bf16 %v10812_v4, %v10811_v19  ;;  %v3132_v4 = vld [vmem:[#allocation2 + $0xd0] sm:$0xff]  ;;  %v10816_v18 = vld [vmem:[%s13027_s13 + $0x1a1] sm:$0xff] }
 0x1e7   : > { %v2947_v52 = vpop.f32.mrf.mxu1  ;;  %3434 = vst.msk [vmem:[#allocation2 + $0xb0] sm:$0xff] %vm281_vm0, %v3402_v20  ;;  %v3400_v55 = vadd.f32 %v3333_v12, %v3126_v42  ;;  %v10815_v12 = vld [vmem:[%s13027_s13 + $0x199] sm:$0xff] }
 0x1e8   : > { %v14939_v13 = vadd.f32 %v2947_v52, %v14657_v6  ;;  %v12099_v0 = vpop.f32.mrf.mxu0 }
 0x1e9   : > { %v12059_v24 = vpop.f32.mrf.mxu1  ;;  %3432 = vst.msk [vmem:[#allocation2 + $0xa0] sm:$0xff] %vm281_vm0, %v3400_v55  ;;  %v3403_v62 = vadd.f32 %v12099_v0, %v3129_v7  ;;  %v3130_v55 = vld [vmem:[#allocation2 + $0xc0] sm:$0xff] }
 0x1ea   : > { %v14945_v48 = vadd.f32 %v12059_v24, %v14663_v25  ;;  %v3336_v6 = vpop.f32.mrf.mxu0  ;;  %v10873_v24 = vld [vmem:[%s13027_s13 + $0x32] sm:$0xff]  ;;  %v10874_v7 = vld [vmem:[%s13027_s13 + $0x3a] sm:$0xff] }
 0x1eb   : > { %v2950_v58 = vpop.f32.mrf.mxu1  ;;  %3435 = vst.msk [vmem:[#allocation2 + $0xb8] sm:$0xff] %vm281_vm0, %v3403_v62  ;;  %v3401_v20 = vadd.f32 %v3336_v6, %v3127_v22  ;;  %v14973_v6 = vpack.c.bf16 %v10816_v18, %v10815_v12 }
 0x1ec   : > { %v14951_v35 = vadd.f32 %v2950_v58, %v14669_v59  ;;  %v12102_v25 = vpop.f32.mrf.mxu0  ;;  %12341 = vmatmul.mubr.msk.bf16.gmra.mxu0 %vm281_vm0, %v14941_v60  ;;  %v16945_v59 = vld [vmem:[#allocation9_spill] sm:$0xff]  ;;  %v3133_v58 = vld [vmem:[#allocation2 + $0xd8] sm:$0xff] }
 0x1ed   : > { %v12062_v19 = vpop.f32.mrf.mxu1  ;;  %12301 = vmatmul.mubr.msk.bf16.gmra.mxu1 %vm281_vm0, %v14659_v46  ;;  %3433 = vst.msk [vmem:[#allocation2 + $0xa8] sm:$0xff] %vm281_vm0, %v3401_v20  ;;  %v3406_v42 = vadd.f32 %v12102_v25, %v3132_v4  ;;  %12344 = vmatprep.mubr.msk.bf16.mxu0 %vm281_vm0, %v14947_v23  ;;  %v14979_v4 = vpack.c.bf16 %v10874_v7, %v10873_v24  ;;  %v10875_v7 = vld [vmem:[%s13027_s13 + $0x4a] sm:$0xff] }
 0x1ee   : > { %v14959_v52 = vadd.f32 %v12062_v19, %v14677_v44  ;;  %12304 = vmatprep.mubr.msk.bf16.mxu1 %vm281_vm0, %v16945_v59  ;;  %v3349_v46 = vpop.f32.mrf.mxu0 }
 0x1ef   : > { %v2963_v10 = vpop.f32.mrf.mxu1  ;;  %3438 = vst.msk [vmem:[#allocation2 + $0xd0] sm:$0xff] %vm281_vm0, %v3406_v42  ;;  %v3404_v44 = vadd.f32 %v3349_v46, %v3130_v55  ;;  %16946 = vst [vmem:[#allocation7_spill] sm:$0xff] %v14979_v4  ;;  %v3131_v42 = vld [vmem:[#allocation2 + $0xc8] sm:$0xff]  ;;  %v16947_v55 = vld [vmem:[#allocation4_spill] sm:$0xff] }
 0x1f0   : > { %v14971_v0 = vadd.f32 %v2963_v10, %v14689_v43  ;;  %v12103_v22 = vpop.f32.mrf.mxu0  ;;  %v3136_v10 = vld [vmem:[#allocation2 + $0xf0] sm:$0xff] }
 0x1f1   : > { %v12063_v62 = vpop.f32.mrf.mxu1  ;;  %3436 = vst.msk [vmem:[#allocation2 + $0xc0] sm:$0xff] %vm281_vm0, %v3404_v44  ;;  %v3407_v19 = vadd.f32 %v12103_v22, %v3133_v58  ;;  %v10876_v44 = vld [vmem:[%s13027_s13 + $0x52] sm:$0xff]  ;;  %v3134_v58 = vld [vmem:[#allocation2 + $0xe0] sm:$0xff] }
 0x1f2   : > { %v14977_v20 = vadd.f32 %v12063_v62, %v14695_v16  ;;  %v3352_v43 = vpop.f32.mrf.mxu0  ;;  %v10877_v22 = vld [vmem:[%s13027_s13 + $0x62] sm:$0xff] }
 0x1f3   : > { %v2966_v25 = vpop.f32.mrf.mxu1  ;;  %3439 = vst.msk [vmem:[#allocation2 + $0xd8] sm:$0xff] %vm281_vm0, %v3407_v19  ;;  %v3405_v12 = vadd.f32 %v3352_v43, %v3131_v42  ;;  %v10878_v19 = vld [vmem:[%s13027_s13 + $0x6a] sm:$0xff] }
 0x1f4   : > { %v14983_v59 = vadd.f32 %v2966_v25, %v14701_v21  ;;  %v12106_v16 = vpop.f32.mrf.mxu0  ;;  %12345 = vmatmul.mubr.msk.bf16.gmra.mxu0 %vm281_vm0, %v14973_v6  ;;  %v16949_v21 = vld [vmem:[#allocation8_spill] sm:$0xff] }
 0x1f5   : > { %v12066_v18 = vpop.f32.mrf.mxu1  ;;  %12305 = vmatmul.mubr.msk.bf16.gmra.mxu1 %vm281_vm0, %v14691_v37  ;;  %3437 = vst.msk [vmem:[#allocation2 + $0xc8] sm:$0xff] %vm281_vm0, %v3405_v12  ;;  %v3410_v24 = vadd.f32 %v12106_v16, %v3136_v10  ;;  %12396 = vmatprep.mubr.msk.bf16.mxu0 %vm281_vm0, %v14979_v4  ;;  %v3137_v12 = vld [vmem:[#allocation2 + $0xf8] sm:$0xff]  ;;  %v15005_v10 = vpack.c.bf16 %v10876_v44, %v10875_v7  ;;  %v12915_v44 = vld [vmem:[%s16894_s5 + $0x110] sm:$0xff]  }
 0x1f6   : > { %v14991_v46 = vadd.f32 %v12066_v18, %v16947_v55  ;;  %12356 = vmatprep.mubr.msk.bf16.mxu1 %vm281_vm0, %v16949_v21  ;;  %v3365_v37 = vpop.f32.mrf.mxu0  ;;  %v15011_v21 = vpack.c.bf16 %v10878_v19, %v10877_v22  ;;  %v10879_v22 = vld [vmem:[%s13027_s13 + $0x7a] sm:$0xff]  ;;  %v10880_v19 = vld [vmem:[%s13027_s13 + $0x82] sm:$0xff] }
 0x1f7   : > { %v2979_v62 = vpop.f32.mrf.mxu1  ;;  %3442 = vst.msk [vmem:[#allocation2 + $0xf0] sm:$0xff] %vm281_vm0, %v3410_v24  ;;  %v3408_v42 = vadd.f32 %v3365_v37, %v3134_v58  ;;  %v16951_v37 = vld [vmem:[#allocation10_spill] sm:$0xff] }
 0x1f8   : > { %16948 = vst [vmem:[#allocation6_spill] sm:$0xff] %v14991_v46  ;;  %v15003_v25 = vadd.f32 %v2979_v62, %v14719_v51  ;;  %v12107_v18 = vpop.f32.mrf.mxu0  ;;  %v3135_v46 = vld [vmem:[#allocation2 + $0xe8] sm:$0xff]  ;;  %v3784_v62 = vld [vmem:[#allocation2 + $0x10] sm:$0xff] }
 0x1f9   : > { %v12067_v43 = vpop.f32.mrf.mxu1  ;;  %3440 = vst.msk [vmem:[#allocation2 + $0xe0] sm:$0xff] %vm281_vm0, %v3408_v42  ;;  %v3411_v55 = vadd.f32 %v12107_v18, %v3137_v12  ;;  %v10881_v12 = vld [vmem:[%s13027_s13 + $0x92] sm:$0xff]  ;;  %v10882_v18 = vld [vmem:[%s13027_s13 + $0x9a] sm:$0xff] }
 0x1fa   : > { %v15009_v16 = vadd.f32 %v12067_v43, %v14727_v57  ;;  %v3368_v24 = vpop.f32.mrf.mxu0  ;;  %v3782_v43 = vld [vmem:[#allocation2] sm:$0xff] }
 0x1fb   : > { %v2982_v4 = vpop.f32.mrf.mxu1  ;;  %3443 = vst.msk [vmem:[#allocation2 + $0xf8] sm:$0xff] %vm281_vm0, %v3411_v55  ;;  %v3409_v7 = vadd.f32 %v3368_v24, %v3135_v46 }
 0x1fc   : > { %v15015_v51 = vadd.f32 %v2982_v4, %v14736_v53  ;;  %v12158_v58 = vpop.f32.mrf.mxu0  ;;  %12397 = vmatmul.mubr.msk.bf16.vlgmr.msra.gmra.mxu0 %vm281_vm0, %v15005_v10  ;;  %v16950_v53 = vld [vmem:[#allocation5_spill] sm:$0xff] }
 0x1fd   : > { %v12118_v57 = vpop.f32.mrf.mxu1  ;;  %12357 = vmatmul.mubr.msk.bf16.vlgmr.msra.gmra.mxu1 %vm281_vm0, %v14723_v63  ;;  %3441 = vst.msk [vmem:[#allocation2 + $0xe8] sm:$0xff] %vm281_vm0, %v3409_v7  ;;  %v4058_v46 = vadd.f32 %v12158_v58, %v3784_v62  ;;  %12400 = vmatprep.mubr.msk.bf16.mxu0 %vm281_vm0, %v15011_v21  ;;  %v12916_v7 = vld [vmem:[%s16894_s5 + $0x108] sm:$0xff]   ;;  %v3785_v62 = vld [vmem:[#allocation2 + $0x18] sm:$0xff] }
 0x1fe   : > { %v15026_v4 = vadd.f32 %v12118_v57, %v16950_v53  ;;  %12360 = vmatprep.mubr.msk.bf16.mxu1 %vm281_vm0, %v16951_v37  ;;  %v3929_v63 = vpop.f32.mrf.mxu0  ;;  %12429 = vmatpush3.bf16.msra.mxu1 %v14818_v50  ;;  %v15044_v53 = vpack.c.bf16 %v10880_v19, %v10879_v22  ;;  %v15050_v37 = vpack.c.bf16 %v10882_v18, %v10881_v12  ;;  %v3788_v12 = vld [vmem:[#allocation2 + $0x30] sm:$0xff] }
 0x1ff   : > { %v3543_v42 = vpop.f32.mrf.mxu1  ;;  %4090 = vst.msk [vmem:[#allocation2 + $0x10] sm:$0xff] %vm281_vm0, %v4058_v46  ;;  %v4056_v24 = vadd.f32 %v3929_v63, %v3782_v43  ;;  %12430 = vmatprep.subr.bf16.mxu1 %v12915_v44 }
 0x200   : > { %v15039_v55 = vadd.f32 %v3543_v42, %v14763_v3  ;;  %v12159_v58 = vpop.f32.mrf.mxu0  ;;  %16952 = vst [vmem:[#allocation9_spill] sm:$0xff] %v15050_v37  ;;  %v3783_v42 = vld [vmem:[#allocation2 + $0x8] sm:$0xff] }
 0x201   : > { %v12119_v57 = vpop.f32.mrf.mxu1  ;;  %4088 = vst.msk [vmem:[#allocation2] sm:$0xff] %vm281_vm0, %v4056_v24  ;;  %v4059_v46 = vadd.f32 %v12159_v58, %v3785_v62  ;;  %v10883_v24 = vld [vmem:[%s13027_s13 + $0xaa] sm:$0xff]  ;;  %v3786_v58 = vld [vmem:[#allocation2 + $0x20] sm:$0xff] }
 0x202   : > { %v15048_v50 = vadd.f32 %v12119_v57, %v14770_v29  ;;  %v3932_v43 = vpop.f32.mrf.mxu0  ;;  %12431 = vmatpush3.bf16.msra.mxu1 %v12915_v44  ;;  %v12917_v29 = vld [vmem:[%s16894_s5 + $0x100] sm:$0xff]   ;;  %v10884_v57 = vld [vmem:[%s13027_s13 + $0xb2] sm:$0xff] }
 0x203   : > { %v3546_v3 = vpop.f32.mrf.mxu1  ;;  %4091 = vst.msk [vmem:[#allocation2 + $0x18] sm:$0xff] %vm281_vm0, %v4059_v46  ;;  %v4057_v22 = vadd.f32 %v3932_v43, %v3783_v42  ;;  %12432 = vmatprep.subr.bf16.mxu1 %v12916_v7  ;;  %v10885_v46 = vld [vmem:[%s13027_s13 + $0xc2] sm:$0xff] }
 0x204   : > { %v15054_v63 = vadd.f32 %v3546_v3, %v14779_v61  ;;  %v12162_v18 = vpop.f32.mrf.mxu0  ;;  %12401 = vmatmul.mubr.msk.bf16.gmra.mxu0 %vm281_vm0, %v15044_v53  ;;  %v10886_v3 = vld [vmem:[%s13027_s13 + $0xca] sm:$0xff] }
 0x205   : > { %v12122_v19 = vpop.f32.mrf.mxu1  ;;  %12361 = vmatmul.mubr.msk.bf16.gmra.mxu1 %vm281_vm0, %v14766_v56  ;;  %4089 = vst.msk [vmem:[#allocation2 + $0x8] sm:$0xff] %vm281_vm0, %v4057_v22  ;;  %v4062_v44 = vadd.f32 %v12162_v18, %v3788_v12  ;;  %12404 = vmatprep.mubr.msk.bf16.mxu0 %vm281_vm0, %v15050_v37  ;;  %v15085_v37 = vpack.c.bf16 %v10886_v3, %v10885_v46  ;;  %v10888_v46 = vld [vmem:[%s13027_s13 + $0xe2] sm:$0xff] }
 0x206   : > { %v15065_v61 = vadd.f32 %v12122_v19, %v14793_v14  ;;  %12364 = vmatprep.mubr.msk.bf16.mxu1 %vm281_vm0, %v14772_v39  ;;  %v3945_v56 = vpop.f32.mrf.mxu0  ;;  %12433 = vmatpush3.bf16.msra.mxu1 %v12916_v7  ;;  %v3789_v39 = vld [vmem:[#allocation2 + $0x38] sm:$0xff]  ;;  %v15079_v19 = vpack.c.bf16 %v10884_v57, %v10883_v24 }
 0x207   : > { %v3559_v62 = vpop.f32.mrf.mxu1  ;;  %4094 = vst.msk [vmem:[#allocation2 + $0x30] sm:$0xff] %vm281_vm0, %v4062_v44  ;;  %v4060_v42 = vadd.f32 %v3945_v56, %v3786_v58  ;;  %12434 = vmatprep.subr.bf16.mxu1 %v12917_v29  ;;  %v3787_v44 = vld [vmem:[#allocation2 + $0x28] sm:$0xff] }
 0x208   : > { %v15077_v14 = vadd.f32 %v3559_v62, %v14805_v45  ;;  %v12163_v22 = vpop.f32.mrf.mxu0 }
 0x209   : > { %v12123_v43 = vpop.f32.mrf.mxu1  ;;  %4092 = vst.msk [vmem:[#allocation2 + $0x20] sm:$0xff] %vm281_vm0, %v4060_v42  ;;  %v4063_v18 = vadd.f32 %v12163_v22, %v3789_v39  ;;  %v3790_v42 = vld [vmem:[#allocation2 + $0x40] sm:$0xff] }
 0x20a   : > { %v15083_v12 = vadd.f32 %v12123_v43, %v14811_v34  ;;  %v3948_v45 = vpop.f32.mrf.mxu0  ;;  %12435 = vmatpush3.bf16.msra.mxu1 %v12917_v29  ;;  %v3792_v34 = vld [vmem:[#allocation2 + $0x50] sm:$0xff]  ;;  %v10890_v39 = vld [vmem:[%s13027_s13 + $0xfa] sm:$0xff] }
 0x20b   : > { %v3562_v7 = vpop.f32.mrf.mxu1  ;;  %4095 = vst.msk [vmem:[#allocation2 + $0x38] sm:$0xff] %vm281_vm0, %v4063_v18  ;;  %v4061_v24 = vadd.f32 %v3948_v45, %v3787_v44  ;;  %v10889_v43 = vld [vmem:[%s13027_s13 + $0xf2] sm:$0xff] }
 0x20c   : > { %v15089_v62 = vadd.f32 %v3562_v7, %v14822_v47  ;;  %v12166_v58 = vpop.f32.mrf.mxu0  ;;  %12405 = vmatmul.mubr.msk.bf16.gmra.mxu0 %vm281_vm0, %v15079_v19  ;;  %v10887_v47 = vld [vmem:[%s13027_s13 + $0xda] sm:$0xff] }
 0x20d   : > { %v12126_v57 = vpop.f32.mrf.mxu1  ;;  %12365 = vmatmul.mubr.msk.bf16.gmra.mxu1 %vm281_vm0, %v14807_v41  ;;  %4093 = vst.msk [vmem:[#allocation2 + $0x28] sm:$0xff] %vm281_vm0, %v4061_v24  ;;  %v4066_v56 = vadd.f32 %v12166_v58, %v3792_v34  ;;  %12408 = vmatprep.mubr.msk.bf16.mxu0 %vm281_vm0, %v15085_v37  ;;  %v3793_v7 = vld [vmem:[#allocation2 + $0x58] sm:$0xff]  ;;  %v3791_v58 = vld [vmem:[#allocation2 + $0x48] sm:$0xff] }
 0x20e   : > { %v15097_v29 = vadd.f32 %v12126_v57, %v14830_v38  ;;  %12368 = vmatprep.mubr.msk.bf16.mxu1 %vm281_vm0, %v14813_v5  ;;  %v3961_v41 = vpop.f32.mrf.mxu0  ;;  %v15111_v5 = vpack.c.bf16 %v10888_v46, %v10887_v47  ;;  %v15117_v57 = vpack.c.bf16 %v10890_v39, %v10889_v43  ;;  %v10892_v43 = vld [vmem:[%s13027_s13 + $0x112] sm:$0xff] }
 0x20f   : > { %v3575_v3 = vpop.f32.mrf.mxu1  ;;  %4098 = vst.msk [vmem:[#allocation2 + $0x50] sm:$0xff] %vm281_vm0, %v4066_v56  ;;  %v4064_v38 = vadd.f32 %v3961_v41, %v3790_v42 }
 0x210   : > { %v15109_v22 = vadd.f32 %v3575_v3, %v14843_v40  ;;  %v12167_v44 = vpop.f32.mrf.mxu0  ;;  %v3796_v3 = vld [vmem:[#allocation2 + $0x70] sm:$0xff] }
 0x211   : > { %v12127_v18 = vpop.f32.mrf.mxu1  ;;  %4096 = vst.msk [vmem:[#allocation2 + $0x40] sm:$0xff] %vm281_vm0, %v4064_v38  ;;  %v4067_v24 = vadd.f32 %v12167_v44, %v3793_v7  ;;  %v3794_v38 = vld [vmem:[#allocation2 + $0x60] sm:$0xff]  ;;  %v10894_v7 = vld [vmem:[%s13027_s13 + $0x12a] sm:$0xff] }
 0x212   : > { %v15115_v45 = vadd.f32 %v12127_v18, %v14849_v2  ;;  %v3964_v40 = vpop.f32.mrf.mxu0  ;;  %v10893_v18 = vld [vmem:[%s13027_s13 + $0x122] sm:$0xff] }
 0x213   : > { %v3578_v34 = vpop.f32.mrf.mxu1  ;;  %4099 = vst.msk [vmem:[#allocation2 + $0x58] sm:$0xff] %vm281_vm0, %v4067_v24  ;;  %v4065_v47 = vadd.f32 %v3964_v40, %v3791_v58 }
 0x214   : > { %v15121_v56 = vadd.f32 %v3578_v34, %v14855_v1  ;;  %v12170_v2 = vpop.f32.mrf.mxu0  ;;  %12409 = vmatmul.mubr.msk.bf16.gmra.mxu0 %vm281_vm0, %v15111_v5  ;;  %v10891_v1 = vld [vmem:[%s13027_s13 + $0x10a] sm:$0xff]  ;;  %v3797_v34 = vld [vmem:[#allocation2 + $0x78] sm:$0xff] }
 0x215   : > { %v12130_v46 = vpop.f32.mrf.mxu1  ;;  %12369 = vmatmul.mubr.msk.bf16.gmra.mxu1 %vm281_vm0, %v14845_v31  ;;  %4097 = vst.msk [vmem:[#allocation2 + $0x48] sm:$0xff] %vm281_vm0, %v4065_v47  ;;  %v4070_v41 = vadd.f32 %v12170_v2, %v3796_v3  ;;  %12412 = vmatprep.mubr.msk.bf16.mxu0 %vm281_vm0, %v15117_v57  ;;  %v3795_v2 = vld [vmem:[#allocation2 + $0x68] sm:$0xff] }
 0x216   : > { %v15129_v42 = vadd.f32 %v12130_v46, %v14863_v36  ;;  %12372 = vmatprep.mubr.msk.bf16.mxu1 %vm281_vm0, %v14851_v26  ;;  %v3977_v31 = vpop.f32.mrf.mxu0  ;;  %v15143_v26 = vpack.c.bf16 %v10892_v43, %v10891_v1  ;;  %v15149_v46 = vpack.c.bf16 %v10894_v7, %v10893_v18  ;;  %v10896_v18 = vld [vmem:[%s13027_s13 + $0x142] sm:$0xff] }
 0x217   : > { %v3591_v39 = vpop.f32.mrf.mxu1  ;;  %4102 = vst.msk [vmem:[#allocation2 + $0x70] sm:$0xff] %vm281_vm0, %v4070_v41  ;;  %v4068_v36 = vadd.f32 %v3977_v31, %v3794_v38 }
 0x218   : > { %v15141_v44 = vadd.f32 %v3591_v39, %v14875_v30  ;;  %v12171_v58 = vpop.f32.mrf.mxu0  ;;  %v3800_v39 = vld [vmem:[#allocation2 + $0x90] sm:$0xff] }
 0x219   : > { %v12131_v24 = vpop.f32.mrf.mxu1  ;;  %4100 = vst.msk [vmem:[#allocation2 + $0x60] sm:$0xff] %vm281_vm0, %v4068_v36  ;;  %v4071_v47 = vadd.f32 %v12171_v58, %v3797_v34  ;;  %v3798_v36 = vld [vmem:[#allocation2 + $0x80] sm:$0xff]  ;;  %v10897_v34 = vld [vmem:[%s13027_s13 + $0x152] sm:$0xff] }
 0x21a   : > { %v15147_v40 = vadd.f32 %v12131_v24, %v14881_v33  ;;  %v3980_v30 = vpop.f32.mrf.mxu0  ;;  %v10898_v58 = vld [vmem:[%s13027_s13 + $0x15a] sm:$0xff] }
 0x21b   : > { %v3594_v3 = vpop.f32.mrf.mxu1  ;;  %4103 = vst.msk [vmem:[#allocation2 + $0x78] sm:$0xff] %vm281_vm0, %v4071_v47  ;;  %v4069_v1 = vadd.f32 %v3980_v30, %v3795_v2 }
 0x21c   : > { %v15153_v41 = vadd.f32 %v3594_v3, %v14887_v15  ;;  %v12174_v33 = vpop.f32.mrf.mxu0  ;;  %12413 = vmatmul.mubr.msk.bf16.gmra.mxu0 %vm281_vm0, %v15143_v26  ;;  %v10895_v15 = vld [vmem:[%s13027_s13 + $0x13a] sm:$0xff] }
 0x21d   : > { %v12134_v43 = vpop.f32.mrf.mxu1  ;;  %12373 = vmatmul.mubr.msk.bf16.gmra.mxu1 %vm281_vm0, %v14877_v11  ;;  %4101 = vst.msk [vmem:[#allocation2 + $0x68] sm:$0xff] %vm281_vm0, %v4069_v1  ;;  %v4074_v31 = vadd.f32 %v12174_v33, %v3800_v39  ;;  %12416 = vmatprep.mubr.msk.bf16.mxu0 %vm281_vm0, %v15149_v46  ;;  %v12918_v11 = vld [vmem:[%s16892_s3 + $0x18] sm:$0xff]   ;;  %v15178_v30 = vpack.c.bf16 %v10896_v18, %v10895_v15 }
 0x21e   : > { %v15161_v38 = vadd.f32 %v12134_v43, %v14895_v27  ;;  %12376 = vmatprep.mubr.msk.bf16.mxu1 %vm281_vm0, %v14883_v9  ;;  %v3993_v24 = vpop.f32.mrf.mxu0  ;;  %12468 = vmatprep.subr.bf16.mxu0 %v12918_v11  ;;  %v3801_v3 = vld [vmem:[#allocation2 + $0x98] sm:$0xff]  ;;  %v15184_v39 = vpack.c.bf16 %v10898_v58, %v10897_v34 }
 0x21f   : > { %v3607_v7 = vpop.f32.mrf.mxu1  ;;  %4106 = vst.msk [vmem:[#allocation2 + $0x90] sm:$0xff] %vm281_vm0, %v4074_v31  ;;  %v4072_v9 = vadd.f32 %v3993_v24, %v3798_v36  ;;  %12469 = vmatpush3.bf16.msra.mxu0 %v12918_v11  ;;  %v3804_v11 = vld [vmem:[#allocation2 + $0xb0] sm:$0xff] }
 0x220   : > { %v15176_v27 = vadd.f32 %v3607_v7, %v14907_v8  ;;  %v12175_v2 = vpop.f32.mrf.mxu0  ;;  %v3799_v8 = vld [vmem:[#allocation2 + $0x88] sm:$0xff]  ;;  %v10900_v34 = vld [vmem:[%s13027_s13 + $0x172] sm:$0xff] }
 0x221   : > { %v12135_v47 = vpop.f32.mrf.mxu1  ;;  %4104 = vst.msk [vmem:[#allocation2 + $0x80] sm:$0xff] %vm281_vm0, %v4072_v9  ;;  %v4075_v43 = vadd.f32 %v12175_v2, %v3801_v3  ;;  %v3802_v9 = vld [vmem:[#allocation2 + $0xa0] sm:$0xff]  ;;  %v10902_v3 = vld [vmem:[%s13027_s13 + $0x18a] sm:$0xff] }
 0x222   : > { %v15182_v1 = vadd.f32 %v12135_v47, %v14913_v28  ;;  %v3996_v31 = vpop.f32.mrf.mxu0  ;;  %v10901_v47 = vld [vmem:[%s13027_s13 + $0x182] sm:$0xff] }
 0x223   : > { %v3610_v33 = vpop.f32.mrf.mxu1  ;;  %4107 = vst.msk [vmem:[#allocation2 + $0x98] sm:$0xff] %vm281_vm0, %v4075_v43  ;;  %v4073_v15 = vadd.f32 %v3996_v31, %v3799_v8 }
 0x224   : > { %v15188_v7 = vadd.f32 %v3610_v33, %v14919_v49  ;;  %v12178_v28 = vpop.f32.mrf.mxu0  ;;  %12417 = vmatmul.mubr.msk.bf16.gmra.mxu0 %vm281_vm0, %v15178_v30  ;;  %v10899_v49 = vld [vmem:[%s13027_s13 + $0x16a] sm:$0xff]  ;;  %v3805_v33 = vld [vmem:[#allocation2 + $0xb8] sm:$0xff] }
 0x225   : > { %v12138_v18 = vpop.f32.mrf.mxu1  ;;  %12377 = vmatmul.mubr.msk.bf16.gmra.mxu1 %vm281_vm0, %v14909_v17  ;;  %4105 = vst.msk [vmem:[#allocation2 + $0x88] sm:$0xff] %vm281_vm0, %v4073_v15  ;;  %v4078_v24 = vadd.f32 %v12178_v28, %v3804_v11  ;;  %12420 = vmatprep.mubr.msk.bf16.mxu0 %vm281_vm0, %v15184_v39  ;;  %v3803_v28 = vld [vmem:[#allocation2 + $0xa8] sm:$0xff] }
 0x226   : > { %16953 = vst [vmem:[#allocation4_spill] sm:$0xff] %v15188_v7  ;;  %v15196_v36 = vadd.f32 %v12138_v18, %v14927_v32  ;;  %12380 = vmatprep.mubr.msk.bf16.mxu1 %vm281_vm0, %v14915_v54  ;;  %v4009_v17 = vpop.f32.mrf.mxu0  ;;  %v15210_v54 = vpack.c.bf16 %v10900_v34, %v10899_v49  ;;  %v15216_v18 = vpack.c.bf16 %v10902_v3, %v10901_v47  ;;  %v10904_v47 = vld [vmem:[%s13027_s13 + $0x1a2] sm:$0xff] }
 0x227   : > { %v3623_v58 = vpop.f32.mrf.mxu1  ;;  %4110 = vst.msk [vmem:[#allocation2 + $0xb0] sm:$0xff] %vm281_vm0, %v4078_v24  ;;  %v4076_v32 = vadd.f32 %v4009_v17, %v3802_v9 }
 0x228   : > { %v15208_v2 = vadd.f32 %v3623_v58, %v14939_v13  ;;  %v12179_v8 = vpop.f32.mrf.mxu0  ;;  %v3808_v58 = vld [vmem:[#allocation2 + $0xd0] sm:$0xff] }
 0x229   : > { %v12139_v43 = vpop.f32.mrf.mxu1  ;;  %4108 = vst.msk [vmem:[#allocation2 + $0xa0] sm:$0xff] %vm281_vm0, %v4076_v32  ;;  %v4079_v15 = vadd.f32 %v12179_v8, %v3805_v33  ;;  %v3806_v32 = vld [vmem:[#allocation2 + $0xc0] sm:$0xff]  ;;  %v3809_v8 = vld [vmem:[#allocation2 + $0xd8] sm:$0xff] }
 0x22a   : > { %v15214_v31 = vadd.f32 %v12139_v43, %v14945_v48  ;;  %v4012_v13 = vpop.f32.mrf.mxu0 }
 0x22b   : > { %v3626_v11 = vpop.f32.mrf.mxu1  ;;  %4111 = vst.msk [vmem:[#allocation2 + $0xb8] sm:$0xff] %vm281_vm0, %v4079_v15  ;;  %v4077_v49 = vadd.f32 %v4012_v13, %v3803_v28 }
 0x22c   : > { %v15220_v24 = vadd.f32 %v3626_v11, %v14951_v35  ;;  %v12182_v9 = vpop.f32.mrf.mxu0  ;;  %12421 = vmatmul.mubr.msk.bf16.gmra.mxu0 %vm281_vm0, %v15210_v54  ;;  %v10903_v35 = vld [vmem:[%s13027_s13 + $0x19a] sm:$0xff] }
 0x22d   : > { %v12142_v34 = vpop.f32.mrf.mxu1  ;;  %12381 = vmatmul.mubr.msk.bf16.gmra.mxu1 %vm281_vm0, %v14941_v60  ;;  %4109 = vst.msk [vmem:[#allocation2 + $0xa8] sm:$0xff] %vm281_vm0, %v4077_v49  ;;  %v4082_v17 = vadd.f32 %v12182_v9, %v3808_v58  ;;  %12424 = vmatprep.mubr.msk.bf16.mxu0 %vm281_vm0, %v15216_v18  ;;  %v12919_v60 = vld [vmem:[%s16892_s3 + $0x10] sm:$0xff]   ;;  %v15243_v11 = vpack.c.bf16 %v10904_v47, %v10903_v35 }
 0x22e   : > { %16954 = vst [vmem:[#allocation8_spill] sm:$0xff] %v15220_v24  ;;  %v15228_v48 = vadd.f32 %v12142_v34, %v14959_v52  ;;  %12384 = vmatprep.mubr.msk.bf16.mxu1 %vm281_vm0, %v14947_v23  ;;  %v4025_v43 = vpop.f32.mrf.mxu0  ;;  %12470 = vmatprep.subr.bf16.mxu0 %v12919_v60  ;;  %v3807_v34 = vld [vmem:[#allocation2 + $0xc8] sm:$0xff] }
 0x22f   : > { %v3639_v3 = vpop.f32.mrf.mxu1  ;;  %4114 = vst.msk [vmem:[#allocation2 + $0xd0] sm:$0xff] %vm281_vm0, %v4082_v17  ;;  %v4080_v33 = vadd.f32 %v4025_v43, %v3806_v32  ;;  %12471 = vmatpush3.bf16.msra.mxu0 %v12919_v60  ;;  %v16957_v32 = vld [vmem:[#allocation7_spill] sm:$0xff]  ;;  %v3810_v43 = vld [vmem:[#allocation2 + $0xe0] sm:$0xff] }
 0x230   : > { %v15241_v52 = vadd.f32 %v3639_v3, %v14971_v0  ;;  %v12183_v15 = vpop.f32.mrf.mxu0  ;;  %v3812_v3 = vld [vmem:[#allocation2 + $0xf0] sm:$0xff] }
 0x231   : > { %v12143_v23 = vpop.f32.mrf.mxu1  ;;  %4112 = vst.msk [vmem:[#allocation2 + $0xc0] sm:$0xff] %vm281_vm0, %v4080_v33  ;;  %v4083_v13 = vadd.f32 %v12183_v15, %v3809_v8  ;;  %v3813_v15 = vld [vmem:[#allocation2 + $0xf8] sm:$0xff] }
 0x232   : > { %v15247_v28 = vadd.f32 %v12143_v23, %v14977_v20  ;;  %v4028_v58 = vpop.f32.mrf.mxu0  ;;  %v16956_v20 = vld [vmem:[#allocation6_spill] sm:$0xff] }
 0x233   : > { %v3642_v49 = vpop.f32.mrf.mxu1  ;;  %4115 = vst.msk [vmem:[#allocation2 + $0xd8] sm:$0xff] %vm281_vm0, %v4083_v13  ;;  %v4081_v9 = vadd.f32 %v4028_v58, %v3807_v34 }
 0x234   : > { %v15251_v0 = vadd.f32 %v3642_v49, %v14983_v59  ;;  %v12186_v35 = vpop.f32.mrf.mxu0  ;;  %12425 = vmatmul.mubr.msk.bf16.gmra.mxu0 %vm281_vm0, %v15243_v11 }
 0x235   : > { %v12146_v17 = vpop.f32.mrf.mxu1  ;;  %12385 = vmatmul.mubr.msk.bf16.gmra.mxu1 %vm281_vm0, %v14973_v6  ;;  %4113 = vst.msk [vmem:[#allocation2 + $0xc8] sm:$0xff] %vm281_vm0, %v4081_v9  ;;  %v4086_v60 = vadd.f32 %v12186_v35, %v3812_v3  ;;  %v3811_v9 = vld [vmem:[#allocation2 + $0xe8] sm:$0xff] }
 0x236   : > { %16955 = vst [vmem:[#allocation5_spill] sm:$0xff] %v15251_v0  ;;  %v15259_v47 = vadd.f32 %v12146_v17, %v16956_v20  ;;  %12436 = vmatprep.mubr.msk.bf16.mxu1 %vm281_vm0, %v16957_v32  ;;  %v4041_v33 = vpop.f32.mrf.mxu0  ;;  %v4461_v20 = vld [vmem:[#allocation2 + $0x10] sm:$0xff] }
 0x237   : > { %v3655_v59 = vpop.f32.mrf.mxu1  ;;  %4118 = vst.msk [vmem:[#allocation2 + $0xf0] sm:$0xff] %vm281_vm0, %v4086_v60  ;;  %v4084_v6 = vadd.f32 %v4041_v33, %v3810_v43  ;;  %v4459_v43 = vld [vmem:[#allocation2] sm:$0xff] }
 0x238   : > { %v15265_v23 = vadd.f32 %v3655_v59, %v15003_v25  ;;  %v12187_v13 = vpop.f32.mrf.mxu0 }
 0x239   : > { %v12147_v8 = vpop.f32.mrf.mxu1  ;;  %4116 = vst.msk [vmem:[#allocation2 + $0xe0] sm:$0xff] %vm281_vm0, %v4084_v6  ;;  %v4087_v34 = vadd.f32 %v12187_v13, %v3813_v15 }
 0x23a   : > { %v15269_v49 = vadd.f32 %v12147_v8, %v15009_v16  ;;  %v4044_v17 = vpop.f32.mrf.mxu0  ;;  %v4462_v8 = vld [vmem:[#allocation2 + $0x18] sm:$0xff] }
 0x23b   : > { %v3658_v58 = vpop.f32.mrf.mxu1  ;;  %4119 = vst.msk [vmem:[#allocation2 + $0xf8] sm:$0xff] %vm281_vm0, %v4087_v34  ;;  %v4085_v25 = vadd.f32 %v4044_v17, %v3811_v9 }
 0x23c   : > { %v15273_v3 = vadd.f32 %v3658_v58, %v15015_v51  ;;  %v12238_v60 = vpop.f32.mrf.mxu0  ;;  %v12920_v51 = vld [vmem:[%s16892_s3 + $0x8] sm:$0xff]  }
 0x23d   : > { %v12198_v35 = vpop.f32.mrf.mxu1  ;;  %12437 = vmatmul.mubr.msk.bf16.vlgmr.msra.gmra.mxu1 %vm281_vm0, %v15005_v10  ;;  %4117 = vst.msk [vmem:[#allocation2 + $0xe8] sm:$0xff] %vm281_vm0, %v4085_v25  ;;  %v4735_v32 = vadd.f32 %v12238_v60, %v4461_v20  ;;  %12472 = vmatprep.subr.bf16.mxu0 %v12920_v51  ;;  %v4460_v58 = vld [vmem:[#allocation2 + $0x8] sm:$0xff] }
 0x23e   : > { %16958 = vst [vmem:[#allocation10_spill] sm:$0xff] %v15273_v3  ;;  %v15279_v16 = vadd.f32 %v12198_v35, %v15026_v4  ;;  %12440 = vmatprep.mubr.msk.bf16.mxu1 %vm281_vm0, %v15011_v21  ;;  %v4606_v33 = vpop.f32.mrf.mxu0  ;;  %12473 = vmatpush3.bf16.msra.mxu0 %v12920_v51  ;;  %v4465_v35 = vld [vmem:[#allocation2 + $0x30] sm:$0xff] }
 0x23f   : > { %v4219_v59 = vpop.f32.mrf.mxu1  ;;  %4767 = vst.msk [vmem:[#allocation2 + $0x10] sm:$0xff] %vm281_vm0, %v4735_v32  ;;  %v4733_v6 = vadd.f32 %v4606_v33, %v4459_v43  ;;  %v16959_v32 = vld [vmem:[#allocation9_spill] sm:$0xff] }
 0x240   : > { %v15288_v10 = vadd.f32 %v4219_v59, %v15039_v55  ;;  %v12239_v15 = vpop.f32.mrf.mxu0  ;;  %v4463_v59 = vld [vmem:[#allocation2 + $0x20] sm:$0xff] }
 0x241   : > { %v12199_v4 = vpop.f32.mrf.mxu1  ;;  %4765 = vst.msk [vmem:[#allocation2] sm:$0xff] %vm281_vm0, %v4733_v6  ;;  %v4736_v13 = vadd.f32 %v12239_v15, %v4462_v8  ;;  %v12922_v15 = vld [vmem:[%s16892_s3 + $0x38] sm:$0xff]  }
 0x242   : > { %v15292_v21 = vadd.f32 %v12199_v4, %v15048_v50  ;;  %v4609_v9 = vpop.f32.mrf.mxu0  ;;  %12508 = vmatprep.subr.bf16.mxu1 %v12922_v15 }
 0x243   : > { %v4222_v34 = vpop.f32.mrf.mxu1  ;;  %4768 = vst.msk [vmem:[#allocation2 + $0x18] sm:$0xff] %vm281_vm0, %v4736_v13  ;;  %v4734_v17 = vadd.f32 %v4609_v9, %v4460_v58  ;;  %12509 = vmatpush3.bf16.msra.mxu1 %v12922_v15 }
 0x244   : > { %v15296_v55 = vadd.f32 %v4222_v34, %v15054_v63  ;;  %v12242_v20 = vpop.f32.mrf.mxu0  ;;  %v4464_v34 = vld [vmem:[#allocation2 + $0x28] sm:$0xff] }
 0x245   : > { %v12202_v25 = vpop.f32.mrf.mxu1  ;;  %12441 = vmatmul.mubr.msk.bf16.gmra.mxu1 %vm281_vm0, %v15044_v53  ;;  %4766 = vst.msk [vmem:[#allocation2 + $0x8] sm:$0xff] %vm281_vm0, %v4734_v17  ;;  %v4739_v60 = vadd.f32 %v12242_v20, %v4465_v35  ;;  %v4466_v53 = vld [vmem:[#allocation2 + $0x38] sm:$0xff] }
 0x246   : > { %v15302_v50 = vadd.f32 %v12202_v25, %v15065_v61  ;;  %12444 = vmatprep.mubr.msk.bf16.mxu1 %vm281_vm0, %v16959_v32  ;;  %v4622_v63 = vpop.f32.mrf.mxu0  ;;  %v4469_v25 = vld [vmem:[#allocation2 + $0x50] sm:$0xff]  ;;  %v4467_v32 = vld [vmem:[#allocation2 + $0x40] sm:$0xff] }
 0x247   : > { %v4235_v51 = vpop.f32.mrf.mxu1  ;;  %4771 = vst.msk [vmem:[#allocation2 + $0x30] sm:$0xff] %vm281_vm0, %v4739_v60  ;;  %v4737_v33 = vadd.f32 %v4622_v63, %v4463_v59  ;;  %v4470_v63 = vld [vmem:[#allocation2 + $0x58] sm:$0xff] }
 0x248   : > { %v15308_v43 = vadd.f32 %v4235_v51, %v15077_v14  ;;  %v12243_v4 = vpop.f32.mrf.mxu0 }
 0x249   : > { %v12203_v6 = vpop.f32.mrf.mxu1  ;;  %4769 = vst.msk [vmem:[#allocation2 + $0x20] sm:$0xff] %vm281_vm0, %v4737_v33  ;;  %v4740_v8 = vadd.f32 %v12243_v4, %v4466_v53  ;;  %v12924_v53 = vld [vmem:[%s16892_s3 + $0x28] sm:$0xff]  }
 0x24a   : > { %v15312_v61 = vadd.f32 %v12203_v6, %v15083_v12  ;;  %v4625_v58 = vpop.f32.mrf.mxu0 }
 0x24b   : > { %v4238_v13 = vpop.f32.mrf.mxu1  ;;  %4772 = vst.msk [vmem:[#allocation2 + $0x38] sm:$0xff] %vm281_vm0, %v4740_v8  ;;  %v4738_v9 = vadd.f32 %v4625_v58, %v4464_v34  ;;  %v4468_v8 = vld [vmem:[#allocation2 + $0x48] sm:$0xff]  ;;  %v4473_v58 = vld [vmem:[#allocation2 + $0x70] sm:$0xff] }
 0x24c   : > { %v15319_v14 = vadd.f32 %v4238_v13, %v15089_v62  ;;  %v12246_v35 = vpop.f32.mrf.mxu0  ;;  %v12923_v62 = vld [vmem:[%s16892_s3 + $0x30] sm:$0xff]  }
 0x24d   : > { %v12206_v17 = vpop.f32.mrf.mxu1  ;;  %12445 = vmatmul.mubr.msk.bf16.gmra.mxu1 %vm281_vm0, %v15079_v19  ;;  %4770 = vst.msk [vmem:[#allocation2 + $0x28] sm:$0xff] %vm281_vm0, %v4738_v9  ;;  %v4743_v20 = vadd.f32 %v12246_v35, %v4469_v25  ;;  %12510 = vmatprep.subr.bf16.mxu1 %v12923_v62  ;;  %v12925_v25 = vld [vmem:[%s16892_s3 + $0x20] sm:$0xff]  }
 0x24e   : > { %v15325_v12 = vadd.f32 %v12206_v17, %v15097_v29  ;;  %12448 = vmatprep.mubr.msk.bf16.mxu1 %vm281_vm0, %v15085_v37  ;;  %v4638_v51 = vpop.f32.mrf.mxu0  ;;  %12511 = vmatpush3.bf16.msra.mxu1 %v12923_v62 }
 0x24f   : > { %v4251_v60 = vpop.f32.mrf.mxu1  ;;  %4775 = vst.msk [vmem:[#allocation2 + $0x50] sm:$0xff] %vm281_vm0, %v4743_v20  ;;  %v4741_v59 = vadd.f32 %v4638_v51, %v4467_v32  ;;  %12512 = vmatprep.subr.bf16.mxu1 %v12924_v53  ;;  %v4474_v51 = vld [vmem:[#allocation2 + $0x78] sm:$0xff] }
 0x250   : > { %v15334_v19 = vadd.f32 %v4251_v60, %v15109_v22  ;;  %v12247_v33 = vpop.f32.mrf.mxu0  ;;  %v6648_v60 = vld [vmem:[#allocation3 + $0xf] sm:$0xff] }
 0x251   : > { %v12207_v29 = vpop.f32.mrf.mxu1  ;;  %4773 = vst.msk [vmem:[#allocation2 + $0x40] sm:$0xff] %vm281_vm0, %v4741_v59  ;;  %v4744_v6 = vadd.f32 %v12247_v33, %v4470_v63 }
 0x252   : > { %v15338_v37 = vadd.f32 %v12207_v29, %v15115_v45  ;;  %v4641_v22 = vpop.f32.mrf.mxu0  ;;  %12513 = vmatpush3.bf16.msra.mxu1 %v12924_v53 }
 0x253   : > { %v4254_v4 = vpop.f32.mrf.mxu1  ;;  %4776 = vst.msk [vmem:[#allocation2 + $0x58] sm:$0xff] %vm281_vm0, %v4744_v6  ;;  %v4742_v13 = vadd.f32 %v4641_v22, %v4468_v8  ;;  %12514 = vmatprep.subr.bf16.mxu1 %v12925_v25 }
 0x254   : > { %v15345_v15 = vadd.f32 %v4254_v4, %v15121_v56  ;;  %v12250_v45 = vpop.f32.mrf.mxu0  ;;  %v12921_v56 = vld [vmem:[%s16892_s3] sm:$0xff]  }
 0x255   : > { %v12210_v34 = vpop.f32.mrf.mxu1  ;;  %12449 = vmatmul.mubr.msk.bf16.gmra.mxu1 %vm281_vm0, %v15111_v5  ;;  %4774 = vst.msk [vmem:[#allocation2 + $0x48] sm:$0xff] %vm281_vm0, %v4742_v13  ;;  %v4747_v17 = vadd.f32 %v12250_v45, %v4473_v58  ;;  %v4471_v5 = vld [vmem:[#allocation2 + $0x60] sm:$0xff]  ;;  %12474 = vmatprep.subr.bf16.mxu0 %v12921_v56  ;;  %v4477_v13 = vld [vmem:[#allocation2 + $0x90] sm:$0xff] }
 0x256   : > { %v15351_v9 = vadd.f32 %v12210_v34, %v15129_v42  ;;  %12452 = vmatprep.mubr.msk.bf16.mxu1 %vm281_vm0, %v15117_v57  ;;  %v4654_v20 = vpop.f32.mrf.mxu0  ;;  %v6647_v57 = vld [vmem:[#allocation3 + $0x7] sm:$0xff]  ;;  %12475 = vmatpush3.bf16.msra.mxu0 %v12921_v56 }
 0x257   : > { %v4267_v35 = vpop.f32.mrf.mxu1  ;;  %4779 = vst.msk [vmem:[#allocation2 + $0x70] sm:$0xff] %vm281_vm0, %v4747_v17  ;;  %v4745_v62 = vadd.f32 %v4654_v20, %v4471_v5  ;;  %v6679_v29 = vpack.c.bf16 %v6648_v60, %v6647_v57  ;;  %12515 = vmatpush3.bf16.msra.mxu1 %v12925_v25  ;;  %v4475_v17 = vld [vmem:[#allocation2 + $0x80] sm:$0xff] }
 0x258   : > { %v15363_v42 = vadd.f32 %v4267_v35, %v15141_v44  ;;  %v12251_v59 = vpop.f32.mrf.mxu0  ;;  %v4472_v44 = vld [vmem:[#allocation2 + $0x68] sm:$0xff] }
 0x259   : > { %v12211_v32 = vpop.f32.mrf.mxu1  ;;  %4777 = vst.msk [vmem:[#allocation2 + $0x60] sm:$0xff] %vm281_vm0, %v4745_v62  ;;  %v4748_v33 = vadd.f32 %v12251_v59, %v4474_v51  ;;  %12476 = vmatprep.mubr.msk.bf16.mxu0 %vm281_vm0, %v6679_v29 }
 0x25a   : > { %v15367_v63 = vadd.f32 %v12211_v32, %v15147_v40  ;;  %v4657_v53 = vpop.f32.mrf.mxu0 }
 0x25b   : > { %v4270_v6 = vpop.f32.mrf.mxu1  ;;  %4780 = vst.msk [vmem:[#allocation2 + $0x78] sm:$0xff] %vm281_vm0, %v4748_v33  ;;  %v4746_v8 = vadd.f32 %v4657_v53, %v4472_v44  ;;  %v4479_v33 = vld [vmem:[#allocation2 + $0xa0] sm:$0xff] }
 0x25c   : > { %v15372_v4 = vadd.f32 %v4270_v6, %v15153_v41  ;;  %v12254_v34 = vpop.f32.mrf.mxu0 }
 0x25d   : > { %v12214_v22 = vpop.f32.mrf.mxu1  ;;  %12453 = vmatmul.mubr.msk.bf16.gmra.mxu1 %vm281_vm0, %v15143_v26  ;;  %4778 = vst.msk [vmem:[#allocation2 + $0x68] sm:$0xff] %vm281_vm0, %v4746_v8  ;;  %v4751_v58 = vadd.f32 %v12254_v34, %v4477_v13  ;;  %v4478_v26 = vld [vmem:[#allocation2 + $0x98] sm:$0xff] }
 0x25e   : > { %v15378_v40 = vadd.f32 %v12214_v22, %v15161_v38  ;;  %12456 = vmatprep.mubr.msk.bf16.mxu1 %vm281_vm0, %v15149_v46  ;;  %v4670_v41 = vpop.f32.mrf.mxu0  ;;  %v4476_v46 = vld [vmem:[#allocation2 + $0x88] sm:$0xff] }
 0x25f   : > { %v4283_v45 = vpop.f32.mrf.mxu1  ;;  %4783 = vst.msk [vmem:[#allocation2 + $0x90] sm:$0xff] %vm281_vm0, %v4751_v58  ;;  %v4749_v25 = vadd.f32 %v4670_v41, %v4475_v17  ;;  %v4480_v58 = vld [vmem:[#allocation2 + $0xa8] sm:$0xff]  ;;  %v4485_v41 = vld [vmem:[#allocation2 + $0xd0] sm:$0xff] }
 0x260   : > { %v15384_v56 = vadd.f32 %v4283_v45, %v15176_v27  ;;  %v12255_v5 = vpop.f32.mrf.mxu0  ;;  %v4481_v27 = vld [vmem:[#allocation2 + $0xb0] sm:$0xff] }
 0x261   : > { %v12215_v35 = vpop.f32.mrf.mxu1  ;;  %4781 = vst.msk [vmem:[#allocation2 + $0x80] sm:$0xff] %vm281_vm0, %v4749_v25  ;;  %v4752_v20 = vadd.f32 %v12255_v5, %v4478_v26  ;;  %v4483_v5 = vld [vmem:[#allocation2 + $0xc0] sm:$0xff] }
 0x262   : > { %v15388_v38 = vadd.f32 %v12215_v35, %v15182_v1  ;;  %v4673_v57 = vpop.f32.mrf.mxu0 }
 0x263   : > { %v15390_v62 = vpop.f32.mrf.mxu1  ;;  %4784 = vst.msk [vmem:[#allocation2 + $0x98] sm:$0xff] %vm281_vm0, %v4752_v20  ;;  %v4750_v60 = vadd.f32 %v4673_v57, %v4476_v46  ;;  %v7032_v46 = vld [vmem:[#allocation3 + $0x8] sm:$0xff]  ;;  %v7033_v57 = vld [vmem:[#allocation3 + $0x10] sm:$0xff] }
 0x264   : > { %16960 = vst [vmem:[#allocation6_spill] sm:$0xff] %v15390_v62  ;;  %v12258_v51 = vpop.f32.mrf.mxu0 }
 0x265   : > { %v12218_v32 = vpop.f32.mrf.mxu1  ;;  %12457 = vmatmul.mubr.msk.bf16.gmra.mxu1 %vm281_vm0, %v15178_v30  ;;  %4782 = vst.msk [vmem:[#allocation2 + $0x88] sm:$0xff] %vm281_vm0, %v4750_v60  ;;  %v4755_v1 = vadd.f32 %v12258_v51, %v4481_v27  ;;  %v4482_v30 = vld [vmem:[#allocation2 + $0xb8] sm:$0xff] }
 0x266   : > { %v15397_v59 = vadd.f32 %v12218_v32, %v15196_v36  ;;  %12460 = vmatprep.mubr.msk.bf16.mxu1 %vm281_vm0, %v15184_v39  ;;  %v4686_v6 = vpop.f32.mrf.mxu0  ;;  %v15412_v39 = vld [vmem:[%s16892_s3 + $0x58] sm:$0xff]  }
 0x267   : > { %v4299_v29 = vpop.f32.mrf.mxu1  ;;  %4787 = vst.msk [vmem:[#allocation2 + $0xb0] sm:$0xff] %vm281_vm0, %v4755_v1  ;;  %v4753_v53 = vadd.f32 %v4686_v6, %v4479_v33  ;;  %12548 = vmatprep.subr.bf16.mxu0 %v15412_v39  ;;  %v4486_v27 = vld [vmem:[#allocation2 + $0xd8] sm:$0xff]  ;;  %v7064_v1 = vpack.c.bf16 %v7033_v57, %v7032_v46  ;;  %v4484_v33 = vld [vmem:[#allocation2 + $0xc8] sm:$0xff] }
 0x268   : > { %v15403_v44 = vadd.f32 %v4299_v29, %v15208_v2  ;;  %v12259_v22 = vpop.f32.mrf.mxu0 }
 0x269   : > { %v12219_v8 = vpop.f32.mrf.mxu1  ;;  %4785 = vst.msk [vmem:[#allocation2 + $0xa0] sm:$0xff] %vm281_vm0, %v4753_v53  ;;  %v4756_v13 = vadd.f32 %v12259_v22, %v4482_v30 }
 0x26a   : > { %v15407_v36 = vadd.f32 %v12219_v8, %v15214_v31  ;;  %v4689_v2 = vpop.f32.mrf.mxu0  ;;  %v4489_v8 = vld [vmem:[#allocation2 + $0xf0] sm:$0xff] }
 0x26b   : > { %v15414_v34 = vpop.f32.mrf.mxu1  ;;  %4788 = vst.msk [vmem:[#allocation2 + $0xb8] sm:$0xff] %vm281_vm0, %v4756_v13  ;;  %v4754_v45 = vadd.f32 %v4689_v2, %v4480_v58  ;;  %v4487_v58 = vld [vmem:[#allocation2 + $0xe0] sm:$0xff] }
 0x26c   : > { %16961 = vst [vmem:[#allocation7_spill] sm:$0xff] %v15414_v34  ;;  %v12262_v25 = vpop.f32.mrf.mxu0 }
 0x26d   : > { %v12222_v17 = vpop.f32.mrf.mxu1  ;;  %12461 = vmatmul.mubr.msk.bf16.gmra.mxu1 %vm281_vm0, %v15210_v54  ;;  %4786 = vst.msk [vmem:[#allocation2 + $0xa8] sm:$0xff] %vm281_vm0, %v4754_v45  ;;  %v4759_v35 = vadd.f32 %v12262_v25, %v4485_v41  ;;  %v4490_v25 = vld [vmem:[#allocation2 + $0xf8] sm:$0xff] }
 0x26e   : > { %v15422_v31 = vadd.f32 %v12222_v17, %v15228_v48  ;;  %12464 = vmatprep.mubr.msk.bf16.mxu1 %vm281_vm0, %v15216_v18  ;;  %v4702_v20 = vpop.f32.mrf.mxu0 }
 0x26f   : > { %v4315_v26 = vpop.f32.mrf.mxu1  ;;  %4791 = vst.msk [vmem:[#allocation2 + $0xd0] sm:$0xff] %vm281_vm0, %v4759_v35  ;;  %v4757_v54 = vadd.f32 %v4702_v20, %v4483_v5  ;;  %v4488_v5 = vld [vmem:[#allocation2 + $0xe8] sm:$0xff] }
 0x270   : > { %v15428_v60 = vadd.f32 %v4315_v26, %v15241_v52  ;;  %v12263_v51 = vpop.f32.mrf.mxu0 }
 0x271   : > { %v12223_v32 = vpop.f32.mrf.mxu1  ;;  %4789 = vst.msk [vmem:[#allocation2 + $0xc0] sm:$0xff] %vm281_vm0, %v4757_v54  ;;  %v4760_v18 = vadd.f32 %v12263_v51, %v4486_v27 }
 0x272   : > { %v15432_v48 = vadd.f32 %v12223_v32, %v15247_v28  ;;  %v4705_v6 = vpop.f32.mrf.mxu0 }
 0x273   : > { %v15434_v29 = vpop.f32.mrf.mxu1  ;;  %4792 = vst.msk [vmem:[#allocation2 + $0xd8] sm:$0xff] %vm281_vm0, %v4760_v18  ;;  %v4758_v53 = vadd.f32 %v4705_v6, %v4484_v33 }
 0x274   : > { %16962 = vst [vmem:[#allocation9_spill] sm:$0xff] %v15434_v29  ;;  %v12266_v30 = vpop.f32.mrf.mxu0 }
 0x275   : > { %v12226_v52 = vpop.f32.mrf.mxu1  ;;  %12465 = vmatmul.mubr.msk.bf16.gmra.mxu1 %vm281_vm0, %v15243_v11  ;;  %4790 = vst.msk [vmem:[#allocation2 + $0xc8] sm:$0xff] %vm281_vm0, %v4758_v53  ;;  %v4763_v22 = vadd.f32 %v12266_v30, %v4489_v8  ;;  %v5138_v53 = vld [vmem:[#allocation2 + $0x18] sm:$0xff] }
 0x276   : > { %v15441_v28 = vadd.f32 %v12226_v52, %v15259_v47  ;;  %12516 = vmatprep.mubr.msk.bf16.mxu1 %vm281_vm0, %v7064_v1  ;;  %v4718_v2 = vpop.f32.mrf.mxu0 }
 0x277   : > { %v4331_v13 = vpop.f32.mrf.mxu1  ;;  %4795 = vst.msk [vmem:[#allocation2 + $0xf0] sm:$0xff] %vm281_vm0, %v4763_v22  ;;  %v4761_v17 = vadd.f32 %v4718_v2, %v4487_v58  ;;  %v5136_v22 = vld [vmem:[#allocation2 + $0x8] sm:$0xff] }
 0x278   : > { %v15446_v45 = vadd.f32 %v4331_v13, %v15265_v23  ;;  %v12267_v11 = vpop.f32.mrf.mxu0  ;;  %v5137_v23 = vld [vmem:[#allocation2 + $0x10] sm:$0xff] }
 0x279   : > { %v12227_v41 = vpop.f32.mrf.mxu1  ;;  %4793 = vst.msk [vmem:[#allocation2 + $0xe0] sm:$0xff] %vm281_vm0, %v4761_v17  ;;  %v4764_v35 = vadd.f32 %v12267_v11, %v4490_v25 }
 0x27a   : > { %v15450_v47 = vadd.f32 %v12227_v41, %v15269_v49  ;;  %v4721_v20 = vpop.f32.mrf.mxu0  ;;  %v5135_v49 = vld [vmem:[#allocation2] sm:$0xff] }
 0x27b   : > { %v15452_v26 = vpop.f32.mrf.mxu1  ;;  %4796 = vst.msk [vmem:[#allocation2 + $0xf8] sm:$0xff] %vm281_vm0, %v4764_v35  ;;  %v4762_v46 = vadd.f32 %v4721_v20, %v4488_v5 }
 0x27c   : > { %16963 = vst [vmem:[#allocation11_spill] sm:$0xff] %v15452_v26  ;;  %v12318_v54 = vpop.f32.mrf.mxu0 }
 0x27d   : > { %v12278_v57 = vpop.f32.mrf.mxu1  ;;  %4794 = vst.msk [vmem:[#allocation2 + $0xe8] sm:$0xff] %vm281_vm0, %v4762_v46  ;;  %v5411_v27 = vadd.f32 %v12318_v54, %v5137_v23 }
 0x27e   : > { %v15457_v32 = vadd.f32 %v12278_v57, %v15279_v16  ;;  %v5282_v18 = vpop.f32.mrf.mxu0  ;;  %v5142_v57 = vld [vmem:[#allocation2 + $0x38] sm:$0xff] }
 0x27f   : > { %v4896_v51 = vpop.f32.mrf.mxu1  ;;  %5443 = vst.msk [vmem:[#allocation2 + $0x10] sm:$0xff] %vm281_vm0, %v5411_v27  ;;  %v5409_v33 = vadd.f32 %v5282_v18, %v5135_v49  ;;  %v15487_v18 = vld [vmem:[%s16892_s3 + $0x78] sm:$0xff]  }
 0x280   : > { %v15461_v1 = vadd.f32 %v4896_v51, %v15288_v10  ;;  %v12319_v52 = vpop.f32.mrf.mxu0  ;;  %v5141_v10 = vld [vmem:[#allocation2 + $0x30] sm:$0xff]  ;;  %v5140_v51 = vld [vmem:[#allocation2 + $0x28] sm:$0xff]  ;;  %12588 = vmatprep.subr.bf16.mxu1 %v15487_v18 }
 0x281   : > { %v12279_v6 = vpop.f32.mrf.mxu1  ;;  %5441 = vst.msk [vmem:[#allocation2] sm:$0xff] %vm281_vm0, %v5409_v33  ;;  %v5412_v16 = vadd.f32 %v12319_v52, %v5138_v53 }
 0x282   : > { %v15465_v8 = vadd.f32 %v12279_v6, %v15292_v21  ;;  %v5285_v13 = vpop.f32.mrf.mxu0  ;;  %v5139_v21 = vld [vmem:[#allocation2 + $0x20] sm:$0xff]  ;;  %v5145_v6 = vld [vmem:[#allocation2 + $0x50] sm:$0xff] }
 0x283   : > { %v15467_v30 = vpop.f32.mrf.mxu1  ;;  %5444 = vst.msk [vmem:[#allocation2 + $0x18] sm:$0xff] %vm281_vm0, %v5412_v16  ;;  %v5410_v58 = vadd.f32 %v5285_v13, %v5136_v22  ;;  %v5143_v22 = vld [vmem:[#allocation2 + $0x40] sm:$0xff] }
 0x284   : > { %v12322_v17 = vpop.f32.mrf.mxu0 }
 0x285   : > { %v12282_v2 = vpop.f32.mrf.mxu1  ;;  %5442 = vst.msk [vmem:[#allocation2 + $0x8] sm:$0xff] %vm281_vm0, %v5410_v58  ;;  %v5415_v25 = vadd.f32 %v12322_v17, %v5141_v10  ;;  %v5146_v17 = vld [vmem:[#allocation2 + $0x58] sm:$0xff] }
 0x286   : > { %v15472_v41 = vadd.f32 %v12282_v2, %v15302_v50  ;;  %v5298_v35 = vpop.f32.mrf.mxu0 }
 0x287   : > { %v4912_v11 = vpop.f32.mrf.mxu1  ;;  %5447 = vst.msk [vmem:[#allocation2 + $0x30] sm:$0xff] %vm281_vm0, %v5415_v25  ;;  %v5413_v20 = vadd.f32 %v5298_v35, %v5139_v21  ;;  %v5144_v35 = vld [vmem:[#allocation2 + $0x48] sm:$0xff] }
 0x288   : > { %v15476_v5 = vadd.f32 %v4912_v11, %v15308_v43  ;;  %v12323_v23 = vpop.f32.mrf.mxu0 }
 0x289   : > { %v12283_v46 = vpop.f32.mrf.mxu1  ;;  %5445 = vst.msk [vmem:[#allocation2 + $0x20] sm:$0xff] %vm281_vm0, %v5413_v20  ;;  %v5416_v50 = vadd.f32 %v12323_v23, %v5142_v57 }
 0x28a   : > { %v15480_v54 = vadd.f32 %v12283_v46, %v15312_v61  ;;  %v5301_v49 = vpop.f32.mrf.mxu0 }
 0x28b   : > { %v15482_v27 = vpop.f32.mrf.mxu1  ;;  %5448 = vst.msk [vmem:[#allocation2 + $0x38] sm:$0xff] %vm281_vm0, %v5416_v50  ;;  %v5414_v43 = vadd.f32 %v5301_v49, %v5140_v51 }
 0x28c   : > { %v12326_v53 = vpop.f32.mrf.mxu0 }
 0x28d   : > { %v12286_v33 = vpop.f32.mrf.mxu1  ;;  %5446 = vst.msk [vmem:[#allocation2 + $0x28] sm:$0xff] %vm281_vm0, %v5414_v43  ;;  %v5419_v52 = vadd.f32 %v12326_v53, %v5145_v6 }
 0x28e   : > { %v15493_v61 = vadd.f32 %v12286_v33, %v15325_v12  ;;  %v5314_v13 = vpop.f32.mrf.mxu0 }
 0x28f   : > { %v4928_v16 = vpop.f32.mrf.mxu1  ;;  %5451 = vst.msk [vmem:[#allocation2 + $0x50] sm:$0xff] %vm281_vm0, %v5419_v52  ;;  %v5417_v2 = vadd.f32 %v5314_v13, %v5143_v22  ;;  %v5150_v52 = vld [vmem:[#allocation2 + $0x78] sm:$0xff] }
 0x290   : > { %v15497_v58 = vadd.f32 %v4928_v16, %v15334_v19  ;;  %v12327_v25 = vpop.f32.mrf.mxu0  ;;  %v5149_v19 = vld [vmem:[#allocation2 + $0x70] sm:$0xff] }
 0x291   : > { %v12287_v10 = vpop.f32.mrf.mxu1  ;;  %5449 = vst.msk [vmem:[#allocation2 + $0x40] sm:$0xff] %vm281_vm0, %v5417_v2  ;;  %v5420_v12 = vadd.f32 %v12327_v25, %v5146_v17  ;;  %v5148_v2 = vld [vmem:[#allocation2 + $0x68] sm:$0xff] }
 0x292   : > { %v15501_v11 = vadd.f32 %v12287_v10, %v15338_v37  ;;  %v5317_v20 = vpop.f32.mrf.mxu0  ;;  %v5147_v37 = vld [vmem:[#allocation2 + $0x60] sm:$0xff] }
 0x293   : > { %v15503_v21 = vpop.f32.mrf.mxu1  ;;  %5452 = vst.msk [vmem:[#allocation2 + $0x58] sm:$0xff] %vm281_vm0, %v5420_v12  ;;  %v5418_v46 = vadd.f32 %v5317_v20, %v5144_v35 }
 0x294   : > { %v12330_v23 = vpop.f32.mrf.mxu0  ;;  %v5816_v3 = vld [vmem:[#allocation2 + $0x28] sm:$0xff] }
 0x295   : > { %v12290_v57 = vpop.f32.mrf.mxu1  ;;  %5450 = vst.msk [vmem:[#allocation2 + $0x48] sm:$0xff] %vm281_vm0, %v5418_v46  ;;  %v5423_v51 = vadd.f32 %v12330_v23, %v5149_v19 }
 0x296   : > { %v15508_v50 = vadd.f32 %v12290_v57, %v15351_v9  ;;  %v5330_v43 = vpop.f32.mrf.mxu0 }
 0x297   : > { %v4944_v49 = vpop.f32.mrf.mxu1  ;;  %5455 = vst.msk [vmem:[#allocation2 + $0x70] sm:$0xff] %vm281_vm0, %v5423_v51  ;;  %v5421_v6 = vadd.f32 %v5330_v43, %v5147_v37 }
 0x298   : > { %v15512_v33 = vadd.f32 %v4944_v49, %v15363_v42  ;;  %v12331_v16 = vpop.f32.mrf.mxu0  ;;  %v5153_v42 = vld [vmem:[#allocation2 + $0x90] sm:$0xff]  ;;  %v5154_v49 = vld [vmem:[#allocation2 + $0x98] sm:$0xff] }
 0x299   : > { %v12291_v53 = vpop.f32.mrf.mxu1  ;;  %5453 = vst.msk [vmem:[#allocation2 + $0x60] sm:$0xff] %vm281_vm0, %v5421_v6  ;;  %v5424_v9 = vadd.f32 %v12331_v16, %v5150_v52 }
 0x29a   : > { %v15516_v22 = vadd.f32 %v12291_v53, %v15367_v63  ;;  %v5333_v10 = vpop.f32.mrf.mxu0  ;;  %v5151_v63 = vld [vmem:[#allocation2 + $0x80] sm:$0xff]  ;;  %v5152_v53 = vld [vmem:[#allocation2 + $0x88] sm:$0xff] }
 0x29b   : > { %v15518_v13 = vpop.f32.mrf.mxu1  ;;  %5456 = vst.msk [vmem:[#allocation2 + $0x78] sm:$0xff] %vm281_vm0, %v5424_v9  ;;  %v5422_v17 = vadd.f32 %v5333_v10, %v5148_v2 }
 0x29c   : > { %v12334_v12 = vpop.f32.mrf.mxu0 }
 0x29d   : > { %v12294_v25 = vpop.f32.mrf.mxu1  ;;  %5454 = vst.msk [vmem:[#allocation2 + $0x68] sm:$0xff] %vm281_vm0, %v5422_v17  ;;  %v5427_v20 = vadd.f32 %v12334_v12, %v5153_v42 }
 0x29e   : > { %v15523_v35 = vadd.f32 %v12294_v25, %v15378_v40  ;;  %v5346_v57 = vpop.f32.mrf.mxu0 }
 0x29f   : > { %v4960_v46 = vpop.f32.mrf.mxu1  ;;  %5459 = vst.msk [vmem:[#allocation2 + $0x90] sm:$0xff] %vm281_vm0, %v5427_v20  ;;  %v5425_v23 = vadd.f32 %v5346_v57, %v5151_v63  ;;  %v5158_v63 = vld [vmem:[#allocation2 + $0xb8] sm:$0xff] }
 0x2a0   : > { %16964 = vst [vmem:[#allocation12_spill] sm:$0xff] %v15523_v35  ;;  %v15527_v19 = vadd.f32 %v4960_v46, %v15384_v56  ;;  %v12335_v37 = vpop.f32.mrf.mxu0  ;;  %v5157_v56 = vld [vmem:[#allocation2 + $0xb0] sm:$0xff] }
 0x2a1   : > { %v12295_v51 = vpop.f32.mrf.mxu1  ;;  %5457 = vst.msk [vmem:[#allocation2 + $0x80] sm:$0xff] %vm281_vm0, %v5425_v23  ;;  %v5428_v40 = vadd.f32 %v12335_v37, %v5154_v49  ;;  %v5156_v49 = vld [vmem:[#allocation2 + $0xa8] sm:$0xff] }
 0x2a2   : > { %16965 = vst [vmem:[#allocation13_spill] sm:$0xff] %v15527_v19  ;;  %v15531_v43 = vadd.f32 %v12295_v51, %v15388_v38  ;;  %v5349_v52 = vpop.f32.mrf.mxu0  ;;  %v5155_v38 = vld [vmem:[#allocation2 + $0xa0] sm:$0xff] }
 0x2a3   : > { %v15533_v6 = vpop.f32.mrf.mxu1  ;;  %5460 = vst.msk [vmem:[#allocation2 + $0x98] sm:$0xff] %vm281_vm0, %v5428_v40  ;;  %v5426_v16 = vadd.f32 %v5349_v52, %v5152_v53 }
 0x2a4   : > { %16966 = vst [vmem:[#allocation14_spill] sm:$0xff] %v15531_v43  ;;  %16967 = vst [vmem:[#allocation15_spill] sm:$0xff] %v15533_v6  ;;  %v12338_v2 = vpop.f32.mrf.mxu0  ;;  %v5824_v24 = vld [vmem:[#allocation2 + $0x68] sm:$0xff] }
 0x2a5   : > { %v12298_v9 = vpop.f32.mrf.mxu1  ;;  %5458 = vst.msk [vmem:[#allocation2 + $0x88] sm:$0xff] %vm281_vm0, %v5426_v16  ;;  %v5431_v17 = vadd.f32 %v12338_v2, %v5157_v56 }
 0x2a6   : > { %v15538_v10 = vadd.f32 %v12298_v9, %v15397_v59  ;;  %v5362_v42 = vpop.f32.mrf.mxu0 }
 0x2a7   : > { %v4976_v25 = vpop.f32.mrf.mxu1  ;;  %5463 = vst.msk [vmem:[#allocation2 + $0xb0] sm:$0xff] %vm281_vm0, %v5431_v17  ;;  %v5429_v20 = vadd.f32 %v5362_v42, %v5155_v38  ;;  %v5162_v42 = vld [vmem:[#allocation2 + $0xd8] sm:$0xff] }
 0x2a8   : > { %16968 = vst [vmem:[#allocation16_spill] sm:$0xff] %v15538_v10  ;;  %v15542_v12 = vadd.f32 %v4976_v25, %v15403_v44  ;;  %v12339_v57 = vpop.f32.mrf.mxu0  ;;  %v5161_v44 = vld [vmem:[#allocation2 + $0xd0] sm:$0xff] }
 0x2a9   : > { %v12299_v46 = vpop.f32.mrf.mxu1  ;;  %5461 = vst.msk [vmem:[#allocation2 + $0xa0] sm:$0xff] %vm281_vm0, %v5429_v20  ;;  %v5432_v59 = vadd.f32 %v12339_v57, %v5158_v63  ;;  %v5160_v57 = vld [vmem:[#allocation2 + $0xc8] sm:$0xff] }
 0x2aa   : > { %16969 = vst [vmem:[#allocation17_spill] sm:$0xff] %v15542_v12  ;;  %v15546_v23 = vadd.f32 %v12299_v46, %v15407_v36  ;;  %v5365_v37 = vpop.f32.mrf.mxu0  ;;  %v5159_v36 = vld [vmem:[#allocation2 + $0xc0] sm:$0xff] }
 0x2ab   : > { %v15548_v51 = vpop.f32.mrf.mxu1  ;;  %5464 = vst.msk [vmem:[#allocation2 + $0xb8] sm:$0xff] %vm281_vm0, %v5432_v59  ;;  %v5430_v40 = vadd.f32 %v5365_v37, %v5156_v49 }
 0x2ac   : > { %16970 = vst [vmem:[#allocation18_spill] sm:$0xff] %v15546_v23  ;;  %16971 = vst [vmem:[#allocation19_spill] sm:$0xff] %v15548_v51  ;;  %v12342_v52 = vpop.f32.mrf.mxu0 }
 0x2ad   : > { %v12302_v53 = vpop.f32.mrf.mxu1  ;;  %5462 = vst.msk [vmem:[#allocation2 + $0xa8] sm:$0xff] %vm281_vm0, %v5430_v40  ;;  %v5435_v9 = vadd.f32 %v12342_v52, %v5161_v44 }
 0x2ae   : > { %v15553_v16 = vadd.f32 %v12302_v53, %v15422_v31  ;;  %v5378_v2 = vpop.f32.mrf.mxu0 }
 0x2af   : > { %v4992_v56 = vpop.f32.mrf.mxu1  ;;  %5467 = vst.msk [vmem:[#allocation2 + $0xd0] sm:$0xff] %vm281_vm0, %v5435_v9  ;;  %v5433_v25 = vadd.f32 %v5378_v2, %v5159_v36 }
 0x2b0   : > { %16972 = vst [vmem:[#allocation20_spill] sm:$0xff] %v15553_v16  ;;  %v15557_v17 = vadd.f32 %v4992_v56, %v15428_v60  ;;  %v12343_v20 = vpop.f32.mrf.mxu0  ;;  %v5165_v60 = vld [vmem:[#allocation2 + $0xf0] sm:$0xff] }
 0x2b1   : > { %v12303_v38 = vpop.f32.mrf.mxu1  ;;  %5465 = vst.msk [vmem:[#allocation2 + $0xc0] sm:$0xff] %vm281_vm0, %v5433_v25  ;;  %v5436_v31 = vadd.f32 %v12343_v20, %v5162_v42  ;;  %v5166_v25 = vld [vmem:[#allocation2 + $0xf8] sm:$0xff] }
 0x2b2   : > { %16973 = vst [vmem:[#allocation21_spill] sm:$0xff] %v15557_v17  ;;  %v15561_v46 = vadd.f32 %v12303_v38, %v15432_v48  ;;  %v5381_v59 = vpop.f32.mrf.mxu0  ;;  %v5163_v48 = vld [vmem:[#allocation2 + $0xe0] sm:$0xff] }
 0x2b3   : > { %v15563_v63 = vpop.f32.mrf.mxu1  ;;  %5468 = vst.msk [vmem:[#allocation2 + $0xd8] sm:$0xff] %vm281_vm0, %v5436_v31  ;;  %v5434_v49 = vadd.f32 %v5381_v59, %v5160_v57  ;;  %v5164_v31 = vld [vmem:[#allocation2 + $0xe8] sm:$0xff] }
 0x2b4   : > { %16974 = vst [vmem:[#allocation22_spill] sm:$0xff] %v15561_v46  ;;  %16975 = vst [vmem:[#allocation23_spill] sm:$0xff] %v15563_v63  ;;  %v12346_v40 = vpop.f32.mrf.mxu0 }
 0x2b5   : > { %v12306_v37 = vpop.f32.mrf.mxu1  ;;  %5466 = vst.msk [vmem:[#allocation2 + $0xc8] sm:$0xff] %vm281_vm0, %v5434_v49  ;;  %v5439_v44 = vadd.f32 %v12346_v40, %v5165_v60 }
 0x2b6   : > { %v15568_v53 = vadd.f32 %v12306_v37, %v15441_v28  ;;  %v5394_v9 = vpop.f32.mrf.mxu0 }
 0x2b7   : > { %v5008_v52 = vpop.f32.mrf.mxu1  ;;  %5471 = vst.msk [vmem:[#allocation2 + $0xf0] sm:$0xff] %vm281_vm0, %v5439_v44  ;;  %v5437_v36 = vadd.f32 %v5394_v9, %v5163_v48  ;;  %v5811_v44 = vld [vmem:[#allocation2] sm:$0xff]  ;;  %v5814_v9 = vld [vmem:[#allocation2 + $0x18] sm:$0xff] }
 0x2b8   : > { %16976 = vst [vmem:[#allocation24_spill] sm:$0xff] %v15568_v53  ;;  %v15572_v56 = vadd.f32 %v5008_v52, %v15446_v45  ;;  %v12347_v38 = vpop.f32.mrf.mxu0  ;;  %v5813_v45 = vld [vmem:[#allocation2 + $0x10] sm:$0xff] }
 0x2b9   : > { %v12307_v2 = vpop.f32.mrf.mxu1  ;;  %5469 = vst.msk [vmem:[#allocation2 + $0xe0] sm:$0xff] %vm281_vm0, %v5437_v36  ;;  %v5440_v28 = vadd.f32 %v12347_v38, %v5166_v25  ;;  %v5812_v38 = vld [vmem:[#allocation2 + $0x8] sm:$0xff] }
 0x2ba   : > { %16977 = vst [vmem:[#allocation25_spill] sm:$0xff] %v15572_v56  ;;  %v15576_v42 = vadd.f32 %v12307_v2, %v15450_v47  ;;  %v5397_v57 = vpop.f32.mrf.mxu0 }
 0x2bb   : > { %v15578_v20 = vpop.f32.mrf.mxu1  ;;  %5472 = vst.msk [vmem:[#allocation2 + $0xf8] sm:$0xff] %vm281_vm0, %v5440_v28  ;;  %v5438_v59 = vadd.f32 %v5397_v57, %v5164_v31  ;;  %v15596_v57 = vld [vmem:[%s16891_s2] ss:$0 sm:$0xff] }
 0x2bc   : > { %16978 = vst [vmem:[#allocation26_spill] sm:$0xff] %v15576_v42  ;;  %16979 = vst [vmem:[#allocation27_spill] sm:$0xff] %v15578_v20  ;;  %v12398_v37 = vpop.f32.mrf.mxu0  ;;  %v5818_v42 = vld [vmem:[#allocation2 + $0x38] sm:$0xff] }
 0x2bd   : > { %v15581_v49 = vpop.f32.mrf.mxu1  ;;  %5470 = vst.msk [vmem:[#allocation2 + $0xe8] sm:$0xff] %vm281_vm0, %v5438_v59  ;;  %v6087_v60 = vadd.f32 %v12398_v37, %v5813_v45  ;;  %v5817_v45 = vld [vmem:[#allocation2 + $0x30] sm:$0xff] }
 0x2be   : > { %v5958_v47 = vpop.f32.mrf.mxu0 }
 0x2bf   : > { %v15584_v40 = vpop.f32.mrf.mxu1  ;;  %6119 = vst.msk [vmem:[#allocation2 + $0x10] sm:$0xff] %vm281_vm0, %v6087_v60  ;;  %v6085_v52 = vadd.f32 %v5958_v47, %v5811_v44 }
 0x2c0   : > { %v12399_v36 = vpop.f32.mrf.mxu0 }
 0x2c1   : > { %v15587_v48 = vpop.f32.mrf.mxu1  ;;  %6117 = vst.msk [vmem:[#allocation2] sm:$0xff] %vm281_vm0, %v6085_v52  ;;  %v6088_v2 = vadd.f32 %v12399_v36, %v5814_v9  ;;  %v5815_v52 = vld [vmem:[#allocation2 + $0x20] sm:$0xff] }
 0x2c2   : > { %v5961_v28 = vpop.f32.mrf.mxu0 }
 0x2c3   : > { %v15590_v25 = vpop.f32.mrf.mxu1  ;;  %6120 = vst.msk [vmem:[#allocation2 + $0x18] sm:$0xff] %vm281_vm0, %v6088_v2  ;;  %v6086_v31 = vadd.f32 %v5961_v28, %v5812_v38 }
 0x2c4   : > { %v12402_v37 = vpop.f32.mrf.mxu0 }
 0x2c5   : > { %v15598_v59 = vpop.f32.mrf.mxu1  ;;  %6118 = vst.msk [vmem:[#allocation2 + $0x8] sm:$0xff] %vm281_vm0, %v6086_v31  ;;  %v6091_v60 = vadd.f32 %v12402_v37, %v5817_v45 }
 0x2c6   : > { %v6513_v44 = vld [vmem:[#allocation2 + $0x10] sm:$0xff]  ;;  %v5974_v9 = vpop.f32.mrf.mxu0 }
 0x2c7   : > { %v15601_v47 = vpop.f32.mrf.mxu1  ;;  %v6552_v36 = vadd.f32 %v15596_v57, %v6513_v44  ;;  %6123 = vst.msk [vmem:[#allocation2 + $0x30] sm:$0xff] %vm281_vm0, %v6091_v60  ;;  %v6089_v2 = vadd.f32 %v5974_v9, %v5815_v52 }
 0x2c8   : > { %v6511_v38 = vld [vmem:[#allocation2] sm:$0xff]  ;;  %v12403_v20 = vpop.f32.mrf.mxu0 }
 0x2c9   : > { %v15605_v28 = vpop.f32.mrf.mxu1  ;;  %v6584_v56 = vmax.f32 %v6552_v36, 0.0  ;;  %v6550_v26 = vadd.f32 %v15596_v57, %v6511_v38  ;;  %6121 = vst.msk [vmem:[#allocation2 + $0x20] sm:$0xff] %vm281_vm0, %v6089_v2  ;;  %v6092_v31 = vadd.f32 %v12403_v20, %v5818_v42  ;;  %v5821_v38 = vld [vmem:[#allocation2 + $0x50] sm:$0xff] }
 0x2ca   : > { %v6514_v45 = vld [vmem:[#allocation2 + $0x18] sm:$0xff]  ;;  %v5977_v53 = vpop.f32.mrf.mxu0 }
 0x2cb   : > { %v15609_v37 = vpop.f32.mrf.mxu1  ;;  %6617 = vst.msk [vmem:[#allocation3 + $0x48] sm:$0xff] %vm281_vm0, %v6584_v56  ;;  %v6582_v60 = vmax.f32 %v6550_v26, 0.0  ;;  %v6553_v44 = vadd.f32 %v15596_v57, %v6514_v45  ;;  %6124 = vst.msk [vmem:[#allocation2 + $0x38] sm:$0xff] %vm281_vm0, %v6092_v31  ;;  %v6090_v52 = vadd.f32 %v5977_v53, %v5816_v3  ;;  %v5819_v45 = vld [vmem:[#allocation2 + $0x40] sm:$0xff] }
 0x2cc   : > { %v6512_v9 = vld [vmem:[#allocation2 + $0x8] sm:$0xff]  ;;  %v12406_v46 = vpop.f32.mrf.mxu0 }
 0x2cd   : > { %v15614_v36 = vpop.f32.mrf.mxu1  ;;  %6615 = vst.msk [vmem:[#allocation3 + $0x28] sm:$0xff] %vm281_vm0, %v6582_v60  ;;  %v6585_v42 = vmax.f32 %v6553_v44, 0.0  ;;  %v6551_v20 = vadd.f32 %v15596_v57, %v6512_v9  ;;  %6122 = vst.msk [vmem:[#allocation2 + $0x28] sm:$0xff] %vm281_vm0, %v6090_v52  ;;  %v6095_v2 = vadd.f32 %v12406_v46, %v5821_v38  ;;  %v5822_v9 = vld [vmem:[#allocation2 + $0x58] sm:$0xff] }
 0x2ce   : > { %v6517_v56 = vld [vmem:[#allocation2 + $0x30] sm:$0xff]  ;;  %v5990_v63 = vpop.f32.mrf.mxu0 }
 0x2cf   : > { %v15619_v26 = vpop.f32.mrf.mxu1  ;;  %6618 = vst.msk [vmem:[#allocation3 + $0x50] sm:$0xff] %vm281_vm0, %v6585_v42  ;;  %v6583_v3 = vmax.f32 %v6551_v20, 0.0  ;;  %v6556_v53 = vadd.f32 %v15596_v57, %v6517_v56  ;;  %6127 = vst.msk [vmem:[#allocation2 + $0x50] sm:$0xff] %vm281_vm0, %v6095_v2  ;;  %v6093_v31 = vadd.f32 %v5990_v63, %v5819_v45  ;;  %v5820_v56 = vld [vmem:[#allocation2 + $0x48] sm:$0xff] }
 0x2d0   : > { %v6515_v60 = vld [vmem:[#allocation2 + $0x20] sm:$0xff]  ;;  %v12407_v17 = vpop.f32.mrf.mxu0 }
 0x2d1   : > { %v15624_v44 = vpop.f32.mrf.mxu1  ;;  %6616 = vst.msk [vmem:[#allocation3 + $0x30] sm:$0xff] %vm281_vm0, %v6583_v3  ;;  %v6588_v46 = vmax.f32 %v6556_v53, 0.0  ;;  %v6554_v52 = vadd.f32 %v15596_v57, %v6515_v60  ;;  %6125 = vst.msk [vmem:[#allocation2 + $0x40] sm:$0xff] %vm281_vm0, %v6093_v31  ;;  %v6096_v38 = vadd.f32 %v12407_v17, %v5822_v9  ;;  %v5825_v60 = vld [vmem:[#allocation2 + $0x70] sm:$0xff] }
 0x2d2   : > { %v6518_v42 = vld [vmem:[#allocation2 + $0x38] sm:$0xff]  ;;  %v5993_v29 = vpop.f32.mrf.mxu0 }
 0x2d3   : > { %v15629_v20 = vpop.f32.mrf.mxu1  ;;  %6621 = vst.msk [vmem:[#allocation3 + $0x88] sm:$0xff] %vm281_vm0, %v6588_v46  ;;  %v6586_v63 = vmax.f32 %v6554_v52, 0.0  ;;  %v6557_v2 = vadd.f32 %v15596_v57, %v6518_v42  ;;  %6128 = vst.msk [vmem:[#allocation2 + $0x58] sm:$0xff] %vm281_vm0, %v6096_v38  ;;  %v6094_v45 = vadd.f32 %v5993_v29, %v5820_v56  ;;  %v5823_v42 = vld [vmem:[#allocation2 + $0x60] sm:$0xff] }
 0x2d4   : > { %v6516_v3 = vld [vmem:[#allocation2 + $0x28] sm:$0xff]  ;;  %v12410_v0 = vpop.f32.mrf.mxu0 }
 0x2d5   : > { %v15634_v53 = vpop.f32.mrf.mxu1  ;;  %6619 = vst.msk [vmem:[#allocation3 + $0x68] sm:$0xff] %vm281_vm0, %v6586_v63  ;;  %v6589_v17 = vmax.f32 %v6557_v2, 0.0  ;;  %v6555_v31 = vadd.f32 %v15596_v57, %v6516_v3  ;;  %6126 = vst.msk [vmem:[#allocation2 + $0x48] sm:$0xff] %vm281_vm0, %v6094_v45  ;;  %v6099_v9 = vadd.f32 %v12410_v0, %v5825_v60  ;;  %v5826_v63 = vld [vmem:[#allocation2 + $0x78] sm:$0xff] }
 0x2d6   : > { %v6521_v46 = vld [vmem:[#allocation2 + $0x50] sm:$0xff]  ;;  %v6006_v16 = vpop.f32.mrf.mxu0 }
 0x2d7   : > { %v15639_v52 = vpop.f32.mrf.mxu1  ;;  %6622 = vst.msk [vmem:[#allocation3 + $0x90] sm:$0xff] %vm281_vm0, %v6589_v17  ;;  %v6587_v29 = vmax.f32 %v6555_v31, 0.0  ;;  %v6560_v38 = vadd.f32 %v15596_v57, %v6521_v46  ;;  %6131 = vst.msk [vmem:[#allocation2 + $0x70] sm:$0xff] %vm281_vm0, %v6099_v9  ;;  %v6097_v56 = vadd.f32 %v6006_v16, %v5823_v42  ;;  %v6652_v2 = vld [vmem:[#allocation3 + $0x4f] sm:$0xff]  ;;  %v6649_v46 = vld [vmem:[#allocation3 + $0x27] sm:$0xff] }
 0x2d8   : > { %v7037_v23 = vld [vmem:[#allocation3 + $0x50] sm:$0xff]  ;;  %v6519_v3 = vld [vmem:[#allocation2 + $0x40] sm:$0xff]  ;;  %v12411_v0 = vpop.f32.mrf.mxu0  ;;  %v7034_v9 = vld [vmem:[#allocation3 + $0x28] sm:$0xff] }
 0x2d9   : > { %v15644_v51 = vpop.f32.mrf.mxu1  ;;  %v6650_v45 = vld [vmem:[#allocation3 + $0x2f] sm:$0xff]  ;;  %6620 = vst.msk [vmem:[#allocation3 + $0x70] sm:$0xff] %vm281_vm0, %v6587_v29  ;;  %v6592_v12 = vmax.f32 %v6560_v38, 0.0  ;;  %v6558_v17 = vadd.f32 %v15596_v57, %v6519_v3  ;;  %6129 = vst.msk [vmem:[#allocation2 + $0x60] sm:$0xff] %vm281_vm0, %v6097_v56  ;;  %v6100_v31 = vadd.f32 %v12411_v0, %v5826_v63  ;;  %v6651_v16 = vld [vmem:[#allocation3 + $0x47] sm:$0xff] }
 0x2da   : > { %v7035_v60 = vld [vmem:[#allocation3 + $0x30] sm:$0xff]  ;;  %v6522_v42 = vld [vmem:[#allocation2 + $0x58] sm:$0xff]  ;;  %v6009_v10 = vpop.f32.mrf.mxu0  ;;  %v15651_v43 = vpack.c.bf16 %v6650_v45, %v6649_v46  ;;  %v15653_v19 = vpack.c.bf16 %v6652_v2, %v6651_v16  ;;  %v7036_v29 = vld [vmem:[#allocation3 + $0x48] sm:$0xff] }
 0x2db   : > { %v15649_v34 = vpop.f32.mrf.mxu1  ;;  %v7065_v6 = vpack.c.bf16 %v7035_v60, %v7034_v9  ;;  %6625 = vst.msk [vmem:[#allocation3 + $0xc8] sm:$0xff] %vm281_vm0, %v6592_v12  ;;  %v6590_v38 = vmax.f32 %v6558_v17, 0.0  ;;  %v6561_v56 = vadd.f32 %v15596_v57, %v6522_v42  ;;  %6132 = vst.msk [vmem:[#allocation2 + $0x78] sm:$0xff] %vm281_vm0, %v6100_v31  ;;  %v6098_v63 = vadd.f32 %v6009_v10, %v5824_v24  ;;  %v12927_v0 = vld [vmem:[%s16892_s3 + $0x50] sm:$0xff]   ;;  %v5827_v9 = vld [vmem:[#allocation2 + $0x80] sm:$0xff] }
 0x2dc   : > { %16980 = vst [vmem:[#allocation28_spill] sm:$0xff] %v15649_v34  ;;  %16981 = vst [vmem:[#allocation29_spill] sm:$0xff] %v15653_v19  ;;  %v7066_v3 = vpack.c.bf16 %v7037_v23, %v7036_v29  ;;  %v12931_v45 = vld [vmem:[%s16892_s3 + $0x70] sm:$0xff]   ;;  %v6520_v2 = vld [vmem:[#allocation2 + $0x48] sm:$0xff]  ;;  %12477 = vmatmul.mubr.msk.bf16.vlgmr.msra.gmra.mxu0 %vm281_vm0, %v15651_v43  ;;  %v12414_v17 = vpop.f32.mrf.mxu0 }
 0x2dd   : > { %12517 = vmatmul.mubr.msk.bf16.vlgmr.msra.gmra.mxu1 %vm281_vm0, %v7065_v6  ;;  %v15667_v12 = vpop.f32.mrf.mxu1  ;;  %v5829_v60 = vld [vmem:[#allocation2 + $0x90] sm:$0xff]  ;;  %6623 = vst.msk [vmem:[#allocation3 + $0xa8] sm:$0xff] %vm281_vm0, %v6590_v38  ;;  %v6593_v24 = vmax.f32 %v6561_v56, 0.0  ;;  %v6559_v10 = vadd.f32 %v15596_v57, %v6520_v2  ;;  %6130 = vst.msk [vmem:[#allocation2 + $0x68] sm:$0xff] %vm281_vm0, %v6098_v63  ;;  %12480 = vmatprep.mubr.msk.bf16.mxu0 %vm281_vm0, %v15653_v19  ;;  %v15678_v6 = vld [vmem:[%s16892_s3 + $0x48] sm:$0xff]  }
 0x2de   : > { %16982 = vst [vmem:[#allocation30_spill] sm:$0xff] %v15667_v12  ;;  %v6103_v23 = vadd.f32 %v12414_v17, %v5829_v60  ;;  %12520 = vmatprep.mubr.msk.bf16.mxu1 %vm281_vm0, %v7066_v3  ;;  %v6525_v31 = vld [vmem:[#allocation2 + $0x70] sm:$0xff]  ;;  %12549 = vmatpush3.bf16.msra.mxu0 %v15412_v39  ;;  %v6022_v16 = vpop.f32.mrf.mxu0  ;;  %v15687_v42 = vld [vmem:[%s16892_s3 + $0x68] sm:$0xff]   ;;  %v5830_v39 = vld [vmem:[#allocation2 + $0x98] sm:$0xff] }
 0x2df   : > { %v15681_v46 = vpop.f32.mrf.mxu1  ;;  %12589 = vmatpush3.bf16.msra.mxu1 %v15487_v18  ;;  %6626 = vst.msk [vmem:[#allocation3 + $0xd0] sm:$0xff] %vm281_vm0, %v6593_v24  ;;  %v6591_v29 = vmax.f32 %v6559_v10, 0.0  ;;  %v6564_v38 = vadd.f32 %v15596_v57, %v6525_v31  ;;  %v6101_v56 = vadd.f32 %v6022_v16, %v5827_v9  ;;  %v6656_v63 = vld [vmem:[#allocation3 + $0x8f] sm:$0xff]  ;;  %12550 = vmatprep.subr.bf16.mxu0 %v12927_v0  ;;  %v6653_v31 = vld [vmem:[#allocation3 + $0x67] sm:$0xff] }
 0x2e0   : > { %16983 = vst [vmem:[#allocation31_spill] sm:$0xff] %v15681_v46  ;;  %6135 = vst.msk [vmem:[#allocation2 + $0x90] sm:$0xff] %vm281_vm0, %v6103_v23  ;;  %v7041_v3 = vld [vmem:[#allocation3 + $0x90] sm:$0xff]  ;;  %12590 = vmatprep.subr.bf16.mxu1 %v12931_v45  ;;  %v6523_v2 = vld [vmem:[#allocation2 + $0x60] sm:$0xff]  ;;  %v12415_v60 = vpop.f32.mrf.mxu0 }
 0x2e1   : > { %v15692_v18 = vpop.f32.mrf.mxu1  ;;  %v6654_v17 = vld [vmem:[#allocation3 + $0x6f] sm:$0xff]  ;;  %6624 = vst.msk [vmem:[#allocation3 + $0xb0] sm:$0xff] %vm281_vm0, %v6591_v29  ;;  %v6596_v24 = vmax.f32 %v6564_v38, 0.0  ;;  %v6562_v10 = vadd.f32 %v15596_v57, %v6523_v2  ;;  %6133 = vst.msk [vmem:[#allocation2 + $0x80] sm:$0xff] %vm281_vm0, %v6101_v56  ;;  %v6104_v23 = vadd.f32 %v12415_v60, %v5830_v39  ;;  %v6655_v16 = vld [vmem:[#allocation3 + $0x87] sm:$0xff] }
 0x2e2   : > { %16984 = vst [vmem:[#allocation32_spill] sm:$0xff] %v15692_v18  ;;  %v7039_v46 = vld [vmem:[#allocation3 + $0x70] sm:$0xff]  ;;  %v7038_v9 = vld [vmem:[#allocation3 + $0x68] sm:$0xff]  ;;  %v6526_v62 = vld [vmem:[#allocation2 + $0x78] sm:$0xff]  ;;  %v6025_v12 = vpop.f32.mrf.mxu0  ;;  %v15699_v18 = vpack.c.bf16 %v6654_v17, %v6653_v31  ;;  %v15701_v34 = vpack.c.bf16 %v6656_v63, %v6655_v16  ;;  %12551 = vmatpush3.bf16.msra.mxu0 %v12927_v0 }
 0x2e3   : > { %v15697_v7 = vpop.f32.mrf.mxu1  ;;  %v5828_v19 = vld [vmem:[#allocation2 + $0x88] sm:$0xff]  ;;  %v7067_v35 = vpack.c.bf16 %v7039_v46, %v7038_v9  ;;  %12591 = vmatpush3.bf16.msra.mxu1 %v12931_v45  ;;  %6629 = vst.msk [vmem:[#allocation3 + $0x108] sm:$0xff] %vm281_vm0, %v6596_v24  ;;  %v6594_v38 = vmax.f32 %v6562_v10, 0.0  ;;  %v6565_v56 = vadd.f32 %v15596_v57, %v6526_v62  ;;  %6136 = vst.msk [vmem:[#allocation2 + $0x98] sm:$0xff] %vm281_vm0, %v6104_v23  ;;  %12552 = vmatprep.subr.bf16.mxu0 %v15678_v6  ;;  %v12929_v46 = vld [vmem:[%s16892_s3 + $0x40] sm:$0xff]  }
 0x2e4   : > { %16985 = vst [vmem:[#allocation33_spill] sm:$0xff] %v15697_v7  ;;  %16986 = vst [vmem:[#allocation34_spill] sm:$0xff] %v15699_v18  ;;  %v7040_v29 = vld [vmem:[#allocation3 + $0x88] sm:$0xff]  ;;  %v6102_v39 = vadd.f32 %v6025_v12, %v5828_v19  ;;  %12592 = vmatprep.subr.bf16.mxu1 %v15687_v42  ;;  %v12933_v0 = vld [vmem:[%s16892_s3 + $0x60] sm:$0xff]   ;;  %12481 = vmatmul.mubr.msk.bf16.gmra.mxu0 %vm281_vm0, %v15699_v18  ;;  %v12418_v12 = vpop.f32.mrf.mxu0 }
 0x2e5   : > { %16987 = vst [vmem:[#allocation35_spill] sm:$0xff] %v15701_v34  ;;  %v7068_v2 = vpack.c.bf16 %v7041_v3, %v7040_v29  ;;  %v6524_v45 = vld [vmem:[#allocation2 + $0x68] sm:$0xff]  ;;  %12521 = vmatmul.mubr.msk.bf16.gmra.mxu1 %vm281_vm0, %v7067_v35  ;;  %v15717_v62 = vpop.f32.mrf.mxu1  ;;  %v5833_v19 = vld [vmem:[#allocation2 + $0xb0] sm:$0xff]  ;;  %6627 = vst.msk [vmem:[#allocation3 + $0xe8] sm:$0xff] %vm281_vm0, %v6594_v38  ;;  %v6597_v63 = vmax.f32 %v6565_v56, 0.0  ;;  %12484 = vmatprep.mubr.msk.bf16.mxu0 %vm281_vm0, %v15701_v34 }
 0x2e6   : > { %16988 = vst [vmem:[#allocation36_spill] sm:$0xff] %v15717_v62  ;;  %v6563_v3 = vadd.f32 %v15596_v57, %v6524_v45  ;;  %6134 = vst.msk [vmem:[#allocation2 + $0x88] sm:$0xff] %vm281_vm0, %v6102_v39  ;;  %v6107_v60 = vadd.f32 %v12418_v12, %v5833_v19  ;;  %v15728_v35 = vld [vmem:[%s16892_s3 + $0x98] sm:$0xff]   ;;  %v5831_v10 = vld [vmem:[#allocation2 + $0xa0] sm:$0xff]  ;;  %v6038_v23 = vpop.f32.mrf.mxu0  ;;  %12553 = vmatpush3.bf16.msra.mxu0 %v15678_v6 }
 0x2e7   : > { %12524 = vmatprep.mubr.msk.bf16.mxu1 %vm281_vm0, %v7068_v2  ;;  %v6529_v17 = vld [vmem:[#allocation2 + $0x90] sm:$0xff]  ;;  %v15730_v24 = vpop.f32.mrf.mxu1  ;;  %v5834_v31 = vld [vmem:[#allocation2 + $0xb8] sm:$0xff]  ;;  %12593 = vmatpush3.bf16.msra.mxu1 %v15687_v42  ;;  %6630 = vst.msk [vmem:[#allocation3 + $0x110] sm:$0xff] %vm281_vm0, %v6597_v63  ;;  %v6105_v29 = vadd.f32 %v6038_v23, %v5831_v10  ;;  %v6659_v10 = vld [vmem:[#allocation3 + $0xc7] sm:$0xff] }
 0x2e8   : > { %16989 = vst [vmem:[#allocation37_spill] sm:$0xff] %v15730_v24  ;;  %v6595_v9 = vmax.f32 %v6563_v3, 0.0  ;;  %v6568_v16 = vadd.f32 %v15596_v57, %v6529_v17  ;;  %6139 = vst.msk [vmem:[#allocation2 + $0xb0] sm:$0xff] %vm281_vm0, %v6107_v60  ;;  %v6660_v38 = vld [vmem:[#allocation3 + $0xcf] sm:$0xff]  ;;  %12554 = vmatprep.subr.bf16.mxu0 %v12929_v46  ;;  %12594 = vmatprep.subr.bf16.mxu1 %v12933_v0  ;;  %v15740_v39 = vld [vmem:[%s16892_s3 + $0xb8] sm:$0xff]   ;;  %v12419_v42 = vpop.f32.mrf.mxu0 }
 0x2e9   : > { %v7045_v56 = vld [vmem:[#allocation3 + $0xd0] sm:$0xff]  ;;  %v6527_v6 = vld [vmem:[#allocation2 + $0x80] sm:$0xff]  ;;  %v15742_v2 = vpop.f32.mrf.mxu1  ;;  %6137 = vst.msk [vmem:[#allocation2 + $0xa0] sm:$0xff] %vm281_vm0, %v6105_v29  ;;  %v6108_v3 = vadd.f32 %v12419_v42, %v5834_v31  ;;  %v7042_v17 = vld [vmem:[#allocation3 + $0xa8] sm:$0xff]  ;;  %v15751_v18 = vpack.c.bf16 %v6660_v38, %v6659_v10 }
 0x2ea   : > { %16990 = vst [vmem:[#allocation38_spill] sm:$0xff] %v15742_v2  ;;  %v6658_v45 = vld [vmem:[#allocation3 + $0xaf] sm:$0xff]  ;;  %6628 = vst.msk [vmem:[#allocation3 + $0xf0] sm:$0xff] %vm281_vm0, %v6595_v9  ;;  %v6600_v12 = vmax.f32 %v6568_v16, 0.0  ;;  %v6566_v63 = vadd.f32 %v15596_v57, %v6527_v6  ;;  %v6657_v60 = vld [vmem:[#allocation3 + $0xa7] sm:$0xff]  ;;  %v6041_v62 = vpop.f32.mrf.mxu0  ;;  %12555 = vmatpush3.bf16.msra.mxu0 %v12929_v46 }
 0x2eb   : > { %v7043_v19 = vld [vmem:[#allocation3 + $0xb0] sm:$0xff]  ;;  %v6530_v23 = vld [vmem:[#allocation2 + $0x98] sm:$0xff]  ;;  %v15747_v24 = vpop.f32.mrf.mxu1  ;;  %v5832_v34 = vld [vmem:[#allocation2 + $0xa8] sm:$0xff]  ;;  %v15749_v2 = vpack.c.bf16 %v6658_v45, %v6657_v60  ;;  %16991 = vst [vmem:[#allocation39_spill] sm:$0xff] %v15751_v18  ;;  %12595 = vmatpush3.bf16.msra.mxu1 %v12933_v0  ;;  %12628 = vmatprep.subr.bf16.mxu0 %v15728_v35 }
 0x2ec   : > { %v7069_v7 = vpack.c.bf16 %v7043_v19, %v7042_v17  ;;  %v7044_v9 = vld [vmem:[#allocation3 + $0xc8] sm:$0xff]  ;;  %6633 = vst.msk [vmem:[#allocation3 + $0x148] sm:$0xff] %vm281_vm0, %v6600_v12  ;;  %v6598_v16 = vmax.f32 %v6566_v63, 0.0  ;;  %v6569_v31 = vadd.f32 %v15596_v57, %v6530_v23  ;;  %6140 = vst.msk [vmem:[#allocation2 + $0xb8] sm:$0xff] %vm281_vm0, %v6108_v3  ;;  %v6106_v29 = vadd.f32 %v6041_v62, %v5832_v34  ;;  %v5837_v0 = vld [vmem:[#allocation2 + $0xd0] sm:$0xff]  ;;  %v12422_v38 = vpop.f32.mrf.mxu0 }
 0x2ed   : > { %v7070_v6 = vpack.c.bf16 %v7045_v56, %v7044_v9  ;;  %12668 = vmatprep.subr.bf16.mxu1 %v15740_v39  ;;  %v6528_v42 = vld [vmem:[#allocation2 + $0x88] sm:$0xff]  ;;  %12485 = vmatmul.mubr.msk.bf16.gmra.mxu0 %vm281_vm0, %v15749_v2  ;;  %v15761_v46 = vpop.f32.mrf.mxu1  ;;  %v6111_v62 = vadd.f32 %v12422_v38, %v5837_v0  ;;  %v5835_v19 = vld [vmem:[#allocation2 + $0xc0] sm:$0xff]  ;;  %v5838_v17 = vld [vmem:[#allocation2 + $0xd8] sm:$0xff] }
 0x2ee   : > { %12525 = vmatmul.mubr.msk.bf16.gmra.mxu1 %vm281_vm0, %v7069_v7  ;;  %6631 = vst.msk [vmem:[#allocation3 + $0x128] sm:$0xff] %vm281_vm0, %v6598_v16  ;;  %v6601_v45 = vmax.f32 %v6569_v31, 0.0  ;;  %v6567_v34 = vadd.f32 %v15596_v57, %v6528_v42  ;;  %6138 = vst.msk [vmem:[#allocation2 + $0xa8] sm:$0xff] %vm281_vm0, %v6106_v29  ;;  %12488 = vmatprep.mubr.msk.bf16.mxu0 %vm281_vm0, %v15751_v18  ;;  %v6054_v12 = vpop.f32.mrf.mxu0  ;;  %v6664_v10 = vld [vmem:[#allocation3 + $0x10f] sm:$0xff] }
 0x2ef   : > { %12528 = vmatprep.mubr.msk.bf16.mxu1 %vm281_vm0, %v7070_v6  ;;  %v6533_v56 = vld [vmem:[#allocation2 + $0xb0] sm:$0xff]  ;;  %v15770_v7 = vpop.f32.mrf.mxu1  ;;  %6143 = vst.msk [vmem:[#allocation2 + $0xd0] sm:$0xff] %vm281_vm0, %v6111_v62  ;;  %v6109_v60 = vadd.f32 %v6054_v12, %v5835_v19  ;;  %v6663_v62 = vld [vmem:[#allocation3 + $0x107] sm:$0xff] }
 0x2f0   : > { %16992 = vst [vmem:[#allocation40_spill] sm:$0xff] %v15770_v7  ;;  %6634 = vst.msk [vmem:[#allocation3 + $0x150] sm:$0xff] %vm281_vm0, %v6601_v45  ;;  %v6599_v63 = vmax.f32 %v6567_v34, 0.0  ;;  %v6572_v3 = vadd.f32 %v15596_v57, %v6533_v56  ;;  %v7049_v23 = vld [vmem:[#allocation3 + $0x110] sm:$0xff]  ;;  %v6531_v9 = vld [vmem:[#allocation2 + $0xa0] sm:$0xff]  ;;  %v12423_v31 = vpop.f32.mrf.mxu0 }
 0x2f1   : > { %v15775_v16 = vpop.f32.mrf.mxu1  ;;  %v6662_v29 = vld [vmem:[#allocation3 + $0xef] sm:$0xff]  ;;  %v6570_v0 = vadd.f32 %v15596_v57, %v6531_v9  ;;  %6141 = vst.msk [vmem:[#allocation2 + $0xc0] sm:$0xff] %vm281_vm0, %v6109_v60  ;;  %v6112_v38 = vadd.f32 %v12423_v31, %v5838_v17  ;;  %v6661_v45 = vld [vmem:[#allocation3 + $0xe7] sm:$0xff] }
 0x2f2   : > { %16993 = vst [vmem:[#allocation41_spill] sm:$0xff] %v15775_v16  ;;  %v7047_v6 = vld [vmem:[#allocation3 + $0xf0] sm:$0xff]  ;;  %6632 = vst.msk [vmem:[#allocation3 + $0x130] sm:$0xff] %vm281_vm0, %v6599_v63  ;;  %v6604_v42 = vmax.f32 %v6572_v3, 0.0  ;;  %v7046_v34 = vld [vmem:[#allocation3 + $0xe8] sm:$0xff]  ;;  %v6057_v16 = vpop.f32.mrf.mxu0  ;;  %v15788_v7 = vpack.c.bf16 %v6662_v29, %v6661_v45  ;;  %v15792_v63 = vpack.c.bf16 %v6664_v10, %v6663_v62 }
 0x2f3   : > { %v6534_v56 = vld [vmem:[#allocation2 + $0xb8] sm:$0xff]  ;;  %v15786_v19 = vpop.f32.mrf.mxu1  ;;  %v5836_v12 = vld [vmem:[#allocation2 + $0xc8] sm:$0xff]  ;;  %v15790_v18 = vpack.c.bf16 %v7047_v6, %v7046_v34  ;;  %v6602_v60 = vmax.f32 %v6570_v0, 0.0  ;;  %6144 = vst.msk [vmem:[#allocation2 + $0xd8] sm:$0xff] %vm281_vm0, %v6112_v38  ;;  %v5841_v29 = vld [vmem:[#allocation2 + $0xf0] sm:$0xff] }
 0x2f4   : > { %16995 = vst [vmem:[#allocation42_spill] sm:$0xff] %v15786_v19  ;;  %16996 = vst [vmem:[#allocation43_spill] sm:$0xff] %v15788_v7  ;;  %v7048_v3 = vld [vmem:[#allocation3 + $0x108] sm:$0xff]  ;;  %v6573_v17 = vadd.f32 %v15596_v57, %v6534_v56  ;;  %v6110_v9 = vadd.f32 %v6057_v16, %v5836_v12  ;;  %v12426_v6 = vpop.f32.mrf.mxu0  ;;  %v5839_v45 = vld [vmem:[#allocation2 + $0xe0] sm:$0xff] }
 0x2f5   : > { %16997 = vst [vmem:[#allocation44_spill] sm:$0xff] %v15790_v18  ;;  %16998 = vst [vmem:[#allocation45_spill] sm:$0xff] %v15792_v63  ;;  %v15797_v31 = vpack.c.bf16 %v7049_v23, %v7048_v3  ;;  %v6532_v19 = vld [vmem:[#allocation2 + $0xa8] sm:$0xff]  ;;  %12489 = vmatmul.mubr.msk.bf16.gmra.mxu0 %vm281_vm0, %v15788_v7  ;;  %v15803_v10 = vpop.f32.mrf.mxu1  ;;  %v5842_v12 = vld [vmem:[#allocation2 + $0xf8] sm:$0xff] }
 0x2f6   : > { %6637 = vst.msk [vmem:[#allocation3 + $0x188] sm:$0xff] %vm281_vm0, %v6604_v42  ;;  %12529 = vmatmul.mubr.msk.bf16.gmra.mxu1 %vm281_vm0, %v15790_v18  ;;  %17000 = vst [vmem:[#allocation47_spill] sm:$0xff] %v15803_v10  ;;  %v6605_v16 = vmax.f32 %v6573_v17, 0.0  ;;  %v6571_v23 = vadd.f32 %v15596_v57, %v6532_v19  ;;  %v6115_v42 = vadd.f32 %v12426_v6, %v5841_v29  ;;  %12492 = vmatprep.mubr.msk.bf16.mxu0 %vm281_vm0, %v15792_v63  ;;  %v6537_v0 = vld [vmem:[#allocation2 + $0xd0] sm:$0xff]  ;;  %v6070_v34 = vpop.f32.mrf.mxu0  ;;  %v5840_v63 = vld [vmem:[#allocation2 + $0xe8] sm:$0xff] }
 0x2f7   : > { %16999 = vst [vmem:[#allocation46_spill] sm:$0xff] %v15797_v31  ;;  %6635 = vst.msk [vmem:[#allocation3 + $0x168] sm:$0xff] %vm281_vm0, %v6602_v60  ;;  %12532 = vmatprep.mubr.msk.bf16.mxu1 %vm281_vm0, %v15797_v31  ;;  %v15818_v38 = vpop.f32.mrf.mxu1  ;;  %v6576_v56 = vadd.f32 %v15596_v57, %v6537_v0  ;;  %v6113_v19 = vadd.f32 %v6070_v34, %v5839_v45  ;;  %v6668_v3 = vld [vmem:[#allocation3 + $0x14f] sm:$0xff]  ;;  %v6667_v45 = vld [vmem:[#allocation3 + $0x147] sm:$0xff]  ;;  %v5701_v34 = vadd.f32 %v15581_v49, %v15457_v32 }
 0x2f8   : > { %6142 = vst.msk [vmem:[#allocation2 + $0xc8] sm:$0xff] %vm281_vm0, %v6110_v9  ;;  %17001 = vst [vmem:[#allocation48_spill] sm:$0xff] %v15818_v38  ;;  %v6603_v62 = vmax.f32 %v6571_v23, 0.0  ;;  %v7053_v60 = vld [vmem:[#allocation3 + $0x150] sm:$0xff]  ;;  %v6535_v17 = vld [vmem:[#allocation2 + $0xc0] sm:$0xff]  ;;  %v12427_v29 = vpop.f32.mrf.mxu0 }
 0x2f9   : > { %6638 = vst.msk [vmem:[#allocation3 + $0x190] sm:$0xff] %vm281_vm0, %v6605_v16  ;;  %6147 = vst.msk [vmem:[#allocation2 + $0xf0] sm:$0xff] %vm281_vm0, %v6115_v42  ;;  %v15823_v9 = vpop.f32.mrf.mxu1  ;;  %v6666_v6 = vld [vmem:[#allocation3 + $0x12f] sm:$0xff]  ;;  %v6608_v18 = vmax.f32 %v6576_v56, 0.0  ;;  %v6574_v16 = vadd.f32 %v15596_v57, %v6535_v17  ;;  %v6116_v23 = vadd.f32 %v12427_v29, %v5842_v12  ;;  %v6665_v42 = vld [vmem:[#allocation3 + $0x127] sm:$0xff]  ;;  %v15837_v56 = vpack.c.bf16 %v6668_v3, %v6667_v45 }
 0x2fa   : > { %17002 = vst [vmem:[#allocation49_spill] sm:$0xff] %v15823_v9  ;;  %v7051_v31 = vld [vmem:[#allocation3 + $0x130] sm:$0xff]  ;;  %6636 = vst.msk [vmem:[#allocation3 + $0x170] sm:$0xff] %vm281_vm0, %v6603_v62  ;;  %v7050_v0 = vld [vmem:[#allocation3 + $0x128] sm:$0xff]  ;;  %v6073_v10 = vpop.f32.mrf.mxu0  ;;  %v15833_v7 = vpack.c.bf16 %v6666_v6, %v6665_v42 }
 0x2fb   : > { %6145 = vst.msk [vmem:[#allocation2 + $0xe0] sm:$0xff] %vm281_vm0, %v6113_v19  ;;  %v6538_v38 = vld [vmem:[#allocation2 + $0xd8] sm:$0xff]  ;;  %v15831_v9 = vpop.f32.mrf.mxu1  ;;  %v15835_v62 = vpack.c.bf16 %v7051_v31, %v7050_v0  ;;  %v7052_v17 = vld [vmem:[#allocation3 + $0x148] sm:$0xff]  ;;  %6641 = vst.msk [vmem:[#allocation3 + $0x1c8] sm:$0xff] %vm281_vm0, %v6608_v18  ;;  %v6606_v19 = vmax.f32 %v6574_v16, 0.0  ;;  %v6114_v32 = vadd.f32 %v6073_v10, %v5840_v63 }
 0x2fc   : > { %v6577_v12 = vadd.f32 %v15596_v57, %v6538_v38  ;;  %6148 = vst.msk [vmem:[#allocation2 + $0xf8] sm:$0xff] %vm281_vm0, %v6116_v23  ;;  %v15842_v49 = vpack.c.bf16 %v7053_v60, %v7052_v17  ;;  %v5699_v38 = vadd.f32 %v15584_v40, %v15461_v1  ;;  %v5024_v60 = vadd.f32 %v15467_v30, %v15296_v55 }
 0x2fd   : > { %12493 = vmatmul.mubr.msk.bf16.gmra.mxu0 %vm281_vm0, %v15833_v7  ;;  %v12438_v18 = vpop.f32.mrf.mxu1  ;;  %6639 = vst.msk [vmem:[#allocation3 + $0x1a8] sm:$0xff] %vm281_vm0, %v6606_v19  ;;  %6146 = vst.msk [vmem:[#allocation2 + $0xe8] sm:$0xff] %vm281_vm0, %v6114_v32  ;;  %v5702_v1 = vadd.f32 %v15587_v48, %v15465_v8 }
 0x2fe   : > { %12533 = vmatmul.mubr.msk.bf16.gmra.mxu1 %vm281_vm0, %v15835_v62  ;;  %v6609_v63 = vmax.f32 %v6577_v12, 0.0  ;;  %v6377_v3 = vadd.f32 %v12438_v18, %v5701_v34  ;;  %12496 = vmatprep.mubr.msk.bf16.mxu0 %vm281_vm0, %v15837_v56  ;;  %v6669_v42 = vld [vmem:[#allocation3 + $0x167] sm:$0xff]  ;;  %v5700_v34 = vadd.f32 %v15590_v25, %v5024_v60 }
 0x2ff   : > { %v6536_v31 = vld [vmem:[#allocation2 + $0xc8] sm:$0xff]  ;;  %12536 = vmatprep.mubr.msk.bf16.mxu1 %vm281_vm0, %v15842_v49  ;;  %v6248_v6 = vpop.f32.mrf.mxu1 }
 0x300   : > { %v6575_v10 = vadd.f32 %v15596_v57, %v6536_v31  ;;  %v6541_v29 = vld [vmem:[#allocation2 + $0xf0] sm:$0xff]  ;;  %6642 = vst.msk [vmem:[#allocation3 + $0x1d0] sm:$0xff] %vm281_vm0, %v6609_v63  ;;  %6409 = vst [vmem:[%s15847_s16 + $0x10] sm:$0xff] %v6377_v3  ;;  %v6375_v23 = vadd.f32 %v6248_v6, %v5699_v38  ;;  %v7054_v31 = vld [vmem:[#allocation3 + $0x168] sm:$0xff]  ;;  %v5705_v38 = vadd.f32 %v15598_v59, %v15472_v41 }
 0x301   : > { %v6580_v16 = vadd.f32 %v15596_v57, %v6541_v29  ;;  %v6672_v0 = vld [vmem:[#allocation3 + $0x18f] sm:$0xff]  ;;  %v12439_v55 = vpop.f32.mrf.mxu1  ;;  %v6671_v18 = vld [vmem:[#allocation3 + $0x187] sm:$0xff]  ;;  %v5703_v59 = vadd.f32 %v15601_v47, %v15476_v5  ;;  %v5706_v5 = vadd.f32 %v15605_v28, %v15480_v54 }
 0x302   : > { %v6607_v40 = vmax.f32 %v6575_v10, 0.0  ;;  %v7057_v45 = vld [vmem:[#allocation3 + $0x190] sm:$0xff]  ;;  %v6539_v17 = vld [vmem:[#allocation2 + $0xe0] sm:$0xff]  ;;  %6407 = vst [vmem:[%s15847_s16] sm:$0xff] %v6375_v23  ;;  %v6378_v12 = vadd.f32 %v12439_v55, %v5702_v1  ;;  %v15879_v3 = vpack.c.bf16 %v6672_v0, %v6671_v18  ;;  %v7056_v60 = vld [vmem:[#allocation3 + $0x188] sm:$0xff] }
 0x303   : > { %v6670_v30 = vld [vmem:[#allocation3 + $0x16f] sm:$0xff]  ;;  %v6612_v8 = vmax.f32 %v6580_v16, 0.0  ;;  %v6578_v48 = vadd.f32 %v15596_v57, %v6539_v17  ;;  %v6542_v25 = vld [vmem:[#allocation2 + $0xf8] sm:$0xff]  ;;  %v6251_v63 = vpop.f32.mrf.mxu1  ;;  %v6675_v18 = vld [vmem:[#allocation3 + $0x1c7] sm:$0xff] }
 0x304   : > { %v7055_v19 = vld [vmem:[#allocation3 + $0x170] sm:$0xff]  ;;  %6640 = vst.msk [vmem:[#allocation3 + $0x1b0] sm:$0xff] %vm281_vm0, %v6607_v40  ;;  %v15873_v32 = vpack.c.bf16 %v6670_v30, %v6669_v42  ;;  %v6581_v6 = vadd.f32 %v15596_v57, %v6542_v25  ;;  %6410 = vst [vmem:[%s15847_s16 + $0x18] sm:$0xff] %v6378_v12  ;;  %v6376_v1 = vadd.f32 %v6251_v63, %v5700_v34  ;;  %v6540_v16 = vld [vmem:[#allocation2 + $0xe8] sm:$0xff] }
 0x305   : > { %v15877_v10 = vpack.c.bf16 %v7055_v19, %v7054_v31  ;;  %6645 = vst.msk [vmem:[#allocation3 + $0x208] sm:$0xff] %vm281_vm0, %v6612_v8  ;;  %v6610_v29 = vmax.f32 %v6578_v48, 0.0  ;;  %v15884_v40 = vpack.c.bf16 %v7057_v45, %v7056_v60  ;;  %v12442_v41 = vpop.f32.mrf.mxu1  ;;  %v6579_v42 = vadd.f32 %v15596_v57, %v6540_v16  ;;  %v6673_v17 = vld [vmem:[#allocation3 + $0x1a7] sm:$0xff] }
 0x306   : > { %12497 = vmatmul.mubr.msk.bf16.gmra.mxu0 %vm281_vm0, %v15873_v32  ;;  %v6613_v23 = vmax.f32 %v6581_v6, 0.0  ;;  %6408 = vst [vmem:[%s15847_s16 + $0x8] sm:$0xff] %v6376_v1  ;;  %v6381_v0 = vadd.f32 %v12442_v41, %v5705_v38  ;;  %v5028_v34 = vadd.f32 %v15482_v27, %v15319_v14  ;;  %v7058_v55 = vld [vmem:[#allocation3 + $0x1a8] sm:$0xff]  ;;  %v5709_v25 = vadd.f32 %v15614_v36, %v15493_v61  ;;  %v7419_v36 = vld [vmem:[#allocation3 + $0x11] sm:$0xff] }
 0x307   : > { %12537 = vmatmul.mubr.msk.bf16.gmra.mxu1 %vm281_vm0, %v15877_v10  ;;  %6643 = vst.msk [vmem:[#allocation3 + $0x1e8] sm:$0xff] %vm281_vm0, %v6610_v29  ;;  %12500 = vmatprep.mubr.msk.bf16.mxu0 %vm281_vm0, %v15879_v3  ;;  %v6264_v45 = vpop.f32.mrf.mxu1  ;;  %v6611_v47 = vmax.f32 %v6579_v42, 0.0  ;;  %v6676_v30 = vld [vmem:[#allocation3 + $0x1cf] sm:$0xff]  ;;  %v5707_v6 = vadd.f32 %v15619_v26, %v15497_v58  ;;  %v5032_v41 = vadd.f32 %v15503_v21, %v15345_v15 }
 0x308   : > { %12540 = vmatprep.mubr.msk.bf16.mxu1 %vm281_vm0, %v15884_v40  ;;  %6646 = vst.msk [vmem:[#allocation3 + $0x210] sm:$0xff] %vm281_vm0, %v6613_v23  ;;  %6413 = vst [vmem:[%s15847_s16 + $0x30] sm:$0xff] %v6381_v0  ;;  %v6379_v57 = vadd.f32 %v6264_v45, %v5703_v59  ;;  %v7061_v12 = vld [vmem:[#allocation3 + $0x1d0] sm:$0xff]  ;;  %v5704_v31 = vadd.f32 %v15609_v37, %v5028_v34  ;;  %v7060_v38 = vld [vmem:[#allocation3 + $0x1c8] sm:$0xff]  ;;  %v15915_v60 = vpack.c.bf16 %v6676_v30, %v6675_v18 }
 0x309   : > { %v12443_v19 = vpop.f32.mrf.mxu1  ;;  %6644 = vst.msk [vmem:[#allocation3 + $0x1f0] sm:$0xff] %vm281_vm0, %v6611_v47  ;;  %v15917_v37 = vpack.c.bf16 %v7061_v12, %v7060_v38  ;;  %v7418_v61 = vld [vmem:[#allocation3 + $0x9] sm:$0xff]  ;;  %v5710_v59 = vadd.f32 %v15624_v44, %v15501_v11  ;;  %v5713_v21 = vadd.f32 %v15634_v53, %v15508_v50  ;;  %v5036_v53 = vadd.f32 %v15518_v13, %v15372_v4  ;;  %v7423_v12 = vld [vmem:[#allocation3 + $0x51] sm:$0xff]  ;;  %v17004_v38 = vld [vmem:[#allocation12_spill] sm:$0xff] }
 0x30a   : > { %6411 = vst [vmem:[%s15847_s16 + $0x20] sm:$0xff] %v6379_v57  ;;  %v6382_v14 = vadd.f32 %v12443_v19, %v5706_v5  ;;  %v7450_v34 = vpack.c.bf16 %v7419_v36, %v7418_v61  ;;  %v5708_v5 = vadd.f32 %v15629_v20, %v5032_v41  ;;  %v5714_v30 = vadd.f32 %v15644_v51, %v15516_v22  ;;  %v17005_v4 = vld [vmem:[#allocation30_spill] sm:$0xff]  ;;  %v17010_v41 = vld [vmem:[#allocation31_spill] sm:$0xff] }
 0x30b   : > { %v6674_v8 = vld [vmem:[#allocation3 + $0x1af] sm:$0xff]  ;;  %v6267_v28 = vpop.f32.mrf.mxu1  ;;  %v5717_v13 = vadd.f32 %v17005_v4, %v17004_v38  ;;  %v17019_v38 = vld [vmem:[#allocation8_spill] sm:$0xff]  ;;  %v17020_v4 = vld [vmem:[#allocation7_spill] sm:$0xff] }
 0x30c   : > { %v7059_v48 = vld [vmem:[#allocation3 + $0x1b0] sm:$0xff]  ;;  %v15908_v54 = vpack.c.bf16 %v6674_v8, %v6673_v17  ;;  %6414 = vst [vmem:[%s15847_s16 + $0x38] sm:$0xff] %v6382_v14  ;;  %v6380_v63 = vadd.f32 %v6267_v28, %v5704_v31  ;;  %v5711_v17 = vadd.f32 %v15639_v52, %v15512_v33  ;;  %v17003_v31 = vld [vmem:[#allocation28_spill] sm:$0xff] }
 0x30d   : > { %v15910_v27 = vpack.c.bf16 %v7059_v48, %v7058_v55  ;;  %v12446_v29 = vpop.f32.mrf.mxu1  ;;  %v7420_v8 = vld [vmem:[#allocation3 + $0x29] sm:$0xff]  ;;  %v7421_v33 = vld [vmem:[#allocation3 + $0x31] sm:$0xff]  ;;  %v5712_v14 = vadd.f32 %v17003_v31, %v5036_v53  ;;  %v12937_v31 = vld [vmem:[%s16892_s3 + $0x80] sm:$0xff]  }
 0x30e   : > { %12501 = vmatmul.mubr.msk.bf16.gmra.mxu0 %vm281_vm0, %v15908_v54  ;;  %6412 = vst [vmem:[%s15847_s16 + $0x28] sm:$0xff] %v6380_v63  ;;  %v6385_v1 = vadd.f32 %v12446_v29, %v5709_v25  ;;  %v6677_v26 = vld [vmem:[#allocation3 + $0x1e7] sm:$0xff]  ;;  %v15961_v18 = vpack.c.bf16 %v7421_v33, %v7420_v8  ;;  %v12935_v25 = vld [vmem:[%s16892_s3 + $0x90] sm:$0xff]  }
 0x30f   : > { %12541 = vmatmul.mubr.msk.bf16.gmra.mxu1 %vm281_vm0, %v15910_v27  ;;  %12504 = vmatprep.mubr.msk.bf16.mxu0 %vm281_vm0, %v15915_v60  ;;  %v6280_v16 = vpop.f32.mrf.mxu1  ;;  %v7062_v0 = vld [vmem:[#allocation3 + $0x1e8] sm:$0xff]  ;;  %v12939_v63 = vld [vmem:[%s16892_s3 + $0xb0] sm:$0xff]   ;;  %v17016_v8 = vld [vmem:[#allocation16_spill] sm:$0xff] }
 0x310   : > { %12544 = vmatprep.mubr.msk.bf16.mxu1 %vm281_vm0, %v15917_v37  ;;  %6417 = vst [vmem:[%s15847_s16 + $0x50] sm:$0xff] %v6385_v1  ;;  %v6383_v58 = vadd.f32 %v6280_v16, %v5707_v6  ;;  %v6678_v42 = vld [vmem:[#allocation3 + $0x1ef] sm:$0xff]  ;;  %v17007_v1 = vld [vmem:[#allocation4_spill] sm:$0xff] }
 0x311   : > { %v12447_v23 = vpop.f32.mrf.mxu1  ;;  %v7063_v45 = vld [vmem:[#allocation3 + $0x1f0] sm:$0xff]  ;;  %v15937_v57 = vpack.c.bf16 %v6678_v42, %v6677_v26  ;;  %v17006_v29 = vld [vmem:[#allocation29_spill] sm:$0xff]  ;;  %v17017_v33 = vld [vmem:[#allocation36_spill] sm:$0xff] }
 0x312   : > { %6415 = vst [vmem:[%s15847_s16 + $0x40] sm:$0xff] %v6383_v58  ;;  %v6386_v47 = vadd.f32 %v12447_v23, %v5710_v59  ;;  %v15939_v15 = vpack.c.bf16 %v7063_v45, %v7062_v0  ;;  %v7422_v48 = vld [vmem:[#allocation3 + $0x49] sm:$0xff]  ;;  %v17012_v0 = vld [vmem:[#allocation15_spill] sm:$0xff] }
 0x313   : > { %v6283_v11 = vpop.f32.mrf.mxu1  ;;  %v15966_v51 = vpack.c.bf16 %v7423_v12, %v7422_v48  ;;  %v17008_v61 = vld [vmem:[#allocation6_spill] sm:$0xff]  ;;  %v17009_v16 = vld [vmem:[#allocation13_spill] sm:$0xff] }
 0x314   : > { %6418 = vst [vmem:[%s15847_s16 + $0x58] sm:$0xff] %v6386_v47  ;;  %v6384_v44 = vadd.f32 %v6283_v11, %v5708_v5  ;;  %v4363_v36 = vadd.f32 %v17008_v61, %v17007_v1  ;;  %v5715_v59 = vadd.f32 %v17010_v41, %v17009_v16  ;;  %v17011_v26 = vld [vmem:[#allocation34_spill] sm:$0xff]  ;;  %v12936_v42 = vld [vmem:[%s16892_s3 + $0x88] sm:$0xff]   ;;  %v17014_v5 = vld [vmem:[#allocation32_spill] sm:$0xff] }
 0x315   : > { %v12450_v20 = vpop.f32.mrf.mxu1  ;;  %v16030_v1 = vld [vmem:[%s16892_s3 + $0xd8] sm:$0xff]   ;;  %v17024_v16 = vld [vmem:[#allocation18_spill] sm:$0xff] }
 0x316   : > { %12505 = vmatmul.mubr.msk.bf16.gmra.mxu0 %vm281_vm0, %v15937_v57  ;;  %6416 = vst [vmem:[%s15847_s16 + $0x48] sm:$0xff] %v6384_v44  ;;  %v6389_v55 = vadd.f32 %v12450_v20, %v5713_v21  ;;  %v5040_v45 = vadd.f32 %v17012_v0, %v4363_v36  ;;  %v7424_v21 = vld [vmem:[#allocation3 + $0x69] sm:$0xff]  ;;  %v7425_v44 = vld [vmem:[#allocation3 + $0x71] sm:$0xff] }
 0x317   : > { %12545 = vmatmul.mubr.msk.bf16.gmra.mxu1 %vm281_vm0, %v15939_v15  ;;  %12556 = vmatprep.mubr.msk.bf16.mxu0 %vm281_vm0, %v7450_v34  ;;  %v6296_v50 = vpop.f32.mrf.mxu1  ;;  %v17013_v34 = vld [vmem:[#allocation14_spill] sm:$0xff]  ;;  %v17023_v61 = vld [vmem:[#allocation19_spill] sm:$0xff] }
 0x318   : > { %12596 = vmatprep.mubr.msk.bf16.mxu1 %vm281_vm0, %v15651_v43  ;;  %6421 = vst [vmem:[%s15847_s16 + $0x70] sm:$0xff] %v6389_v55  ;;  %v6387_v19 = vadd.f32 %v6296_v50, %v5711_v17  ;;  %v5718_v47 = vadd.f32 %v17014_v5, %v17013_v34  ;;  %v7426_v17 = vld [vmem:[#allocation3 + $0x89] sm:$0xff]  ;;  %v7427_v55 = vld [vmem:[#allocation3 + $0x91] sm:$0xff] }
 0x319   : > { %v12451_v52 = vpop.f32.mrf.mxu1  ;;  %v16006_v12 = vpack.c.bf16 %v7427_v55, %v7426_v17  ;;  %v17025_v41 = vld [vmem:[#allocation38_spill] sm:$0xff]  ;;  %v17028_v55 = vld [vmem:[#allocation5_spill] sm:$0xff] }
 0x31a   : > { %6419 = vst [vmem:[%s15847_s16 + $0x60] sm:$0xff] %v6387_v19  ;;  %v6390_v43 = vadd.f32 %v12451_v52, %v5714_v30  ;;  %v16001_v19 = vpack.c.bf16 %v7425_v44, %v7424_v21  ;;  %v5721_v52 = vadd.f32 %v17017_v33, %v17016_v8  ;;  %v7430_v0 = vld [vmem:[#allocation3 + $0xc9] sm:$0xff]  ;;  %v17026_v21 = vld [vmem:[#allocation20_spill] sm:$0xff]  ;;  %v17032_v33 = vld [vmem:[#allocation43_spill] sm:$0xff] }
 0x31b   : > { %v6299_v28 = vpop.f32.mrf.mxu1  ;;  %v5725_v44 = vadd.f32 %v15761_v46, %v17026_v21  ;;  %v17030_v46 = vld [vmem:[#allocation21_spill] sm:$0xff]  ;;  %v17043_v21 = vld [vmem:[#allocation48_spill] sm:$0xff] }
 0x31c   : > { %6422 = vst [vmem:[%s15847_s16 + $0x78] sm:$0xff] %v6390_v43  ;;  %v6388_v22 = vadd.f32 %v6299_v28, %v5712_v14  ;;  %v12941_v14 = vld [vmem:[%s16892_s3 + $0xa0] sm:$0xff]   ;;  %v17018_v43 = vld [vmem:[#allocation35_spill] sm:$0xff] }
 0x31d   : > { %v12454_v6 = vpop.f32.mrf.mxu1 }
 0x31e   : > { %12557 = vmatmul.mubr.msk.bf16.vlgmr.msra.gmra.mxu0 %vm281_vm0, %v15961_v18  ;;  %6420 = vst [vmem:[%s15847_s16 + $0x68] sm:$0xff] %v6388_v22  ;;  %v6393_v58 = vadd.f32 %v12454_v6, %v5717_v13  ;;  %v4367_v13 = vadd.f32 %v17020_v4, %v17019_v38  ;;  %v17021_v22 = vld [vmem:[#allocation17_spill] sm:$0xff] }
 0x31f   : > { %12597 = vmatmul.mubr.msk.bf16.vlgmr.msra.gmra.mxu1 %vm281_vm0, %v17006_v29  ;;  %12560 = vmatprep.mubr.msk.bf16.mxu0 %vm281_vm0, %v15966_v51  ;;  %v6312_v23 = vpop.f32.mrf.mxu1  ;;  %v7432_v4 = vld [vmem:[#allocation3 + $0xe9] sm:$0xff] }
 0x320   : > { %12600 = vmatprep.mubr.msk.bf16.mxu1 %vm281_vm0, %v17011_v26  ;;  %12629 = vmatpush3.bf16.msra.mxu0 %v15728_v35  ;;  %6425 = vst [vmem:[%s15847_s16 + $0x90] sm:$0xff] %v6393_v58  ;;  %v6391_v11 = vadd.f32 %v6312_v23, %v5715_v59  ;;  %v12940_v35 = vld [vmem:[%s16892_s3 + $0xa8] sm:$0xff]   ;;  %v5044_v36 = vadd.f32 %v17023_v61, %v4367_v13  ;;  %v7429_v23 = vld [vmem:[#allocation3 + $0xb1] sm:$0xff] }
 0x321   : > { %12669 = vmatpush3.bf16.msra.mxu1 %v15740_v39  ;;  %12630 = vmatprep.subr.bf16.mxu0 %v12935_v25  ;;  %v12455_v20 = vpop.f32.mrf.mxu1  ;;  %v17015_v39 = vld [vmem:[#allocation33_spill] sm:$0xff]  ;;  %v5722_v59 = vadd.f32 %v17025_v41, %v17024_v16  ;;  %v7433_v13 = vld [vmem:[#allocation3 + $0xf1] sm:$0xff]  ;;  %v17037_v41 = vld [vmem:[#allocation24_spill] sm:$0xff] }
 0x322   : > { %12670 = vmatprep.subr.bf16.mxu1 %v12939_v63  ;;  %v5716_v50 = vadd.f32 %v17015_v39, %v5040_v45  ;;  %6423 = vst [vmem:[%s15847_s16 + $0x80] sm:$0xff] %v6391_v11  ;;  %v6394_v53 = vadd.f32 %v12455_v20, %v5718_v47  ;;  %v7428_v26 = vld [vmem:[#allocation3 + $0xa9] sm:$0xff]  ;;  %v7431_v45 = vld [vmem:[#allocation3 + $0xd1] sm:$0xff]  ;;  %v5720_v34 = vadd.f32 %v15747_v24, %v5044_v36 }
 0x323   : > { %v6315_v30 = vpop.f32.mrf.mxu1  ;;  %v16043_v11 = vpack.c.bf16 %v7429_v23, %v7428_v26  ;;  %v16048_v20 = vpack.c.bf16 %v7431_v45, %v7430_v0  ;;  %v17027_v24 = vld [vmem:[#allocation39_spill] sm:$0xff]  ;;  %v17029_v39 = vld [vmem:[#allocation9_spill] sm:$0xff]  ;;  %v16071_v16 = vpack.c.bf16 %v7433_v13, %v7432_v4  ;;  %v17040_v45 = vld [vmem:[#allocation10_spill] sm:$0xff] }
 0x324   : > { %12631 = vmatpush3.bf16.msra.mxu0 %v12935_v25  ;;  %6426 = vst [vmem:[%s15847_s16 + $0x98] sm:$0xff] %v6394_v53  ;;  %v6392_v48 = vadd.f32 %v6315_v30, %v5716_v50  ;;  %v17022_v25 = vld [vmem:[#allocation37_spill] sm:$0xff]  ;;  %v4371_v50 = vadd.f32 %v17029_v39, %v17028_v55  ;;  %v17031_v53 = vld [vmem:[#allocation40_spill] sm:$0xff]  ;;  %v17045_v39 = vld [vmem:[#allocation26_spill] sm:$0xff] }
 0x325   : > { %12671 = vmatpush3.bf16.msra.mxu1 %v12939_v63  ;;  %12632 = vmatprep.subr.bf16.mxu0 %v12936_v42  ;;  %v12458_v28 = vpop.f32.mrf.mxu1  ;;  %v5719_v63 = vadd.f32 %v17022_v25, %v17021_v22  ;;  %v5723_v30 = vadd.f32 %v17031_v53, %v17030_v46  ;;  %v7434_v25 = vld [vmem:[#allocation3 + $0x109] sm:$0xff]  ;;  %v7441_v4 = vld [vmem:[#allocation3 + $0x171] sm:$0xff] }
 0x326   : > { %12672 = vmatprep.subr.bf16.mxu1 %v12940_v35  ;;  %12561 = vmatmul.mubr.msk.bf16.gmra.mxu0 %vm281_vm0, %v16001_v19  ;;  %6424 = vst [vmem:[%s15847_s16 + $0x88] sm:$0xff] %v6392_v48  ;;  %v6397_v29 = vadd.f32 %v12458_v28, %v5721_v52  ;;  %v17033_v48 = vld [vmem:[#allocation23_spill] sm:$0xff]  ;;  %v7442_v13 = vld [vmem:[#allocation3 + $0x189] sm:$0xff] }
 0x327   : > { %12601 = vmatmul.mubr.msk.bf16.gmra.mxu1 %vm281_vm0, %v17018_v43  ;;  %12564 = vmatprep.mubr.msk.bf16.mxu0 %vm281_vm0, %v16006_v12  ;;  %v6328_v6 = vpop.f32.mrf.mxu1  ;;  %v17035_v43 = vld [vmem:[#allocation41_spill] sm:$0xff] }
 0x328   : > { %12604 = vmatprep.mubr.msk.bf16.mxu1 %vm281_vm0, %v15749_v2  ;;  %12633 = vmatpush3.bf16.msra.mxu0 %v12936_v42  ;;  %6429 = vst [vmem:[%s15847_s16 + $0xb0] sm:$0xff] %v6397_v29  ;;  %v6395_v58 = vadd.f32 %v6328_v6, %v5719_v63  ;;  %v16039_v2 = vld [vmem:[%s16892_s3 + $0xf8] sm:$0xff]   ;;  %v17036_v29 = vld [vmem:[#allocation42_spill] sm:$0xff] }
 0x329   : > { %12673 = vmatpush3.bf16.msra.mxu1 %v12940_v35  ;;  %12634 = vmatprep.subr.bf16.mxu0 %v12937_v31  ;;  %v12459_v42 = vpop.f32.mrf.mxu1  ;;  %v7435_v63 = vld [vmem:[#allocation3 + $0x111] sm:$0xff] }
 0x32a   : > { %12674 = vmatprep.subr.bf16.mxu1 %v12941_v14  ;;  %6427 = vst [vmem:[%s15847_s16 + $0xa0] sm:$0xff] %v6395_v58  ;;  %v6398_v5 = vadd.f32 %v12459_v42, %v5722_v59  ;;  %v17038_v59 = vld [vmem:[#allocation47_spill] sm:$0xff]  ;;  %v16076_v23 = vpack.c.bf16 %v7435_v63, %v7434_v25  ;;  %v17039_v42 = vld [vmem:[#allocation45_spill] sm:$0xff] }
 0x32b   : > { %v6331_v47 = vpop.f32.mrf.mxu1  ;;  %v5729_v58 = vadd.f32 %v17038_v59, %v17037_v41  ;;  %v7835_v41 = vld [vmem:[#allocation3 + $0x20f] sm:$0xff] }
 0x32c   : > { %12635 = vmatpush3.bf16.msra.mxu0 %v12937_v31  ;;  %6430 = vst [vmem:[%s15847_s16 + $0xb8] sm:$0xff] %v6398_v5  ;;  %v6396_v35 = vadd.f32 %v6331_v47, %v5720_v34  ;;  %v5048_v31 = vadd.f32 %v17033_v48, %v4371_v50  ;;  %v17041_v34 = vld [vmem:[#allocation11_spill] sm:$0xff]  ;;  %v17042_v47 = vld [vmem:[#allocation25_spill] sm:$0xff]  ;;  %v8191_v59 = vld [vmem:[#allocation3 + $0x30] sm:$0xff] }
 0x32d   : > { %12675 = vmatpush3.bf16.msra.mxu1 %v12941_v14  ;;  %12708 = vmatprep.subr.bf16.mxu0 %v16030_v1  ;;  %v12462_v17 = vpop.f32.mrf.mxu1  ;;  %v17034_v14 = vld [vmem:[#allocation22_spill] sm:$0xff]  ;;  %v4375_v5 = vadd.f32 %v17041_v34, %v17040_v45  ;;  %v17046_v50 = vld [vmem:[#allocation49_spill] sm:$0xff] }
 0x32e   : > { %12748 = vmatprep.subr.bf16.mxu1 %v16039_v2  ;;  %12565 = vmatmul.mubr.msk.bf16.gmra.mxu0 %vm281_vm0, %v16043_v11  ;;  %6428 = vst [vmem:[%s15847_s16 + $0xa8] sm:$0xff] %v6396_v35  ;;  %v6401_v8 = vadd.f32 %v12462_v17, %v5725_v44  ;;  %v5726_v28 = vadd.f32 %v17035_v43, %v17034_v14  ;;  %v17044_v17 = vld [vmem:[#allocation27_spill] sm:$0xff]  ;;  %v8192_v34 = vld [vmem:[#allocation3 + $0x48] sm:$0xff] }
 0x32f   : > { %12605 = vmatmul.mubr.msk.bf16.gmra.mxu1 %vm281_vm0, %v17027_v24  ;;  %12568 = vmatprep.mubr.msk.bf16.mxu0 %vm281_vm0, %v16048_v20  ;;  %v6344_v52 = vpop.f32.mrf.mxu1  ;;  %v5724_v6 = vadd.f32 %v17036_v29, %v5048_v31  ;;  %v5727_v44 = vadd.f32 %v17043_v21, %v17042_v47  ;;  %v5052_v55 = vadd.f32 %v17044_v17, %v4375_v5  ;;  %v7439_v48 = vld [vmem:[#allocation3 + $0x151] sm:$0xff]  ;;  %v7446_v29 = vld [vmem:[#allocation3 + $0x1c9] sm:$0xff] }
 0x330   : > { %12608 = vmatprep.mubr.msk.bf16.mxu1 %vm281_vm0, %v17032_v33  ;;  %6433 = vst [vmem:[%s15847_s16 + $0xd0] sm:$0xff] %v6401_v8  ;;  %v6399_v38 = vadd.f32 %v6344_v52, %v5723_v30  ;;  %v5730_v46 = vadd.f32 %v17046_v50, %v17045_v39  ;;  %v7436_v30 = vld [vmem:[#allocation3 + $0x129] sm:$0xff]  ;;  %v7437_v8 = vld [vmem:[#allocation3 + $0x131] sm:$0xff]  ;;  %v12949_v50 = vld [vmem:[%s16892_s3 + $0xe0] sm:$0xff]  }
 0x331   : > { %v12463_v22 = vpop.f32.mrf.mxu1  ;;  %v7438_v52 = vld [vmem:[#allocation3 + $0x149] sm:$0xff]  ;;  %v5728_v31 = vadd.f32 %v15831_v9, %v5052_v55  ;;  %v16097_v43 = vpack.c.bf16 %v7437_v8, %v7436_v30 }
 0x332   : > { %6431 = vst [vmem:[%s15847_s16 + $0xc0] sm:$0xff] %v6399_v38  ;;  %v6402_v61 = vadd.f32 %v12463_v22, %v5726_v28  ;;  %v16100_v38 = vpack.c.bf16 %v7439_v48, %v7438_v52  ;;  %v7440_v9 = vld [vmem:[#allocation3 + $0x169] sm:$0xff]  ;;  %v7443_v22 = vld [vmem:[#allocation3 + $0x191] sm:$0xff] }
 0x333   : > { %v6347_v36 = vpop.f32.mrf.mxu1  ;;  %v16111_v25 = vpack.c.bf16 %v7441_v4, %v7440_v9  ;;  %v16113_v63 = vpack.c.bf16 %v7443_v22, %v7442_v13  ;;  %v8194_v47 = vld [vmem:[#allocation3 + $0x68] sm:$0xff]  ;;  %v8199_v17 = vld [vmem:[#allocation3 + $0xb0] sm:$0xff]  ;;  %v6695_v4 = vld [vmem:[%s15847_s16] sm:$0xff] }
 0x334   : > { %6434 = vst [vmem:[%s15847_s16 + $0xd8] sm:$0xff] %v6402_v61  ;;  %v6400_v26 = vadd.f32 %v6347_v36, %v5724_v6  ;;  %v7447_v6 = vld [vmem:[#allocation3 + $0x1d1] sm:$0xff]  ;;  %v8196_v55 = vld [vmem:[#allocation3 + $0x88] sm:$0xff] }
 0x335   : > { %v12466_v0 = vpop.f32.mrf.mxu1  ;;  %v16125_v36 = vpack.c.bf16 %v7447_v6, %v7446_v29  ;;  %v8200_v30 = vld [vmem:[#allocation3 + $0xc8] sm:$0xff]  ;;  %v6698_v29 = vld [vmem:[%s15847_s16 + $0x18] sm:$0xff] }
 0x336   : > { %12569 = vmatmul.mubr.msk.bf16.gmra.mxu0 %vm281_vm0, %v16071_v16  ;;  %6432 = vst [vmem:[%s15847_s16 + $0xc8] sm:$0xff] %v6400_v26  ;;  %v6405_v35 = vadd.f32 %v12466_v0, %v5729_v58  ;;  %v7834_v58 = vld [vmem:[#allocation3 + $0x207] sm:$0xff] }
 0x337   : > { %12609 = vmatmul.mubr.msk.bf16.gmra.mxu1 %vm281_vm0, %v17039_v42  ;;  %12572 = vmatprep.mubr.msk.bf16.mxu0 %vm281_vm0, %v16076_v23  ;;  %v6360_v24 = vpop.f32.mrf.mxu1  ;;  %v7851_v42 = vpack.c.bf16 %v7835_v41, %v7834_v58  ;;  %v8190_v0 = vld [vmem:[#allocation3 + $0x28] sm:$0xff] }
 0x338   : > { %12612 = vmatprep.mubr.msk.bf16.mxu1 %vm281_vm0, %v15833_v7  ;;  %6437 = vst [vmem:[%s15847_s16 + $0xf0] sm:$0xff] %v6405_v35  ;;  %v6403_v53 = vadd.f32 %v6360_v24, %v5727_v44  ;;  %v8222_v45 = vpack.c.bf16 %v8191_v59, %v8190_v0  ;;  %v12943_v44 = vld [vmem:[%s16892_s3 + $0xd0] sm:$0xff]   ;;  %v12944_v24 = vld [vmem:[%s16892_s3 + $0xc8] sm:$0xff]  }
 0x339   : > { %v12467_v33 = vpop.f32.mrf.mxu1  ;;  %v12947_v35 = vld [vmem:[%s16892_s3 + $0xf0] sm:$0xff]   ;;  %v8965_v52 = vld [vmem:[#allocation3 + $0x67] sm:$0xff] }
 0x33a   : > { %6435 = vst [vmem:[%s15847_s16 + $0xe0] sm:$0xff] %v6403_v53  ;;  %v6406_v14 = vadd.f32 %v12467_v33, %v5730_v46  ;;  %v8201_v46 = vld [vmem:[#allocation3 + $0xd0] sm:$0xff]  ;;  %v12950_v53 = vld [vmem:[%s16892_s3 + $0x118] sm:$0xff]   ;;  %v8969_v41 = vld [vmem:[#allocation3 + $0xa7] sm:$0xff] }
 0x33b   : > { %v6363_v7 = vpop.f32.mrf.mxu1  ;;  %v16190_v8 = vpack.c.bf16 %v8201_v46, %v8200_v30  ;;  %v8968_v33 = vld [vmem:[#allocation3 + $0x8f] sm:$0xff]  ;;  %v8971_v0 = vld [vmem:[#allocation3 + $0xc7] sm:$0xff] }
 0x33c   : > { %6438 = vst [vmem:[%s15847_s16 + $0xf8] sm:$0xff] %v6406_v14  ;;  %v6404_v28 = vadd.f32 %v6363_v7, %v5728_v31  ;;  %v8967_v31 = vld [vmem:[#allocation3 + $0x87] sm:$0xff]  ;;  %v12951_v7 = vld [vmem:[%s16892_s3 + $0x110] sm:$0xff]  }
 0x33d   : > { %v8997_v14 = vpack.c.bf16 %v8968_v33, %v8967_v31  ;;  %v6696_v59 = vld [vmem:[%s15847_s16 + $0x8] sm:$0xff] }
 0x33e   : > { %12573 = vmatmul.mubr.msk.bf16.gmra.mxu0 %vm281_vm0, %v16097_v43  ;;  %6436 = vst [vmem:[%s15847_s16 + $0xe8] sm:$0xff] %v6404_v28  ;;  %v8976_v46 = vld [vmem:[#allocation3 + $0x10f] sm:$0xff] }
 0x33f   : > { %12613 = vmatmul.mubr.msk.bf16.gmra.mxu1 %vm281_vm0, %v15837_v56  ;;  %12576 = vmatprep.mubr.msk.bf16.mxu0 %vm281_vm0, %v16100_v38  ;;  %v7444_v56 = vld [vmem:[#allocation3 + $0x1a9] sm:$0xff] }
 0x340   : > { %12616 = vmatprep.mubr.msk.bf16.mxu1 %vm281_vm0, %v15873_v32  ;;  %v7445_v32 = vld [vmem:[#allocation3 + $0x1b1] sm:$0xff] }
 0x341   : > { %v16123_v61 = vpack.c.bf16 %v7445_v32, %v7444_v56  ;;  %v8970_v56 = vld [vmem:[#allocation3 + $0xaf] sm:$0xff] }
 0x342   : > { %v12952_v32 = vld [vmem:[%s16892_s3 + $0x108] sm:$0xff]  }
 0x346   : > { %12577 = vmatmul.mubr.msk.bf16.gmra.mxu0 %vm281_vm0, %v16111_v25 }
 0x347   : > { %12617 = vmatmul.mubr.msk.bf16.gmra.mxu1 %vm281_vm0, %v15879_v3  ;;  %12580 = vmatprep.mubr.msk.bf16.mxu0 %vm281_vm0, %v16113_v63  ;;  %v7448_v3 = vld [vmem:[#allocation3 + $0x1e9] sm:$0xff] }
 0x348   : > { %12620 = vmatprep.mubr.msk.bf16.mxu1 %vm281_vm0, %v15908_v54  ;;  %v7449_v54 = vld [vmem:[#allocation3 + $0x1f1] sm:$0xff] }
 0x349   : > { %v16135_v26 = vpack.c.bf16 %v7449_v54, %v7448_v3 }
 0x34e   : > { %12581 = vmatmul.mubr.msk.bf16.gmra.mxu0 %vm281_vm0, %v16123_v61 }
 0x34f   : > { %12621 = vmatmul.mubr.msk.bf16.gmra.mxu1 %vm281_vm0, %v15915_v60  ;;  %12584 = vmatprep.mubr.msk.bf16.mxu0 %vm281_vm0, %v16125_v36  ;;  %v8193_v60 = vld [vmem:[#allocation3 + $0x50] sm:$0xff] }
 0x350   : > { %12624 = vmatprep.mubr.msk.bf16.mxu1 %vm281_vm0, %v15937_v57  ;;  %v8195_v57 = vld [vmem:[#allocation3 + $0x70] sm:$0xff]  ;;  %v16143_v5 = vpack.c.bf16 %v8193_v60, %v8192_v34  ;;  %v12953_v34 = vld [vmem:[%s16892_s3 + $0x100] sm:$0xff]  }
 0x351   : > { %v16145_v21 = vpack.c.bf16 %v8195_v57, %v8194_v47 }
 0x356   : > { %12585 = vmatmul.mubr.msk.bf16.gmra.mxu0 %vm281_vm0, %v16135_v26 }
 0x357   : > { %12625 = vmatmul.mubr.msk.bf16.gmra.mxu1 %vm281_vm0, %v7851_v42  ;;  %12636 = vmatprep.mubr.msk.bf16.mxu0 %vm281_vm0, %v8222_v45  ;;  %v8998_v42 = vpack.c.bf16 %v8970_v56, %v8969_v41  ;;  %v6706_v56 = vld [vmem:[%s15847_s16 + $0x58] sm:$0xff]  ;;  %v8977_v41 = vld [vmem:[#allocation3 + $0x127] sm:$0xff] }
 0x358   : > { %12676 = vmatprep.mubr.msk.bf16.mxu1 %vm281_vm0, %v15961_v18  ;;  %v8197_v18 = vld [vmem:[#allocation3 + $0x90] sm:$0xff] }
 0x359   : > { %v16169_v39 = vpack.c.bf16 %v8197_v18, %v8196_v55  ;;  %v6699_v18 = vld [vmem:[%s15847_s16 + $0x20] sm:$0xff] }
 0x35e   : > { %12637 = vmatmul.mubr.msk.bf16.vlgmr.msra.gmra.mxu0 %vm281_vm0, %v16143_v5 }
 0x35f   : > { %12677 = vmatmul.mubr.msk.bf16.vlgmr.msra.gmra.mxu1 %vm281_vm0, %v15966_v51  ;;  %12640 = vmatprep.mubr.msk.bf16.mxu0 %vm281_vm0, %v16145_v21  ;;  %v12948_v51 = vld [vmem:[%s16892_s3 + $0xe8] sm:$0xff]  }
 0x360   : > { %12680 = vmatprep.mubr.msk.bf16.mxu1 %vm281_vm0, %v16001_v19  ;;  %12709 = vmatpush3.bf16.msra.mxu0 %v16030_v1  ;;  %v8198_v19 = vld [vmem:[#allocation3 + $0xa8] sm:$0xff] }
 0x361   : > { %12749 = vmatpush3.bf16.msra.mxu1 %v16039_v2  ;;  %12710 = vmatprep.subr.bf16.mxu0 %v12943_v44  ;;  %v16171_v1 = vpack.c.bf16 %v8199_v17, %v8198_v19  ;;  %v12945_v2 = vld [vmem:[%s16892_s3 + $0xc0] sm:$0xff]   ;;  %v9360_v19 = vld [vmem:[#allocation3 + $0xf0] sm:$0xff] }
 0x362   : > { %12750 = vmatprep.subr.bf16.mxu1 %v12947_v35 }
 0x364   : > { %12711 = vmatpush3.bf16.msra.mxu0 %v12943_v44 }
 0x365   : > { %12751 = vmatpush3.bf16.msra.mxu1 %v12947_v35  ;;  %12712 = vmatprep.subr.bf16.mxu0 %v12944_v24 }
 0x366   : > { %12752 = vmatprep.subr.bf16.mxu1 %v12948_v51  ;;  %12641 = vmatmul.mubr.msk.bf16.gmra.mxu0 %vm281_vm0, %v16169_v39 }
 0x367   : > { %12681 = vmatmul.mubr.msk.bf16.gmra.mxu1 %vm281_vm0, %v16006_v12  ;;  %12644 = vmatprep.mubr.msk.bf16.mxu0 %vm281_vm0, %v16171_v1  ;;  %v17047_v12 = vld [vmem:[#allocation44_spill] sm:$0xff] }
 0x368   : > { %12684 = vmatprep.mubr.msk.bf16.mxu1 %vm281_vm0, %v16043_v11  ;;  %12713 = vmatpush3.bf16.msra.mxu0 %v12944_v24  ;;  %v17048_v11 = vld [vmem:[#allocation46_spill] sm:$0xff] }
 0x369   : > { %12753 = vmatpush3.bf16.msra.mxu1 %v12948_v51  ;;  %12714 = vmatprep.subr.bf16.mxu0 %v12945_v2 }
 0x36a   : > { %12754 = vmatprep.subr.bf16.mxu1 %v12949_v50 }
 0x36c   : > { %12715 = vmatpush3.bf16.msra.mxu0 %v12945_v2 }
 0x36d   : > { %12755 = vmatpush3.bf16.msra.mxu1 %v12949_v50  ;;  %12788 = vmatprep.subr.bf16.mxu0 %v12950_v53 }
 0x36e   : > { %12645 = vmatmul.mubr.msk.bf16.gmra.mxu0 %vm281_vm0, %v16190_v8 }
 0x36f   : > { %12685 = vmatmul.mubr.msk.bf16.gmra.mxu1 %vm281_vm0, %v16048_v20  ;;  %12648 = vmatprep.mubr.msk.bf16.mxu0 %vm281_vm0, %v17047_v12  ;;  %v8973_v12 = vld [vmem:[#allocation3 + $0xe7] sm:$0xff] }
 0x370   : > { %12688 = vmatprep.mubr.msk.bf16.mxu1 %vm281_vm0, %v16071_v16 }
 0x376   : > { %12649 = vmatmul.mubr.msk.bf16.gmra.mxu0 %vm281_vm0, %v17048_v11  ;;  %v9359_v11 = vld [vmem:[#allocation3 + $0xe8] sm:$0xff] }
 0x377   : > { %12689 = vmatmul.mubr.msk.bf16.gmra.mxu1 %vm281_vm0, %v16076_v23  ;;  %12652 = vmatprep.mubr.msk.bf16.mxu0 %vm281_vm0, %v15835_v62  ;;  %v8221_v62 = vld [vmem:[#allocation3 + $0x210] sm:$0xff]  ;;  %v8963_v23 = vld [vmem:[#allocation3 + $0x47] sm:$0xff] }
 0x378   : > { %12692 = vmatprep.mubr.msk.bf16.mxu1 %vm281_vm0, %v16097_v43  ;;  %v6697_v43 = vld [vmem:[%s15847_s16 + $0x10] sm:$0xff] }
 0x37e   : > { %12653 = vmatmul.mubr.msk.bf16.gmra.mxu0 %vm281_vm0, %v15842_v49  ;;  %v8606_v49 = vld [vmem:[#allocation3 + $0x209] sm:$0xff] }
 0x37f   : > { %12693 = vmatmul.mubr.msk.bf16.gmra.mxu1 %vm281_vm0, %v16100_v38  ;;  %12656 = vmatprep.mubr.msk.bf16.mxu0 %vm281_vm0, %v15877_v10  ;;  %v8607_v10 = vld [vmem:[#allocation3 + $0x211] sm:$0xff] }
 0x380   : > { %12696 = vmatprep.mubr.msk.bf16.mxu1 %vm281_vm0, %v16111_v25  ;;  %v8623_v16 = vpack.c.bf16 %v8607_v10, %v8606_v49 }
 0x386   : > { %12657 = vmatmul.mubr.msk.bf16.gmra.mxu0 %vm281_vm0, %v15884_v40  ;;  %v8964_v40 = vld [vmem:[#allocation3 + $0x4f] sm:$0xff] }
 0x387   : > { %12697 = vmatmul.mubr.msk.bf16.gmra.mxu1 %vm281_vm0, %v16113_v63  ;;  %12660 = vmatprep.mubr.msk.bf16.mxu0 %vm281_vm0, %v15910_v27  ;;  %v8220_v27 = vld [vmem:[#allocation3 + $0x208] sm:$0xff] }
 0x388   : > { %12700 = vmatprep.mubr.msk.bf16.mxu1 %vm281_vm0, %v16123_v61  ;;  %v16232_v20 = vpack.c.bf16 %v8221_v62, %v8220_v27  ;;  %v6700_v62 = vld [vmem:[%s15847_s16 + $0x28] sm:$0xff]  ;;  %v9386_v27 = vpack.c.bf16 %v9360_v19, %v9359_v11  ;;  %v6707_v19 = vld [vmem:[%s15847_s16 + $0x60] sm:$0xff] }
 0x38e   : > { %12661 = vmatmul.mubr.msk.bf16.gmra.mxu0 %vm281_vm0, %v15917_v37  ;;  %v8995_v37 = vpack.c.bf16 %v8964_v40, %v8963_v23  ;;  %v9361_v23 = vld [vmem:[#allocation3 + $0x108] sm:$0xff] }
 0x38f   : > { %12701 = vmatmul.mubr.msk.bf16.gmra.mxu1 %vm281_vm0, %v16125_v36  ;;  %12664 = vmatprep.mubr.msk.bf16.mxu0 %vm281_vm0, %v15939_v15  ;;  %v8966_v15 = vld [vmem:[#allocation3 + $0x6f] sm:$0xff] }
 0x390   : > { %12704 = vmatprep.mubr.msk.bf16.mxu1 %vm281_vm0, %v16135_v26  ;;  %v8996_v48 = vpack.c.bf16 %v8966_v15, %v8965_v52  ;;  %v8972_v36 = vld [vmem:[#allocation3 + $0xcf] sm:$0xff] }
 0x391   : > { %v8999_v57 = vpack.c.bf16 %v8972_v36, %v8971_v0 }
 0x396   : > { %12665 = vmatmul.mubr.msk.bf16.gmra.mxu0 %vm281_vm0, %v16232_v20 }
 0x397   : > { %12705 = vmatmul.mubr.msk.bf16.gmra.mxu1 %vm281_vm0, %v8623_v16  ;;  %12716 = vmatprep.mubr.msk.bf16.mxu0 %vm281_vm0, %v8995_v37  ;;  %v8975_v16 = vld [vmem:[#allocation3 + $0x107] sm:$0xff] }
 0x398   : > { %12756 = vmatprep.mubr.msk.bf16.mxu1 %vm281_vm0, %v16143_v5  ;;  %v6701_v5 = vld [vmem:[%s15847_s16 + $0x30] sm:$0xff]  ;;  %v9001_v33 = vpack.c.bf16 %v8976_v46, %v8975_v16  ;;  %v8981_v16 = vld [vmem:[#allocation3 + $0x167] sm:$0xff] }
 0x39c   : > { %v12478_v28 = vpop.f32.mrf.mxu0 }
 0x39d   : > { %v12518_v38 = vpop.f32.mrf.mxu1  ;;  %v6970_v9 = vadd.f32 %v12478_v28, %v6697_v43  ;;  %v6703_v28 = vld [vmem:[%s15847_s16 + $0x40] sm:$0xff] }
 0x39e   : > { %12717 = vmatmul.mubr.msk.bf16.vlgmr.msra.gmra.mxu0 %vm281_vm0, %v8996_v48  ;;  %v6841_v13 = vpop.f32.mrf.mxu0  ;;  %v6705_v48 = vld [vmem:[%s15847_s16 + $0x50] sm:$0xff] }
 0x39f   : > { %12757 = vmatmul.mubr.msk.bf16.vlgmr.msra.gmra.mxu1 %vm281_vm0, %v16145_v21  ;;  %12720 = vmatprep.mubr.msk.bf16.mxu0 %vm281_vm0, %v8997_v14  ;;  %v7227_v22 = vpop.f32.mrf.mxu1  ;;  %v16251_v25 = vadd.f32 %v12518_v38, %v6970_v9  ;;  %v6968_v63 = vadd.f32 %v6841_v13, %v6695_v4 }
 0x3a0   : > { %12760 = vmatprep.mubr.msk.bf16.mxu1 %vm281_vm0, %v16169_v39  ;;  %12789 = vmatpush3.bf16.msra.mxu0 %v12950_v53  ;;  %v12479_v6 = vpop.f32.mrf.mxu0  ;;  %v8974_v39 = vld [vmem:[#allocation3 + $0xef] sm:$0xff] }
 0x3a1   : > { %12790 = vmatprep.subr.bf16.mxu0 %v12951_v7  ;;  %v12519_v61 = vpop.f32.mrf.mxu1  ;;  %v16257_v3 = vadd.f32 %v7227_v22, %v6968_v63  ;;  %v6971_v54 = vadd.f32 %v12479_v6, %v6698_v29  ;;  %v9362_v53 = vld [vmem:[#allocation3 + $0x110] sm:$0xff]  ;;  %v9000_v40 = vpack.c.bf16 %v8974_v39, %v8973_v12  ;;  %v6710_v12 = vld [vmem:[%s15847_s16 + $0x78] sm:$0xff] }
 0x3a2   : > { %v6844_v58 = vpop.f32.mrf.mxu0  ;;  %v9387_v52 = vpack.c.bf16 %v9362_v53, %v9361_v23  ;;  %v8978_v22 = vld [vmem:[#allocation3 + $0x12f] sm:$0xff] }
 0x3a3   : > { %v7230_v26 = vpop.f32.mrf.mxu1  ;;  %v16260_v45 = vadd.f32 %v12519_v61, %v6971_v54  ;;  %v6969_v60 = vadd.f32 %v6844_v58, %v6696_v59  ;;  %v9364_v63 = vld [vmem:[#allocation3 + $0x130] sm:$0xff]  ;;  %v9363_v59 = vld [vmem:[#allocation3 + $0x128] sm:$0xff]  ;;  %v9002_v0 = vpack.c.bf16 %v8978_v22, %v8977_v41 }
 0x3a4   : > { %12791 = vmatpush3.bf16.msra.mxu0 %v12951_v7  ;;  %v12482_v47 = vpop.f32.mrf.mxu0  ;;  %v8980_v6 = vld [vmem:[#allocation3 + $0x14f] sm:$0xff] }
 0x3a5   : > { %12792 = vmatprep.subr.bf16.mxu0 %v12952_v32  ;;  %v12522_v21 = vpop.f32.mrf.mxu1  ;;  %v16269_v44 = vadd.f32 %v7230_v26, %v6969_v60  ;;  %v6974_v35 = vadd.f32 %v12482_v47, %v6701_v5  ;;  %v9366_v61 = vld [vmem:[#allocation3 + $0x150] sm:$0xff]  ;;  %v6704_v58 = vld [vmem:[%s15847_s16 + $0x48] sm:$0xff]  ;;  %v9388_v60 = vpack.c.bf16 %v9364_v63, %v9363_v59 }
 0x3a6   : > { %12721 = vmatmul.mubr.msk.bf16.gmra.mxu0 %vm281_vm0, %v8998_v42  ;;  %v6857_v24 = vpop.f32.mrf.mxu0  ;;  %v8982_v53 = vld [vmem:[#allocation3 + $0x16f] sm:$0xff] }
 0x3a7   : > { %12761 = vmatmul.mubr.msk.bf16.gmra.mxu1 %vm281_vm0, %v16171_v1  ;;  %12724 = vmatprep.mubr.msk.bf16.mxu0 %vm281_vm0, %v8999_v57  ;;  %v7243_v51 = vpop.f32.mrf.mxu1  ;;  %v16275_v17 = vadd.f32 %v12522_v21, %v6974_v35  ;;  %v6972_v55 = vadd.f32 %v6857_v24, %v6699_v18  ;;  %v6702_v1 = vld [vmem:[%s15847_s16 + $0x38] sm:$0xff]  ;;  %v8979_v57 = vld [vmem:[#allocation3 + $0x147] sm:$0xff]  ;;  %v6709_v18 = vld [vmem:[%s15847_s16 + $0x70] sm:$0xff] }
 0x3a8   : > { %12764 = vmatprep.mubr.msk.bf16.mxu1 %vm281_vm0, %v16190_v8  ;;  %12793 = vmatpush3.bf16.msra.mxu0 %v12952_v32  ;;  %v12483_v2 = vpop.f32.mrf.mxu0  ;;  %v9003_v21 = vpack.c.bf16 %v8980_v6, %v8979_v57  ;;  %v9367_v23 = vld [vmem:[#allocation3 + $0x168] sm:$0xff]  ;;  %v6713_v22 = vld [vmem:[%s15847_s16 + $0x90] sm:$0xff]  ;;  %v6711_v6 = vld [vmem:[%s15847_s16 + $0x80] sm:$0xff] }
 0x3a9   : > { %12794 = vmatprep.subr.bf16.mxu0 %v12953_v34  ;;  %v12523_v50 = vpop.f32.mrf.mxu1  ;;  %v16278_v30 = vadd.f32 %v7243_v51, %v6972_v55  ;;  %v6975_v8 = vadd.f32 %v12483_v2, %v6702_v1  ;;  %v8988_v57 = vld [vmem:[#allocation3 + $0x1cf] sm:$0xff] }
 0x3aa   : > { %v6860_v49 = vpop.f32.mrf.mxu0 }
 0x3ab   : > { %v7246_v10 = vpop.f32.mrf.mxu1  ;;  %v16281_v37 = vadd.f32 %v12523_v50, %v6975_v8  ;;  %v6973_v15 = vadd.f32 %v6860_v49, %v6700_v62  ;;  %v9368_v8 = vld [vmem:[#allocation3 + $0x170] sm:$0xff] }
 0x3ac   : > { %12795 = vmatpush3.bf16.msra.mxu0 %v12953_v34  ;;  %v9365_v34 = vld [vmem:[#allocation3 + $0x148] sm:$0xff] }
 0x3ad   : > { %v12486_v31 = vpop.f32.mrf.mxu0  ;;  %v16286_v7 = vadd.f32 %v7246_v10, %v6973_v15  ;;  %v9389_v35 = vpack.c.bf16 %v9366_v61, %v9365_v34  ;;  %v8984_v49 = vld [vmem:[#allocation3 + $0x18f] sm:$0xff] }
 0x3ae   : > { %v12526_v14 = vpop.f32.mrf.mxu1  ;;  %12725 = vmatmul.mubr.msk.bf16.gmra.mxu0 %vm281_vm0, %v9000_v40  ;;  %v6978_v43 = vadd.f32 %v12486_v31, %v6705_v48  ;;  %v9370_v10 = vld [vmem:[#allocation3 + $0x190] sm:$0xff]  ;;  %v6708_v15 = vld [vmem:[%s15847_s16 + $0x68] sm:$0xff]  ;;  %v9004_v48 = vpack.c.bf16 %v8982_v53, %v8981_v16  ;;  %v9390_v31 = vpack.c.bf16 %v9368_v8, %v9367_v23  ;;  %v6715_v23 = vld [vmem:[%s15847_s16 + $0xa0] sm:$0xff] }
 0x3af   : > { %12765 = vmatmul.mubr.msk.bf16.gmra.mxu1 %vm281_vm0, %v9386_v27  ;;  %12728 = vmatprep.mubr.msk.bf16.mxu0 %vm281_vm0, %v9001_v33  ;;  %v6873_v38 = vpop.f32.mrf.mxu0  ;;  %v9374_v34 = vld [vmem:[#allocation3 + $0x1d0] sm:$0xff] }
 0x3b0   : > { %12768 = vmatprep.mubr.msk.bf16.mxu1 %vm281_vm0, %v9387_v52  ;;  %v7259_v9 = vpop.f32.mrf.mxu1  ;;  %v16291_v4 = vadd.f32 %v12526_v14, %v6978_v43  ;;  %v6976_v13 = vadd.f32 %v6873_v38, %v6703_v28  ;;  %v8983_v14 = vld [vmem:[#allocation3 + $0x187] sm:$0xff] }
 0x3b1   : > { %v12487_v32 = vpop.f32.mrf.mxu0  ;;  %v9369_v43 = vld [vmem:[#allocation3 + $0x188] sm:$0xff] }
 0x3b2   : > { %v12527_v29 = vpop.f32.mrf.mxu1  ;;  %v16294_v36 = vadd.f32 %v7259_v9, %v6976_v13  ;;  %v6979_v54 = vadd.f32 %v12487_v32, %v6706_v56  ;;  %v9005_v9 = vpack.c.bf16 %v8984_v49, %v8983_v14  ;;  %v9391_v13 = vpack.c.bf16 %v9370_v10, %v9369_v43  ;;  %v9376_v14 = vld [vmem:[#allocation3 + $0x1f0] sm:$0xff]  ;;  %v6718_v43 = vld [vmem:[%s15847_s16 + $0xb8] sm:$0xff] }
 0x3b3   : > { %v6876_v26 = vpop.f32.mrf.mxu0 }
 0x3b4   : > { %v7262_v42 = vpop.f32.mrf.mxu1  ;;  %v16297_v5 = vadd.f32 %v12527_v29, %v6979_v54  ;;  %v6977_v47 = vadd.f32 %v6876_v26, %v6704_v58  ;;  %v8986_v58 = vld [vmem:[#allocation3 + $0x1af] sm:$0xff] }
 0x3b5   : > { %v12490_v24 = vpop.f32.mrf.mxu0  ;;  %v9372_v26 = vld [vmem:[#allocation3 + $0x1b0] sm:$0xff] }
 0x3b6   : > { %v12530_v51 = vpop.f32.mrf.mxu1  ;;  %12729 = vmatmul.mubr.msk.bf16.gmra.mxu0 %vm281_vm0, %v9002_v0  ;;  %v16302_v55 = vadd.f32 %v7262_v42, %v6977_v47  ;;  %v6982_v39 = vadd.f32 %v12490_v24, %v6709_v18  ;;  %v6714_v42 = vld [vmem:[%s15847_s16 + $0x98] sm:$0xff]  ;;  %v9371_v18 = vld [vmem:[#allocation3 + $0x1a8] sm:$0xff] }
 0x3b7   : > { %12769 = vmatmul.mubr.msk.bf16.gmra.mxu1 %vm281_vm0, %v9388_v60  ;;  %12732 = vmatprep.mubr.msk.bf16.mxu0 %vm281_vm0, %v9003_v21  ;;  %v6889_v1 = vpop.f32.mrf.mxu0  ;;  %v6712_v24 = vld [vmem:[%s15847_s16 + $0x88] sm:$0xff] }
 0x3b8   : > { %12772 = vmatprep.mubr.msk.bf16.mxu1 %vm281_vm0, %v9389_v35  ;;  %v7275_v2 = vpop.f32.mrf.mxu1  ;;  %v16307_v50 = vadd.f32 %v12530_v51, %v6982_v39  ;;  %v6980_v46 = vadd.f32 %v6889_v1, %v6707_v19  ;;  %v8985_v35 = vld [vmem:[#allocation3 + $0x1a7] sm:$0xff]  ;;  %v9392_v1 = vpack.c.bf16 %v9372_v26, %v9371_v18 }
 0x3b9   : > { %v12491_v11 = vpop.f32.mrf.mxu0  ;;  %v9006_v19 = vpack.c.bf16 %v8986_v58, %v8985_v35  ;;  %v8991_v26 = vld [vmem:[#allocation3 + $0x207] sm:$0xff] }
 0x3ba   : > { %v12531_v62 = vpop.f32.mrf.mxu1  ;;  %v16310_v40 = vadd.f32 %v7275_v2, %v6980_v46  ;;  %v6983_v27 = vadd.f32 %v12491_v11, %v6710_v12  ;;  %v8987_v2 = vld [vmem:[#allocation3 + $0x1c7] sm:$0xff] }
 0x3bb   : > { %v6892_v33 = vpop.f32.mrf.mxu0  ;;  %v9373_v46 = vld [vmem:[#allocation3 + $0x1c8] sm:$0xff]  ;;  %v9007_v12 = vpack.c.bf16 %v8988_v57, %v8987_v2  ;;  %v6721_v57 = vld [vmem:[%s15847_s16 + $0xd0] sm:$0xff] }
 0x3bc   : > { %v7278_v52 = vpop.f32.mrf.mxu1  ;;  %v16313_v28 = vadd.f32 %v12531_v62, %v6983_v27  ;;  %v6981_v38 = vadd.f32 %v6892_v33, %v6708_v15  ;;  %v9393_v11 = vpack.c.bf16 %v9374_v34, %v9373_v46  ;;  %v6717_v62 = vld [vmem:[%s15847_s16 + $0xb0] sm:$0xff]  ;;  %v8993_v35 = vld [vmem:[#allocation3 + $0x227] sm:$0xff] }
 0x3bd   : > { %v12494_v63 = vpop.f32.mrf.mxu0 }
 0x3be   : > { %v12534_v56 = vpop.f32.mrf.mxu1  ;;  %12733 = vmatmul.mubr.msk.bf16.gmra.mxu0 %vm281_vm0, %v9004_v48  ;;  %v16318_v32 = vadd.f32 %v7278_v52, %v6981_v38  ;;  %v6986_v29 = vadd.f32 %v12494_v63, %v6713_v22 }
 0x3bf   : > { %12773 = vmatmul.mubr.msk.bf16.gmra.mxu1 %vm281_vm0, %v9390_v31  ;;  %12736 = vmatprep.mubr.msk.bf16.mxu0 %vm281_vm0, %v9005_v9  ;;  %v6905_v61 = vpop.f32.mrf.mxu0  ;;  %v8990_v31 = vld [vmem:[#allocation3 + $0x1ef] sm:$0xff] }
 0x3c0   : > { %12776 = vmatprep.mubr.msk.bf16.mxu1 %vm281_vm0, %v9391_v13  ;;  %v7291_v54 = vpop.f32.mrf.mxu1  ;;  %v16323_v41 = vadd.f32 %v12534_v56, %v6986_v29  ;;  %v6984_v59 = vadd.f32 %v6905_v61, %v6711_v6  ;;  %v8992_v13 = vld [vmem:[#allocation3 + $0x20f] sm:$0xff]  ;;  %v8989_v56 = vld [vmem:[#allocation3 + $0x1e7] sm:$0xff] }
 0x3c1   : > { %v12495_v0 = vpop.f32.mrf.mxu0  ;;  %v9375_v29 = vld [vmem:[#allocation3 + $0x1e8] sm:$0xff] }
 0x3c2   : > { %v12535_v60 = vpop.f32.mrf.mxu1  ;;  %v16326_v47 = vadd.f32 %v7291_v54, %v6984_v59  ;;  %v6987_v21 = vadd.f32 %v12495_v0, %v6714_v42  ;;  %v6716_v6 = vld [vmem:[%s15847_s16 + $0xa8] sm:$0xff]  ;;  %v9008_v59 = vpack.c.bf16 %v8990_v31, %v8989_v56  ;;  %v9394_v58 = vpack.c.bf16 %v9376_v14, %v9375_v29 }
 0x3c3   : > { %v6908_v51 = vpop.f32.mrf.mxu0 }
 0x3c4   : > { %v7294_v39 = vpop.f32.mrf.mxu1  ;;  %v16329_v53 = vadd.f32 %v12535_v60, %v6987_v21  ;;  %v6985_v8 = vadd.f32 %v6908_v51, %v6712_v24  ;;  %v9009_v60 = vpack.c.bf16 %v8992_v13, %v8991_v26  ;;  %v8994_v51 = vld [vmem:[#allocation3 + $0x22f] sm:$0xff] }
 0x3c5   : > { %v6725_v13 = vld [vmem:[%s15847_s16 + $0xf0] sm:$0xff] }
 0x3c6   : > { %v12498_v49 = vpop.f32.mrf.mxu0  ;;  %12737 = vmatmul.mubr.msk.bf16.gmra.mxu0 %vm281_vm0, %v9006_v19  ;;  %v16334_v27 = vadd.f32 %v7294_v39, %v6985_v8  ;;  %v9379_v39 = vld [vmem:[#allocation3 + $0x228] sm:$0xff]  ;;  %v9380_v19 = vld [vmem:[#allocation3 + $0x230] sm:$0xff] }
 0x3c7   : > { %v12538_v10 = vpop.f32.mrf.mxu1  ;;  %12777 = vmatmul.mubr.msk.bf16.gmra.mxu1 %vm281_vm0, %v9392_v1  ;;  %v6990_v16 = vadd.f32 %v12498_v49, %v6717_v62  ;;  %12740 = vmatprep.mubr.msk.bf16.mxu0 %vm281_vm0, %v9007_v12  ;;  %v6719_v1 = vld [vmem:[%s15847_s16 + $0xc0] sm:$0xff] }
 0x3c8   : > { %12780 = vmatprep.mubr.msk.bf16.mxu1 %vm281_vm0, %v9393_v11  ;;  %v6921_v15 = vpop.f32.mrf.mxu0  ;;  %v6722_v11 = vld [vmem:[%s15847_s16 + $0xd8] sm:$0xff] }
 0x3c9   : > { %v7307_v33 = vpop.f32.mrf.mxu1  ;;  %v16339_v52 = vadd.f32 %v12538_v10, %v6990_v16  ;;  %v6988_v48 = vadd.f32 %v6921_v15, %v6715_v23  ;;  %v9010_v10 = vpack.c.bf16 %v8994_v51, %v8993_v35  ;;  %v9735_v16 = vld [vmem:[#allocation3 + $0x49] sm:$0xff]  ;;  %v9736_v23 = vld [vmem:[#allocation3 + $0x51] sm:$0xff]  ;;  %v9396_v15 = vpack.c.bf16 %v9380_v19, %v9379_v39 }
 0x3ca   : > { %v12499_v38 = vpop.f32.mrf.mxu0  ;;  %v9739_v35 = vld [vmem:[#allocation3 + $0x89] sm:$0xff] }
 0x3cb   : > { %v12539_v9 = vpop.f32.mrf.mxu1  ;;  %v16342_v22 = vadd.f32 %v7307_v33, %v6988_v48  ;;  %v6991_v63 = vadd.f32 %v12499_v38, %v6718_v43  ;;  %v6720_v48 = vld [vmem:[%s15847_s16 + $0xc8] sm:$0xff] }
 0x3cc   : > { %v6924_v61 = vpop.f32.mrf.mxu0  ;;  %v6724_v19 = vld [vmem:[%s15847_s16 + $0xe8] sm:$0xff] }
 0x3cd   : > { %v7310_v54 = vpop.f32.mrf.mxu1  ;;  %v16345_v42 = vadd.f32 %v12539_v9, %v6991_v63  ;;  %v6989_v0 = vadd.f32 %v6924_v61, %v6716_v6  ;;  %v9767_v9 = vpack.c.bf16 %v9736_v23, %v9735_v16  ;;  %v6723_v61 = vld [vmem:[%s15847_s16 + $0xe0] sm:$0xff] }
 0x3ce   : > { %v12502_v34 = vpop.f32.mrf.mxu0  ;;  %12741 = vmatmul.mubr.msk.bf16.gmra.mxu0 %vm281_vm0, %v9008_v59 }
 0x3cf   : > { %v12542_v21 = vpop.f32.mrf.mxu1  ;;  %12781 = vmatmul.mubr.msk.bf16.gmra.mxu1 %vm281_vm0, %v9394_v58  ;;  %v16350_v18 = vadd.f32 %v7310_v54, %v6989_v0  ;;  %v6994_v24 = vadd.f32 %v12502_v34, %v6721_v57  ;;  %12744 = vmatprep.mubr.msk.bf16.mxu0 %vm281_vm0, %v9009_v60  ;;  %v9737_v0 = vld [vmem:[#allocation3 + $0x69] sm:$0xff]  ;;  %v9738_v60 = vld [vmem:[#allocation3 + $0x71] sm:$0xff] }
 0x3d0   : > { %12784 = vmatprep.mubr.msk.bf16.mxu1 %vm281_vm0, %v16232_v20  ;;  %v6937_v2 = vpop.f32.mrf.mxu0  ;;  %v6726_v57 = vld [vmem:[%s15847_s16 + $0xf8] sm:$0xff] }
 0x3d1   : > { %v7323_v46 = vpop.f32.mrf.mxu1  ;;  %v16356_v8 = vadd.f32 %v12542_v21, %v6994_v24  ;;  %v6992_v12 = vadd.f32 %v6937_v2, %v6719_v1  ;;  %v9740_v24 = vld [vmem:[#allocation3 + $0x91] sm:$0xff] }
 0x3d2   : > { %v12503_v62 = vpop.f32.mrf.mxu0 }
 0x3d3   : > { %v12543_v49 = vpop.f32.mrf.mxu1  ;;  %v16359_v33 = vadd.f32 %v7323_v46, %v6992_v12  ;;  %v6995_v20 = vadd.f32 %v12503_v62, %v6722_v11  ;;  %v9768_v46 = vpack.c.bf16 %v9738_v60, %v9737_v0  ;;  %v9769_v62 = vpack.c.bf16 %v9740_v24, %v9739_v35 }
 0x3d4   : > { %v6940_v31 = vpop.f32.mrf.mxu0 }
 0x3d5   : > { %v7326_v14 = vpop.f32.mrf.mxu1  ;;  %v16362_v43 = vadd.f32 %v12543_v49, %v6995_v20  ;;  %v6993_v38 = vadd.f32 %v6940_v31, %v6720_v48 }
 0x3d6   : > { %v12506_v63 = vpop.f32.mrf.mxu0  ;;  %12745 = vmatmul.mubr.msk.bf16.gmra.mxu0 %vm281_vm0, %v9010_v10 }
 0x3d7   : > { %v12546_v56 = vpop.f32.mrf.mxu1  ;;  %12785 = vmatmul.mubr.msk.bf16.gmra.mxu1 %vm281_vm0, %v9396_v15  ;;  %v16367_v29 = vadd.f32 %v7326_v14, %v6993_v38  ;;  %v6998_v6 = vadd.f32 %v12506_v63, %v6725_v13  ;;  %12796 = vmatprep.mubr.msk.bf16.mxu0 %vm281_vm0, %v9767_v9  ;;  %v9741_v14 = vld [vmem:[#allocation3 + $0xa9] sm:$0xff]  ;;  %v9742_v38 = vld [vmem:[#allocation3 + $0xb1] sm:$0xff] }
 0x3d8   : > { %v6953_v54 = vpop.f32.mrf.mxu0  ;;  %v9743_v63 = vld [vmem:[#allocation3 + $0xc9] sm:$0xff] }
 0x3d9   : > { %v7339_v59 = vpop.f32.mrf.mxu1  ;;  %v16371_v58 = vadd.f32 %v12546_v56, %v6998_v6  ;;  %v6996_v26 = vadd.f32 %v6953_v54, %v6723_v61  ;;  %v9744_v56 = vld [vmem:[#allocation3 + $0xd1] sm:$0xff] }
 0x3da   : > { %v12507_v34 = vpop.f32.mrf.mxu0  ;;  %v9771_v60 = vpack.c.bf16 %v9744_v56, %v9743_v63 }
 0x3db   : > { %v12547_v21 = vpop.f32.mrf.mxu1  ;;  %v16374_v51 = vadd.f32 %v7339_v59, %v6996_v26  ;;  %v6999_v39 = vadd.f32 %v12507_v34, %v6726_v57  ;;  %v9770_v59 = vpack.c.bf16 %v9742_v38, %v9741_v14 }
 0x3dc   : > { %v6956_v1 = vpop.f32.mrf.mxu0 }
 0x3dd   : > { %v7342_v2 = vpop.f32.mrf.mxu1  ;;  %v16377_v12 = vadd.f32 %v12547_v21, %v6999_v39  ;;  %v6997_v11 = vadd.f32 %v6956_v1, %v6724_v19  ;;  %v9745_v19 = vld [vmem:[#allocation3 + $0xe9] sm:$0xff]  ;;  %v9746_v1 = vld [vmem:[#allocation3 + $0xf1] sm:$0xff] }
 0x3de   : > { %v12558_v49 = vpop.f32.mrf.mxu0  ;;  %12797 = vmatmul.mubr.msk.bf16.vlgmr.msra.gmra.mxu0 %vm281_vm0, %v9768_v46  ;;  %v9747_v46 = vld [vmem:[#allocation3 + $0x109] sm:$0xff] }
 0x3df   : > { %v12598_v10 = vpop.f32.mrf.mxu1  ;;  %v16380_v16 = vadd.f32 %v7342_v2, %v6997_v11  ;;  %v7742_v23 = vadd.f32 %v12558_v49, %v16251_v25  ;;  %12800 = vmatprep.mubr.msk.bf16.mxu0 %vm281_vm0, %v9769_v62  ;;  %v9748_v11 = vld [vmem:[#allocation3 + $0x111] sm:$0xff] }
 0x3e0   : > { %v7613_v15 = vpop.f32.mrf.mxu0 }
 0x3e1   : > { %v7999_v20 = vpop.f32.mrf.mxu1  ;;  %v16384_v48 = vadd.f32 %v12598_v10, %v7742_v23  ;;  %v7740_v31 = vadd.f32 %v7613_v15, %v16257_v3  ;;  %v9772_v23 = vpack.c.bf16 %v9746_v1, %v9745_v19 }
 0x3e2   : > { %v12559_v9 = vpop.f32.mrf.mxu0 }
 0x3e3   : > { %v12599_v13 = vpop.f32.mrf.mxu1  ;;  %v16387_v6 = vadd.f32 %v7999_v20, %v7740_v31  ;;  %v7743_v61 = vadd.f32 %v12559_v9, %v16260_v45  ;;  %v9773_v31 = vpack.c.bf16 %v9748_v11, %v9747_v46 }
 0x3e4   : > { %v7616_v54 = vpop.f32.mrf.mxu0 }
 0x3e5   : > { %v8002_v25 = vpop.f32.mrf.mxu1  ;;  %v16390_v26 = vadd.f32 %v12599_v13, %v7743_v61  ;;  %v7741_v0 = vadd.f32 %v7616_v54, %v16269_v44  ;;  %v9749_v61 = vld [vmem:[#allocation3 + $0x129] sm:$0xff]  ;;  %v9750_v54 = vld [vmem:[#allocation3 + $0x131] sm:$0xff] }
 0x3e6   : > { %v12562_v57 = vpop.f32.mrf.mxu0  ;;  %12801 = vmatmul.mubr.msk.bf16.gmra.mxu0 %vm281_vm0, %v9770_v59  ;;  %v9751_v59 = vld [vmem:[#allocation3 + $0x149] sm:$0xff] }
 0x3e7   : > { %v12602_v3 = vpop.f32.mrf.mxu1  ;;  %v16394_v34 = vadd.f32 %v8002_v25, %v7741_v0  ;;  %v7746_v21 = vadd.f32 %v12562_v57, %v16275_v17  ;;  %12804 = vmatprep.mubr.msk.bf16.mxu0 %vm281_vm0, %v9771_v60  ;;  %v9752_v0 = vld [vmem:[#allocation3 + $0x151] sm:$0xff] }
 0x3e8   : > { %v7629_v35 = vpop.f32.mrf.mxu0 }
 0x3e9   : > { %v8015_v45 = vpop.f32.mrf.mxu1  ;;  %v16398_v24 = vadd.f32 %v12602_v3, %v7746_v21  ;;  %v7744_v39 = vadd.f32 %v7629_v35, %v16278_v30  ;;  %v9774_v21 = vpack.c.bf16 %v9750_v54, %v9749_v61 }
 0x3ea   : > { %v12563_v44 = vpop.f32.mrf.mxu0 }
 0x3eb   : > { %v12603_v2 = vpop.f32.mrf.mxu1  ;;  %v16401_v62 = vadd.f32 %v8015_v45, %v7744_v39  ;;  %v7747_v49 = vadd.f32 %v12563_v44, %v16281_v37  ;;  %v9775_v39 = vpack.c.bf16 %v9752_v0, %v9751_v59 }
 0x3ec   : > { %v7632_v10 = vpop.f32.mrf.mxu0 }
 0x3ed   : > { %v8018_v17 = vpop.f32.mrf.mxu1  ;;  %v16404_v15 = vadd.f32 %v12603_v2, %v7747_v49  ;;  %v7745_v20 = vadd.f32 %v7632_v10, %v16286_v7  ;;  %v9753_v49 = vld [vmem:[#allocation3 + $0x169] sm:$0xff]  ;;  %v9754_v10 = vld [vmem:[#allocation3 + $0x171] sm:$0xff] }
 0x3ee   : > { %v12566_v14 = vpop.f32.mrf.mxu0  ;;  %12805 = vmatmul.mubr.msk.bf16.gmra.mxu0 %vm281_vm0, %v9772_v23  ;;  %v9755_v23 = vld [vmem:[#allocation3 + $0x189] sm:$0xff] }
 0x3ef   : > { %v12606_v30 = vpop.f32.mrf.mxu1  ;;  %v16408_v38 = vadd.f32 %v8018_v17, %v7745_v20  ;;  %v7750_v9 = vadd.f32 %v12566_v14, %v16291_v4  ;;  %12808 = vmatprep.mubr.msk.bf16.mxu0 %vm281_vm0, %v9773_v31  ;;  %v9756_v20 = vld [vmem:[#allocation3 + $0x191] sm:$0xff] }
 0x3f0   : > { %v7645_v13 = vpop.f32.mrf.mxu0 }
 0x3f1   : > { %v8031_v37 = vpop.f32.mrf.mxu1  ;;  %v16412_v63 = vadd.f32 %v12606_v30, %v7750_v9  ;;  %v7748_v56 = vadd.f32 %v7645_v13, %v16294_v36  ;;  %v9776_v9 = vpack.c.bf16 %v9754_v10, %v9753_v49 }
 0x3f2   : > { %v12567_v7 = vpop.f32.mrf.mxu0 }
 0x3f3   : > { %v12607_v25 = vpop.f32.mrf.mxu1  ;;  %v16415_v60 = vadd.f32 %v8031_v37, %v7748_v56  ;;  %v7751_v57 = vadd.f32 %v12567_v7, %v16297_v5  ;;  %v9777_v56 = vpack.c.bf16 %v9756_v20, %v9755_v23 }
 0x3f4   : > { %v7648_v3 = vpop.f32.mrf.mxu0 }
 0x3f5   : > { %v8034_v4 = vpop.f32.mrf.mxu1  ;;  %v16418_v35 = vadd.f32 %v12607_v25, %v7751_v57  ;;  %v7749_v45 = vadd.f32 %v7648_v3, %v16302_v55  ;;  %v9757_v57 = vld [vmem:[#allocation3 + $0x1a9] sm:$0xff]  ;;  %v9758_v3 = vld [vmem:[#allocation3 + $0x1b1] sm:$0xff] }
 0x3f6   : > { %v12570_v19 = vpop.f32.mrf.mxu0  ;;  %12809 = vmatmul.mubr.msk.bf16.gmra.mxu0 %vm281_vm0, %v9774_v21  ;;  %v9759_v21 = vld [vmem:[#allocation3 + $0x1c9] sm:$0xff] }
 0x3f7   : > { %v12610_v36 = vpop.f32.mrf.mxu1  ;;  %v16422_v1 = vadd.f32 %v8034_v4, %v7749_v45  ;;  %v7754_v44 = vadd.f32 %v12570_v19, %v16307_v50  ;;  %12812 = vmatprep.mubr.msk.bf16.mxu0 %vm281_vm0, %v9775_v39  ;;  %v9760_v45 = vld [vmem:[#allocation3 + $0x1d1] sm:$0xff] }
 0x3f8   : > { %v7661_v2 = vpop.f32.mrf.mxu0 }
 0x3f9   : > { %v8047_v5 = vpop.f32.mrf.mxu1  ;;  %v16426_v46 = vadd.f32 %v12610_v36, %v7754_v44  ;;  %v7752_v11 = vadd.f32 %v7661_v2, %v16310_v40  ;;  %v9778_v44 = vpack.c.bf16 %v9758_v3, %v9757_v57 }
 0x3fa   : > { %v12571_v55 = vpop.f32.mrf.mxu0 }
 0x3fb   : > { %v12611_v17 = vpop.f32.mrf.mxu1  ;;  %v16429_v31 = vadd.f32 %v8047_v5, %v7752_v11  ;;  %v7755_v14 = vadd.f32 %v12571_v55, %v16313_v28  ;;  %v9779_v11 = vpack.c.bf16 %v9760_v45, %v9759_v21 }
 0x3fc   : > { %v7664_v30 = vpop.f32.mrf.mxu0 }
 0x3fd   : > { %v8050_v50 = vpop.f32.mrf.mxu1  ;;  %v16432_v13 = vadd.f32 %v12611_v17, %v7755_v14  ;;  %v7753_v37 = vadd.f32 %v7664_v30, %v16318_v32  ;;  %v9761_v14 = vld [vmem:[#allocation3 + $0x1e9] sm:$0xff]  ;;  %v9762_v30 = vld [vmem:[#allocation3 + $0x1f1] sm:$0xff] }
 0x3fe   : > { %v12574_v61 = vpop.f32.mrf.mxu0  ;;  %12813 = vmatmul.mubr.msk.bf16.gmra.mxu0 %vm281_vm0, %v9776_v9  ;;  %v9763_v9 = vld [vmem:[#allocation3 + $0x209] sm:$0xff] }
 0x3ff   : > { %v12614_v40 = vpop.f32.mrf.mxu1  ;;  %v16436_v54 = vadd.f32 %v8050_v50, %v7753_v37  ;;  %v7758_v7 = vadd.f32 %v12574_v61, %v16323_v41  ;;  %12816 = vmatprep.mubr.msk.bf16.mxu0 %vm281_vm0, %v9777_v56  ;;  %v9764_v37 = vld [vmem:[#allocation3 + $0x211] sm:$0xff] }
 0x400   : > { %v7677_v25 = vpop.f32.mrf.mxu0 }
 0x401   : > { %v8063_v28 = vpop.f32.mrf.mxu1  ;;  %v16440_v59 = vadd.f32 %v12614_v40, %v7758_v7  ;;  %v7756_v0 = vadd.f32 %v7677_v25, %v16326_v47  ;;  %v9780_v7 = vpack.c.bf16 %v9762_v30, %v9761_v14 }
 0x402   : > { %v12575_v32 = vpop.f32.mrf.mxu0 }
 0x403   : > { %v12615_v4 = vpop.f32.mrf.mxu1  ;;  %v16443_v39 = vadd.f32 %v8063_v28, %v7756_v0  ;;  %v7759_v19 = vadd.f32 %v12575_v32, %v16329_v53  ;;  %v9781_v0 = vpack.c.bf16 %v9764_v37, %v9763_v9 }
 0x404   : > { %v7680_v36 = vpop.f32.mrf.mxu0 }
 0x405   : > { %v8066_v41 = vpop.f32.mrf.mxu1  ;;  %v16446_v2 = vadd.f32 %v12615_v4, %v7759_v19  ;;  %v7757_v5 = vadd.f32 %v7680_v36, %v16334_v27  ;;  %v9765_v4 = vld [vmem:[#allocation3 + $0x229] sm:$0xff] }
 0x406   : > { %v12578_v49 = vpop.f32.mrf.mxu0  ;;  %12817 = vmatmul.mubr.msk.bf16.gmra.mxu0 %vm281_vm0, %v9778_v44 }
 0x407   : > { %v12618_v47 = vpop.f32.mrf.mxu1  ;;  %v16450_v10 = vadd.f32 %v8066_v41, %v7757_v5  ;;  %v7762_v55 = vadd.f32 %v12578_v49, %v16339_v52  ;;  %12820 = vmatprep.mubr.msk.bf16.mxu0 %vm281_vm0, %v9779_v11 }
 0x408   : > { %v7693_v17 = vpop.f32.mrf.mxu0 }
 0x409   : > { %v8079_v53 = vpop.f32.mrf.mxu1  ;;  %v16454_v23 = vadd.f32 %v12618_v47, %v7762_v55  ;;  %v7760_v20 = vadd.f32 %v7693_v17, %v16342_v22 }
 0x40a   : > { %v12579_v27 = vpop.f32.mrf.mxu0 }
 0x40b   : > { %v12619_v50 = vpop.f32.mrf.mxu1  ;;  %v16457_v56 = vadd.f32 %v8079_v53, %v7760_v20  ;;  %v7763_v61 = vadd.f32 %v12579_v27, %v16345_v42  ;;  %v9766_v42 = vld [vmem:[#allocation3 + $0x231] sm:$0xff] }
 0x40c   : > { %v7696_v40 = vpop.f32.mrf.mxu0  ;;  %v9782_v44 = vpack.c.bf16 %v9766_v42, %v9765_v4 }
 0x40d   : > { %v8082_v52 = vpop.f32.mrf.mxu1  ;;  %v16460_v25 = vadd.f32 %v12619_v50, %v7763_v61  ;;  %v7761_v28 = vadd.f32 %v7696_v40, %v16350_v18 }
 0x40e   : > { %v12582_v57 = vpop.f32.mrf.mxu0  ;;  %12821 = vmatmul.mubr.msk.bf16.gmra.mxu0 %vm281_vm0, %v9780_v7 }
 0x40f   : > { %v12622_v22 = vpop.f32.mrf.mxu1  ;;  %v16464_v3 = vadd.f32 %v8082_v52, %v7761_v28  ;;  %v7766_v32 = vadd.f32 %v12582_v57, %v16356_v8  ;;  %12824 = vmatprep.mubr.msk.bf16.mxu0 %vm281_vm0, %v9781_v0 }
 0x410   : > { %v7709_v21 = vpop.f32.mrf.mxu0 }
 0x411   : > { %v8095_v45 = vpop.f32.mrf.mxu1  ;;  %v16468_v19 = vadd.f32 %v12622_v22, %v7766_v32  ;;  %v7764_v36 = vadd.f32 %v7709_v21, %v16359_v33 }
 0x412   : > { %v12583_v18 = vpop.f32.mrf.mxu0 }
 0x413   : > { %v12623_v41 = vpop.f32.mrf.mxu1  ;;  %v16471_v5 = vadd.f32 %v8095_v45, %v7764_v36  ;;  %v7767_v11 = vadd.f32 %v12583_v18, %v16362_v43 }
 0x414   : > { %v7712_v49 = vpop.f32.mrf.mxu0 }
 0x415   : > { %v8098_v47 = vpop.f32.mrf.mxu1  ;;  %v16474_v8 = vadd.f32 %v12623_v41, %v7767_v11  ;;  %v7765_v55 = vadd.f32 %v7712_v49, %v16367_v29 }
 0x416   : > { %v12586_v17 = vpop.f32.mrf.mxu0  ;;  %12825 = vmatmul.mubr.msk.bf16.gmra.mxu0 %vm281_vm0, %v9782_v44 }
 0x417   : > { %v12626_v53 = vpop.f32.mrf.mxu1  ;;  %v16478_v20 = vadd.f32 %v8098_v47, %v7765_v55  ;;  %v7770_v33 = vadd.f32 %v12586_v17, %v16371_v58 }
 0x418   : > { %v7725_v14 = vpop.f32.mrf.mxu0 }
 0x419   : > { %v8111_v30 = vpop.f32.mrf.mxu1  ;;  %v16481_v27 = vadd.f32 %v12626_v53, %v7770_v33  ;;  %v7768_v43 = vadd.f32 %v7725_v14, %v16374_v51 }
 0x41a   : > { %v12587_v50 = vpop.f32.mrf.mxu0 }
 0x41b   : > { %v12627_v9 = vpop.f32.mrf.mxu1  ;;  %v16484_v37 = vadd.f32 %v8111_v30, %v7768_v43  ;;  %v7771_v29 = vadd.f32 %v12587_v50, %v16377_v12 }
 0x41c   : > { %v7728_v61 = vpop.f32.mrf.mxu0 }
 0x41d   : > { %v8114_v40 = vpop.f32.mrf.mxu1  ;;  %v16487_v52 = vadd.f32 %v12627_v9, %v7771_v29  ;;  %v7769_v7 = vadd.f32 %v7728_v61, %v16380_v16 }
 0x41e   : > { %v12638_v28 = vpop.f32.mrf.mxu0 }
 0x41f   : > { %v16490_v58 = vpop.f32.mrf.mxu1  ;;  %v16492_v0 = vadd.f32 %v8114_v40, %v7769_v7  ;;  %v16495_v57 = vadd.f32 %v12638_v28, %v16384_v48 }
 0x420   : > { %v8385_v51 = vpop.f32.mrf.mxu0 }
 0x421   : > { %v16497_v22 = vpop.f32.mrf.mxu1  ;;  %v16500_v32 = vadd.f32 %v8385_v51, %v16387_v6 }
 0x422   : > { %v12639_v12 = vpop.f32.mrf.mxu0 }
 0x423   : > { %v16502_v4 = vpop.f32.mrf.mxu1  ;;  %v16505_v42 = vadd.f32 %v12639_v12, %v16390_v26 }
 0x424   : > { %v8388_v16 = vpop.f32.mrf.mxu0 }
 0x425   : > { %v16507_v21 = vpop.f32.mrf.mxu1  ;;  %v16510_v45 = vadd.f32 %v8388_v16, %v16394_v34 }
 0x426   : > { %v12642_v48 = vpop.f32.mrf.mxu0 }
 0x427   : > { %v16512_v36 = vpop.f32.mrf.mxu1  ;;  %v16515_v18 = vadd.f32 %v12642_v48, %v16398_v24 }
 0x428   : > { %v8401_v6 = vpop.f32.mrf.mxu0 }
 0x429   : > { %v16517_v41 = vpop.f32.mrf.mxu1  ;;  %v16520_v44 = vadd.f32 %v8401_v6, %v16401_v62 }
 0x42a   : > { %v12643_v26 = vpop.f32.mrf.mxu0 }
 0x42b   : > { %v16522_v11 = vpop.f32.mrf.mxu1  ;;  %v16525_v49 = vadd.f32 %v12643_v26, %v16404_v15 }
 0x42c   : > { %v8404_v34 = vpop.f32.mrf.mxu0 }
 0x42d   : > { %v16527_v47 = vpop.f32.mrf.mxu1  ;;  %v16530_v55 = vadd.f32 %v8404_v34, %v16408_v38 }
 0x42e   : > { %v12646_v24 = vpop.f32.mrf.mxu0 }
 0x42f   : > { %v16532_v17 = vpop.f32.mrf.mxu1  ;;  %v16535_v53 = vadd.f32 %v12646_v24, %v16412_v63 }
 0x430   : > { %v8417_v62 = vpop.f32.mrf.mxu0 }
 0x431   : > { %v16537_v33 = vpop.f32.mrf.mxu1  ;;  %v16540_v14 = vadd.f32 %v8417_v62, %v16415_v60 }
 0x432   : > { %v12647_v15 = vpop.f32.mrf.mxu0 }
 0x433   : > { %v16542_v30 = vpop.f32.mrf.mxu1  ;;  %v16545_v43 = vadd.f32 %v12647_v15, %v16418_v35 }
 0x434   : > { %v8420_v38 = vpop.f32.mrf.mxu0 }
 0x435   : > { %v16547_v50 = vpop.f32.mrf.mxu1  ;;  %v16550_v9 = vadd.f32 %v8420_v38, %v16422_v1 }
 0x436   : > { %v12650_v63 = vpop.f32.mrf.mxu0 }
 0x437   : > { %v16552_v29 = vpop.f32.mrf.mxu1  ;;  %v16555_v61 = vadd.f32 %v12650_v63, %v16426_v46 }
 0x438   : > { %v8433_v60 = vpop.f32.mrf.mxu0 }
 0x439   : > { %v16557_v40 = vpop.f32.mrf.mxu1  ;;  %v16560_v7 = vadd.f32 %v8433_v60, %v16429_v31 }
 0x43a   : > { %v12651_v35 = vpop.f32.mrf.mxu0 }
 0x43b   : > { %v16562_v28 = vpop.f32.mrf.mxu1  ;;  %v16565_v51 = vadd.f32 %v12651_v35, %v16432_v13 }
 0x43c   : > { %17049 = vst [vmem:[#allocation28_spill] sm:$0xff] %v16562_v28  ;;  %v8436_v1 = vpop.f32.mrf.mxu0 }
 0x43d   : > { %v16567_v12 = vpop.f32.mrf.mxu1  ;;  %v16570_v16 = vadd.f32 %v8436_v1, %v16436_v54 }
 0x43e   : > { %17050 = vst [vmem:[#allocation12_spill] sm:$0xff] %v16567_v12  ;;  %v12654_v46 = vpop.f32.mrf.mxu0 }
 0x43f   : > { %17051 = vst [vmem:[#allocation30_spill] sm:$0xff] %v16570_v16  ;;  %v16572_v48 = vpop.f32.mrf.mxu1  ;;  %v16575_v6 = vadd.f32 %v12654_v46, %v16440_v59 }
 0x440   : > { %17052 = vst [vmem:[#allocation29_spill] sm:$0xff] %v16572_v48  ;;  %v8449_v31 = vpop.f32.mrf.mxu0 }
 0x441   : > { %17053 = vst [vmem:[#allocation4_spill] sm:$0xff] %v16575_v6  ;;  %v16577_v26 = vpop.f32.mrf.mxu1  ;;  %v16580_v34 = vadd.f32 %v8449_v31, %v16443_v39 }
 0x442   : > { %17054 = vst [vmem:[#allocation6_spill] sm:$0xff] %v16577_v26  ;;  %v12655_v13 = vpop.f32.mrf.mxu0 }
 0x443   : > { %17055 = vst [vmem:[#allocation13_spill] sm:$0xff] %v16580_v34  ;;  %v16582_v24 = vpop.f32.mrf.mxu1  ;;  %v16585_v62 = vadd.f32 %v12655_v13, %v16446_v2 }
 0x444   : > { %17056 = vst [vmem:[#allocation31_spill] sm:$0xff] %v16582_v24  ;;  %v8452_v54 = vpop.f32.mrf.mxu0 }
 0x445   : > { %17057 = vst [vmem:[#allocation34_spill] sm:$0xff] %v16585_v62  ;;  %v16587_v15 = vpop.f32.mrf.mxu1  ;;  %v16590_v38 = vadd.f32 %v8452_v54, %v16450_v10 }
 0x446   : > { %17058 = vst [vmem:[#allocation15_spill] sm:$0xff] %v16587_v15  ;;  %v12658_v59 = vpop.f32.mrf.mxu0 }
 0x447   : > { %17059 = vst [vmem:[#allocation14_spill] sm:$0xff] %v16590_v38  ;;  %v16592_v63 = vpop.f32.mrf.mxu1  ;;  %v16595_v60 = vadd.f32 %v12658_v59, %v16454_v23 }
 0x448   : > { %17060 = vst [vmem:[#allocation32_spill] sm:$0xff] %v16592_v63  ;;  %v8465_v39 = vpop.f32.mrf.mxu0 }
 0x449   : > { %17061 = vst [vmem:[#allocation33_spill] sm:$0xff] %v16595_v60  ;;  %v16597_v35 = vpop.f32.mrf.mxu1  ;;  %v16600_v1 = vadd.f32 %v8465_v39, %v16457_v56 }
 0x44a   : > { %17062 = vst [vmem:[#allocation16_spill] sm:$0xff] %v16597_v35  ;;  %v12659_v2 = vpop.f32.mrf.mxu0 }
 0x44b   : > { %17063 = vst [vmem:[#allocation36_spill] sm:$0xff] %v16600_v1  ;;  %v16602_v46 = vpop.f32.mrf.mxu1  ;;  %v16605_v31 = vadd.f32 %v12659_v2, %v16460_v25 }
 0x44c   : > { %17064 = vst [vmem:[#allocation35_spill] sm:$0xff] %v16602_v46  ;;  %v8468_v10 = vpop.f32.mrf.mxu0 }
 0x44d   : > { %17065 = vst [vmem:[#allocation8_spill] sm:$0xff] %v16605_v31  ;;  %v16607_v13 = vpop.f32.mrf.mxu1  ;;  %v16610_v54 = vadd.f32 %v8468_v10, %v16464_v3 }
 0x44e   : > { %17066 = vst [vmem:[#allocation7_spill] sm:$0xff] %v16607_v13  ;;  %v12662_v23 = vpop.f32.mrf.mxu0 }
 0x44f   : > { %17067 = vst [vmem:[#allocation17_spill] sm:$0xff] %v16610_v54  ;;  %v16612_v59 = vpop.f32.mrf.mxu1  ;;  %v16615_v35 = vadd.f32 %v12662_v23, %v16468_v19 }
 0x450   : > { %17068 = vst [vmem:[#allocation37_spill] sm:$0xff] %v16612_v59  ;;  %v8481_v56 = vpop.f32.mrf.mxu0 }
 0x451   : > { %17069 = vst [vmem:[#allocation19_spill] sm:$0xff] %v16615_v35  ;;  %v16617_v39 = vpop.f32.mrf.mxu1  ;;  %v16620_v46 = vadd.f32 %v8481_v56, %v16471_v5 }
 0x452   : > { %17070 = vst [vmem:[#allocation18_spill] sm:$0xff] %v16617_v39  ;;  %v12663_v25 = vpop.f32.mrf.mxu0 }
 0x453   : > { %17071 = vst [vmem:[#allocation38_spill] sm:$0xff] %v16620_v46  ;;  %v16622_v2 = vpop.f32.mrf.mxu1  ;;  %v16625_v13 = vadd.f32 %v12663_v25, %v16474_v8 }
 0x454   : > { %17072 = vst [vmem:[#allocation20_spill] sm:$0xff] %v16622_v2  ;;  %v8484_v3 = vpop.f32.mrf.mxu0 }
 0x455   : > { %17073 = vst [vmem:[#allocation39_spill] sm:$0xff] %v16625_v13  ;;  %v16627_v10 = vpop.f32.mrf.mxu1  ;;  %v16630_v59 = vadd.f32 %v8484_v3, %v16478_v20 }
 0x456   : > { %17074 = vst [vmem:[#allocation5_spill] sm:$0xff] %v16627_v10  ;;  %v12666_v19 = vpop.f32.mrf.mxu0 }
 0x457   : > { %17075 = vst [vmem:[#allocation9_spill] sm:$0xff] %v16630_v59  ;;  %v16632_v23 = vpop.f32.mrf.mxu1  ;;  %v16635_v39 = vadd.f32 %v12666_v19, %v16481_v27 }
 0x458   : > { %17076 = vst [vmem:[#allocation21_spill] sm:$0xff] %v16632_v23  ;;  %v8497_v5 = vpop.f32.mrf.mxu0 }
 0x459   : > { %17077 = vst [vmem:[#allocation40_spill] sm:$0xff] %v16635_v39  ;;  %v16637_v56 = vpop.f32.mrf.mxu1  ;;  %v16640_v2 = vadd.f32 %v8497_v5, %v16484_v37 }
 0x45a   : > { %17078 = vst [vmem:[#allocation43_spill] sm:$0xff] %v16637_v56  ;;  %v12667_v8 = vpop.f32.mrf.mxu0 }
 0x45b   : > { %17079 = vst [vmem:[#allocation23_spill] sm:$0xff] %v16640_v2  ;;  %v16642_v25 = vpop.f32.mrf.mxu1  ;;  %v16645_v10 = vadd.f32 %v12667_v8, %v16487_v52 }
 0x45c   : > { %17080 = vst [vmem:[#allocation22_spill] sm:$0xff] %v16642_v25  ;;  %v8500_v20 = vpop.f32.mrf.mxu0 }
 0x45d   : > { %17081 = vst [vmem:[#allocation41_spill] sm:$0xff] %v16645_v10  ;;  %v16647_v3 = vpop.f32.mrf.mxu1  ;;  %v16650_v23 = vadd.f32 %v8500_v20, %v16492_v0 }
 0x45e   : > { %17082 = vst [vmem:[#allocation42_spill] sm:$0xff] %v16647_v3  ;;  %v12718_v27 = vpop.f32.mrf.mxu0 }
 0x45f   : > { %17083 = vst [vmem:[#allocation24_spill] sm:$0xff] %v16650_v23  ;;  %v12758_v19 = vpop.f32.mrf.mxu1 }
 0x460   : > { %v9158_v39 = vpop.f32.mrf.mxu0 }
 0x461   : > { %v9544_v59 = vpop.f32.mrf.mxu1 }
 0x462   : > { %v12719_v56 = vpop.f32.mrf.mxu0 }
 0x463   : > { %v12759_v37 = vpop.f32.mrf.mxu1 }
 0x464   : > { %v9161_v13 = vpop.f32.mrf.mxu0 }
 0x465   : > { %v9547_v25 = vpop.f32.mrf.mxu1 }
 0x466   : > { %v12722_v5 = vpop.f32.mrf.mxu0 }
 0x467   : > { %v16658_v8 = vpop.f32.mrf.mxu1 }
 0x468   : > { %v16652_v2 = vpop.f32.mrf.mxu0 }
 0x469   : > { %v16664_v20 = vpop.f32.mrf.mxu1 }
 0x46a   : > { %v16654_v46 = vpop.f32.mrf.mxu0 }
 0x46b   : > { %v16670_v35 = vpop.f32.mrf.mxu1 }
 0x46c   : > { %v16656_v52 = vpop.f32.mrf.mxu0 }
 0x46d   : > { %v16676_v1 = vpop.f32.mrf.mxu1 }
 0x46e   : > { %v16660_v3 = vpop.f32.mrf.mxu0 }
 0x46f   : > { %v16682_v15 = vpop.f32.mrf.mxu1 }
 0x470   : > { %v16662_v0 = vpop.f32.mrf.mxu0 }
 0x471   : > { %v16688_v62 = vpop.f32.mrf.mxu1 }
 0x472   : > { %v16666_v23 = vpop.f32.mrf.mxu0 }
 0x473   : > { %v16694_v48 = vpop.f32.mrf.mxu1 }
 0x474   : > { %v16668_v10 = vpop.f32.mrf.mxu0 }
 0x476   : > { %v16672_v54 = vpop.f32.mrf.mxu0 }
 0x478   : > { %v16674_v31 = vpop.f32.mrf.mxu0 }
 0x479   : > { %17084 = vst [vmem:[#allocation47_spill] sm:$0xff] %v16674_v31 }
 0x47a   : > { %v16678_v63 = vpop.f32.mrf.mxu0 }
 0x47b   : > { %17085 = vst [vmem:[#allocation45_spill] sm:$0xff] %v16678_v63  ;;  %v16700_v63 = vpop.f32.mrf.mxu1 }
 0x47c   : > { %v16680_v60 = vpop.f32.mrf.mxu0  ;;  %17093 = vst [vmem:[#allocation44_spill] sm:$0xff] %v16700_v63 }
 0x47d   : > { %17086 = vst [vmem:[#allocation10_spill] sm:$0xff] %v16680_v60 }
 0x47e   : > { %v16684_v38 = vpop.f32.mrf.mxu0 }
 0x47f   : > { %17087 = vst [vmem:[#allocation11_spill] sm:$0xff] %v16684_v38  ;;  %v16706_v38 = vpop.f32.mrf.mxu1 }
 0x480   : > { %v16686_v24 = vpop.f32.mrf.mxu0  ;;  %17096 = vst [vmem:[#allocation51_spill] sm:$0xff] %v16706_v38 }
 0x481   : > { %17088 = vst [vmem:[#allocation25_spill] sm:$0xff] %v16686_v24 }
 0x482   : > { %v16690_v26 = vpop.f32.mrf.mxu0 }
 0x483   : > { %17089 = vst [vmem:[#allocation48_spill] sm:$0xff] %v16690_v26  ;;  %v16712_v26 = vpop.f32.mrf.mxu1 }
 0x484   : > { %v16692_v34 = vpop.f32.mrf.mxu0  ;;  %17099 = vst [vmem:[#allocation54_spill] sm:$0xff] %v16712_v26 }
 0x485   : > { %17090 = vst [vmem:[#allocation27_spill] sm:$0xff] %v16692_v34 }
 0x486   : > { %v16696_v6 = vpop.f32.mrf.mxu0 }
 0x487   : > { %17091 = vst [vmem:[#allocation26_spill] sm:$0xff] %v16696_v6  ;;  %v16718_v6 = vpop.f32.mrf.mxu1 }
 0x488   : > { %v16698_v12 = vpop.f32.mrf.mxu0  ;;  %17102 = vst [vmem:[#allocation57_spill] sm:$0xff] %v16718_v6 }
 0x489   : > { %17092 = vst [vmem:[#allocation49_spill] sm:$0xff] %v16698_v12 }
 0x48a   : > { %v16702_v60 = vpop.f32.mrf.mxu0 }
 0x48b   : > { %17094 = vst [vmem:[#allocation46_spill] sm:$0xff] %v16702_v60  ;;  %v8900_v60 = vadd.f32 %v16490_v58, %v16495_v57 }
 0x48c   : > { %v16704_v16 = vpop.f32.mrf.mxu0 }
 0x48d   : > { %17095 = vst [vmem:[#allocation50_spill] sm:$0xff] %v16704_v16  ;;  %v9287_v38 = vadd.f32 %v12718_v27, %v8900_v60 }
 0x48e   : > { %v16708_v24 = vpop.f32.mrf.mxu0 }
 0x48f   : > { %17097 = vst [vmem:[#allocation52_spill] sm:$0xff] %v16708_v24  ;;  %v8898_v24 = vadd.f32 %v16497_v22, %v16500_v32  ;;  %v9673_v58 = vadd.f32 %v12758_v19, %v9287_v38  ;;  %v8904_v22 = vadd.f32 %v16512_v36, %v16515_v18 }
 0x490   : > { %v16710_v31 = vpop.f32.mrf.mxu0 }
 0x491   : > { %17098 = vst [vmem:[#allocation53_spill] sm:$0xff] %v16710_v31  ;;  %v16728_v31 = vpop.f32.mrf.mxu1 }
 0x492   : > { %v16714_v34 = vpop.f32.mrf.mxu0 }
 0x493   : > { %17100 = vst [vmem:[#allocation55_spill] sm:$0xff] %v16714_v34  ;;  %v9285_v34 = vadd.f32 %v9158_v39, %v8898_v24  ;;  %v9291_v39 = vadd.f32 %v12722_v5, %v8904_v22 }
 0x494   : > { %v16716_v28 = vpop.f32.mrf.mxu0 }
 0x495   : > { %17101 = vst [vmem:[#allocation56_spill] sm:$0xff] %v16716_v28  ;;  %v8901_v28 = vadd.f32 %v16502_v4, %v16505_v42  ;;  %v9671_v32 = vadd.f32 %v9544_v59, %v9285_v34  ;;  %v8902_v4 = vadd.f32 %v16517_v41, %v16520_v44  ;;  %v8903_v41 = vadd.f32 %v16527_v47, %v16530_v55 }
 0x496   : > { %v16720_v12 = vpop.f32.mrf.mxu0  ;;  %v9677_v34 = vadd.f32 %v16658_v8, %v9291_v39 }
 0x497   : > { %17103 = vst [vmem:[#allocation58_spill] sm:$0xff] %v16720_v12  ;;  %v8899_v12 = vadd.f32 %v16507_v21, %v16510_v45  ;;  %v9288_v57 = vadd.f32 %v12719_v56, %v8901_v28  ;;  %v8905_v28 = vadd.f32 %v16522_v11, %v16525_v49  ;;  %v9289_v36 = vadd.f32 %v16652_v2, %v8902_v4 }
 0x498   : > { %v16724_v16 = vpop.f32.mrf.mxu0 }
 0x499   : > { %17104 = vst [vmem:[#allocation59_spill] sm:$0xff] %v16724_v16  ;;  %v16738_v16 = vpop.f32.mrf.mxu1  ;;  %v9286_v60 = vadd.f32 %v9161_v13, %v8899_v12  ;;  %v9674_v24 = vadd.f32 %v12759_v37, %v9288_v57  ;;  %v8908_v13 = vadd.f32 %v16532_v17, %v16535_v53  ;;  %v9290_v37 = vadd.f32 %v16656_v52, %v8903_v41 }
 0x49a   : > { %v16730_v26 = vpop.f32.mrf.mxu0 }
 0x49b   : > { %v16746_v38 = vpop.f32.mrf.mxu1  ;;  %v9672_v19 = vadd.f32 %v9547_v25, %v9286_v60  ;;  %v9675_v25 = vadd.f32 %v16664_v20, %v9289_v36  ;;  %v8909_v20 = vadd.f32 %v16542_v30, %v16545_v43  ;;  %v9676_v22 = vadd.f32 %v16676_v1, %v9290_v37  ;;  %v17107_v36 = vld [vmem:[#allocation47_spill] sm:$0xff] }
 0x49c   : > { %v16734_v6 = vpop.f32.mrf.mxu0  ;;  %v8912_v1 = vadd.f32 %v16552_v29, %v16555_v61 }
 0x49d   : > { %v16757_v59 = vpop.f32.mrf.mxu1 }
 0x49e   : > { %v12798_v63 = vpop.f32.mrf.mxu0 }
 0x49f   : > { %v10059_v27 = vadd.f32 %v12798_v63, %v9673_v58  ;;  %v9292_v63 = vadd.f32 %v16654_v46, %v8905_v28  ;;  %v8906_v46 = vadd.f32 %v16537_v33, %v16540_v14  ;;  %v9295_v58 = vadd.f32 %v16660_v3, %v8908_v13  ;;  %v16769_v52 = vpop.f32.mrf.mxu1  ;;  %v17112_v13 = vld [vmem:[#allocation4_spill] sm:$0xff] }
 0x4a0   : > { %v9930_v42 = vpop.f32.mrf.mxu0 }
 0x4a1   : > { %v10155_v21 = vmax.f32 %v10059_v27, 0.0  ;;  %v10057_v45 = vadd.f32 %v9930_v42, %v9671_v32  ;;  %v9678_v8 = vadd.f32 %v16670_v35, %v9292_v63  ;;  %v9293_v32 = vadd.f32 %v16662_v0, %v8906_v46  ;;  %v16781_v0 = vpop.f32.mrf.mxu1  ;;  %v17111_v63 = vld [vmem:[#allocation45_spill] sm:$0xff] }
 0x4a2   : > { %v12799_v56 = vpop.f32.mrf.mxu0  ;;  %v8907_v35 = vadd.f32 %v16547_v50, %v16550_v9  ;;  %v9681_v60 = vadd.f32 %v16682_v15, %v9295_v58  ;;  %v9296_v27 = vadd.f32 %v16666_v23, %v8909_v20  ;;  %v8910_v15 = vadd.f32 %v16557_v40, %v16560_v7  ;;  %v17117_v20 = vld [vmem:[#allocation6_spill] sm:$0xff] }
 0x4a3   : > { %10187 = vst [vmem:[%s15847_s16 + $0x10] sm:$0xff] %v10155_v21  ;;  %v10153_v18 = vmax.f32 %v10057_v45, 0.0  ;;  %v10060_v12 = vadd.f32 %v12799_v56, %v9674_v24  ;;  %v9679_v42 = vadd.f32 %v16688_v62, %v9293_v32  ;;  %v9299_v21 = vadd.f32 %v16672_v54, %v8912_v1  ;;  %v17105_v62 = vld [vmem:[#allocation28_spill] sm:$0xff]  ;;  %v17118_v32 = vld [vmem:[#allocation57_spill] sm:$0xff] }
 0x4a4   : > { %v9933_v44 = vpop.f32.mrf.mxu0  ;;  %v9294_v24 = vadd.f32 %v16668_v10, %v8907_v35  ;;  %v9682_v39 = vadd.f32 %v16694_v48, %v9296_v27  ;;  %v8913_v45 = vadd.f32 %v17105_v62, %v16565_v51  ;;  %v16793_v10 = vpop.f32.mrf.mxu1  ;;  %v17106_v56 = vld [vmem:[#allocation44_spill] sm:$0xff]  ;;  %v17108_v48 = vld [vmem:[#allocation30_spill] sm:$0xff] }
 0x4a5   : > { %10185 = vst [vmem:[%s15847_s16] sm:$0xff] %v10153_v18  ;;  %v10156_v11 = vmax.f32 %v10060_v12, 0.0  ;;  %v10058_v49 = vadd.f32 %v9933_v44, %v9672_v19  ;;  %v9297_v18 = vadd.f32 %v17107_v36, %v8910_v15  ;;  %v17109_v54 = vld [vmem:[#allocation12_spill] sm:$0xff]  ;;  %v17110_v44 = vld [vmem:[#allocation51_spill] sm:$0xff]  ;;  %v17120_v27 = vld [vmem:[#allocation34_spill] sm:$0xff] }
 0x4a6   : > { %v12802_v2 = vpop.f32.mrf.mxu0  ;;  %v9680_v19 = vadd.f32 %v17106_v56, %v9294_v24  ;;  %v8911_v12 = vadd.f32 %v17109_v54, %v17108_v48  ;;  %v16805_v37 = vpop.f32.mrf.mxu1  ;;  %v17122_v24 = vld [vmem:[#allocation25_spill] sm:$0xff]  ;;  %v17125_v62 = vld [vmem:[#allocation48_spill] sm:$0xff]  ;;  %v17128_v48 = vld [vmem:[#allocation27_spill] sm:$0xff] }
 0x4a7   : > { %10188 = vst [vmem:[%s15847_s16 + $0x18] sm:$0xff] %v10156_v11  ;;  %v10154_v47 = vmax.f32 %v10058_v49, 0.0  ;;  %v10063_v55 = vadd.f32 %v12802_v2, %v9677_v34  ;;  %v9685_v34 = vadd.f32 %v17110_v44, %v9299_v21  ;;  %v9300_v11 = vadd.f32 %v17111_v63, %v8913_v45  ;;  %v17113_v2 = vld [vmem:[#allocation29_spill] sm:$0xff]  ;;  %v17130_v44 = vld [vmem:[#allocation16_spill] sm:$0xff] }
 0x4a8   : > { %v9946_v5 = vpop.f32.mrf.mxu0  ;;  %v9627_v1 = vpop.f32.mrf.mxu1 }
 0x4a9   : > { %10186 = vst [vmem:[%s15847_s16 + $0x8] sm:$0xff] %v10154_v47  ;;  %v10159_v17 = vmax.f32 %v10063_v55, 0.0  ;;  %v10061_v53 = vadd.f32 %v9946_v5, %v9675_v25  ;;  %v8916_v25 = vadd.f32 %v17113_v2, %v17112_v13  ;;  %v17114_v55 = vld [vmem:[#allocation54_spill] sm:$0xff] }
 0x4aa   : > { %v12803_v57 = vpop.f32.mrf.mxu0  ;;  %v9683_v46 = vadd.f32 %v17114_v55, %v9297_v18  ;;  %v17115_v5 = vld [vmem:[#allocation10_spill] sm:$0xff]  ;;  %v12782_v18 = vpop.f32.mrf.mxu1 }
 0x4ab   : > { %10191 = vst [vmem:[%s15847_s16 + $0x30] sm:$0xff] %v10159_v17  ;;  %v10157_v33 = vmax.f32 %v10061_v53, 0.0  ;;  %v10064_v14 = vadd.f32 %v12803_v57, %v9678_v8  ;;  %v9298_v8 = vadd.f32 %v17115_v5, %v8911_v12  ;;  %v17116_v53 = vld [vmem:[#allocation13_spill] sm:$0xff] }
 0x4ac   : > { %v9949_v3 = vpop.f32.mrf.mxu0  ;;  %v8914_v57 = vadd.f32 %v17117_v20, %v17116_v53  ;;  %v9640_v55 = vpop.f32.mrf.mxu1  ;;  %v17136_v20 = vld [vmem:[#allocation7_spill] sm:$0xff] }
 0x4ad   : > { %10189 = vst [vmem:[%s15847_s16 + $0x20] sm:$0xff] %v10157_v33  ;;  %v10160_v30 = vmax.f32 %v10064_v14, 0.0  ;;  %v10062_v43 = vadd.f32 %v9949_v3, %v9676_v22  ;;  %v9686_v33 = vadd.f32 %v17118_v32, %v9300_v11  ;;  %v17119_v14 = vld [vmem:[#allocation11_spill] sm:$0xff] }
 0x4ae   : > { %v12806_v4 = vpop.f32.mrf.mxu0  ;;  %v9303_v35 = vadd.f32 %v17119_v14, %v8916_v25  ;;  %v17132_v25 = vld [vmem:[#allocation8_spill] sm:$0xff] }
 0x4af   : > { %10192 = vst [vmem:[%s15847_s16 + $0x38] sm:$0xff] %v10160_v30  ;;  %v10158_v50 = vmax.f32 %v10062_v43, 0.0  ;;  %v10067_v9 = vadd.f32 %v12806_v4, %v9681_v60  ;;  %v17121_v30 = vld [vmem:[#allocation31_spill] sm:$0xff] }
 0x4b0   : > { %v9962_v23 = vpop.f32.mrf.mxu0  ;;  %v8917_v43 = vadd.f32 %v17121_v30, %v17120_v27  ;;  %v12783_v30 = vpop.f32.mrf.mxu1 }
 0x4b1   : > { %10190 = vst [vmem:[%s15847_s16 + $0x28] sm:$0xff] %v10158_v50  ;;  %v10163_v29 = vmax.f32 %v10067_v9, 0.0  ;;  %v10065_v61 = vadd.f32 %v9962_v23, %v9679_v42  ;;  %v9684_v42 = vadd.f32 %v16728_v31, %v9298_v8  ;;  %v9301_v50 = vadd.f32 %v17122_v24, %v8914_v57  ;;  %v17123_v23 = vld [vmem:[#allocation14_spill] sm:$0xff]  ;;  %v17127_v31 = vld [vmem:[#allocation32_spill] sm:$0xff]  ;;  %v17134_v8 = vld [vmem:[#allocation49_spill] sm:$0xff] }
 0x4b2   : > { %v12807_v28 = vpop.f32.mrf.mxu0  ;;  %v9304_v45 = vadd.f32 %v17125_v62, %v8917_v43 }
 0x4b3   : > { %10195 = vst [vmem:[%s15847_s16 + $0x50] sm:$0xff] %v10163_v29  ;;  %v10161_v40 = vmax.f32 %v10065_v61, 0.0  ;;  %v10068_v7 = vadd.f32 %v12807_v28, %v9682_v39  ;;  %v17124_v39 = vld [vmem:[#allocation15_spill] sm:$0xff]  ;;  %v9689_v61 = vadd.f32 %v16738_v16, %v9303_v35  ;;  %v17129_v16 = vld [vmem:[#allocation36_spill] sm:$0xff] }
 0x4b4   : > { %v9965_v41 = vpop.f32.mrf.mxu0  ;;  %v8915_v21 = vadd.f32 %v17124_v39, %v17123_v23  ;;  %v9690_v11 = vadd.f32 %v16757_v59, %v9304_v45  ;;  %v17135_v59 = vld [vmem:[#allocation17_spill] sm:$0xff] }
 0x4b5   : > { %10193 = vst [vmem:[%s15847_s16 + $0x40] sm:$0xff] %v10161_v40  ;;  %v10164_v51 = vmax.f32 %v10068_v7, 0.0  ;;  %v10066_v49 = vadd.f32 %v9965_v41, %v9680_v19  ;;  %v17126_v19 = vld [vmem:[#allocation33_spill] sm:$0xff]  ;;  %v9687_v7 = vadd.f32 %v16746_v38, %v9301_v50  ;;  %v17133_v38 = vld [vmem:[#allocation35_spill] sm:$0xff]  ;;  %v8919_v57 = vadd.f32 %v17136_v20, %v17135_v59 }
 0x4b6   : > { %v12810_v47 = vpop.f32.mrf.mxu0  ;;  %v8920_v36 = vadd.f32 %v17127_v31, %v17126_v19  ;;  %v9302_v54 = vadd.f32 %v17128_v48, %v8915_v21  ;;  %v9643_v19 = vpop.f32.mrf.mxu1 }
 0x4b7   : > { %10196 = vst [vmem:[%s15847_s16 + $0x58] sm:$0xff] %v10164_v51  ;;  %v10162_v58 = vmax.f32 %v10066_v49, 0.0  ;;  %v10071_v17 = vadd.f32 %v12810_v47, %v9685_v34  ;;  %v8918_v34 = vadd.f32 %v17130_v44, %v17129_v16  ;;  %v17131_v51 = vld [vmem:[#allocation26_spill] sm:$0xff]  ;;  %v8921_v47 = vadd.f32 %v17133_v38, %v17132_v25 }
 0x4b8   : > { %v9978_v22 = vpop.f32.mrf.mxu0  ;;  %v9307_v49 = vadd.f32 %v17131_v51, %v8920_v36  ;;  %v9688_v5 = vadd.f32 %v16769_v52, %v9302_v54  ;;  %v17139_v52 = vld [vmem:[#allocation37_spill] sm:$0xff]  ;;  %v12786_v16 = vpop.f32.mrf.mxu1 }
 0x4b9   : > { %10194 = vst [vmem:[%s15847_s16 + $0x48] sm:$0xff] %v10162_v58  ;;  %v10167_v3 = vmax.f32 %v10071_v17, 0.0  ;;  %v10069_v60 = vadd.f32 %v9978_v22, %v9683_v46  ;;  %v9305_v58 = vadd.f32 %v17134_v8, %v8918_v34 }
 0x4ba   : > { %v12811_v4 = vpop.f32.mrf.mxu0  ;;  %v9693_v32 = vadd.f32 %v16781_v0, %v9307_v49  ;;  %v17141_v0 = vld [vmem:[#allocation38_spill] sm:$0xff] }
 0x4bb   : > { %10199 = vst [vmem:[%s15847_s16 + $0x70] sm:$0xff] %v10167_v3  ;;  %v10165_v9 = vmax.f32 %v10069_v60, 0.0  ;;  %v10072_v15 = vadd.f32 %v12811_v4, %v9686_v33  ;;  %v17137_v33 = vld [vmem:[#allocation46_spill] sm:$0xff]  ;;  %v17138_v60 = vld [vmem:[#allocation19_spill] sm:$0xff]  ;;  %v9691_v4 = vadd.f32 %v16793_v10, %v9305_v58  ;;  %v17145_v10 = vld [vmem:[#allocation20_spill] sm:$0xff] }
 0x4bc   : > { %v9981_v29 = vpop.f32.mrf.mxu0  ;;  %v9308_v14 = vadd.f32 %v17137_v33, %v8921_v47  ;;  %v8924_v27 = vadd.f32 %v17139_v52, %v17138_v60  ;;  %v17152_v47 = vld [vmem:[#allocation56_spill] sm:$0xff]  ;;  %v17153_v58 = vld [vmem:[#allocation23_spill] sm:$0xff] }
 0x4bd   : > { %10197 = vst [vmem:[%s15847_s16 + $0x60] sm:$0xff] %v10165_v9  ;;  %v10168_v28 = vmax.f32 %v10072_v15, 0.0  ;;  %v10070_v56 = vadd.f32 %v9981_v29, %v9684_v42  ;;  %v17140_v42 = vld [vmem:[#allocation50_spill] sm:$0xff]  ;;  %v17143_v29 = vld [vmem:[#allocation52_spill] sm:$0xff]  ;;  %v17158_v52 = vld [vmem:[#allocation59_spill] sm:$0xff] }
 0x4be   : > { %v12814_v40 = vpop.f32.mrf.mxu0  ;;  %v9306_v24 = vadd.f32 %v17140_v42, %v8919_v57  ;;  %v17142_v15 = vld [vmem:[#allocation18_spill] sm:$0xff]  ;;  %v9694_v21 = vadd.f32 %v16805_v37, %v9308_v14  ;;  %v17148_v37 = vld [vmem:[#allocation5_spill] sm:$0xff]  ;;  %v17159_v42 = vld [vmem:[#allocation24_spill] sm:$0xff] }
 0x4bf   : > { %10200 = vst [vmem:[%s15847_s16 + $0x78] sm:$0xff] %v10168_v28  ;;  %v10166_v12 = vmax.f32 %v10070_v56, 0.0  ;;  %v10075_v41 = vadd.f32 %v12814_v40, %v9689_v61  ;;  %v8922_v23 = vadd.f32 %v17142_v15, %v17141_v0  ;;  %v9311_v61 = vadd.f32 %v17143_v29, %v8924_v27  ;;  %v17144_v28 = vld [vmem:[#allocation39_spill] sm:$0xff]  ;;  %v17146_v40 = vld [vmem:[#allocation53_spill] sm:$0xff]  ;;  %v17155_v57 = vld [vmem:[#allocation58_spill] sm:$0xff] }
 0x4c0   : > { %v9994_v63 = vpop.f32.mrf.mxu0  ;;  %v8925_v56 = vadd.f32 %v17145_v10, %v17144_v28  ;;  %v9692_v36 = vadd.f32 %v9627_v1, %v9306_v24  ;;  %v17151_v1 = vld [vmem:[#allocation21_spill] sm:$0xff]  ;;  %v17160_v24 = vld [vmem:[#allocation42_spill] sm:$0xff] }
 0x4c1   : > { %10198 = vst [vmem:[%s15847_s16 + $0x68] sm:$0xff] %v10166_v12  ;;  %v10171_v13 = vmax.f32 %v10075_v41, 0.0  ;;  %v10073_v2 = vadd.f32 %v9994_v63, %v9687_v7  ;;  %v9309_v7 = vadd.f32 %v17146_v40, %v8922_v23  ;;  %v17147_v12 = vld [vmem:[#allocation9_spill] sm:$0xff]  ;;  %v9697_v34 = vadd.f32 %v12782_v18, %v9311_v61  ;;  %v17149_v63 = vld [vmem:[#allocation55_spill] sm:$0xff] }
 0x4c2   : > { %v12815_v46 = vpop.f32.mrf.mxu0  ;;  %v8923_v41 = vadd.f32 %v17148_v37, %v17147_v12  ;;  %v17156_v14 = vld [vmem:[#allocation41_spill] sm:$0xff] }
 0x4c3   : > { %10203 = vst [vmem:[%s15847_s16 + $0x90] sm:$0xff] %v10171_v13  ;;  %v10169_v17 = vmax.f32 %v10073_v2, 0.0  ;;  %v10076_v53 = vadd.f32 %v12815_v46, %v9690_v11  ;;  %v9312_v11 = vadd.f32 %v17149_v63, %v8925_v56  ;;  %v17150_v13 = vld [vmem:[#allocation40_spill] sm:$0xff]  ;;  %v9695_v38 = vadd.f32 %v9640_v55, %v9309_v7  ;;  %v17157_v55 = vld [vmem:[#allocation22_spill] sm:$0xff] }
 0x4c4   : > { %v9997_v22 = vpop.f32.mrf.mxu0  ;;  %v8928_v2 = vadd.f32 %v17151_v1, %v17150_v13  ;;  %v9310_v46 = vadd.f32 %v17152_v47, %v8923_v41 }
 0x4c5   : > { %10201 = vst [vmem:[%s15847_s16 + $0x80] sm:$0xff] %v10169_v17  ;;  %v10172_v35 = vmax.f32 %v10076_v53, 0.0  ;;  %v10074_v3 = vadd.f32 %v9997_v22, %v9688_v5  ;;  %v17154_v17 = vld [vmem:[#allocation43_spill] sm:$0xff]  ;;  %v9656_v53 = vpop.f32.mrf.mxu1  ;;  %v9698_v20 = vadd.f32 %v12783_v30, %v9312_v11  ;;  %v8927_v30 = vadd.f32 %v17160_v24, %v17159_v42 }
 0x4c6   : > { %v12818_v43 = vpop.f32.mrf.mxu0  ;;  %v8926_v18 = vadd.f32 %v17154_v17, %v17153_v58  ;;  %v9315_v22 = vadd.f32 %v17155_v57, %v8928_v2  ;;  %v9696_v60 = vadd.f32 %v9643_v19, %v9310_v46 }
 0x4c7   : > { %10204 = vst [vmem:[%s15847_s16 + $0x98] sm:$0xff] %v10172_v35  ;;  %v10170_v50 = vmax.f32 %v10074_v3, 0.0  ;;  %v10079_v9 = vadd.f32 %v12818_v43, %v9693_v32  ;;  %v8929_v35 = vadd.f32 %v17157_v55, %v17156_v14  ;;  %v9314_v29 = vadd.f32 %v16734_v6, %v8927_v30 }
 0x4c8   : > { %v10010_v39 = vpop.f32.mrf.mxu0  ;;  %v9313_v27 = vadd.f32 %v17158_v52, %v8926_v18  ;;  %v9701_v15 = vadd.f32 %v12786_v16, %v9315_v22 }
 0x4c9   : > { %10202 = vst [vmem:[%s15847_s16 + $0x88] sm:$0xff] %v10170_v50  ;;  %v10175_v62 = vmax.f32 %v10079_v9, 0.0  ;;  %v10077_v45 = vadd.f32 %v10010_v39, %v9691_v4  ;;  %v12787_v50 = vpop.f32.mrf.mxu1  ;;  %v9316_v0 = vadd.f32 %v16730_v26, %v8929_v35 }
 0x4ca   : > { %v12819_v31 = vpop.f32.mrf.mxu0  ;;  %v9699_v61 = vadd.f32 %v9656_v53, %v9313_v27 }
 0x4cb   : > { %10207 = vst [vmem:[%s15847_s16 + $0xb0] sm:$0xff] %v10175_v62  ;;  %v10173_v48 = vmax.f32 %v10077_v45, 0.0  ;;  %v10080_v54 = vadd.f32 %v12819_v31, %v9694_v21  ;;  %v9659_v28 = vpop.f32.mrf.mxu1  ;;  %v9702_v56 = vadd.f32 %v12787_v50, %v9316_v0 }
 0x4cc   : > { %v10013_v44 = vpop.f32.mrf.mxu0 }
 0x4cd   : > { %10205 = vst [vmem:[%s15847_s16 + $0xa0] sm:$0xff] %v10173_v48  ;;  %v10176_v51 = vmax.f32 %v10080_v54, 0.0  ;;  %v10078_v49 = vadd.f32 %v10013_v44, %v9692_v36  ;;  %v9700_v36 = vadd.f32 %v9659_v28, %v9314_v29 }
 0x4ce   : > { %v12822_v25 = vpop.f32.mrf.mxu0 }
 0x4cf   : > { %10208 = vst [vmem:[%s15847_s16 + $0xb8] sm:$0xff] %v10176_v51  ;;  %v10174_v5 = vmax.f32 %v10078_v49, 0.0  ;;  %v10083_v8 = vadd.f32 %v12822_v25, %v9697_v34 }
 0x4d0   : > { %v10026_v59 = vpop.f32.mrf.mxu0 }
 0x4d1   : > { %10206 = vst [vmem:[%s15847_s16 + $0xa8] sm:$0xff] %v10174_v5  ;;  %v10179_v32 = vmax.f32 %v10083_v8, 0.0  ;;  %v10081_v33 = vadd.f32 %v10026_v59, %v9695_v38 }
 0x4d2   : > { %v12823_v3 = vpop.f32.mrf.mxu0 }
 0x4d3   : > { %10211 = vst [vmem:[%s15847_s16 + $0xd0] sm:$0xff] %v10179_v32  ;;  %v10177_v43 = vmax.f32 %v10081_v33, 0.0  ;;  %v10084_v4 = vadd.f32 %v12823_v3, %v9698_v20 }
 0x4d4   : > { %v10029_v9 = vpop.f32.mrf.mxu0 }
 0x4d5   : > { %10209 = vst [vmem:[%s15847_s16 + $0xc0] sm:$0xff] %v10177_v43  ;;  %v10180_v23 = vmax.f32 %v10084_v4, 0.0  ;;  %v10082_v39 = vadd.f32 %v10029_v9, %v9696_v60 }
 0x4d6   : > { %v12826_v21 = vpop.f32.mrf.mxu0 }
 0x4d7   : > { %10212 = vst [vmem:[%s15847_s16 + $0xd8] sm:$0xff] %v10180_v23  ;;  %v10178_v62 = vmax.f32 %v10082_v39, 0.0  ;;  %v10087_v45 = vadd.f32 %v12826_v21, %v9701_v15 }
 0x4d8   : > { %v10042_v10 = vpop.f32.mrf.mxu0 }
 0x4d9   : > { %10210 = vst [vmem:[%s15847_s16 + $0xc8] sm:$0xff] %v10178_v62  ;;  %v10183_v26 = vmax.f32 %v10087_v45, 0.0  ;;  %v10085_v19 = vadd.f32 %v10042_v10, %v9699_v61 }
 0x4da   : > { %v12827_v31 = vpop.f32.mrf.mxu0 }
 0x4db   : > { %10215 = vst [vmem:[%s15847_s16 + $0xf0] sm:$0xff] %v10183_v26  ;;  %v10181_v40 = vmax.f32 %v10085_v19, 0.0  ;;  %v10088_v7 = vadd.f32 %v12827_v31, %v9702_v56 }
 0x4dc   : > { %v10045_v48 = vpop.f32.mrf.mxu0 }
 0x4dd   : > { %10213 = vst [vmem:[%s15847_s16 + $0xe0] sm:$0xff] %v10181_v40  ;;  %v10184_v6 = vmax.f32 %v10088_v7, 0.0  ;;  %v10086_v54 = vadd.f32 %v10045_v48, %v9700_v36 }
 0x4df   : > { %10216 = vst [vmem:[%s15847_s16 + $0xf8] sm:$0xff] %v10184_v6  ;;  %v10182_v12 = vmax.f32 %v10086_v54, 0.0 }
 0x4e1   : > { %10214 = vst [vmem:[%s15847_s16 + $0xe8] sm:$0xff] %v10182_v12 }
 0x4e2 PF: > { %s17_s24 = sadd.s32 1, %s12960_s24  }
 0x4e3   : > { %p14_p5 = scmp.ge.s32.totalorder %s17_s24, 4  }
 0x4e5   :  { %16 = sbr.rel (!%p14_p5) target bundleno = 1 (0x1), region = 106 }

</bundles_post_ra>
